<compile_context>
chip_gen: v6e
topology: v6e:2x2x1
jax: 0.10.0
libtpu: 0.0.40
codegen_flags: <defaults>
</compile_context>

<pallas_src>
import functools

import jax
import jax.numpy as jnp
from jax.experimental import pallas as pl
from jax.experimental.pallas import tpu as pltpu

LRELU_SLOPE = 0.2
IN_EPS = 1e-5            # PyTorch InstanceNorm2d default eps
KH = KW = 4
_SUB = 8                 # f32 sublane tile


def _round_up(x, m):
    return ((x + m - 1) // m) * m


def _leaky(x):
    return jnp.where(x > 0, x, LRELU_SLOPE * x)


def _ds(start, size, stride):
    return pl.ds(start, size) if stride == 1 else pl.ds(start, size, stride)


# --------------------------- in-kernel building blocks ----------------------

def _im2col_matmul(src_ref, w_slab, L):
    """One 4x4 conv as a SINGLE MXU matmul with the 16 taps packed into K.

    src_ref : (Hp, Wa, Cin) f32 VMEM ref holding the reflect-padded input.
    w_slab  : (16*Cin, Cmax) bf16 value (tap-major, channel-minor K order).
    Returns an f32 (Ho*Wl, Cout) result; rows (ho, wl) with wl >= Wo are
    don't-care (masked / sliced away by the caller).
    """
    Ho, Wl, sh, sw = L["Ho"], L["Wl"], L["sh"], L["sw"]
    slabs = [src_ref[_ds(i, Ho, sh), _ds(j, Wl, sw), :]
             for i in range(KH) for j in range(KW)]
    lhs = jnp.concatenate(slabs, axis=-1)                    # (Ho, Wl, 16*Cin)
    lhs = lhs.reshape(Ho * Wl, KH * KW * L["cin"]).astype(jnp.bfloat16)
    out = jnp.dot(lhs, w_slab, preferred_element_type=jnp.float32)
    return out[:, :L["cout"]]


def _instance_norm_lrelu(acc, gamma, beta, Ho, Wl, Wo):
    """Per-sample per-channel stats over the Ho x Wo valid positions (biased
    variance, eps inside rsqrt), affine, then LeakyReLU(0.2).  Don't-care rows
    (wl >= Wo) are excluded with a NaN-safe where-select."""
    cnt = float(Ho * Wo)
    if Wl == Wo:
        mean = jnp.mean(acc, axis=0, keepdims=True)
        var = jnp.mean((acc - mean) ** 2, axis=0, keepdims=True)
    else:
        r = jax.lax.broadcasted_iota(jnp.int32, (acc.shape[0], 1), 0)
        if Wl & (Wl - 1) == 0:
            col = jnp.bitwise_and(r, Wl - 1)
        else:  # generality fallback (never hit for the shapes used here)
            col = r - (r // Wl) * Wl
        valid = col < Wo
        mean = jnp.sum(jnp.where(valid, acc, 0.0), axis=0, keepdims=True) / cnt
        diff = jnp.where(valid, acc - mean, 0.0)
        var = jnp.sum(diff * diff, axis=0, keepdims=True) / cnt
    y = (acc - mean) * jax.lax.rsqrt(var + IN_EPS) * gamma + beta
    return _leaky(y)


def _store_reflect_pad(dst_ref, y):
    """Reflect-pad y (H, W, C) by 1 px fully in registers and write it to
    dst_ref (H+2, Wa, C) with ONE store.  Spare columns [W+2, Wa) are left
    untouched (never read by valid output positions)."""
    H, W = y.shape[0], y.shape[1]
    rows = jnp.concatenate([y[1:2], y, y[H - 2:H - 1]], axis=0)          # (H+2, W, C)
    full = jnp.concatenate([rows[:, 1:2], rows, rows[:, W - 2:W - 1]],
                           axis=1)                                       # (H+2, W+2, C)
    dst_ref[:, :W + 2, :] = full.astype(dst_ref.dtype)


def _build_kernel(plan):
    n_layers = len(plan)

    def kernel(x_ref, w_ref, p_ref, o_ref, *pad_refs):
        # Pad the raw network input in-kernel (same path as every other layer).
        _store_reflect_pad(pad_refs[0], x_ref[...])
        src = pad_refs[0]
        for li, L in enumerate(plan):
            K = KH * KW * L["cin"]
            w_slab = w_ref[L["koff"]:L["koff"] + K, :]        # (K, Cmax) bf16
            acc = _im2col_matmul(src, w_slab, L)              # (Ho*Wl, Cout) f32
            r, c = L["prow"], L["cout"]
            if L["kind"] == "initial":                        # conv(bias) + LeakyReLU
                y = _leaky(acc + p_ref[r:r + 1, :c])
            elif L["kind"] == "cnn":                          # conv + IN + LeakyReLU
                y = _instance_norm_lrelu(acc, p_ref[r:r + 1, :c],
                                         p_ref[r + 1:r + 2, :c],
                                         L["Ho"], L["Wl"], L["Wo"])
            else:                                             # final conv(bias)
                y = acc + p_ref[r:r + 1, :c]
            y3 = y.reshape(L["Ho"], L["Wl"], c)[:, :L["Wo"], :]
            if li == n_layers - 1:
                o_ref[...] = y3
            else:
                _store_reflect_pad(pad_refs[li + 1], y3)
                src = pad_refs[li + 1]

    return kernel


# --------------------------------- wrapper ----------------------------------

def _make_plan(static_cfg, H, W):
    plan, koff, prow = [], 0, 0
    h, w = H, W
    for kind, (sh, sw), cin, cout in static_cfg:
        Ho = (h + 2 - KH) // sh + 1
        Wo = (w + 2 - KW) // sw + 1
        Wl = _round_up(Wo, _SUB)                 # 8-aligned compute width
        need_w = (Wl - 1) * sw + KW              # columns the taps may read
        wa = _round_up(max(w + 2, need_w), _SUB)
        plan.append(dict(kind=kind, sh=sh, sw=sw, cin=cin, cout=cout,
                         hin=h, win=w, Ho=Ho, Wo=Wo, Wl=Wl, wa=wa,
                         koff=koff, prow=prow))
        koff += KH * KW * cin
        prow += 2 if kind == "cnn" else 1
        h, w = Ho, Wo
    return plan


@functools.partial(jax.jit, static_argnames=("static_cfg",))
def discriminator_forward(x_nchw, w_blob, p_blob, static_cfg):
    """PatchGAN discriminator forward.  x_nchw: (N, 2*channels, H, W) f32.
    Returns (N, 1, Ho, Wo) f32 in NCHW, matching the PyTorch module."""
    x = jnp.transpose(x_nchw, (0, 2, 3, 1)).astype(jnp.float32)      # NHWC
    N, H, W, C0 = x.shape
    plan = _make_plan(static_cfg, H, W)
    assert plan[0]["cin"] == C0

    # One f32 VMEM scratch per layer input (reflect-padded activation).
    scratch = [pltpu.VMEM((L["hin"] + 2, L["wa"], L["cin"]), jnp.float32)
               for L in plan]

    Lf = plan[-1]
    out_nhwc = pl.pallas_call(
        _build_kernel(plan),
        out_shape=jax.ShapeDtypeStruct((N, Lf["Ho"], Lf["Wo"], Lf["cout"]),
                                       jnp.float32),
        grid=(N,),
        in_specs=[
            pl.BlockSpec((None, H, W, C0), lambda n: (n, 0, 0, 0)),
            pl.BlockSpec(w_blob.shape, lambda n: (0, 0)),
            pl.BlockSpec(p_blob.shape, lambda n: (0, 0)),
        ],
        out_specs=pl.BlockSpec((None, Lf["Ho"], Lf["Wo"], Lf["cout"]),
                               lambda n: (n, 0, 0, 0)),
        scratch_shapes=scratch,
        compiler_params=pltpu.CompilerParams(
            dimension_semantics=("parallel",)),       # megacore-shard the batch
    )(x, w_blob, p_blob)

    return jnp.transpose(out_nhwc, (0, 3, 1, 2))      # back to NCHW


# --------------------------- params & pure-JAX reference --------------------

def init_discriminator_params(key, channels=2, features=(8, 16, 32, 64),
                              strides=((2, 2), (2, 2), (2, 2), (1, 1))):
    """Deterministic synthetic init matching the module's layer shapes.

    Returns:
      w_blob : (sum_l 16*Cin_l, Cmax) bf16 — all conv weights, tap-major K.
      p_blob : (rows, Cmax) f32 — bias / gamma / beta rows in layer order.
      ref_params : per-layer dicts with f32 'wf' (HWIO) + affine, for the
                   pure-JAX reference.
      static_cfg : tuple of (kind, stride, cin, cout) per layer.
    """
    kinds = ["initial"] + ["cnn"] * (len(features) - 1) + ["final"]
    outs = list(features) + [1]
    strd = list(strides) + [(1, 1)]
    cmax = max(outs)
    c_in = channels * 2                      # Discriminator sees concat(x, y)
    w_rows, p_rows, ref_params, cfg = [], [], [], []
    for kind, c_out, s in zip(kinds, outs, strd):
        key, kw_, k1, k2 = jax.random.split(key, 4)
        w4 = 0.02 * jax.random.normal(kw_, (KH, KW, c_in, c_out), jnp.float32)
        w4 = w4.astype(jnp.bfloat16).astype(jnp.float32)   # bf16-rounded master
        w_rows.append(jnp.pad(w4.reshape(KH * KW * c_in, c_out),
                              ((0, 0), (0, cmax - c_out))))
        layer = dict(wf=w4)
        if kind == "cnn":
            layer["gamma"] = 1.0 + 0.1 * jax.random.normal(k1, (c_out,), jnp.float32)
            layer["beta"] = 0.1 * jax.random.normal(k2, (c_out,), jnp.float32)
            p_rows += [jnp.pad(layer["gamma"], (0, cmax - c_out)),
                       jnp.pad(layer["beta"], (0, cmax - c_out))]
        else:
            layer["b"] = 0.02 * jax.random.normal(k1, (c_out,), jnp.float32)
            p_rows.append(jnp.pad(layer["b"], (0, cmax - c_out)))
        ref_params.append(layer)
        cfg.append((kind, tuple(s), c_in, c_out))
        c_in = c_out
    w_blob = jnp.concatenate(w_rows, axis=0).astype(jnp.bfloat16)
    p_blob = jnp.stack(p_rows, axis=0).astype(jnp.float32)
    return w_blob, p_blob, ref_params, tuple(cfg)


def _reference_forward(x_nchw, ref_params, static_cfg):
    """Pure-JAX (XLA conv) f32 reference using the same bf16-rounded weights."""
    x = jnp.transpose(x_nchw, (0, 2, 3, 1)).astype(jnp.float32)
    for (kind, s, _, _), p in zip(static_cfg, ref_params):
        xp = jnp.pad(x, ((0, 0), (1, 1), (1, 1), (0, 0)), mode="reflect")
        y = jax.lax.conv_general_dilated(
            xp, p["wf"], window_strides=s, padding="VALID",
            dimension_numbers=("NHWC", "HWIO", "NHWC"))
        if kind == "cnn":
            mean = jnp.mean(y, axis=(1, 2), keepdims=True)
            var = jnp.mean((y - mean) ** 2, axis=(1, 2), keepdims=True)
            y = ((y - mean) * jax.lax.rsqrt(var + IN_EPS)
                 * p["gamma"].reshape(1, 1, 1, -1)
                 + p["beta"].reshape(1, 1, 1, -1))
            y = _leaky(y)
        else:
            y = y + p["b"].reshape(1, 1, 1, -1)
            if kind == "initial":
                y = _leaky(y)
        x = y
    return jnp.transpose(x, (0, 3, 1, 2))


if __name__ == "__main__":
    key = jax.random.PRNGKey(0)
    k_in, k_par = jax.random.split(key)

    # Discriminator(channels=2, features=[8, 16, 32, 64]) -> 2*2 = 4 input chans.
    batch, channels, spatial = 2, 2, 32
    x = jax.random.normal(k_in, (batch, channels * 2, spatial, spatial),
                          jnp.float32)
    w_blob, p_blob, ref_params, cfg = init_discriminator_params(
        k_par, channels=channels)

    out = discriminator_forward(x, w_blob, p_blob, static_cfg=cfg)
    out = jax.block_until_ready(out)

    # 32 -> 16 -> 8 -> 4 -> 3 -> 2 : PatchGAN map of shape (N, 1, 2, 2)
    assert out.shape == (batch, 1, 2, 2), out.shape
    assert bool(jnp.all(jnp.isfinite(out)))

    # Cross-check vs the pure-JAX f32 reference.  Only the in-kernel bf16
    # activation rounding differs (instance-norm amplifies it slightly),
    # hence the documented loose tolerance.
    ref = _reference_forward(x, ref_params, cfg)
    max_err = float(jnp.max(jnp.abs(out - ref)))
    assert max_err < 1e-1, f"kernel deviates from reference: max|diff|={max_err}"

    print("KERNEL_OK")
</pallas_src>

<mosaic_0001>
module attributes {stable_mosaic.version = 11 : i64} {
  func.func @kernel(%arg0: i32, %arg1: memref<1x32x32x4xf32, #tpu.memory_space<vmem>>, %arg2: memref<1984x64xbf16, #tpu.memory_space<vmem>>, %arg3: memref<8x64xf32, #tpu.memory_space<vmem>>, %arg4: memref<1x2x2x1xf32, #tpu.memory_space<vmem>>, %arg5: memref<34x40x4xf32, #tpu.memory_space<vmem>>, %arg6: memref<18x24x8xf32, #tpu.memory_space<vmem>>, %arg7: memref<10x24x16xf32, #tpu.memory_space<vmem>>, %arg8: memref<6x16x32xf32, #tpu.memory_space<vmem>>, %arg9: memref<5x16x64xf32, #tpu.memory_space<vmem>>) attributes {dimension_semantics = [#tpu.dimension_semantics<parallel>], iteration_bounds = array<i64: 2>, scalar_prefetch = 0 : i64, scratch_operands = 5 : i64, tpu.core_type = #tpu.core_type<tc>, window_params = [{transform_indices = @transform_0, window_bounds = array<i64: 1, 32, 32, 4>}, {pipeline_mode = #tpu.pipeline_mode<synchronous>, transform_indices = @transform_1, window_bounds = array<i64: 1984, 64>}, {pipeline_mode = #tpu.pipeline_mode<synchronous>, transform_indices = @transform_2, window_bounds = array<i64: 8, 64>}, {transform_indices = @transform_3, window_bounds = array<i64: 1, 2, 2, 1>}]} {
    %c0 = arith.constant 0 : index
    %c0_0 = arith.constant 0 : index
    %c0_1 = arith.constant 0 : index
    %c0_2 = arith.constant 0 : index
    %0 = vector.load %arg1[%c0, %c0_0, %c0_1, %c0_2] : memref<1x32x32x4xf32, #tpu.memory_space<vmem>>, vector<1x32x32x4xf32>
    %1 = vector.shape_cast %0 : vector<1x32x32x4xf32> to vector<32x32x4xf32>
    %2 = vector.extract_strided_slice %1 {offsets = [1, 0, 0], sizes = [1, 32, 4], strides = [1, 1, 1]} : vector<32x32x4xf32> to vector<1x32x4xf32>
    %3 = vector.extract_strided_slice %1 {offsets = [30, 0, 0], sizes = [1, 32, 4], strides = [1, 1, 1]} : vector<32x32x4xf32> to vector<1x32x4xf32>
    %4 = tpu.concatenate %2, %1, %3 in 0 : vector<1x32x4xf32>, vector<32x32x4xf32>, vector<1x32x4xf32> -> vector<34x32x4xf32>
    %5 = vector.extract_strided_slice %4 {offsets = [0, 1, 0], sizes = [34, 1, 4], strides = [1, 1, 1]} : vector<34x32x4xf32> to vector<34x1x4xf32>
    %6 = vector.extract_strided_slice %4 {offsets = [0, 30, 0], sizes = [34, 1, 4], strides = [1, 1, 1]} : vector<34x32x4xf32> to vector<34x1x4xf32>
    %7 = tpu.concatenate %5, %4, %6 in 1 : vector<34x1x4xf32>, vector<34x32x4xf32>, vector<34x1x4xf32> -> vector<34x34x4xf32>
    %c0_3 = arith.constant 0 : index
    %c0_4 = arith.constant 0 : index
    %c0_5 = arith.constant 0 : index
    %8 = vector.load %arg5[%c0_3, %c0_4, %c0_5] : memref<34x40x4xf32, #tpu.memory_space<vmem>>, vector<34x34x4xf32>
    tpu.vector_store %arg5[%c0_3, %c0_4, %c0_5], %7 {strides = array<i32>} : memref<34x40x4xf32, #tpu.memory_space<vmem>>, vector<34x34x4xf32>,
    %c0_6 = arith.constant 0 : index
    %c0_7 = arith.constant 0 : index
    %9 = vector.load %arg2[%c0_6, %c0_7] : memref<1984x64xbf16, #tpu.memory_space<vmem>>, vector<64x64xbf16>
    %c0_8 = arith.constant 0 : index
    %c0_9 = arith.constant 0 : index
    %c0_10 = arith.constant 0 : index
    %10 = tpu.strided_load %arg5[%c0_8, %c0_9, %c0_10] {strides = array<i32: 2, 2, 1>} : memref<34x40x4xf32, #tpu.memory_space<vmem>>, vector<16x16x4xf32>
    %c0_11 = arith.constant 0 : index
    %c1 = arith.constant 1 : index
    %c0_12 = arith.constant 0 : index
    %11 = tpu.strided_load %arg5[%c0_11, %c1, %c0_12] {strides = array<i32: 2, 2, 1>} : memref<34x40x4xf32, #tpu.memory_space<vmem>>, vector<16x16x4xf32>
    %c0_13 = arith.constant 0 : index
    %c2 = arith.constant 2 : index
    %c0_14 = arith.constant 0 : index
    %12 = tpu.strided_load %arg5[%c0_13, %c2, %c0_14] {strides = array<i32: 2, 2, 1>} : memref<34x40x4xf32, #tpu.memory_space<vmem>>, vector<16x16x4xf32>
    %c0_15 = arith.constant 0 : index
    %c3 = arith.constant 3 : index
    %c0_16 = arith.constant 0 : index
    %13 = tpu.strided_load %arg5[%c0_15, %c3, %c0_16] {strides = array<i32: 2, 2, 1>} : memref<34x40x4xf32, #tpu.memory_space<vmem>>, vector<16x16x4xf32>
    %c1_17 = arith.constant 1 : index
    %c0_18 = arith.constant 0 : index
    %c0_19 = arith.constant 0 : index
    %14 = tpu.strided_load %arg5[%c1_17, %c0_18, %c0_19] {strides = array<i32: 2, 2, 1>} : memref<34x40x4xf32, #tpu.memory_space<vmem>>, vector<16x16x4xf32>
    %c1_20 = arith.constant 1 : index
    %c1_21 = arith.constant 1 : index
    %c0_22 = arith.constant 0 : index
    %15 = tpu.strided_load %arg5[%c1_20, %c1_21, %c0_22] {strides = array<i32: 2, 2, 1>} : memref<34x40x4xf32, #tpu.memory_space<vmem>>, vector<16x16x4xf32>
    %c1_23 = arith.constant 1 : index
    %c2_24 = arith.constant 2 : index
    %c0_25 = arith.constant 0 : index
    %16 = tpu.strided_load %arg5[%c1_23, %c2_24, %c0_25] {strides = array<i32: 2, 2, 1>} : memref<34x40x4xf32, #tpu.memory_space<vmem>>, vector<16x16x4xf32>
    %c1_26 = arith.constant 1 : index
    %c3_27 = arith.constant 3 : index
    %c0_28 = arith.constant 0 : index
    %17 = tpu.strided_load %arg5[%c1_26, %c3_27, %c0_28] {strides = array<i32: 2, 2, 1>} : memref<34x40x4xf32, #tpu.memory_space<vmem>>, vector<16x16x4xf32>
    %c2_29 = arith.constant 2 : index
    %c0_30 = arith.constant 0 : index
    %c0_31 = arith.constant 0 : index
    %18 = tpu.strided_load %arg5[%c2_29, %c0_30, %c0_31] {strides = array<i32: 2, 2, 1>} : memref<34x40x4xf32, #tpu.memory_space<vmem>>, vector<16x16x4xf32>
    %c2_32 = arith.constant 2 : index
    %c1_33 = arith.constant 1 : index
    %c0_34 = arith.constant 0 : index
    %19 = tpu.strided_load %arg5[%c2_32, %c1_33, %c0_34] {strides = array<i32: 2, 2, 1>} : memref<34x40x4xf32, #tpu.memory_space<vmem>>, vector<16x16x4xf32>
    %c2_35 = arith.constant 2 : index
    %c2_36 = arith.constant 2 : index
    %c0_37 = arith.constant 0 : index
    %20 = tpu.strided_load %arg5[%c2_35, %c2_36, %c0_37] {strides = array<i32: 2, 2, 1>} : memref<34x40x4xf32, #tpu.memory_space<vmem>>, vector<16x16x4xf32>
    %c2_38 = arith.constant 2 : index
    %c3_39 = arith.constant 3 : index
    %c0_40 = arith.constant 0 : index
    %21 = tpu.strided_load %arg5[%c2_38, %c3_39, %c0_40] {strides = array<i32: 2, 2, 1>} : memref<34x40x4xf32, #tpu.memory_space<vmem>>, vector<16x16x4xf32>
    %c3_41 = arith.constant 3 : index
    %c0_42 = arith.constant 0 : index
    %c0_43 = arith.constant 0 : index
    %22 = tpu.strided_load %arg5[%c3_41, %c0_42, %c0_43] {strides = array<i32: 2, 2, 1>} : memref<34x40x4xf32, #tpu.memory_space<vmem>>, vector<16x16x4xf32>
    %c3_44 = arith.constant 3 : index
    %c1_45 = arith.constant 1 : index
    %c0_46 = arith.constant 0 : index
    %23 = tpu.strided_load %arg5[%c3_44, %c1_45, %c0_46] {strides = array<i32: 2, 2, 1>} : memref<34x40x4xf32, #tpu.memory_space<vmem>>, vector<16x16x4xf32>
    %c3_47 = arith.constant 3 : index
    %c2_48 = arith.constant 2 : index
    %c0_49 = arith.constant 0 : index
    %24 = tpu.strided_load %arg5[%c3_47, %c2_48, %c0_49] {strides = array<i32: 2, 2, 1>} : memref<34x40x4xf32, #tpu.memory_space<vmem>>, vector<16x16x4xf32>
    %c3_50 = arith.constant 3 : index
    %c3_51 = arith.constant 3 : index
    %c0_52 = arith.constant 0 : index
    %25 = tpu.strided_load %arg5[%c3_50, %c3_51, %c0_52] {strides = array<i32: 2, 2, 1>} : memref<34x40x4xf32, #tpu.memory_space<vmem>>, vector<16x16x4xf32>
    %26 = tpu.concatenate %10, %11, %12, %13, %14, %15, %16, %17, %18, %19, %20, %21, %22, %23, %24, %25 in 2 : vector<16x16x4xf32>, vector<16x16x4xf32>, vector<16x16x4xf32>, vector<16x16x4xf32>, vector<16x16x4xf32>, vector<16x16x4xf32>, vector<16x16x4xf32>, vector<16x16x4xf32>, vector<16x16x4xf32>, vector<16x16x4xf32>, vector<16x16x4xf32>, vector<16x16x4xf32>, vector<16x16x4xf32>, vector<16x16x4xf32>, vector<16x16x4xf32>, vector<16x16x4xf32> -> vector<16x16x64xf32>
    %27 = vector.shape_cast %26 : vector<16x16x64xf32> to vector<256x64xf32>
    %28 = arith.truncf %27 : vector<256x64xf32> to vector<256x64xbf16>
    %cst = arith.constant dense<0.000000e+00> : vector<256x64xf32>
    %29 = tpu.matmul %28, %9, %cst {dimension_numbers = #tpu.dot_dimension_numbers<[1], [0], [0], [1], [0, 0, 1, 1], [], []>} : vector<256x64xbf16>, vector<64x64xbf16>, vector<256x64xf32> -> vector<256x64xf32>
    %30 = vector.extract_strided_slice %29 {offsets = [0, 0], sizes = [256, 8], strides = [1, 1]} : vector<256x64xf32> to vector<256x8xf32>
    %c0_53 = arith.constant 0 : index
    %c0_54 = arith.constant 0 : index
    %31 = vector.load %arg3[%c0_53, %c0_54] : memref<8x64xf32, #tpu.memory_space<vmem>>, vector<1x8xf32>
    %32 = vector.broadcast %31 : vector<1x8xf32> to vector<256x8xf32>
    %33 = arith.addf %30, %32 : vector<256x8xf32>
    %cst_55 = arith.constant 0.000000e+00 : f32
    %34 = vector.broadcast %cst_55 : f32 to vector<256x8xf32>
    %35 = arith.cmpf ogt, %33, %34 : vector<256x8xf32>
    %cst_56 = arith.constant 2.000000e-01 : f32
    %36 = vector.broadcast %cst_56 : f32 to vector<256x8xf32>
    %37 = arith.mulf %36, %33 : vector<256x8xf32>
    %38 = arith.select %35, %33, %37 : vector<256x8xi1>, vector<256x8xf32>
    %39 = vector.shape_cast %38 : vector<256x8xf32> to vector<16x16x8xf32>
    %40 = vector.extract_strided_slice %39 {offsets = [1, 0, 0], sizes = [1, 16, 8], strides = [1, 1, 1]} : vector<16x16x8xf32> to vector<1x16x8xf32>
    %41 = vector.extract_strided_slice %39 {offsets = [14, 0, 0], sizes = [1, 16, 8], strides = [1, 1, 1]} : vector<16x16x8xf32> to vector<1x16x8xf32>
    %42 = tpu.concatenate %40, %39, %41 in 0 : vector<1x16x8xf32>, vector<16x16x8xf32>, vector<1x16x8xf32> -> vector<18x16x8xf32>
    %43 = vector.extract_strided_slice %42 {offsets = [0, 1, 0], sizes = [18, 1, 8], strides = [1, 1, 1]} : vector<18x16x8xf32> to vector<18x1x8xf32>
    %44 = vector.extract_strided_slice %42 {offsets = [0, 14, 0], sizes = [18, 1, 8], strides = [1, 1, 1]} : vector<18x16x8xf32> to vector<18x1x8xf32>
    %45 = tpu.concatenate %43, %42, %44 in 1 : vector<18x1x8xf32>, vector<18x16x8xf32>, vector<18x1x8xf32> -> vector<18x18x8xf32>
    %c0_57 = arith.constant 0 : index
    %c0_58 = arith.constant 0 : index
    %c0_59 = arith.constant 0 : index
    %46 = vector.load %arg6[%c0_57, %c0_58, %c0_59] : memref<18x24x8xf32, #tpu.memory_space<vmem>>, vector<18x18x8xf32>
    tpu.vector_store %arg6[%c0_57, %c0_58, %c0_59], %45 {strides = array<i32>} : memref<18x24x8xf32, #tpu.memory_space<vmem>>, vector<18x18x8xf32>,
    %c64 = arith.constant 64 : index
    %c0_60 = arith.constant 0 : index
    %47 = vector.load %arg2[%c64, %c0_60] : memref<1984x64xbf16, #tpu.memory_space<vmem>>, vector<128x64xbf16>
    %c0_61 = arith.constant 0 : index
    %c0_62 = arith.constant 0 : index
    %c0_63 = arith.constant 0 : index
    %48 = tpu.strided_load %arg6[%c0_61, %c0_62, %c0_63] {strides = array<i32: 2, 2, 1>} : memref<18x24x8xf32, #tpu.memory_space<vmem>>, vector<8x8x8xf32>
    %c0_64 = arith.constant 0 : index
    %c1_65 = arith.constant 1 : index
    %c0_66 = arith.constant 0 : index
    %49 = tpu.strided_load %arg6[%c0_64, %c1_65, %c0_66] {strides = array<i32: 2, 2, 1>} : memref<18x24x8xf32, #tpu.memory_space<vmem>>, vector<8x8x8xf32>
    %c0_67 = arith.constant 0 : index
    %c2_68 = arith.constant 2 : index
    %c0_69 = arith.constant 0 : index
    %50 = tpu.strided_load %arg6[%c0_67, %c2_68, %c0_69] {strides = array<i32: 2, 2, 1>} : memref<18x24x8xf32, #tpu.memory_space<vmem>>, vector<8x8x8xf32>
    %c0_70 = arith.constant 0 : index
    %c3_71 = arith.constant 3 : index
    %c0_72 = arith.constant 0 : index
    %51 = tpu.strided_load %arg6[%c0_70, %c3_71, %c0_72] {strides = array<i32: 2, 2, 1>} : memref<18x24x8xf32, #tpu.memory_space<vmem>>, vector<8x8x8xf32>
    %c1_73 = arith.constant 1 : index
    %c0_74 = arith.constant 0 : index
    %c0_75 = arith.constant 0 : index
    %52 = tpu.strided_load %arg6[%c1_73, %c0_74, %c0_75] {strides = array<i32: 2, 2, 1>} : memref<18x24x8xf32, #tpu.memory_space<vmem>>, vector<8x8x8xf32>
    %c1_76 = arith.constant 1 : index
    %c1_77 = arith.constant 1 : index
    %c0_78 = arith.constant 0 : index
    %53 = tpu.strided_load %arg6[%c1_76, %c1_77, %c0_78] {strides = array<i32: 2, 2, 1>} : memref<18x24x8xf32, #tpu.memory_space<vmem>>, vector<8x8x8xf32>
    %c1_79 = arith.constant 1 : index
    %c2_80 = arith.constant 2 : index
    %c0_81 = arith.constant 0 : index
    %54 = tpu.strided_load %arg6[%c1_79, %c2_80, %c0_81] {strides = array<i32: 2, 2, 1>} : memref<18x24x8xf32, #tpu.memory_space<vmem>>, vector<8x8x8xf32>
    %c1_82 = arith.constant 1 : index
    %c3_83 = arith.constant 3 : index
    %c0_84 = arith.constant 0 : index
    %55 = tpu.strided_load %arg6[%c1_82, %c3_83, %c0_84] {strides = array<i32: 2, 2, 1>} : memref<18x24x8xf32, #tpu.memory_space<vmem>>, vector<8x8x8xf32>
    %c2_85 = arith.constant 2 : index
    %c0_86 = arith.constant 0 : index
    %c0_87 = arith.constant 0 : index
    %56 = tpu.strided_load %arg6[%c2_85, %c0_86, %c0_87] {strides = array<i32: 2, 2, 1>} : memref<18x24x8xf32, #tpu.memory_space<vmem>>, vector<8x8x8xf32>
    %c2_88 = arith.constant 2 : index
    %c1_89 = arith.constant 1 : index
    %c0_90 = arith.constant 0 : index
    %57 = tpu.strided_load %arg6[%c2_88, %c1_89, %c0_90] {strides = array<i32: 2, 2, 1>} : memref<18x24x8xf32, #tpu.memory_space<vmem>>, vector<8x8x8xf32>
    %c2_91 = arith.constant 2 : index
    %c2_92 = arith.constant 2 : index
    %c0_93 = arith.constant 0 : index
    %58 = tpu.strided_load %arg6[%c2_91, %c2_92, %c0_93] {strides = array<i32: 2, 2, 1>} : memref<18x24x8xf32, #tpu.memory_space<vmem>>, vector<8x8x8xf32>
    %c2_94 = arith.constant 2 : index
    %c3_95 = arith.constant 3 : index
    %c0_96 = arith.constant 0 : index
    %59 = tpu.strided_load %arg6[%c2_94, %c3_95, %c0_96] {strides = array<i32: 2, 2, 1>} : memref<18x24x8xf32, #tpu.memory_space<vmem>>, vector<8x8x8xf32>
    %c3_97 = arith.constant 3 : index
    %c0_98 = arith.constant 0 : index
    %c0_99 = arith.constant 0 : index
    %60 = tpu.strided_load %arg6[%c3_97, %c0_98, %c0_99] {strides = array<i32: 2, 2, 1>} : memref<18x24x8xf32, #tpu.memory_space<vmem>>, vector<8x8x8xf32>
    %c3_100 = arith.constant 3 : index
    %c1_101 = arith.constant 1 : index
    %c0_102 = arith.constant 0 : index
    %61 = tpu.strided_load %arg6[%c3_100, %c1_101, %c0_102] {strides = array<i32: 2, 2, 1>} : memref<18x24x8xf32, #tpu.memory_space<vmem>>, vector<8x8x8xf32>
    %c3_103 = arith.constant 3 : index
    %c2_104 = arith.constant 2 : index
    %c0_105 = arith.constant 0 : index
    %62 = tpu.strided_load %arg6[%c3_103, %c2_104, %c0_105] {strides = array<i32: 2, 2, 1>} : memref<18x24x8xf32, #tpu.memory_space<vmem>>, vector<8x8x8xf32>
    %c3_106 = arith.constant 3 : index
    %c3_107 = arith.constant 3 : index
    %c0_108 = arith.constant 0 : index
    %63 = tpu.strided_load %arg6[%c3_106, %c3_107, %c0_108] {strides = array<i32: 2, 2, 1>} : memref<18x24x8xf32, #tpu.memory_space<vmem>>, vector<8x8x8xf32>
    %64 = tpu.concatenate %48, %49, %50, %51, %52, %53, %54, %55, %56, %57, %58, %59, %60, %61, %62, %63 in 2 : vector<8x8x8xf32>, vector<8x8x8xf32>, vector<8x8x8xf32>, vector<8x8x8xf32>, vector<8x8x8xf32>, vector<8x8x8xf32>, vector<8x8x8xf32>, vector<8x8x8xf32>, vector<8x8x8xf32>, vector<8x8x8xf32>, vector<8x8x8xf32>, vector<8x8x8xf32>, vector<8x8x8xf32>, vector<8x8x8xf32>, vector<8x8x8xf32>, vector<8x8x8xf32> -> vector<8x8x128xf32>
    %65 = vector.shape_cast %64 : vector<8x8x128xf32> to vector<64x128xf32>
    %66 = arith.truncf %65 : vector<64x128xf32> to vector<64x128xbf16>
    %cst_109 = arith.constant dense<0.000000e+00> : vector<64x64xf32>
    %67 = tpu.matmul %66, %47, %cst_109 {dimension_numbers = #tpu.dot_dimension_numbers<[1], [0], [0], [1], [0, 0, 1, 1], [], []>} : vector<64x128xbf16>, vector<128x64xbf16>, vector<64x64xf32> -> vector<64x64xf32>
    %68 = vector.extract_strided_slice %67 {offsets = [0, 0], sizes = [64, 16], strides = [1, 1]} : vector<64x64xf32> to vector<64x16xf32>
    %c1_110 = arith.constant 1 : index
    %c0_111 = arith.constant 0 : index
    %69 = vector.load %arg3[%c1_110, %c0_111] : memref<8x64xf32, #tpu.memory_space<vmem>>, vector<1x16xf32>
    %c2_112 = arith.constant 2 : index
    %c0_113 = arith.constant 0 : index
    %70 = vector.load %arg3[%c2_112, %c0_113] : memref<8x64xf32, #tpu.memory_space<vmem>>, vector<1x16xf32>
    %cst_114 = arith.constant dense<0.000000e+00> : vector<16xf32>
    %71 = vector.multi_reduction <add>, %68, %cst_114 [0] : vector<64x16xf32> to vector<16xf32>
    %72 = vector.shape_cast %71 : vector<16xf32> to vector<1x16xf32>
    %cst_115 = arith.constant 6.400000e+01 : f32
    %73 = vector.broadcast %cst_115 : f32 to vector<1x16xf32>
    %74 = arith.divf %72, %73 : vector<1x16xf32>
    %75 = vector.broadcast %74 : vector<1x16xf32> to vector<64x16xf32>
    %76 = arith.subf %68, %75 : vector<64x16xf32>
    %77 = arith.mulf %76, %76 : vector<64x16xf32>
    %cst_116 = arith.constant dense<0.000000e+00> : vector<16xf32>
    %78 = vector.multi_reduction <add>, %77, %cst_116 [0] : vector<64x16xf32> to vector<16xf32>
    %79 = vector.shape_cast %78 : vector<16xf32> to vector<1x16xf32>
    %cst_117 = arith.constant 6.400000e+01 : f32
    %80 = vector.broadcast %cst_117 : f32 to vector<1x16xf32>
    %81 = arith.divf %79, %80 : vector<1x16xf32>
    %82 = vector.broadcast %74 : vector<1x16xf32> to vector<64x16xf32>
    %83 = arith.subf %68, %82 : vector<64x16xf32>
    %cst_118 = arith.constant 9.99999974E-6 : f32
    %84 = vector.broadcast %cst_118 : f32 to vector<1x16xf32>
    %85 = arith.addf %81, %84 : vector<1x16xf32>
    %86 = math.rsqrt %85 : vector<1x16xf32>
    %87 = vector.broadcast %86 : vector<1x16xf32> to vector<64x16xf32>
    %88 = arith.mulf %83, %87 : vector<64x16xf32>
    %89 = vector.broadcast %69 : vector<1x16xf32> to vector<64x16xf32>
    %90 = arith.mulf %88, %89 : vector<64x16xf32>
    %91 = vector.broadcast %70 : vector<1x16xf32> to vector<64x16xf32>
    %92 = arith.addf %90, %91 : vector<64x16xf32>
    %cst_119 = arith.constant 0.000000e+00 : f32
    %93 = vector.broadcast %cst_119 : f32 to vector<64x16xf32>
    %94 = arith.cmpf ogt, %92, %93 : vector<64x16xf32>
    %cst_120 = arith.constant 2.000000e-01 : f32
    %95 = vector.broadcast %cst_120 : f32 to vector<64x16xf32>
    %96 = arith.mulf %95, %92 : vector<64x16xf32>
    %97 = arith.select %94, %92, %96 : vector<64x16xi1>, vector<64x16xf32>
    %98 = vector.shape_cast %97 : vector<64x16xf32> to vector<8x8x16xf32>
    %99 = vector.extract_strided_slice %98 {offsets = [1, 0, 0], sizes = [1, 8, 16], strides = [1, 1, 1]} : vector<8x8x16xf32> to vector<1x8x16xf32>
    %100 = vector.extract_strided_slice %98 {offsets = [6, 0, 0], sizes = [1, 8, 16], strides = [1, 1, 1]} : vector<8x8x16xf32> to vector<1x8x16xf32>
    %101 = tpu.concatenate %99, %98, %100 in 0 : vector<1x8x16xf32>, vector<8x8x16xf32>, vector<1x8x16xf32> -> vector<10x8x16xf32>
    %102 = vector.extract_strided_slice %101 {offsets = [0, 1, 0], sizes = [10, 1, 16], strides = [1, 1, 1]} : vector<10x8x16xf32> to vector<10x1x16xf32>
    %103 = vector.extract_strided_slice %101 {offsets = [0, 6, 0], sizes = [10, 1, 16], strides = [1, 1, 1]} : vector<10x8x16xf32> to vector<10x1x16xf32>
    %104 = tpu.concatenate %102, %101, %103 in 1 : vector<10x1x16xf32>, vector<10x8x16xf32>, vector<10x1x16xf32> -> vector<10x10x16xf32>
    %c0_121 = arith.constant 0 : index
    %c0_122 = arith.constant 0 : index
    %c0_123 = arith.constant 0 : index
    %105 = vector.load %arg7[%c0_121, %c0_122, %c0_123] : memref<10x24x16xf32, #tpu.memory_space<vmem>>, vector<10x10x16xf32>
    tpu.vector_store %arg7[%c0_121, %c0_122, %c0_123], %104 {strides = array<i32>} : memref<10x24x16xf32, #tpu.memory_space<vmem>>, vector<10x10x16xf32>,
    %c192 = arith.constant 192 : index
    %c0_124 = arith.constant 0 : index
    %106 = vector.load %arg2[%c192, %c0_124] : memref<1984x64xbf16, #tpu.memory_space<vmem>>, vector<256x64xbf16>
    %c0_125 = arith.constant 0 : index
    %c0_126 = arith.constant 0 : index
    %c0_127 = arith.constant 0 : index
    %107 = tpu.strided_load %arg7[%c0_125, %c0_126, %c0_127] {strides = array<i32: 2, 2, 1>} : memref<10x24x16xf32, #tpu.memory_space<vmem>>, vector<4x8x16xf32>
    %c0_128 = arith.constant 0 : index
    %c1_129 = arith.constant 1 : index
    %c0_130 = arith.constant 0 : index
    %108 = tpu.strided_load %arg7[%c0_128, %c1_129, %c0_130] {strides = array<i32: 2, 2, 1>} : memref<10x24x16xf32, #tpu.memory_space<vmem>>, vector<4x8x16xf32>
    %c0_131 = arith.constant 0 : index
    %c2_132 = arith.constant 2 : index
    %c0_133 = arith.constant 0 : index
    %109 = tpu.strided_load %arg7[%c0_131, %c2_132, %c0_133] {strides = array<i32: 2, 2, 1>} : memref<10x24x16xf32, #tpu.memory_space<vmem>>, vector<4x8x16xf32>
    %c0_134 = arith.constant 0 : index
    %c3_135 = arith.constant 3 : index
    %c0_136 = arith.constant 0 : index
    %110 = tpu.strided_load %arg7[%c0_134, %c3_135, %c0_136] {strides = array<i32: 2, 2, 1>} : memref<10x24x16xf32, #tpu.memory_space<vmem>>, vector<4x8x16xf32>
    %c1_137 = arith.constant 1 : index
    %c0_138 = arith.constant 0 : index
    %c0_139 = arith.constant 0 : index
    %111 = tpu.strided_load %arg7[%c1_137, %c0_138, %c0_139] {strides = array<i32: 2, 2, 1>} : memref<10x24x16xf32, #tpu.memory_space<vmem>>, vector<4x8x16xf32>
    %c1_140 = arith.constant 1 : index
    %c1_141 = arith.constant 1 : index
    %c0_142 = arith.constant 0 : index
    %112 = tpu.strided_load %arg7[%c1_140, %c1_141, %c0_142] {strides = array<i32: 2, 2, 1>} : memref<10x24x16xf32, #tpu.memory_space<vmem>>, vector<4x8x16xf32>
    %c1_143 = arith.constant 1 : index
    %c2_144 = arith.constant 2 : index
    %c0_145 = arith.constant 0 : index
    %113 = tpu.strided_load %arg7[%c1_143, %c2_144, %c0_145] {strides = array<i32: 2, 2, 1>} : memref<10x24x16xf32, #tpu.memory_space<vmem>>, vector<4x8x16xf32>
    %c1_146 = arith.constant 1 : index
    %c3_147 = arith.constant 3 : index
    %c0_148 = arith.constant 0 : index
    %114 = tpu.strided_load %arg7[%c1_146, %c3_147, %c0_148] {strides = array<i32: 2, 2, 1>} : memref<10x24x16xf32, #tpu.memory_space<vmem>>, vector<4x8x16xf32>
    %c2_149 = arith.constant 2 : index
    %c0_150 = arith.constant 0 : index
    %c0_151 = arith.constant 0 : index
    %115 = tpu.strided_load %arg7[%c2_149, %c0_150, %c0_151] {strides = array<i32: 2, 2, 1>} : memref<10x24x16xf32, #tpu.memory_space<vmem>>, vector<4x8x16xf32>
    %c2_152 = arith.constant 2 : index
    %c1_153 = arith.constant 1 : index
    %c0_154 = arith.constant 0 : index
    %116 = tpu.strided_load %arg7[%c2_152, %c1_153, %c0_154] {strides = array<i32: 2, 2, 1>} : memref<10x24x16xf32, #tpu.memory_space<vmem>>, vector<4x8x16xf32>
    %c2_155 = arith.constant 2 : index
    %c2_156 = arith.constant 2 : index
    %c0_157 = arith.constant 0 : index
    %117 = tpu.strided_load %arg7[%c2_155, %c2_156, %c0_157] {strides = array<i32: 2, 2, 1>} : memref<10x24x16xf32, #tpu.memory_space<vmem>>, vector<4x8x16xf32>
    %c2_158 = arith.constant 2 : index
    %c3_159 = arith.constant 3 : index
    %c0_160 = arith.constant 0 : index
    %118 = tpu.strided_load %arg7[%c2_158, %c3_159, %c0_160] {strides = array<i32: 2, 2, 1>} : memref<10x24x16xf32, #tpu.memory_space<vmem>>, vector<4x8x16xf32>
    %c3_161 = arith.constant 3 : index
    %c0_162 = arith.constant 0 : index
    %c0_163 = arith.constant 0 : index
    %119 = tpu.strided_load %arg7[%c3_161, %c0_162, %c0_163] {strides = array<i32: 2, 2, 1>} : memref<10x24x16xf32, #tpu.memory_space<vmem>>, vector<4x8x16xf32>
    %c3_164 = arith.constant 3 : index
    %c1_165 = arith.constant 1 : index
    %c0_166 = arith.constant 0 : index
    %120 = tpu.strided_load %arg7[%c3_164, %c1_165, %c0_166] {strides = array<i32: 2, 2, 1>} : memref<10x24x16xf32, #tpu.memory_space<vmem>>, vector<4x8x16xf32>
    %c3_167 = arith.constant 3 : index
    %c2_168 = arith.constant 2 : index
    %c0_169 = arith.constant 0 : index
    %121 = tpu.strided_load %arg7[%c3_167, %c2_168, %c0_169] {strides = array<i32: 2, 2, 1>} : memref<10x24x16xf32, #tpu.memory_space<vmem>>, vector<4x8x16xf32>
    %c3_170 = arith.constant 3 : index
    %c3_171 = arith.constant 3 : index
    %c0_172 = arith.constant 0 : index
    %122 = tpu.strided_load %arg7[%c3_170, %c3_171, %c0_172] {strides = array<i32: 2, 2, 1>} : memref<10x24x16xf32, #tpu.memory_space<vmem>>, vector<4x8x16xf32>
    %123 = tpu.concatenate %107, %108, %109, %110, %111, %112, %113, %114, %115, %116, %117, %118, %119, %120, %121, %122 in 2 : vector<4x8x16xf32>, vector<4x8x16xf32>, vector<4x8x16xf32>, vector<4x8x16xf32>, vector<4x8x16xf32>, vector<4x8x16xf32>, vector<4x8x16xf32>, vector<4x8x16xf32>, vector<4x8x16xf32>, vector<4x8x16xf32>, vector<4x8x16xf32>, vector<4x8x16xf32>, vector<4x8x16xf32>, vector<4x8x16xf32>, vector<4x8x16xf32>, vector<4x8x16xf32> -> vector<4x8x256xf32>
    %124 = vector.shape_cast %123 : vector<4x8x256xf32> to vector<32x256xf32>
    %125 = arith.truncf %124 : vector<32x256xf32> to vector<32x256xbf16>
    %cst_173 = arith.constant dense<0.000000e+00> : vector<32x64xf32>
    %126 = tpu.matmul %125, %106, %cst_173 {dimension_numbers = #tpu.dot_dimension_numbers<[1], [0], [0], [1], [0, 0, 1, 1], [], []>} : vector<32x256xbf16>, vector<256x64xbf16>, vector<32x64xf32> -> vector<32x64xf32>
    %127 = vector.extract_strided_slice %126 {offsets = [0, 0], sizes = [32, 32], strides = [1, 1]} : vector<32x64xf32> to vector<32x32xf32>
    %c3_174 = arith.constant 3 : index
    %c0_175 = arith.constant 0 : index
    %128 = vector.load %arg3[%c3_174, %c0_175] : memref<8x64xf32, #tpu.memory_space<vmem>>, vector<1x32xf32>
    %c4 = arith.constant 4 : index
    %c0_176 = arith.constant 0 : index
    %129 = vector.load %arg3[%c4, %c0_176] : memref<8x64xf32, #tpu.memory_space<vmem>>, vector<1x32xf32>
    %130 = tpu.iota {dimensions = array<i32: 0>} : vector<32x1xi32>
    %c7_i32 = arith.constant 7 : i32
    %131 = vector.broadcast %c7_i32 : i32 to vector<32x1xi32>
    %132 = arith.andi %130, %131 : vector<32x1xi32>
    %c4_i32 = arith.constant 4 : i32
    %133 = vector.broadcast %c4_i32 : i32 to vector<32x1xi32>
    %134 = arith.cmpi slt, %132, %133 : vector<32x1xi32>
    %cst_177 = arith.constant 0.000000e+00 : f32
    %135 = vector.shape_cast %134 : vector<32x1xi1> to vector<32x1xi1>
    %136 = vector.broadcast %135 : vector<32x1xi1> to vector<32x32xi1>
    %137 = vector.broadcast %cst_177 : f32 to vector<32x32xf32>
    %138 = arith.select %136, %127, %137 : vector<32x32xi1>, vector<32x32xf32>
    %cst_178 = arith.constant dense<0.000000e+00> : vector<32xf32>
    %139 = vector.multi_reduction <add>, %138, %cst_178 [0] : vector<32x32xf32> to vector<32xf32>
    %140 = vector.shape_cast %139 : vector<32xf32> to vector<1x32xf32>
    %cst_179 = arith.constant 1.600000e+01 : f32
    %141 = vector.broadcast %cst_179 : f32 to vector<1x32xf32>
    %142 = arith.divf %140, %141 : vector<1x32xf32>
    %143 = vector.broadcast %142 : vector<1x32xf32> to vector<32x32xf32>
    %144 = arith.subf %127, %143 : vector<32x32xf32>
    %cst_180 = arith.constant 0.000000e+00 : f32
    %145 = vector.shape_cast %134 : vector<32x1xi1> to vector<32x1xi1>
    %146 = vector.broadcast %145 : vector<32x1xi1> to vector<32x32xi1>
    %147 = vector.broadcast %cst_180 : f32 to vector<32x32xf32>
    %148 = arith.select %146, %144, %147 : vector<32x32xi1>, vector<32x32xf32>
    %149 = arith.mulf %148, %148 : vector<32x32xf32>
    %cst_181 = arith.constant dense<0.000000e+00> : vector<32xf32>
    %150 = vector.multi_reduction <add>, %149, %cst_181 [0] : vector<32x32xf32> to vector<32xf32>
    %151 = vector.shape_cast %150 : vector<32xf32> to vector<1x32xf32>
    %cst_182 = arith.constant 1.600000e+01 : f32
    %152 = vector.broadcast %cst_182 : f32 to vector<1x32xf32>
    %153 = arith.divf %151, %152 : vector<1x32xf32>
    %154 = vector.broadcast %142 : vector<1x32xf32> to vector<32x32xf32>
    %155 = arith.subf %127, %154 : vector<32x32xf32>
    %cst_183 = arith.constant 9.99999974E-6 : f32
    %156 = vector.broadcast %cst_183 : f32 to vector<1x32xf32>
    %157 = arith.addf %153, %156 : vector<1x32xf32>
    %158 = math.rsqrt %157 : vector<1x32xf32>
    %159 = vector.broadcast %158 : vector<1x32xf32> to vector<32x32xf32>
    %160 = arith.mulf %155, %159 : vector<32x32xf32>
    %161 = vector.broadcast %128 : vector<1x32xf32> to vector<32x32xf32>
    %162 = arith.mulf %160, %161 : vector<32x32xf32>
    %163 = vector.broadcast %129 : vector<1x32xf32> to vector<32x32xf32>
    %164 = arith.addf %162, %163 : vector<32x32xf32>
    %cst_184 = arith.constant 0.000000e+00 : f32
    %165 = vector.broadcast %cst_184 : f32 to vector<32x32xf32>
    %166 = arith.cmpf ogt, %164, %165 : vector<32x32xf32>
    %cst_185 = arith.constant 2.000000e-01 : f32
    %167 = vector.broadcast %cst_185 : f32 to vector<32x32xf32>
    %168 = arith.mulf %167, %164 : vector<32x32xf32>
    %169 = arith.select %166, %164, %168 : vector<32x32xi1>, vector<32x32xf32>
    %170 = vector.shape_cast %169 : vector<32x32xf32> to vector<4x8x32xf32>
    %171 = vector.extract_strided_slice %170 {offsets = [0, 0, 0], sizes = [4, 4, 32], strides = [1, 1, 1]} : vector<4x8x32xf32> to vector<4x4x32xf32>
    %172 = vector.extract_strided_slice %171 {offsets = [1, 0, 0], sizes = [1, 4, 32], strides = [1, 1, 1]} : vector<4x4x32xf32> to vector<1x4x32xf32>
    %173 = vector.extract_strided_slice %171 {offsets = [2, 0, 0], sizes = [1, 4, 32], strides = [1, 1, 1]} : vector<4x4x32xf32> to vector<1x4x32xf32>
    %174 = tpu.concatenate %172, %171, %173 in 0 : vector<1x4x32xf32>, vector<4x4x32xf32>, vector<1x4x32xf32> -> vector<6x4x32xf32>
    %175 = vector.extract_strided_slice %174 {offsets = [0, 1, 0], sizes = [6, 1, 32], strides = [1, 1, 1]} : vector<6x4x32xf32> to vector<6x1x32xf32>
    %176 = vector.extract_strided_slice %174 {offsets = [0, 2, 0], sizes = [6, 1, 32], strides = [1, 1, 1]} : vector<6x4x32xf32> to vector<6x1x32xf32>
    %177 = tpu.concatenate %175, %174, %176 in 1 : vector<6x1x32xf32>, vector<6x4x32xf32>, vector<6x1x32xf32> -> vector<6x6x32xf32>
    %c0_186 = arith.constant 0 : index
    %c0_187 = arith.constant 0 : index
    %c0_188 = arith.constant 0 : index
    %178 = vector.load %arg8[%c0_186, %c0_187, %c0_188] : memref<6x16x32xf32, #tpu.memory_space<vmem>>, vector<6x6x32xf32>
    tpu.vector_store %arg8[%c0_186, %c0_187, %c0_188], %177 {strides = array<i32>} : memref<6x16x32xf32, #tpu.memory_space<vmem>>, vector<6x6x32xf32>,
    %c448 = arith.constant 448 : index
    %c0_189 = arith.constant 0 : index
    %179 = vector.load %arg2[%c448, %c0_189] : memref<1984x64xbf16, #tpu.memory_space<vmem>>, vector<512x64xbf16>
    %c0_190 = arith.constant 0 : index
    %c0_191 = arith.constant 0 : index
    %c0_192 = arith.constant 0 : index
    %180 = vector.load %arg8[%c0_190, %c0_191, %c0_192] : memref<6x16x32xf32, #tpu.memory_space<vmem>>, vector<3x8x32xf32>
    %c0_193 = arith.constant 0 : index
    %c1_194 = arith.constant 1 : index
    %c0_195 = arith.constant 0 : index
    %181 = vector.load %arg8[%c0_193, %c1_194, %c0_195] : memref<6x16x32xf32, #tpu.memory_space<vmem>>, vector<3x8x32xf32>
    %c0_196 = arith.constant 0 : index
    %c2_197 = arith.constant 2 : index
    %c0_198 = arith.constant 0 : index
    %182 = vector.load %arg8[%c0_196, %c2_197, %c0_198] : memref<6x16x32xf32, #tpu.memory_space<vmem>>, vector<3x8x32xf32>
    %c0_199 = arith.constant 0 : index
    %c3_200 = arith.constant 3 : index
    %c0_201 = arith.constant 0 : index
    %183 = vector.load %arg8[%c0_199, %c3_200, %c0_201] : memref<6x16x32xf32, #tpu.memory_space<vmem>>, vector<3x8x32xf32>
    %c1_202 = arith.constant 1 : index
    %c0_203 = arith.constant 0 : index
    %c0_204 = arith.constant 0 : index
    %184 = vector.load %arg8[%c1_202, %c0_203, %c0_204] : memref<6x16x32xf32, #tpu.memory_space<vmem>>, vector<3x8x32xf32>
    %c1_205 = arith.constant 1 : index
    %c1_206 = arith.constant 1 : index
    %c0_207 = arith.constant 0 : index
    %185 = vector.load %arg8[%c1_205, %c1_206, %c0_207] : memref<6x16x32xf32, #tpu.memory_space<vmem>>, vector<3x8x32xf32>
    %c1_208 = arith.constant 1 : index
    %c2_209 = arith.constant 2 : index
    %c0_210 = arith.constant 0 : index
    %186 = vector.load %arg8[%c1_208, %c2_209, %c0_210] : memref<6x16x32xf32, #tpu.memory_space<vmem>>, vector<3x8x32xf32>
    %c1_211 = arith.constant 1 : index
    %c3_212 = arith.constant 3 : index
    %c0_213 = arith.constant 0 : index
    %187 = vector.load %arg8[%c1_211, %c3_212, %c0_213] : memref<6x16x32xf32, #tpu.memory_space<vmem>>, vector<3x8x32xf32>
    %c2_214 = arith.constant 2 : index
    %c0_215 = arith.constant 0 : index
    %c0_216 = arith.constant 0 : index
    %188 = vector.load %arg8[%c2_214, %c0_215, %c0_216] : memref<6x16x32xf32, #tpu.memory_space<vmem>>, vector<3x8x32xf32>
    %c2_217 = arith.constant 2 : index
    %c1_218 = arith.constant 1 : index
    %c0_219 = arith.constant 0 : index
    %189 = vector.load %arg8[%c2_217, %c1_218, %c0_219] : memref<6x16x32xf32, #tpu.memory_space<vmem>>, vector<3x8x32xf32>
    %c2_220 = arith.constant 2 : index
    %c2_221 = arith.constant 2 : index
    %c0_222 = arith.constant 0 : index
    %190 = vector.load %arg8[%c2_220, %c2_221, %c0_222] : memref<6x16x32xf32, #tpu.memory_space<vmem>>, vector<3x8x32xf32>
    %c2_223 = arith.constant 2 : index
    %c3_224 = arith.constant 3 : index
    %c0_225 = arith.constant 0 : index
    %191 = vector.load %arg8[%c2_223, %c3_224, %c0_225] : memref<6x16x32xf32, #tpu.memory_space<vmem>>, vector<3x8x32xf32>
    %c3_226 = arith.constant 3 : index
    %c0_227 = arith.constant 0 : index
    %c0_228 = arith.constant 0 : index
    %192 = vector.load %arg8[%c3_226, %c0_227, %c0_228] : memref<6x16x32xf32, #tpu.memory_space<vmem>>, vector<3x8x32xf32>
    %c3_229 = arith.constant 3 : index
    %c1_230 = arith.constant 1 : index
    %c0_231 = arith.constant 0 : index
    %193 = vector.load %arg8[%c3_229, %c1_230, %c0_231] : memref<6x16x32xf32, #tpu.memory_space<vmem>>, vector<3x8x32xf32>
    %c3_232 = arith.constant 3 : index
    %c2_233 = arith.constant 2 : index
    %c0_234 = arith.constant 0 : index
    %194 = vector.load %arg8[%c3_232, %c2_233, %c0_234] : memref<6x16x32xf32, #tpu.memory_space<vmem>>, vector<3x8x32xf32>
    %c3_235 = arith.constant 3 : index
    %c3_236 = arith.constant 3 : index
    %c0_237 = arith.constant 0 : index
    %195 = vector.load %arg8[%c3_235, %c3_236, %c0_237] : memref<6x16x32xf32, #tpu.memory_space<vmem>>, vector<3x8x32xf32>
    %196 = tpu.concatenate %180, %181, %182, %183, %184, %185, %186, %187, %188, %189, %190, %191, %192, %193, %194, %195 in 2 : vector<3x8x32xf32>, vector<3x8x32xf32>, vector<3x8x32xf32>, vector<3x8x32xf32>, vector<3x8x32xf32>, vector<3x8x32xf32>, vector<3x8x32xf32>, vector<3x8x32xf32>, vector<3x8x32xf32>, vector<3x8x32xf32>, vector<3x8x32xf32>, vector<3x8x32xf32>, vector<3x8x32xf32>, vector<3x8x32xf32>, vector<3x8x32xf32>, vector<3x8x32xf32> -> vector<3x8x512xf32>
    %197 = vector.shape_cast %196 : vector<3x8x512xf32> to vector<24x512xf32>
    %198 = arith.truncf %197 : vector<24x512xf32> to vector<24x512xbf16>
    %cst_238 = arith.constant dense<0.000000e+00> : vector<24x64xf32>
    %199 = tpu.matmul %198, %179, %cst_238 {dimension_numbers = #tpu.dot_dimension_numbers<[1], [0], [0], [1], [0, 0, 1, 1], [], []>} : vector<24x512xbf16>, vector<512x64xbf16>, vector<24x64xf32> -> vector<24x64xf32>
    %c5 = arith.constant 5 : index
    %c0_239 = arith.constant 0 : index
    %200 = vector.load %arg3[%c5, %c0_239] : memref<8x64xf32, #tpu.memory_space<vmem>>, vector<1x64xf32>
    %c6 = arith.constant 6 : index
    %c0_240 = arith.constant 0 : index
    %201 = vector.load %arg3[%c6, %c0_240] : memref<8x64xf32, #tpu.memory_space<vmem>>, vector<1x64xf32>
    %202 = tpu.iota {dimensions = array<i32: 0>} : vector<24x1xi32>
    %c7_i32_241 = arith.constant 7 : i32
    %203 = vector.broadcast %c7_i32_241 : i32 to vector<24x1xi32>
    %204 = arith.andi %202, %203 : vector<24x1xi32>
    %c3_i32 = arith.constant 3 : i32
    %205 = vector.broadcast %c3_i32 : i32 to vector<24x1xi32>
    %206 = arith.cmpi slt, %204, %205 : vector<24x1xi32>
    %cst_242 = arith.constant 0.000000e+00 : f32
    %207 = vector.shape_cast %206 : vector<24x1xi1> to vector<24x1xi1>
    %208 = vector.broadcast %207 : vector<24x1xi1> to vector<24x64xi1>
    %209 = vector.broadcast %cst_242 : f32 to vector<24x64xf32>
    %210 = arith.select %208, %199, %209 : vector<24x64xi1>, vector<24x64xf32>
    %cst_243 = arith.constant dense<0.000000e+00> : vector<64xf32>
    %211 = vector.multi_reduction <add>, %210, %cst_243 [0] : vector<24x64xf32> to vector<64xf32>
    %212 = vector.shape_cast %211 : vector<64xf32> to vector<1x64xf32>
    %cst_244 = arith.constant 9.000000e+00 : f32
    %213 = vector.broadcast %cst_244 : f32 to vector<1x64xf32>
    %214 = arith.divf %212, %213 : vector<1x64xf32>
    %215 = vector.broadcast %214 : vector<1x64xf32> to vector<24x64xf32>
    %216 = arith.subf %199, %215 : vector<24x64xf32>
    %cst_245 = arith.constant 0.000000e+00 : f32
    %217 = vector.shape_cast %206 : vector<24x1xi1> to vector<24x1xi1>
    %218 = vector.broadcast %217 : vector<24x1xi1> to vector<24x64xi1>
    %219 = vector.broadcast %cst_245 : f32 to vector<24x64xf32>
    %220 = arith.select %218, %216, %219 : vector<24x64xi1>, vector<24x64xf32>
    %221 = arith.mulf %220, %220 : vector<24x64xf32>
    %cst_246 = arith.constant dense<0.000000e+00> : vector<64xf32>
    %222 = vector.multi_reduction <add>, %221, %cst_246 [0] : vector<24x64xf32> to vector<64xf32>
    %223 = vector.shape_cast %222 : vector<64xf32> to vector<1x64xf32>
    %cst_247 = arith.constant 9.000000e+00 : f32
    %224 = vector.broadcast %cst_247 : f32 to vector<1x64xf32>
    %225 = arith.divf %223, %224 : vector<1x64xf32>
    %226 = vector.broadcast %214 : vector<1x64xf32> to vector<24x64xf32>
    %227 = arith.subf %199, %226 : vector<24x64xf32>
    %cst_248 = arith.constant 9.99999974E-6 : f32
    %228 = vector.broadcast %cst_248 : f32 to vector<1x64xf32>
    %229 = arith.addf %225, %228 : vector<1x64xf32>
    %230 = math.rsqrt %229 : vector<1x64xf32>
    %231 = vector.broadcast %230 : vector<1x64xf32> to vector<24x64xf32>
    %232 = arith.mulf %227, %231 : vector<24x64xf32>
    %233 = vector.broadcast %200 : vector<1x64xf32> to vector<24x64xf32>
    %234 = arith.mulf %232, %233 : vector<24x64xf32>
    %235 = vector.broadcast %201 : vector<1x64xf32> to vector<24x64xf32>
    %236 = arith.addf %234, %235 : vector<24x64xf32>
    %cst_249 = arith.constant 0.000000e+00 : f32
    %237 = vector.broadcast %cst_249 : f32 to vector<24x64xf32>
    %238 = arith.cmpf ogt, %236, %237 : vector<24x64xf32>
    %cst_250 = arith.constant 2.000000e-01 : f32
    %239 = vector.broadcast %cst_250 : f32 to vector<24x64xf32>
    %240 = arith.mulf %239, %236 : vector<24x64xf32>
    %241 = arith.select %238, %236, %240 : vector<24x64xi1>, vector<24x64xf32>
    %242 = vector.shape_cast %241 : vector<24x64xf32> to vector<3x8x64xf32>
    %243 = vector.extract_strided_slice %242 {offsets = [0, 0, 0], sizes = [3, 3, 64], strides = [1, 1, 1]} : vector<3x8x64xf32> to vector<3x3x64xf32>
    %244 = vector.extract_strided_slice %243 {offsets = [1, 0, 0], sizes = [1, 3, 64], strides = [1, 1, 1]} : vector<3x3x64xf32> to vector<1x3x64xf32>
    %245 = vector.extract_strided_slice %243 {offsets = [1, 0, 0], sizes = [1, 3, 64], strides = [1, 1, 1]} : vector<3x3x64xf32> to vector<1x3x64xf32>
    %246 = tpu.concatenate %244, %243, %245 in 0 : vector<1x3x64xf32>, vector<3x3x64xf32>, vector<1x3x64xf32> -> vector<5x3x64xf32>
    %247 = vector.extract_strided_slice %246 {offsets = [0, 1, 0], sizes = [5, 1, 64], strides = [1, 1, 1]} : vector<5x3x64xf32> to vector<5x1x64xf32>
    %248 = vector.extract_strided_slice %246 {offsets = [0, 1, 0], sizes = [5, 1, 64], strides = [1, 1, 1]} : vector<5x3x64xf32> to vector<5x1x64xf32>
    %249 = tpu.concatenate %247, %246, %248 in 1 : vector<5x1x64xf32>, vector<5x3x64xf32>, vector<5x1x64xf32> -> vector<5x5x64xf32>
    %c0_251 = arith.constant 0 : index
    %c0_252 = arith.constant 0 : index
    %c0_253 = arith.constant 0 : index
    %250 = vector.load %arg9[%c0_251, %c0_252, %c0_253] : memref<5x16x64xf32, #tpu.memory_space<vmem>>, vector<5x5x64xf32>
    tpu.vector_store %arg9[%c0_251, %c0_252, %c0_253], %249 {strides = array<i32>} : memref<5x16x64xf32, #tpu.memory_space<vmem>>, vector<5x5x64xf32>,
    %c960 = arith.constant 960 : index
    %c0_254 = arith.constant 0 : index
    %251 = vector.load %arg2[%c960, %c0_254] : memref<1984x64xbf16, #tpu.memory_space<vmem>>, vector<1024x64xbf16>
    %c0_255 = arith.constant 0 : index
    %c0_256 = arith.constant 0 : index
    %c0_257 = arith.constant 0 : index
    %252 = vector.load %arg9[%c0_255, %c0_256, %c0_257] : memref<5x16x64xf32, #tpu.memory_space<vmem>>, vector<2x8x64xf32>
    %c0_258 = arith.constant 0 : index
    %c1_259 = arith.constant 1 : index
    %c0_260 = arith.constant 0 : index
    %253 = vector.load %arg9[%c0_258, %c1_259, %c0_260] : memref<5x16x64xf32, #tpu.memory_space<vmem>>, vector<2x8x64xf32>
    %c0_261 = arith.constant 0 : index
    %c2_262 = arith.constant 2 : index
    %c0_263 = arith.constant 0 : index
    %254 = vector.load %arg9[%c0_261, %c2_262, %c0_263] : memref<5x16x64xf32, #tpu.memory_space<vmem>>, vector<2x8x64xf32>
    %c0_264 = arith.constant 0 : index
    %c3_265 = arith.constant 3 : index
    %c0_266 = arith.constant 0 : index
    %255 = vector.load %arg9[%c0_264, %c3_265, %c0_266] : memref<5x16x64xf32, #tpu.memory_space<vmem>>, vector<2x8x64xf32>
    %c1_267 = arith.constant 1 : index
    %c0_268 = arith.constant 0 : index
    %c0_269 = arith.constant 0 : index
    %256 = vector.load %arg9[%c1_267, %c0_268, %c0_269] : memref<5x16x64xf32, #tpu.memory_space<vmem>>, vector<2x8x64xf32>
    %c1_270 = arith.constant 1 : index
    %c1_271 = arith.constant 1 : index
    %c0_272 = arith.constant 0 : index
    %257 = vector.load %arg9[%c1_270, %c1_271, %c0_272] : memref<5x16x64xf32, #tpu.memory_space<vmem>>, vector<2x8x64xf32>
    %c1_273 = arith.constant 1 : index
    %c2_274 = arith.constant 2 : index
    %c0_275 = arith.constant 0 : index
    %258 = vector.load %arg9[%c1_273, %c2_274, %c0_275] : memref<5x16x64xf32, #tpu.memory_space<vmem>>, vector<2x8x64xf32>
    %c1_276 = arith.constant 1 : index
    %c3_277 = arith.constant 3 : index
    %c0_278 = arith.constant 0 : index
    %259 = vector.load %arg9[%c1_276, %c3_277, %c0_278] : memref<5x16x64xf32, #tpu.memory_space<vmem>>, vector<2x8x64xf32>
    %c2_279 = arith.constant 2 : index
    %c0_280 = arith.constant 0 : index
    %c0_281 = arith.constant 0 : index
    %260 = vector.load %arg9[%c2_279, %c0_280, %c0_281] : memref<5x16x64xf32, #tpu.memory_space<vmem>>, vector<2x8x64xf32>
    %c2_282 = arith.constant 2 : index
    %c1_283 = arith.constant 1 : index
    %c0_284 = arith.constant 0 : index
    %261 = vector.load %arg9[%c2_282, %c1_283, %c0_284] : memref<5x16x64xf32, #tpu.memory_space<vmem>>, vector<2x8x64xf32>
    %c2_285 = arith.constant 2 : index
    %c2_286 = arith.constant 2 : index
    %c0_287 = arith.constant 0 : index
    %262 = vector.load %arg9[%c2_285, %c2_286, %c0_287] : memref<5x16x64xf32, #tpu.memory_space<vmem>>, vector<2x8x64xf32>
    %c2_288 = arith.constant 2 : index
    %c3_289 = arith.constant 3 : index
    %c0_290 = arith.constant 0 : index
    %263 = vector.load %arg9[%c2_288, %c3_289, %c0_290] : memref<5x16x64xf32, #tpu.memory_space<vmem>>, vector<2x8x64xf32>
    %c3_291 = arith.constant 3 : index
    %c0_292 = arith.constant 0 : index
    %c0_293 = arith.constant 0 : index
    %264 = vector.load %arg9[%c3_291, %c0_292, %c0_293] : memref<5x16x64xf32, #tpu.memory_space<vmem>>, vector<2x8x64xf32>
    %c3_294 = arith.constant 3 : index
    %c1_295 = arith.constant 1 : index
    %c0_296 = arith.constant 0 : index
    %265 = vector.load %arg9[%c3_294, %c1_295, %c0_296] : memref<5x16x64xf32, #tpu.memory_space<vmem>>, vector<2x8x64xf32>
    %c3_297 = arith.constant 3 : index
    %c2_298 = arith.constant 2 : index
    %c0_299 = arith.constant 0 : index
    %266 = vector.load %arg9[%c3_297, %c2_298, %c0_299] : memref<5x16x64xf32, #tpu.memory_space<vmem>>, vector<2x8x64xf32>
    %c3_300 = arith.constant 3 : index
    %c3_301 = arith.constant 3 : index
    %c0_302 = arith.constant 0 : index
    %267 = vector.load %arg9[%c3_300, %c3_301, %c0_302] : memref<5x16x64xf32, #tpu.memory_space<vmem>>, vector<2x8x64xf32>
    %268 = tpu.concatenate %252, %253, %254, %255, %256, %257, %258, %259, %260, %261, %262, %263, %264, %265, %266, %267 in 2 : vector<2x8x64xf32>, vector<2x8x64xf32>, vector<2x8x64xf32>, vector<2x8x64xf32>, vector<2x8x64xf32>, vector<2x8x64xf32>, vector<2x8x64xf32>, vector<2x8x64xf32>, vector<2x8x64xf32>, vector<2x8x64xf32>, vector<2x8x64xf32>, vector<2x8x64xf32>, vector<2x8x64xf32>, vector<2x8x64xf32>, vector<2x8x64xf32>, vector<2x8x64xf32> -> vector<2x8x1024xf32>
    %269 = vector.shape_cast %268 : vector<2x8x1024xf32> to vector<16x1024xf32>
    %270 = arith.truncf %269 : vector<16x1024xf32> to vector<16x1024xbf16>
    %cst_303 = arith.constant dense<0.000000e+00> : vector<16x64xf32>
    %271 = tpu.matmul %270, %251, %cst_303 {dimension_numbers = #tpu.dot_dimension_numbers<[1], [0], [0], [1], [0, 0, 1, 1], [], []>} : vector<16x1024xbf16>, vector<1024x64xbf16>, vector<16x64xf32> -> vector<16x64xf32>
    %272 = vector.extract_strided_slice %271 {offsets = [0, 0], sizes = [16, 1], strides = [1, 1]} : vector<16x64xf32> to vector<16x1xf32>
    %c7 = arith.constant 7 : index
    %c0_304 = arith.constant 0 : index
    %273 = vector.load %arg3[%c7, %c0_304] : memref<8x64xf32, #tpu.memory_space<vmem>>, vector<1x1xf32>
    %274 = vector.broadcast %273 : vector<1x1xf32> to vector<16x1xf32>
    %275 = arith.addf %272, %274 : vector<16x1xf32>
    %276 = vector.shape_cast %275 : vector<16x1xf32> to vector<2x8x1xf32>
    %277 = vector.extract_strided_slice %276 {offsets = [0, 0, 0], sizes = [2, 2, 1], strides = [1, 1, 1]} : vector<2x8x1xf32> to vector<2x2x1xf32>
    %c0_305 = arith.constant 0 : index
    %c0_306 = arith.constant 0 : index
    %c0_307 = arith.constant 0 : index
    %c0_308 = arith.constant 0 : index
    %278 = vector.load %arg4[%c0_305, %c0_306, %c0_307, %c0_308] : memref<1x2x2x1xf32, #tpu.memory_space<vmem>>, vector<1x2x2x1xf32>
    %279 = vector.shape_cast %278 : vector<1x2x2x1xf32> to vector<2x2x1xf32>
    %280 = vector.shape_cast %277 : vector<2x2x1xf32> to vector<1x2x2x1xf32>
    tpu.vector_store %arg4[%c0_305, %c0_306, %c0_307, %c0_308], %280 {strides = array<i32>} : memref<1x2x2x1xf32, #tpu.memory_space<vmem>>, vector<1x2x2x1xf32>,
    return
  }
  func.func @transform_0(%arg0: i32) -> (i32, i32, i32, i32) {
    %c0_i32 = arith.constant 0 : i32
    %c0_i32_0 = arith.constant 0 : i32
    %c0_i32_1 = arith.constant 0 : i32
    %c0_i32_2 = arith.constant 0 : i32
    return %arg0, %c0_i32, %c0_i32_0, %c0_i32_1 : i32, i32, i32, i32
  }
  func.func @transform_1(%arg0: i32) -> (i32, i32) {
    %c0_i32 = arith.constant 0 : i32
    %c0_i32_0 = arith.constant 0 : i32
    %c0_i32_1 = arith.constant 0 : i32
    return %c0_i32, %c0_i32_0 : i32, i32
  }
  func.func @transform_2(%arg0: i32) -> (i32, i32) {
    %c0_i32 = arith.constant 0 : i32
    %c0_i32_0 = arith.constant 0 : i32
    %c0_i32_1 = arith.constant 0 : i32
    return %c0_i32, %c0_i32_0 : i32, i32
  }
  func.func @transform_3(%arg0: i32) -> (i32, i32, i32, i32) {
    %c0_i32 = arith.constant 0 : i32
    %c0_i32_0 = arith.constant 0 : i32
    %c0_i32_1 = arith.constant 0 : i32
    %c0_i32_2 = arith.constant 0 : i32
    return %arg0, %c0_i32, %c0_i32_0, %c0_i32_1 : i32, i32, i32, i32
  }
}

</mosaic_0001>

<bundles_post_ra>
// kernel: discriminator_forward.1
= control target key start
LH: loop header
LB: loop body
LE: loop exit
PB: predicated region body
PF: predicated region fallthrough
CT: control target
= control target key end

     0   :  { %s11724_s12 = smov 0   ;;  %s15999_s0 = inlined_call_operand.vmem [shape: f32[2,32,32,4], index: 0, kind: input, shape index: {}]   ;;  %s16000_s1 = inlined_call_operand.vmem [shape: bf16[1984,64], index: 1, kind: input, shape index: {}]   ;;  %s16001_s2 = inlined_call_operand.vmem [shape: f32[8,64], index: 2, kind: input, shape index: {}]   ;;  %s16002_s3 = inlined_call_operand.vmem [shape: f32[2,2,2,1], index: 3, kind: output, shape index: {}]  }
   0x1 LB: > { %s9311_s13 = sadd.s32 4294967295, %s11679_s12   ;;  %p9315_p0 = scmp.ge.s32.totalorder %s11679_s12, 1  ;;  %s11679_s12 = sphi %s11724_s12, %s13_s12  }
   0x2   : > { %p137_p1 = scmp.lt.s32.totalorder %s11679_s12, 3 }
   0x4   : > { %p138_p2 = pnand %p9315_p0, %p137_p1 }
   0x6   : > { %141 = sbr.rel (%p138_p2) target bundleno = 2604 (0xa2c), region = 32 }
   0xb   : > { %p161_p3 = scmp.lt.s32.totalorder %s9311_s13, 1  ;;  %vm492_vm0 = vcmask 1040384   ;;  %vm1005_vm1 = vcmask 31744   ;;  %vm1010_vm2 = vcmask 25600   ;;  %s11681_s18 = smov 8   ;;  %vm16051_vm3 = vcmask 64512  }
   0xc   : > { %s11682_s19 = smov 4   ;;  %s11683_s20 = smov 12   ;;  %vm16050_vm4 = vcmask 97280   ;;  %vm4226_vm5 = vcmask 130048   ;;  %vm16052_vm6 = vcmask 162816   ;;  %vm16026_vm7 = vcmask 195584  }
   0xd   : > { %s16700_s13 = smov (!%p161_p3, %s9311_s13), 1  ;;  %s11684_s21 = smov 16   ;;  %vm4325_vm8 = vcmask 228352   ;;  %vm16027_vm9 = vcmask 261120   ;;  %vm4391_vm10 = vcmask 293888   ;;  %vm4424_vm11 = vcmask 326656  }
   0xe   : > { %s9470_s14 = sshll.u32 %s16700_s13, 10  ;;  %s11685_s22 = smov 20   ;;  %vm4457_vm12 = vcmask 359424   ;;  %vm4490_vm13 = vcmask 392192   ;;  %vm4523_vm14 = vcmask 424960   ;;  %vm16107_vm15 = vcmask 457728  }
   0xf   : > { %s11738_s17 = scalar_lea.vmem %s15999_s0, %s9470_s14  ;;  %s11686_s23 = smov 24  }
  0x10   : > { %v176_v0 = vld [vmem:[%s11738_s17 + $0x20] sm:$0xff]  ;;  %v177_v1 = vld [vmem:[%s11738_s17 + $0x28] sm:$0xff]  ;;  %v178_v2 = vld [vmem:[%s11738_s17 + $0x30] sm:$0xff]  ;;  %s11687_s24 = smov 28   ;;  %s11688_s25 = smov 32  }
  0x11   : > { %v179_v3 = vld [vmem:[%s11738_s17 + $0x38] sm:$0xff]  ;;  %v332_v4 = vrot.slane %v176_v0, 1  ;;  %v493_v5 = vrot.slane %v176_v0, 7  ;;  %v494_v6 = vrot.slane %v177_v1, 7  ;;  %v496_v7 = vrot.slane %v178_v2, 7  ;;  %v180_v8 = vld [vmem:[%s11738_s17 + $0x40] sm:$0xff] }
  0x12   : > { %v498_v9 = vrot.slane %v179_v3, 7  ;;  %v877_v10 = vrot.slane %v179_v3, 5  ;;  %v181_v11 = vld [vmem:[%s11738_s17 + $0x48] sm:$0xff]  ;;  %v182_v12 = vld [vmem:[%s11738_s17 + $0x50] sm:$0xff]  ;;  %v183_v13 = vld [vmem:[%s11738_s17 + $0x58] sm:$0xff]  ;;  %v334_v14 = vrot.slane %v180_v8, 1 }
  0x13   : > { %v495_v15 = vsel %vm492_vm0, %v493_v5, %v494_v6  ;;  %v497_v16 = vsel %vm492_vm0, %v494_v6, %v496_v7  ;;  %v941_v17 = vsel %vm492_vm0, %v332_v4, %v493_v5  ;;  %v507_v18 = vrot.slane %v180_v8, 7  ;;  %v172_v19 = vld [vmem:[%s11738_s17] sm:$0xff]  ;;  %v173_v20 = vld [vmem:[%s11738_s17 + $0x8] sm:$0xff]  ;;  %v174_v21 = vld [vmem:[%s11738_s17 + $0x10] sm:$0xff]  ;;  %s11689_s26 = smov 36   ;;  %s11690_s27 = smov 40  }
  0x14   : > { %v499_v22 = vsel %vm492_vm0, %v496_v7, %v498_v9  ;;  %v973_v23 = vsel %vm492_vm0, %v498_v9, %v877_v10  ;;  %1006 = vst.msk [vmem:[#allocation2] sm:$0xff] %vm1005_vm1, %v941_v17  ;;  %1007 = vst.msk [vmem:[#allocation2 + $0x8] sm:$0xff] %vm1005_vm1, %v495_v15  ;;  %v508_v24 = vrot.slane %v181_v11, 7  ;;  %v510_v25 = vrot.slane %v182_v12, 7  ;;  %v175_v26 = vld [vmem:[%s11738_s17 + $0x18] sm:$0xff]  ;;  %v184_v31 = vld [vmem:[%s11738_s17 + $0x60] sm:$0xff] }
  0x15   : > { %1008 = vst.msk [vmem:[#allocation2 + $0x10] sm:$0xff] %vm1005_vm1, %v497_v16  ;;  %1017 = vst.msk [vmem:[#allocation2 + $0x50] sm:$0xff] %vm1005_vm1, %v941_v17  ;;  %v512_v27 = vrot.slane %v183_v13, 7  ;;  %v943_v28 = vsel %vm492_vm0, %v334_v14, %v507_v18  ;;  %v333_v29 = vrot.slane %v172_v19, 1  ;;  %v500_v30 = vrot.slane %v172_v19, 7  ;;  %v185_v36 = vld [vmem:[%s11738_s17 + $0x68] sm:$0xff] }
  0x16   : > { %1018 = vst.msk [vmem:[#allocation2 + $0x58] sm:$0xff] %vm1005_vm1, %v495_v15  ;;  %1019 = vst.msk [vmem:[#allocation2 + $0x60] sm:$0xff] %vm1005_vm1, %v497_v16  ;;  %v509_v32 = vsel %vm492_vm0, %v507_v18, %v508_v24  ;;  %v511_v33 = vsel %vm492_vm0, %v508_v24, %v510_v25  ;;  %v501_v34 = vrot.slane %v173_v20, 7  ;;  %v503_v35 = vrot.slane %v174_v21, 7  ;;  %v186_v41 = vld [vmem:[%s11738_s17 + $0x70] sm:$0xff]  ;;  %v187_v42 = vld [vmem:[%s11738_s17 + $0x78] sm:$0xff] }
  0x17   : > { %1009 = vst.msk [vmem:[#allocation2 + $0x18] sm:$0xff] %vm1005_vm1, %v499_v22  ;;  %1020 = vst.msk [vmem:[#allocation2 + $0x68] sm:$0xff] %vm1005_vm1, %v499_v22  ;;  %v513_v37 = vsel %vm492_vm0, %v510_v25, %v512_v27  ;;  %v505_v38 = vrot.slane %v175_v26, 7  ;;  %v942_v39 = vsel %vm492_vm0, %v333_v29, %v500_v30  ;;  %v879_v40 = vrot.slane %v183_v13, 5  ;;  %v192_v15 = vld [vmem:[%s11738_s17 + $0xa0] sm:$0xff]  ;;  %v193_v19 = vld [vmem:[%s11738_s17 + $0xa8] sm:$0xff] }
  0x18   : > { %1011 = vst.msk [vmem:[#allocation2 + $0x20] sm:$0x3] %vm1010_vm2, %v973_v23  ;;  %1021 = vst.msk [vmem:[#allocation2 + $0x70] sm:$0x3] %vm1010_vm2, %v973_v23  ;;  %v502_v43 = vsel %vm492_vm0, %v500_v30, %v501_v34  ;;  %v504_v44 = vsel %vm492_vm0, %v501_v34, %v503_v35  ;;  %v878_v45 = vrot.slane %v175_v26, 5  ;;  %v335_v46 = vrot.slane %v184_v31, 1 }
  0x19   : > { %1022 = vst.msk [vmem:[#allocation2 + $0x78] sm:$0xff] %vm1005_vm1, %v943_v28  ;;  %1023 = vst.msk [vmem:[#allocation2 + $0x80] sm:$0xff] %vm1005_vm1, %v509_v32  ;;  %v506_v47 = vsel %vm492_vm0, %v503_v35, %v505_v38  ;;  %v975_v48 = vsel %vm492_vm0, %v512_v27, %v879_v40  ;;  %v514_v49 = vrot.slane %v184_v31, 7  ;;  %v515_v50 = vrot.slane %v185_v36, 7  ;;  %v194_v20 = vld [vmem:[%s11738_s17 + $0xb0] sm:$0xff]  ;;  %v195_v21 = vld [vmem:[%s11738_s17 + $0xb8] sm:$0xff] }
  0x1a   : > { %1024 = vst.msk [vmem:[#allocation2 + $0x88] sm:$0xff] %vm1005_vm1, %v511_v33  ;;  %1025 = vst.msk [vmem:[#allocation2 + $0x90] sm:$0xff] %vm1005_vm1, %v513_v37  ;;  %v974_v51 = vsel %vm492_vm0, %v505_v38, %v878_v45  ;;  %v517_v52 = vrot.slane %v186_v41, 7  ;;  %v519_v53 = vrot.slane %v187_v42, 7  ;;  %v880_v54 = vrot.slane %v187_v42, 5  ;;  %v188_v33 = vld [vmem:[%s11738_s17 + $0x80] sm:$0xff] }
  0x1b   : > { %1012 = vst.msk [vmem:[#allocation2 + $0x28] sm:$0xff] %vm1005_vm1, %v942_v39  ;;  %1013 = vst.msk [vmem:[#allocation2 + $0x30] sm:$0xff] %vm1005_vm1, %v502_v43  ;;  %v1249_v56 = vld [vmem:[#allocation2 + $0x1] ss:$2 sm:$0xff]  ;;  %v516_v58 = vsel %vm492_vm0, %v514_v49, %v515_v50  ;;  %v944_v59 = vsel %vm492_vm0, %v335_v46, %v514_v49  ;;  %v337_v27 = vrot.slane %v192_v15, 1  ;;  %v528_v28 = vrot.slane %v192_v15, 7 }
  0x1c   : > { %1014 = vst.msk [vmem:[#allocation2 + $0x38] sm:$0xff] %vm1005_vm1, %v504_v44  ;;  %1015 = vst.msk [vmem:[#allocation2 + $0x40] sm:$0xff] %vm1005_vm1, %v506_v47  ;;  %v1313_v55 = vld [vmem:[#allocation2 + $0x2] ss:$2 sm:$0xff]  ;;  %v518_v63 = vsel %vm492_vm0, %v515_v50, %v517_v52  ;;  %v520_v0 = vsel %vm492_vm0, %v517_v52, %v519_v53  ;;  %v976_v1 = vsel %vm492_vm0, %v519_v53, %v880_v54  ;;  %v1377_v10 = vld [vmem:[#allocation2 + $0x3] ss:$2 sm:$0xff] }
  0x1d   : > { %1026 = vst.msk [vmem:[#allocation2 + $0x98] sm:$0x3] %vm1010_vm2, %v975_v48  ;;  %v1317_v57 = vld [vmem:[#allocation2 + $0x52] ss:$2 sm:$0xff]  ;;  %1016 = vst.msk [vmem:[#allocation2 + $0x48] sm:$0x3] %vm1010_vm2, %v974_v51  ;;  %v946_v34 = vsel %vm492_vm0, %v337_v27, %v528_v28 }
  0x1e   : > { %v1251_v61 = vld [vmem:[#allocation2 + $0x11] ss:$2 sm:$0xff]  ;;  %1027 = vst.msk [vmem:[#allocation2 + $0xa0] sm:$0xff] %vm1005_vm1, %v944_v59  ;;  %1028 = vst.msk [vmem:[#allocation2 + $0xa8] sm:$0xff] %vm1005_vm1, %v516_v58  ;;  %v1255_v5 = vld [vmem:[#allocation2 + $0x61] ss:$2 sm:$0xff] }
  0x1f   : > { %v1315_v60 = vld [vmem:[#allocation2 + $0x12] ss:$2 sm:$0xff]  ;;  %v1319_v62 = vld [vmem:[#allocation2 + $0x62] ss:$2 sm:$0xff]  ;;  %v9771_v3 = vpack.i.bf16 %v1251_v61, %v1249_v56  ;;  %v1253_v4 = vld [vmem:[#allocation2 + $0x51] ss:$2 sm:$0xff] }
  0x20   : > { %v9781_v2 = vpack.i.bf16 %v1315_v60, %v1313_v55  ;;  %1029 = vst.msk [vmem:[#allocation2 + $0xb0] sm:$0xff] %vm1005_vm1, %v518_v63  ;;  %1030 = vst.msk [vmem:[#allocation2 + $0xb8] sm:$0xff] %vm1005_vm1, %v520_v0  ;;  %v9786_v6 = vpack.i.bf16 %v1319_v62, %v1317_v57  ;;  %v9776_v7 = vpack.i.bf16 %v1255_v5, %v1253_v4  ;;  %v1381_v8 = vld [vmem:[#allocation2 + $0x53] ss:$2 sm:$0xff]  ;;  %v1383_v9 = vld [vmem:[#allocation2 + $0x63] ss:$2 sm:$0xff] }
  0x21   : > { %1031 = vst.msk [vmem:[#allocation2 + $0xc0] sm:$0x3] %vm1010_vm2, %v976_v1  ;;  %9772 = vrot.lane.b32.xlu0 %v9771_v3, %s11682_s19  ;;  %v1379_v11 = vld [vmem:[#allocation2 + $0x13] ss:$2 sm:$0xff]  ;;  %v9796_v12 = vpack.i.bf16 %v1383_v9, %v1381_v8  ;;  %v1445_v14 = vld [vmem:[#allocation2 + $0x78] ss:$2 sm:$0xff] }
  0x22   : > { %9782 = vrot.lane.b32.xlu1 %v9781_v2, %s11681_s18  ;;  %v9791_v13 = vpack.i.bf16 %v1379_v11, %v1377_v10  ;;  %v1447_v16 = vld [vmem:[#allocation2 + $0x88] ss:$2 sm:$0xff]  ;;  %v1509_v22 = vld [vmem:[#allocation2 + $0x79] ss:$2 sm:$0xff]  ;;  %v1511_v25 = vld [vmem:[#allocation2 + $0x89] ss:$2 sm:$0xff] }
  0x23   : > { %v1441_v17 = vld [vmem:[#allocation2 + $0x28] ss:$2 sm:$0xff]  ;;  %v1443_v18 = vld [vmem:[#allocation2 + $0x38] ss:$2 sm:$0xff]  ;;  %v9806_v23 = vpack.i.bf16 %v1447_v16, %v1445_v14  ;;  %v1505_v26 = vld [vmem:[#allocation2 + $0x29] ss:$2 sm:$0xff]  ;;  %v9816_v43 = vpack.i.bf16 %v1511_v25, %v1509_v22 }
  0x24   : > { %v9801_v24 = vpack.i.bf16 %v1443_v18, %v1441_v17  ;;  %v1507_v29 = vld [vmem:[#allocation2 + $0x39] ss:$2 sm:$0xff]  ;;  %v529_v30 = vrot.slane %v193_v19, 7  ;;  %v531_v31 = vrot.slane %v194_v20, 7  ;;  %v533_v32 = vrot.slane %v195_v21, 7  ;;  %v189_v35 = vld [vmem:[%s11738_s17 + $0x88] sm:$0xff] }
  0x25   : > { %9777 = vrot.lane.b32.xlu0 %v9776_v7, %s11682_s19  ;;  %v190_v36 = vld [vmem:[%s11738_s17 + $0x90] sm:$0xff]  ;;  %v11815_v37 = vld [vmem:[#allocation2 + $0x7a] ss:$2 sm:$0xff]  ;;  %1037 = vst.msk [vmem:[#allocation2 + $0xf0] sm:$0xff] %vm1005_vm1, %v946_v34  ;;  %v9811_v44 = vpack.i.bf16 %v1507_v29, %v1505_v26  ;;  %v882_v47 = vrot.slane %v195_v21, 5  ;;  %v336_v48 = vrot.slane %v188_v33, 1 }
  0x26   : > { %9787 = vrot.lane.b32.xlu1 %v9786_v6, %s11681_s18  ;;  %v530_v38 = vsel %vm492_vm0, %v528_v28, %v529_v30  ;;  %v532_v39 = vsel %vm492_vm0, %v529_v30, %v531_v31  ;;  %v534_v40 = vsel %vm492_vm0, %v531_v31, %v533_v32  ;;  %v191_v41 = vld [vmem:[%s11738_s17 + $0x98] sm:$0xff]  ;;  %v196_v42 = vld [vmem:[%s11738_s17 + $0xc0] sm:$0xff]  ;;  %v521_v50 = vrot.slane %v188_v33, 7  ;;  %v197_v53 = vld [vmem:[%s11738_s17 + $0xc8] sm:$0xff]  ;;  %s11691_s28 = smov 44   ;;  %s11692_s29 = smov 48  }
  0x27   : > { %v1575_v45 = vld [vmem:[#allocation2 + $0x8a] ss:$2 sm:$0xff]  ;;  %1038 = vst.msk [vmem:[#allocation2 + $0xf8] sm:$0xff] %vm1005_vm1, %v530_v38  ;;  %1039 = vst.msk [vmem:[#allocation2 + $0x100] sm:$0xff] %vm1005_vm1, %v532_v39  ;;  %v1571_v49 = vld [vmem:[#allocation2 + $0x3a] ss:$2 sm:$0xff]  ;;  %v978_v54 = vsel %vm492_vm0, %v533_v32, %v882_v47 }
  0x28   : > { %v1569_v46 = vld [vmem:[#allocation2 + $0x2a] ss:$2 sm:$0xff]  ;;  %1040 = vst.msk [vmem:[#allocation2 + $0x108] sm:$0xff] %vm1005_vm1, %v534_v40  ;;  %v522_v51 = vrot.slane %v189_v35, 7  ;;  %v524_v52 = vrot.slane %v190_v36, 7  ;;  %v526_v55 = vrot.slane %v191_v41, 7  ;;  %v9826_v59 = vpack.i.bf16 %v1575_v45, %v11815_v37 }
  0x29   : > { %9792 = vrot.lane.b32.xlu0 %v9791_v13, %s11683_s20  ;;  %v198_v56 = vld [vmem:[%s11738_s17 + $0xd0] sm:$0xff]  ;;  %v199_v57 = vld [vmem:[%s11738_s17 + $0xd8] sm:$0xff]  ;;  %v338_v58 = vrot.slane %v196_v42, 1  ;;  %1041 = vst.msk [vmem:[#allocation2 + $0x110] sm:$0x3] %vm1010_vm2, %v978_v54  ;;  %v945_v63 = vsel %vm492_vm0, %v336_v48, %v521_v50  ;;  %v9821_v0 = vpack.i.bf16 %v1571_v49, %v1569_v46  ;;  %v535_v4 = vrot.slane %v196_v42, 7 }
  0x2a   : > { %9797 = vrot.lane.b32.xlu1 %v9796_v12, %s11683_s20  ;;  %v1637_v60 = vld [vmem:[#allocation2 + $0x7b] ss:$2 sm:$0xff]  ;;  %v523_v61 = vsel %vm492_vm0, %v521_v50, %v522_v51  ;;  %v525_v62 = vsel %vm492_vm0, %v522_v51, %v524_v52  ;;  %v1639_v1 = vld [vmem:[#allocation2 + $0x8b] ss:$2 sm:$0xff]  ;;  %v527_v3 = vsel %vm492_vm0, %v524_v52, %v526_v55  ;;  %1032 = vst.msk [vmem:[#allocation2 + $0xc8] sm:$0xff] %vm1005_vm1, %v945_v63  ;;  %v536_v5 = vrot.slane %v197_v53, 7 }
  0x2b   : > { %v1633_v2 = vld [vmem:[#allocation2 + $0x2b] ss:$2 sm:$0xff]  ;;  %1033 = vst.msk [vmem:[#allocation2 + $0xd0] sm:$0xff] %vm1005_vm1, %v523_v61  ;;  %1034 = vst.msk [vmem:[#allocation2 + $0xd8] sm:$0xff] %vm1005_vm1, %v525_v62  ;;  %v1635_v6 = vld [vmem:[#allocation2 + $0x3b] ss:$2 sm:$0xff]  ;;  %v947_v11 = vsel %vm492_vm0, %v338_v58, %v535_v4  ;;  %v9836_v20 = vpack.i.bf16 %v1639_v1, %v1637_v60 }
  0x2c   : > { %1035 = vst.msk [vmem:[#allocation2 + $0xe0] sm:$0xff] %vm1005_vm1, %v527_v3  ;;  %v538_v7 = vrot.slane %v198_v56, 7  ;;  %v540_v8 = vrot.slane %v199_v57, 7  ;;  %v881_v9 = vrot.slane %v191_v41, 5  ;;  %v537_v10 = vsel %vm492_vm0, %v535_v4, %v536_v5  ;;  %v200_v13 = vld [vmem:[%s11738_s17 + $0xe0] sm:$0xff]  ;;  %v201_v14 = vld [vmem:[%s11738_s17 + $0xe8] sm:$0xff] }
  0x2d   : > { %9802 = vrot.lane.b32.xlu0 %v9801_v24, %s11684_s21  ;;  %v883_v12 = vrot.slane %v199_v57, 5  ;;  %1042 = vst.msk [vmem:[#allocation2 + $0x118] sm:$0xff] %vm1005_vm1, %v947_v11  ;;  %1043 = vst.msk [vmem:[#allocation2 + $0x120] sm:$0xff] %vm1005_vm1, %v537_v10  ;;  %v202_v18 = vld [vmem:[%s11738_s17 + $0xf0] sm:$0xff]  ;;  %v11855_v19 = vld [vmem:[%s11738_s17 + $0xf8] sm:$0xff]  ;;  %v9831_v21 = vpack.i.bf16 %v1635_v6, %v1633_v2  ;;  %v339_v27 = vrot.slane %v200_v13, 1 }
  0x2e   : > { %9807 = vrot.lane.b32.xlu1 %v9806_v23, %s11684_s21  ;;  %v539_v15 = vsel %vm492_vm0, %v536_v5, %v538_v7  ;;  %v541_v16 = vsel %vm492_vm0, %v538_v7, %v540_v8  ;;  %v977_v17 = vsel %vm492_vm0, %v526_v55, %v881_v9  ;;  %v1257_v22 = vld [vmem:[#allocation2 + $0xa1] ss:$2 sm:$0xff]  ;;  %v1259_v23 = vld [vmem:[#allocation2 + $0xb1] ss:$2 sm:$0xff]  ;;  %v1697_v24 = vld [vmem:[#allocation2 + $0x50] ss:$2 sm:$0xff] }
  0x2f   : > { %1044 = vst.msk [vmem:[#allocation2 + $0x128] sm:$0xff] %vm1005_vm1, %v539_v15  ;;  %1045 = vst.msk [vmem:[#allocation2 + $0x130] sm:$0xff] %vm1005_vm1, %v541_v16  ;;  %v979_v25 = vsel %vm492_vm0, %v540_v8, %v883_v12  ;;  %v1699_v26 = vld [vmem:[#allocation2 + $0x60] ss:$2 sm:$0xff]  ;;  %v542_v28 = vrot.slane %v200_v13, 7  ;;  %v543_v29 = vrot.slane %v201_v14, 7  ;;  %v9846_v32 = vpack.i.bf16 %v1259_v23, %v1257_v22 }
  0x30   : > { %1036 = vst.msk [vmem:[#allocation2 + $0xe8] sm:$0x3] %vm1010_vm2, %v977_v17  ;;  %1046 = vst.msk [vmem:[#allocation2 + $0x138] sm:$0x3] %vm1010_vm2, %v979_v25  ;;  %v545_v30 = vrot.slane %v202_v18, 7  ;;  %v547_v31 = vrot.slane %v11855_v19, 7  ;;  %v9841_v35 = vpack.i.bf16 %v1699_v26, %v1697_v24 }
  0x31   : > { %9812 = vrot.lane.b32.xlu0 %v9811_v44, %s11685_s22  ;;  %v544_v33 = vsel %vm492_vm0, %v542_v28, %v543_v29  ;;  %v948_v34 = vsel %vm492_vm0, %v339_v27, %v542_v28  ;;  %v1761_v36 = vld [vmem:[#allocation2 + $0x51] ss:$2 sm:$0xff]  ;;  %v1763_v39 = vld [vmem:[#allocation2 + $0x61] ss:$2 sm:$0xff]  ;;  %v1701_v40 = vld [vmem:[#allocation2 + $0xa0] ss:$2 sm:$0xff] }
  0x32   : > { %9817 = vrot.lane.b32.xlu1 %v9816_v43, %s11685_s22  ;;  %v546_v37 = vsel %vm492_vm0, %v543_v29, %v545_v30  ;;  %v548_v38 = vsel %vm492_vm0, %v545_v30, %v547_v31  ;;  %1047 = vst.msk [vmem:[#allocation2 + $0x140] sm:$0xff] %vm1005_vm1, %v948_v34  ;;  %1048 = vst.msk [vmem:[#allocation2 + $0x148] sm:$0xff] %vm1005_vm1, %v544_v33  ;;  %v1703_v41 = vld [vmem:[#allocation2 + $0xb0] ss:$2 sm:$0xff]  ;;  %v9856_v42 = vpack.i.bf16 %v1763_v39, %v1761_v36  ;;  %v1261_v46 = vld [vmem:[#allocation2 + $0xf1] ss:$2 sm:$0xff] }
  0x33   : > { %1049 = vst.msk [vmem:[#allocation2 + $0x150] sm:$0xff] %vm1005_vm1, %v546_v37  ;;  %1050 = vst.msk [vmem:[#allocation2 + $0x158] sm:$0xff] %vm1005_vm1, %v548_v38  ;;  %v9851_v43 = vpack.i.bf16 %v1703_v41, %v1701_v40  ;;  %v1321_v44 = vld [vmem:[#allocation2 + $0xa2] ss:$2 sm:$0xff]  ;;  %v1323_v45 = vld [vmem:[#allocation2 + $0xb2] ss:$2 sm:$0xff] }
  0x34   : > { %v1263_v47 = vld [vmem:[#allocation2 + $0x101] ss:$2 sm:$0xff]  ;;  %v210_v50 = vld [vmem:[%s11738_s17 + $0x130] sm:$0xff]  ;;  %v211_v51 = vld [vmem:[%s11738_s17 + $0x138] sm:$0xff]  ;;  %v9866_v52 = vpack.i.bf16 %v1323_v45, %v1321_v44  ;;  %v884_v56 = vrot.slane %v11855_v19, 5  ;;  %s11693_s30 = smov 52  }
  0x35   : > { %9822 = vrot.lane.b32.xlu0 %v9821_v0, %s11686_s23  ;;  %v208_v48 = vld [vmem:[%s11738_s17 + $0x120] sm:$0xff]  ;;  %v209_v49 = vld [vmem:[%s11738_s17 + $0x128] sm:$0xff]  ;;  %v9861_v53 = vpack.i.bf16 %v1263_v47, %v1261_v46  ;;  %v559_v63 = vrot.slane %v210_v50, 7  ;;  %v561_v0 = vrot.slane %v211_v51, 7  ;;  %v886_v6 = vrot.slane %v211_v51, 5  ;;  %v206_v15 = vld [vmem:[%s11738_s17 + $0x110] sm:$0xff] }
  0x36   : > { %9827 = vrot.lane.b32.xlu1 %v9826_v59, %s11686_s23  ;;  %v1825_v54 = vld [vmem:[#allocation2 + $0x52] ss:$2 sm:$0xff]  ;;  %v1827_v55 = vld [vmem:[#allocation2 + $0x62] ss:$2 sm:$0xff]  ;;  %v341_v57 = vrot.slane %v208_v48, 1  ;;  %v556_v60 = vrot.slane %v208_v48, 7  ;;  %v980_v62 = vsel %vm492_vm0, %v547_v31, %v884_v56 }
  0x37   : > { %v1765_v58 = vld [vmem:[#allocation2 + $0xa1] ss:$2 sm:$0xff]  ;;  %v1767_v59 = vld [vmem:[#allocation2 + $0xb1] ss:$2 sm:$0xff]  ;;  %v557_v61 = vrot.slane %v209_v49, 7  ;;  %v9876_v2 = vpack.i.bf16 %v1827_v55, %v1825_v54  ;;  %v562_v13 = vsel %vm492_vm0, %v559_v63, %v561_v0  ;;  %v982_v14 = vsel %vm492_vm0, %v561_v0, %v886_v6  ;;  %s11694_s4 = smov 56  }
  0x38   : > { %v204_v1 = vld [vmem:[%s11738_s17 + $0x100] sm:$0xff]  ;;  %1051 = vst.msk [vmem:[#allocation2 + $0x160] sm:$0x3] %vm1010_vm2, %v980_v62  ;;  %v950_v5 = vsel %vm492_vm0, %v341_v57, %v556_v60  ;;  %v205_v7 = vld [vmem:[%s11738_s17 + $0x108] sm:$0xff]  ;;  %v9871_v8 = vpack.i.bf16 %v1767_v59, %v1765_v58  ;;  %v207_v16 = vld [vmem:[%s11738_s17 + $0x118] sm:$0xff]  ;;  %s11695_s7 = smov 60  }
  0x39   : > { %9832 = vrot.lane.b32.xlu0 %v9831_v21, %s11687_s24  ;;  %v1385_v3 = vld [vmem:[#allocation2 + $0xa3] ss:$2 sm:$0xff]  ;;  %v558_v4 = vsel %vm492_vm0, %v556_v60, %v557_v61  ;;  %v1387_v9 = vld [vmem:[#allocation2 + $0xb3] ss:$2 sm:$0xff]  ;;  %v1325_v10 = vld [vmem:[#allocation2 + $0xf2] ss:$2 sm:$0xff]  ;;  %v560_v12 = vsel %vm492_vm0, %v557_v61, %v559_v63 }
  0x3a   : > { %9837 = vrot.lane.b32.xlu1 %v9836_v20, %s11687_s24  ;;  %v1327_v11 = vld [vmem:[#allocation2 + $0x102] ss:$2 sm:$0xff]  ;;  %1057 = vst.msk [vmem:[#allocation2 + $0x190] sm:$0xff] %vm1005_vm1, %v950_v5  ;;  %1058 = vst.msk [vmem:[#allocation2 + $0x198] sm:$0xff] %vm1005_vm1, %v558_v4  ;;  %v340_v17 = vrot.slane %v204_v1, 1  ;;  %v549_v18 = vrot.slane %v204_v1, 7  ;;  %v9886_v23 = vpack.i.bf16 %v1387_v9, %v1385_v3 }
  0x3b   : > { %1059 = vst.msk [vmem:[#allocation2 + $0x1a0] sm:$0xff] %vm1005_vm1, %v560_v12  ;;  %1060 = vst.msk [vmem:[#allocation2 + $0x1a8] sm:$0xff] %vm1005_vm1, %v562_v13  ;;  %v550_v19 = vrot.slane %v205_v7, 7  ;;  %v552_v20 = vrot.slane %v206_v15, 7  ;;  %v554_v21 = vrot.slane %v207_v16, 7  ;;  %v212_v22 = vld [vmem:[%s11738_s17 + $0x140] sm:$0xff]  ;;  %v9881_v24 = vpack.i.bf16 %v1327_v11, %v1325_v10 }
  0x3c   : > { %1061 = vst.msk [vmem:[#allocation2 + $0x1b0] sm:$0x3] %vm1010_vm2, %v982_v14  ;;  %v949_v25 = vsel %vm492_vm0, %v340_v17, %v549_v18  ;;  %v1889_v26 = vld [vmem:[#allocation2 + $0x53] ss:$2 sm:$0xff]  ;;  %v1891_v27 = vld [vmem:[#allocation2 + $0x63] ss:$2 sm:$0xff] }
  0x3d   : > { %9842 = vrot.lane.b32.xlu0 %v9841_v35, %s11688_s25  ;;  %v551_v28 = vsel %vm492_vm0, %v549_v18, %v550_v19  ;;  %v553_v29 = vsel %vm492_vm0, %v550_v19, %v552_v20  ;;  %v555_v30 = vsel %vm492_vm0, %v552_v20, %v554_v21  ;;  %1052 = vst.msk [vmem:[#allocation2 + $0x168] sm:$0xff] %vm1005_vm1, %v949_v25  ;;  %v213_v31 = vld [vmem:[%s11738_s17 + $0x148] sm:$0xff]  ;;  %v1831_v34 = vld [vmem:[#allocation2 + $0xb2] ss:$2 sm:$0xff]  ;;  %v563_v35 = vrot.slane %v212_v22, 7  ;;  %s11701_s5 = smov 104  }
  0x3e   : > { %9847 = vrot.lane.b32.xlu1 %v9846_v32, %s11682_s19  ;;  %v342_v32 = vrot.slane %v212_v22, 1  ;;  %v1829_v33 = vld [vmem:[#allocation2 + $0xa2] ss:$2 sm:$0xff]  ;;  %1053 = vst.msk [vmem:[#allocation2 + $0x170] sm:$0xff] %vm1005_vm1, %v551_v28  ;;  %1054 = vst.msk [vmem:[#allocation2 + $0x178] sm:$0xff] %vm1005_vm1, %v553_v29  ;;  %v564_v36 = vrot.slane %v213_v31, 7  ;;  %v9896_v40 = vpack.i.bf16 %v1891_v27, %v1889_v26 }
  0x3f   : > { %1055 = vst.msk [vmem:[#allocation2 + $0x180] sm:$0xff] %vm1005_vm1, %v555_v30  ;;  %v214_v37 = vld [vmem:[%s11738_s17 + $0x150] sm:$0xff]  ;;  %v215_v38 = vld [vmem:[%s11738_s17 + $0x158] sm:$0xff]  ;;  %v9891_v41 = vpack.i.bf16 %v1831_v34, %v1829_v33  ;;  %v885_v51 = vrot.slane %v207_v16, 5  ;;  %v216_v3 = vld [vmem:[%s11738_s17 + $0x160] sm:$0xff]  ;;  %s11702_s6 = smov 112  }
  0x40   : > { %v565_v39 = vsel %vm492_vm0, %v563_v35, %v564_v36  ;;  %v951_v44 = vsel %vm492_vm0, %v342_v32, %v563_v35  ;;  %v1449_v45 = vld [vmem:[#allocation2 + $0xc8] ss:$2 sm:$0xff]  ;;  %v1451_v46 = vld [vmem:[#allocation2 + $0xd8] ss:$2 sm:$0xff]  ;;  %v566_v47 = vrot.slane %v214_v37, 7  ;;  %v568_v48 = vrot.slane %v215_v38, 7 }
  0x41   : > { %9852 = vrot.lane.b32.xlu0 %v9851_v43, %s11688_s25  ;;  %v1391_v43 = vld [vmem:[#allocation2 + $0x103] ss:$2 sm:$0xff]  ;;  %1063 = vst.msk [vmem:[#allocation2 + $0x1c0] sm:$0xff] %vm1005_vm1, %v565_v39  ;;  %1062 = vst.msk [vmem:[#allocation2 + $0x1b8] sm:$0xff] %vm1005_vm1, %v951_v44  ;;  %v1953_v54 = vld [vmem:[#allocation2 + $0x78] ss:$2 sm:$0xff]  ;;  %v981_v58 = vsel %vm492_vm0, %v554_v21, %v885_v51 }
  0x42   : > { %9857 = vrot.lane.b32.xlu1 %v9856_v42, %s11689_s26  ;;  %v1389_v42 = vld [vmem:[#allocation2 + $0xf3] ss:$2 sm:$0xff]  ;;  %v567_v49 = vsel %vm492_vm0, %v564_v36, %v566_v47  ;;  %v569_v50 = vsel %vm492_vm0, %v566_v47, %v568_v48  ;;  %v1955_v55 = vld [vmem:[#allocation2 + $0x88] ss:$2 sm:$0xff]  ;;  %v1893_v56 = vld [vmem:[#allocation2 + $0xa3] ss:$2 sm:$0xff] }
  0x43   : > { %1064 = vst.msk [vmem:[#allocation2 + $0x1c8] sm:$0xff] %vm1005_vm1, %v567_v49  ;;  %1065 = vst.msk [vmem:[#allocation2 + $0x1d0] sm:$0xff] %vm1005_vm1, %v569_v50  ;;  %v1895_v57 = vld [vmem:[#allocation2 + $0xb3] ss:$2 sm:$0xff]  ;;  %v887_v59 = vrot.slane %v215_v38, 5  ;;  %v9916_v60 = vpack.i.bf16 %v1955_v55, %v1953_v54  ;;  %v217_v4 = vld [vmem:[%s11738_s17 + $0x168] sm:$0xff] }
  0x44   : > { %1056 = vst.msk [vmem:[#allocation2 + $0x188] sm:$0x3] %vm1010_vm2, %v981_v58  ;;  %v9911_v61 = vpack.i.bf16 %v1895_v57, %v1893_v56  ;;  %v1513_v62 = vld [vmem:[#allocation2 + $0xc9] ss:$2 sm:$0xff]  ;;  %v1515_v63 = vld [vmem:[#allocation2 + $0xd9] ss:$2 sm:$0xff] }
  0x45   : > { %9862 = vrot.lane.b32.xlu0 %v9861_v53, %s11682_s19  ;;  %v9901_v53 = vpack.i.bf16 %v1391_v43, %v1389_v42  ;;  %v1453_v0 = vld [vmem:[#allocation2 + $0x118] ss:$2 sm:$0xff]  ;;  %v1455_v1 = vld [vmem:[#allocation2 + $0x128] ss:$2 sm:$0xff]  ;;  %v9926_v5 = vpack.i.bf16 %v1515_v63, %v1513_v62  ;;  %v2017_v7 = vld [vmem:[#allocation2 + $0x79] ss:$2 sm:$0xff] }
  0x46   : > { %9867 = vrot.lane.b32.xlu1 %v9866_v52, %s11681_s18  ;;  %v9906_v52 = vpack.i.bf16 %v1451_v46, %v1449_v45  ;;  %v9921_v6 = vpack.i.bf16 %v1455_v1, %v1453_v0  ;;  %v219_v9 = vld [vmem:[%s11738_s17 + $0x178] sm:$0xff]  ;;  %v343_v10 = vrot.slane %v216_v3, 1  ;;  %v570_v11 = vrot.slane %v216_v3, 7  ;;  %v2019_v12 = vld [vmem:[#allocation2 + $0x89] ss:$2 sm:$0xff]  ;;  %v224_v16 = vld [vmem:[%s11738_s17 + $0x1a0] sm:$0xff] }
  0x47   : > { %v1957_v13 = vld [vmem:[#allocation2 + $0xc8] ss:$2 sm:$0xff]  ;;  %v1959_v14 = vld [vmem:[#allocation2 + $0xd8] ss:$2 sm:$0xff]  ;;  %v571_v15 = vrot.slane %v217_v4, 7  ;;  %v575_v18 = vrot.slane %v219_v9, 7  ;;  %v9936_v20 = vpack.i.bf16 %v2019_v12, %v2017_v7 }
  0x48   : > { %v952_v19 = vsel %vm492_vm0, %v343_v10, %v570_v11  ;;  %v9931_v21 = vpack.i.bf16 %v1959_v14, %v1957_v13  ;;  %v1577_v22 = vld [vmem:[#allocation2 + $0xca] ss:$2 sm:$0xff]  ;;  %v888_v25 = vrot.slane %v219_v9, 5  ;;  %v1579_v26 = vld [vmem:[#allocation2 + $0xda] ss:$2 sm:$0xff]  ;;  %v345_v31 = vrot.slane %v224_v16, 1 }
  0x49   : > { %9872 = vrot.lane.b32.xlu0 %v9871_v8, %s11689_s26  ;;  %v218_v8 = vld [vmem:[%s11738_s17 + $0x170] sm:$0xff]  ;;  %1067 = vst.msk [vmem:[#allocation2 + $0x1e0] sm:$0xff] %vm1005_vm1, %v952_v19  ;;  %v225_v30 = vld [vmem:[%s11738_s17 + $0x1a8] sm:$0xff]  ;;  %v227_v35 = vld [vmem:[%s11738_s17 + $0x1b8] sm:$0xff]  ;;  %v584_v36 = vrot.slane %v224_v16, 7  ;;  %s9471_s11 = sshll.u32 %s16700_s13, 2 }
  0x4a   : > { %9877 = vrot.lane.b32.xlu1 %v9876_v2, %s11690_s27  ;;  %v983_v2 = vsel %vm492_vm0, %v568_v48, %v887_v59  ;;  %v573_v17 = vrot.slane %v218_v8, 7  ;;  %v1519_v27 = vld [vmem:[#allocation2 + $0x129] ss:$2 sm:$0xff]  ;;  %v2081_v32 = vld [vmem:[#allocation2 + $0x7a] ss:$2 sm:$0xff]  ;;  %v984_v33 = vsel %vm492_vm0, %v575_v18, %v888_v25  ;;  %v585_v38 = vrot.slane %v225_v30, 7 }
  0x4b   : > { %1066 = vst.msk [vmem:[#allocation2 + $0x1d8] sm:$0x3] %vm1010_vm2, %v983_v2  ;;  %v226_v34 = vld [vmem:[%s11738_s17 + $0x1b0] sm:$0xff]  ;;  %1071 = vst.msk [vmem:[#allocation2 + $0x200] sm:$0x3] %vm1010_vm2, %v984_v33  ;;  %v954_v45 = vsel %vm492_vm0, %v345_v31, %v584_v36  ;;  %v890_v46 = vrot.slane %v227_v35, 5 }
  0x4c   : > { %v574_v28 = vsel %vm492_vm0, %v571_v15, %v573_v17  ;;  %v576_v29 = vsel %vm492_vm0, %v573_v17, %v575_v18  ;;  %v2083_v37 = vld [vmem:[#allocation2 + $0x8a] ss:$2 sm:$0xff]  ;;  %v587_v39 = vrot.slane %v226_v34, 7  ;;  %v2021_v43 = vld [vmem:[#allocation2 + $0xc9] ss:$2 sm:$0xff]  ;;  %v586_v47 = vsel %vm492_vm0, %v584_v36, %v585_v38  ;;  %1077 = vst.msk [vmem:[#allocation2 + $0x230] sm:$0xff] %vm1005_vm1, %v954_v45 }
  0x4d   : > { %9882 = vrot.lane.b32.xlu0 %v9881_v24, %s11681_s18  ;;  %v572_v24 = vsel %vm492_vm0, %v570_v11, %v571_v15  ;;  %1069 = vst.msk [vmem:[#allocation2 + $0x1f0] sm:$0xff] %vm1005_vm1, %v574_v28  ;;  %1070 = vst.msk [vmem:[#allocation2 + $0x1f8] sm:$0xff] %vm1005_vm1, %v576_v29  ;;  %v2023_v44 = vld [vmem:[#allocation2 + $0xd9] ss:$2 sm:$0xff]  ;;  %v221_v51 = vld [vmem:[%s11738_s17 + $0x188] sm:$0xff]  ;;  %v9956_v58 = vpack.i.bf16 %v2083_v37, %v2081_v32 }
  0x4e   : > { %9887 = vrot.lane.b32.xlu1 %v9886_v23, %s11683_s20  ;;  %v1517_v23 = vld [vmem:[#allocation2 + $0x119] ss:$2 sm:$0xff]  ;;  %1068 = vst.msk [vmem:[#allocation2 + $0x1e8] sm:$0xff] %vm1005_vm1, %v572_v24  ;;  %v588_v48 = vsel %vm492_vm0, %v585_v38, %v587_v39  ;;  %1078 = vst.msk [vmem:[#allocation2 + $0x238] sm:$0xff] %vm1005_vm1, %v586_v47  ;;  %v578_v57 = vrot.slane %v221_v51, 7  ;;  %v229_v11 = vld [vmem:[%s11738_s17 + $0x1c8] sm:$0xff] }
  0x4f   : > { %v9941_v42 = vpack.i.bf16 %v1519_v27, %v1517_v23  ;;  %v220_v50 = vld [vmem:[%s11738_s17 + $0x180] sm:$0xff]  ;;  %1079 = vst.msk [vmem:[#allocation2 + $0x240] sm:$0xff] %vm1005_vm1, %v588_v48  ;;  %v11971_v54 = vld [vmem:[%s11738_s17 + $0x198] sm:$0xff]  ;;  %v230_v14 = vld [vmem:[%s11738_s17 + $0x1d0] sm:$0xff]  ;;  %v592_v18 = vrot.slane %v229_v11, 7 }
  0x50   : > { %v344_v55 = vrot.slane %v220_v50, 1  ;;  %v577_v56 = vrot.slane %v220_v50, 7  ;;  %v1641_v62 = vld [vmem:[#allocation2 + $0xcb] ss:$2 sm:$0xff]  ;;  %v1643_v1 = vld [vmem:[#allocation2 + $0xdb] ss:$2 sm:$0xff] }
  0x51   : > { %9892 = vrot.lane.b32.xlu0 %v9891_v41, %s11690_s27  ;;  %v9946_v41 = vpack.i.bf16 %v1579_v26, %v1577_v22  ;;  %v1581_v2 = vld [vmem:[#allocation2 + $0x11a] ss:$2 sm:$0xff]  ;;  %v1583_v3 = vld [vmem:[#allocation2 + $0x12a] ss:$2 sm:$0xff]  ;;  %v9966_v7 = vpack.i.bf16 %v1643_v1, %v1641_v62  ;;  %v2145_v9 = vld [vmem:[#allocation2 + $0x7b] ss:$2 sm:$0xff] }
  0x52   : > { %9897 = vrot.lane.b32.xlu1 %v9896_v40, %s11691_s28  ;;  %v589_v40 = vrot.slane %v227_v35, 7  ;;  %v579_v63 = vsel %vm492_vm0, %v577_v56, %v578_v57  ;;  %v953_v0 = vsel %vm492_vm0, %v344_v55, %v577_v56  ;;  %v9961_v8 = vpack.i.bf16 %v1583_v3, %v1581_v2  ;;  %v2147_v10 = vld [vmem:[#allocation2 + $0x8b] ss:$2 sm:$0xff]  ;;  %v2085_v12 = vld [vmem:[#allocation2 + $0xca] ss:$2 sm:$0xff]  ;;  %v232_v48 = vld [vmem:[%s11738_s17 + $0x1e0] sm:$0xff] }
  0x53   : > { %1072 = vst.msk [vmem:[#allocation2 + $0x208] sm:$0xff] %vm1005_vm1, %v953_v0  ;;  %1073 = vst.msk [vmem:[#allocation2 + $0x210] sm:$0xff] %vm1005_vm1, %v579_v63  ;;  %v2087_v13 = vld [vmem:[#allocation2 + $0xda] ss:$2 sm:$0xff]  ;;  %v594_v24 = vrot.slane %v230_v14, 7  ;;  %v889_v33 = vrot.slane %v11971_v54, 5 }
  0x54   : > { %v590_v49 = vsel %vm492_vm0, %v587_v39, %v589_v40  ;;  %v231_v16 = vld [vmem:[%s11738_s17 + $0x1d8] sm:$0xff]  ;;  %v1707_v23 = vld [vmem:[#allocation2 + $0x100] ss:$2 sm:$0xff]  ;;  %v1265_v39 = vld [vmem:[#allocation2 + $0x141] ss:$2 sm:$0xff]  ;;  %v598_v56 = vrot.slane %v232_v48, 7 }
  0x55   : > { %9902 = vrot.lane.b32.xlu0 %v9901_v53, %s11683_s20  ;;  %1080 = vst.msk [vmem:[#allocation2 + $0x248] sm:$0xff] %vm1005_vm1, %v590_v49  ;;  %v986_v53 = vsel %vm492_vm0, %v589_v40, %v890_v46  ;;  %v11541_v19 = vld [vmem:[%s16000_s1 + $0x18] sm:$0xff]   ;;  %v596_v25 = vrot.slane %v231_v16, 7  ;;  %v891_v29 = vrot.slane %v231_v16, 5  ;;  %v595_v31 = vsel %vm492_vm0, %v592_v18, %v594_v24  ;;  %v1771_v47 = vld [vmem:[#allocation2 + $0x101] ss:$2 sm:$0xff] }
  0x56   : > { %9907 = vrot.lane.b32.xlu1 %v9906_v52, %s11684_s21  ;;  %v222_v52 = vld [vmem:[%s11738_s17 + $0x190] sm:$0xff]  ;;  %1081 = vst.msk [vmem:[#allocation2 + $0x250] sm:$0x3] %vm1010_vm2, %v986_v53  ;;  %v1645_v26 = vld [vmem:[#allocation2 + $0x11b] ss:$2 sm:$0xff]  ;;  %9676 = vmatprep.subr.bf16.mxu0 %v11541_v19 }
  0x57   : > { %v580_v59 = vrot.slane %v222_v52, 7  ;;  %v1705_v22 = vld [vmem:[#allocation2 + $0xf0] ss:$2 sm:$0xff]  ;;  %v1647_v27 = vld [vmem:[#allocation2 + $0x12b] ss:$2 sm:$0xff]  ;;  %v597_v32 = vsel %vm492_vm0, %v594_v24, %v596_v25  ;;  %9677 = vmatpush3.bf16.msra.mxu0 %v11541_v19  ;;  %1084 = vst.msk [vmem:[#allocation2 + $0x268] sm:$0xff] %vm1005_vm1, %v595_v31  ;;  %v987_v38 = vsel %vm492_vm0, %v596_v25, %v891_v29 }
  0x58   : > { %1085 = vst.msk [vmem:[#allocation2 + $0x270] sm:$0xff] %vm1005_vm1, %v597_v32  ;;  %v9986_v34 = vpack.i.bf16 %v1707_v23, %v1705_v22  ;;  %v9981_v35 = vpack.i.bf16 %v1647_v27, %v1645_v26  ;;  %v2149_v36 = vld [vmem:[#allocation2 + $0xcb] ss:$2 sm:$0xff]  ;;  %v2151_v37 = vld [vmem:[#allocation2 + $0xdb] ss:$2 sm:$0xff]  ;;  %v347_v52 = vrot.slane %v232_v48, 1 }
  0x59   : > { %9912 = vrot.lane.b32.xlu0 %v9911_v61, %s11691_s28  ;;  %v9951_v61 = vpack.i.bf16 %v2023_v44, %v2021_v43  ;;  %v581_v4 = vsel %vm492_vm0, %v578_v57, %v580_v59  ;;  %v1267_v40 = vld [vmem:[#allocation2 + $0x151] ss:$2 sm:$0xff]  ;;  %1086 = vst.msk [vmem:[#allocation2 + $0x278] sm:$0x3] %vm1010_vm2, %v987_v38  ;;  %v11543_v43 = vld [vmem:[%s16000_s1 + $0x8] sm:$0xff]   ;;  %v9991_v45 = vpack.i.bf16 %v2151_v37, %v2149_v36  ;;  %v11544_v53 = vld [vmem:[%s16000_s1] sm:$0xff]  }
  0x5a   : > { %9917 = vrot.lane.b32.xlu1 %v9916_v60, %s11692_s29  ;;  %v582_v60 = vrot.slane %v11971_v54, 7  ;;  %1074 = vst.msk [vmem:[#allocation2 + $0x218] sm:$0xff] %vm1005_vm1, %v581_v4  ;;  %v9996_v44 = vpack.i.bf16 %v1267_v40, %v1265_v39  ;;  %v1769_v46 = vld [vmem:[#allocation2 + $0xf1] ss:$2 sm:$0xff]  ;;  %v1709_v49 = vld [vmem:[#allocation2 + $0x140] ss:$2 sm:$0xff]  ;;  %v956_v3 = vsel %vm492_vm0, %v347_v52, %v598_v56 }
  0x5b   : > { %v1711_v50 = vld [vmem:[#allocation2 + $0x150] ss:$2 sm:$0xff]  ;;  %v233_v51 = vld [vmem:[%s11738_s17 + $0x1e8] sm:$0xff]  ;;  %v1269_v0 = vld [vmem:[#allocation2 + $0x191] ss:$2 sm:$0xff]  ;;  %1087 = vst.msk [vmem:[#allocation2 + $0x280] sm:$0xff] %vm1005_vm1, %v956_v3 }
  0x5c   : > { %v234_v54 = vld [vmem:[%s11738_s17 + $0x1f0] sm:$0xff]  ;;  %v235_v55 = vld [vmem:[%s11738_s17 + $0x1f8] sm:$0xff]  ;;  %v599_v57 = vrot.slane %v233_v51, 7  ;;  %v1271_v1 = vld [vmem:[#allocation2 + $0x1a1] ss:$2 sm:$0xff] }
  0x5d   : > { %9922 = vrot.lane.b32.xlu0 %v9921_v6, %s11684_s21  ;;  %v228_v6 = vld [vmem:[%s11738_s17 + $0x1c0] sm:$0xff]  ;;  %v603_v62 = vrot.slane %v235_v55, 7  ;;  %v1775_v11 = vld [vmem:[#allocation2 + $0x151] ss:$2 sm:$0xff]  ;;  %v241_v14 = vld [vmem:[%s11738_s17 + $0x228] sm:$0xff] }
  0x5e   : > { %9927 = vrot.lane.b32.xlu1 %v9926_v5, %s11685_s22  ;;  %v583_v5 = vsel %vm492_vm0, %v580_v59, %v582_v60  ;;  %v346_v15 = vrot.slane %v228_v6, 1  ;;  %v591_v17 = vrot.slane %v228_v6, 7  ;;  %v10001_v59 = vpack.i.bf16 %v1711_v50, %v1709_v49  ;;  %v1331_v63 = vld [vmem:[#allocation2 + $0x152] ss:$2 sm:$0xff]  ;;  %v1393_v27 = vld [vmem:[#allocation2 + $0x143] ss:$2 sm:$0xff] }
  0x5f   : > { %1075 = vst.msk [vmem:[#allocation2 + $0x220] sm:$0xff] %vm1005_vm1, %v583_v5  ;;  %v600_v2 = vsel %vm492_vm0, %v598_v56, %v599_v57  ;;  %v1833_v4 = vld [vmem:[#allocation2 + $0xf2] ss:$2 sm:$0xff]  ;;  %v1835_v5 = vld [vmem:[#allocation2 + $0x102] ss:$2 sm:$0xff] }
  0x60   : > { %v593_v28 = vsel %vm492_vm0, %v591_v17, %v592_v18  ;;  %v955_v30 = vsel %vm492_vm0, %v346_v15, %v591_v17  ;;  %1088 = vst.msk [vmem:[#allocation2 + $0x288] sm:$0xff] %vm1005_vm1, %v600_v2  ;;  %v10026_v15 = vpack.i.bf16 %v1835_v5, %v1833_v4  ;;  %v242_v16 = vld [vmem:[%s11738_s17 + $0x230] sm:$0xff]  ;;  %v243_v17 = vld [vmem:[%s11738_s17 + $0x238] sm:$0xff]  ;;  %v237_v38 = vld [vmem:[%s11738_s17 + $0x208] sm:$0xff] }
  0x61   : > { %9932 = vrot.lane.b32.xlu0 %v9931_v21, %s11692_s29  ;;  %v9971_v21 = vpack.i.bf16 %v2087_v13, %v2085_v12  ;;  %1082 = vst.msk [vmem:[#allocation2 + $0x258] sm:$0xff] %vm1005_vm1, %v955_v30  ;;  %1083 = vst.msk [vmem:[#allocation2 + $0x260] sm:$0xff] %vm1005_vm1, %v593_v28  ;;  %v892_v12 = vrot.slane %v235_v55, 5  ;;  %v240_v13 = vld [vmem:[%s11738_s17 + $0x220] sm:$0xff]  ;;  %v615_v23 = vrot.slane %v242_v16, 7  ;;  %v617_v24 = vrot.slane %v243_v17, 7 }
  0x62   : > { %9937 = vrot.lane.b32.xlu1 %v9936_v20, %s11693_s30  ;;  %v9976_v20 = vpack.i.bf16 %v2147_v10, %v2145_v9  ;;  %v10011_v10 = vpack.i.bf16 %v1271_v1, %v1269_v0  ;;  %v349_v18 = vrot.slane %v240_v13, 1  ;;  %v612_v19 = vrot.slane %v240_v13, 7  ;;  %v1395_v28 = vld [vmem:[#allocation2 + $0x153] ss:$2 sm:$0xff]  ;;  %v1333_v36 = vld [vmem:[#allocation2 + $0x192] ss:$2 sm:$0xff] }
  0x63   : > { %v988_v22 = vsel %vm492_vm0, %v603_v62, %v892_v12  ;;  %v894_v25 = vrot.slane %v243_v17, 5  ;;  %v1335_v37 = vld [vmem:[#allocation2 + $0x1a2] ss:$2 sm:$0xff]  ;;  %v239_v40 = vld [vmem:[%s11738_s17 + $0x218] sm:$0xff]  ;;  %v1901_v5 = vld [vmem:[#allocation2 + $0x143] ss:$2 sm:$0xff] }
  0x64   : > { %1091 = vst.msk [vmem:[#allocation2 + $0x2a0] sm:$0x3] %vm1010_vm2, %v988_v22  ;;  %v958_v30 = vsel %vm492_vm0, %v349_v18, %v612_v19  ;;  %v238_v39 = vld [vmem:[%s11738_s17 + $0x210] sm:$0xff]  ;;  %v610_v50 = vrot.slane %v239_v40, 7  ;;  %v244_v51 = vld [vmem:[%s11738_s17 + $0x240] sm:$0xff]  ;;  %v893_v13 = vrot.slane %v239_v40, 5 }
  0x65   : > { %9942 = vrot.lane.b32.xlu0 %v9941_v42, %s11685_s22  ;;  %v11542_v42 = vld [vmem:[%s16000_s1 + $0x10] sm:$0xff]   ;;  %1097 = vst.msk [vmem:[#allocation2 + $0x2d0] sm:$0xff] %vm1005_vm1, %v958_v30  ;;  %v608_v49 = vrot.slane %v238_v39, 7  ;;  %v1459_v0 = vld [vmem:[#allocation2 + $0x178] ss:$2 sm:$0xff]  ;;  %v619_v1 = vrot.slane %v244_v51, 7 }
  0x66   : > { %9947 = vrot.lane.b32.xlu1 %v9946_v41, %s11686_s23  ;;  %v985_v41 = vsel %vm492_vm0, %v582_v60, %v889_v33  ;;  %9678 = vmatprep.subr.bf16.mxu0 %v11542_v42  ;;  %v1329_v60 = vld [vmem:[#allocation2 + $0x142] ss:$2 sm:$0xff]  ;;  %v618_v33 = vsel %vm492_vm0, %v615_v23, %v617_v24  ;;  %v1839_v48 = vld [vmem:[#allocation2 + $0x152] ss:$2 sm:$0xff]  ;;  %v989_v16 = vsel %vm492_vm0, %v610_v50, %v893_v13  ;;  %v1521_v17 = vld [vmem:[#allocation2 + $0x169] ss:$2 sm:$0xff] }
  0x67   : > { %1076 = vst.msk [vmem:[#allocation2 + $0x228] sm:$0x3] %vm1010_vm2, %v985_v41  ;;  %9679 = vmatpush3.bf16.msra.mxu0 %v11542_v42  ;;  %v10016_v9 = vpack.i.bf16 %v1331_v63, %v1329_v60  ;;  %v1897_v42 = vld [vmem:[#allocation2 + $0xf3] ss:$2 sm:$0xff]  ;;  %v1457_v63 = vld [vmem:[#allocation2 + $0x168] ss:$2 sm:$0xff] }
  0x68   : > { %9680 = vmatprep.subr.bf16.mxu0 %v11543_v43  ;;  %1100 = vst.msk [vmem:[#allocation2 + $0x2e8] sm:$0xff] %vm1005_vm1, %v618_v33  ;;  %v246_v60 = vld [vmem:[%s11738_s17 + $0x250] sm:$0xff]  ;;  %v1961_v3 = vld [vmem:[#allocation2 + $0x118] ss:$2 sm:$0xff]  ;;  %v1523_v18 = vld [vmem:[#allocation2 + $0x179] ss:$2 sm:$0xff] }
  0x69   : > { %9952 = vrot.lane.b32.xlu0 %v9951_v61, %s11693_s30  ;;  %v601_v61 = vrot.slane %v234_v54, 7  ;;  %v1397_v54 = vld [vmem:[#allocation2 + $0x193] ss:$2 sm:$0xff]  ;;  %v1963_v4 = vld [vmem:[#allocation2 + $0x128] ss:$2 sm:$0xff] }
  0x6a   : > { %9957 = vrot.lane.b32.xlu1 %v9956_v58, %s11694_s4  ;;  %v10006_v58 = vpack.i.bf16 %v1771_v47, %v1769_v46  ;;  %v1837_v46 = vld [vmem:[#allocation2 + $0x142] ss:$2 sm:$0xff]  ;;  %v606_v47 = vrot.slane %v237_v38, 7  ;;  %1096 = vst.msk [vmem:[#allocation2 + $0x2c8] sm:$0x3] %vm1010_vm2, %v989_v16 }
  0x6b   : > { %9681 = vmatpush3.bf16.msra.mxu0 %v11543_v43  ;;  %v602_v6 = vsel %vm492_vm0, %v599_v57, %v601_v61  ;;  %v10036_v43 = vpack.i.bf16 %v1395_v28, %v1393_v27  ;;  %v10041_v57 = vpack.i.bf16 %v1839_v48, %v1837_v46  ;;  %v1463_v22 = vld [vmem:[#allocation2 + $0x1c8] ss:$2 sm:$0xff]  ;;  %v10076_v27 = vpack.i.bf16 %v1523_v18, %v1521_v17  ;;  %v2031_v48 = vld [vmem:[#allocation2 + $0x179] ss:$2 sm:$0xff] }
  0x6c   : > { %9682 = vmatprep.subr.bf16.mxu0 %v11544_v53  ;;  %1089 = vst.msk [vmem:[#allocation2 + $0x290] sm:$0xff] %vm1005_vm1, %v602_v6  ;;  %v609_v55 = vsel %vm492_vm0, %v606_v47, %v608_v49  ;;  %v1903_v6 = vld [vmem:[#allocation2 + $0x153] ss:$2 sm:$0xff]  ;;  %v1587_v40 = vld [vmem:[#allocation2 + $0x17a] ss:$2 sm:$0xff] }
  0x6d   : > { %9962 = vrot.lane.b32.xlu0 %v9961_v8, %s11686_s23  ;;  %v604_v8 = vsel %vm492_vm0, %v601_v61, %v603_v62  ;;  %1094 = vst.msk [vmem:[#allocation2 + $0x2b8] sm:$0xff] %vm1005_vm1, %v609_v55  ;;  %v247_v61 = vld [vmem:[%s11738_s17 + $0x258] sm:$0xff]  ;;  %v350_v62 = vrot.slane %v244_v51, 1  ;;  %v1715_v13 = vld [vmem:[#allocation2 + $0x1a0] ss:$2 sm:$0xff] }
  0x6e   : > { %9967 = vrot.lane.b32.xlu1 %v9966_v7, %s11687_s24  ;;  %v1773_v7 = vld [vmem:[#allocation2 + $0x141] ss:$2 sm:$0xff]  ;;  %1090 = vst.msk [vmem:[#allocation2 + $0x298] sm:$0xff] %vm1005_vm1, %v604_v8  ;;  %v622_v8 = vrot.slane %v246_v60, 7  ;;  %v895_v30 = vrot.slane %v247_v61, 5 }
  0x6f   : > { %9683 = vmatpush3.bf16.msra.mxu0 %v11544_v53  ;;  %v10021_v26 = vpack.i.bf16 %v1775_v11, %v1773_v7  ;;  %v245_v53 = vld [vmem:[%s11738_s17 + $0x248] sm:$0xff]  ;;  %v959_v12 = vsel %vm492_vm0, %v350_v62, %v619_v1  ;;  %v256_v17 = vld [vmem:[%s11738_s17 + $0x2a0] sm:$0xff] }
  0x70   : > { %v620_v2 = vrot.slane %v245_v53, 7  ;;  %1102 = vst.msk [vmem:[#allocation2 + $0x2f8] sm:$0xff] %vm1005_vm1, %v959_v12  ;;  %v1649_v51 = vld [vmem:[#allocation2 + $0x16b] ss:$2 sm:$0xff]  ;;  %v1589_v53 = vld [vmem:[#allocation2 + $0x1ba] ss:$2 sm:$0xff] }
  0x71   : > { %9972 = vrot.lane.b32.xlu0 %v9971_v21, %s11694_s4  ;;  %v236_v21 = vld [vmem:[%s11738_s17 + $0x200] sm:$0xff]  ;;  %v1713_v12 = vld [vmem:[#allocation2 + $0x190] ss:$2 sm:$0xff]  ;;  %v257_v18 = vld [vmem:[%s11738_s17 + $0x2a8] sm:$0xff] }
  0x72   : > { %9977 = vrot.lane.b32.xlu1 %v9976_v20, %s11695_s7  ;;  %v613_v20 = vrot.slane %v241_v14, 7  ;;  %v348_v31 = vrot.slane %v236_v21, 1  ;;  %v621_v7 = vsel %vm492_vm0, %v619_v1, %v620_v2  ;;  %v623_v14 = vsel %vm492_vm0, %v620_v2, %v622_v8  ;;  %v2153_v1 = vld [vmem:[#allocation2 + $0x11b] ss:$2 sm:$0xff]  ;;  %v2155_v2 = vld [vmem:[#allocation2 + $0x12b] ss:$2 sm:$0xff] }
  0x73   : > { %1103 = vst.msk [vmem:[#allocation2 + $0x300] sm:$0xff] %vm1005_vm1, %v621_v7  ;;  %1104 = vst.msk [vmem:[#allocation2 + $0x308] sm:$0xff] %vm1005_vm1, %v623_v14  ;;  %v1653_v16 = vld [vmem:[#allocation2 + $0x1bb] ss:$2 sm:$0xff] }
  0x74   : > { %v614_v29 = vsel %vm492_vm0, %v612_v19, %v613_v20  ;;  %v616_v32 = vsel %vm492_vm0, %v613_v20, %v615_v23  ;;  %v10066_v19 = vpack.i.bf16 %v1963_v4, %v1961_v3  ;;  %v10061_v20 = vpack.i.bf16 %v1903_v6, %v1901_v5  ;;  %v2093_v3 = vld [vmem:[#allocation2 + $0x16a] ss:$2 sm:$0xff] }
  0x75   : > { %9982 = vrot.lane.b32.xlu0 %v9981_v35, %s11687_s24  ;;  %1098 = vst.msk [vmem:[#allocation2 + $0x2d8] sm:$0xff] %vm1005_vm1, %v614_v29  ;;  %v605_v35 = vrot.slane %v236_v21, 7  ;;  %1099 = vst.msk [vmem:[#allocation2 + $0x2e0] sm:$0xff] %vm1005_vm1, %v616_v32  ;;  %v1461_v21 = vld [vmem:[#allocation2 + $0x1b8] ss:$2 sm:$0xff] }
  0x76   : > { %9987 = vrot.lane.b32.xlu1 %v9986_v34, %s11688_s25  ;;  %v990_v34 = vsel %vm492_vm0, %v617_v24, %v894_v25  ;;  %v2025_v25 = vld [vmem:[#allocation2 + $0x119] ss:$2 sm:$0xff]  ;;  %v10071_v28 = vpack.i.bf16 %v1463_v22, %v1461_v21  ;;  %v1965_v29 = vld [vmem:[#allocation2 + $0x168] ss:$2 sm:$0xff] }
  0x77   : > { %1101 = vst.msk [vmem:[#allocation2 + $0x2f0] sm:$0x3] %vm1010_vm2, %v990_v34  ;;  %v957_v41 = vsel %vm492_vm0, %v348_v31, %v605_v35  ;;  %v607_v52 = vsel %vm492_vm0, %v605_v35, %v606_v47  ;;  %v1967_v31 = vld [vmem:[#allocation2 + $0x178] ss:$2 sm:$0xff]  ;;  %v1655_v21 = vld [vmem:[#allocation2 + $0x1cb] ss:$2 sm:$0xff] }
  0x78   : > { %1092 = vst.msk [vmem:[#allocation2 + $0x2a8] sm:$0xff] %vm1005_vm1, %v957_v41  ;;  %1093 = vst.msk [vmem:[#allocation2 + $0x2b0] sm:$0xff] %vm1005_vm1, %v607_v52  ;;  %v1585_v35 = vld [vmem:[#allocation2 + $0x16a] ss:$2 sm:$0xff]  ;;  %v10081_v39 = vpack.i.bf16 %v1967_v31, %v1965_v29  ;;  %v1651_v52 = vld [vmem:[#allocation2 + $0x17b] ss:$2 sm:$0xff] }
  0x79   : > { %9992 = vrot.lane.b32.xlu0 %v9991_v45, %s11695_s7  ;;  %v1899_v45 = vld [vmem:[#allocation2 + $0x103] ss:$2 sm:$0xff]  ;;  %v10096_v46 = vpack.i.bf16 %v1587_v40, %v1585_v35  ;;  %v10116_v4 = vpack.i.bf16 %v1651_v52, %v1649_v51  ;;  %v640_v35 = vrot.slane %v256_v17, 7 }
  0x7a   : > { %9997 = vrot.lane.b32.xlu1 %v9996_v44, %s11682_s19  ;;  %v10031_v44 = vpack.i.bf16 %v1335_v37, %v1333_v36  ;;  %v10046_v56 = vpack.i.bf16 %v1899_v45, %v1897_v42  ;;  %v1525_v36 = vld [vmem:[#allocation2 + $0x1b9] ss:$2 sm:$0xff]  ;;  %v1527_v37 = vld [vmem:[#allocation2 + $0x1c9] ss:$2 sm:$0xff] }
  0x7b   : > { %v2029_v45 = vld [vmem:[#allocation2 + $0x169] ss:$2 sm:$0xff]  ;;  %v10091_v47 = vpack.i.bf16 %v1527_v37, %v1525_v36  ;;  %v10136_v36 = vpack.i.bf16 %v1715_v13, %v1713_v12 }
  0x7c   : > { %v1273_v37 = vld [vmem:[#allocation2 + $0x1e1] ss:$2 sm:$0xff] }
  0x7d   : > { %10002 = vrot.lane.b32.xlu0 %v10001_v59, %s11688_s25  ;;  %v611_v59 = vsel %vm492_vm0, %v608_v49, %v610_v50  ;;  %v2159_v40 = vld [vmem:[#allocation2 + $0x17b] ss:$2 sm:$0xff] }
  0x7e   : > { %10007 = vrot.lane.b32.xlu1 %v10006_v58, %s11689_s26  ;;  %v1399_v58 = vld [vmem:[#allocation2 + $0x1a3] ss:$2 sm:$0xff]  ;;  %1095 = vst.msk [vmem:[#allocation2 + $0x2c0] sm:$0xff] %vm1005_vm1, %v611_v59 }
  0x7f   : > { %v10051_v11 = vpack.i.bf16 %v1399_v58, %v1397_v54  ;;  %v248_v54 = vld [vmem:[%s11738_s17 + $0x260] sm:$0xff]  ;;  %v249_v58 = vld [vmem:[%s11738_s17 + $0x268] sm:$0xff]  ;;  %v250_v59 = vld [vmem:[%s11738_s17 + $0x270] sm:$0xff] }
  0x80   : > { %v351_v60 = vrot.slane %v248_v54, 1  ;;  %v627_v6 = vrot.slane %v249_v58, 7  ;;  %v629_v7 = vrot.slane %v250_v59, 7 }
  0x81   : > { %10012 = vrot.lane.b32.xlu0 %v10011_v10, %s11682_s19  ;;  %v10056_v10 = vpack.i.bf16 %v1459_v0, %v1457_v63 }
  0x82   : > { %10017 = vrot.lane.b32.xlu1 %v10016_v9, %s11681_s18  ;;  %v624_v9 = vrot.slane %v247_v61, 7  ;;  %v626_v61 = vrot.slane %v248_v54, 7 }
  0x84   : > { %v991_v34 = vsel %vm492_vm0, %v624_v9, %v895_v30  ;;  %v960_v0 = vsel %vm492_vm0, %v351_v60, %v626_v61  ;;  %v628_v14 = vsel %vm492_vm0, %v626_v61, %v627_v6  ;;  %v1717_v60 = vld [vmem:[#allocation2 + $0x1e0] ss:$2 sm:$0xff]  ;;  %v1719_v61 = vld [vmem:[#allocation2 + $0x1f0] ss:$2 sm:$0xff] }
  0x85   : > { %10022 = vrot.lane.b32.xlu0 %v10021_v26, %s11689_s26  ;;  %v2027_v26 = vld [vmem:[#allocation2 + $0x129] ss:$2 sm:$0xff]  ;;  %1106 = vst.msk [vmem:[#allocation2 + $0x318] sm:$0x3] %vm1010_vm2, %v991_v34  ;;  %v353_v34 = vrot.slane %v256_v17, 1 }
  0x86   : > { %10027 = vrot.lane.b32.xlu1 %v10026_v15, %s11690_s27  ;;  %v625_v15 = vsel %vm492_vm0, %v622_v8, %v624_v9  ;;  %v10086_v38 = vpack.i.bf16 %v2027_v26, %v2025_v25  ;;  %1107 = vst.msk [vmem:[#allocation2 + $0x320] sm:$0xff] %vm1005_vm1, %v960_v0  ;;  %v2095_v8 = vld [vmem:[#allocation2 + $0x17a] ss:$2 sm:$0xff]  ;;  %1108 = vst.msk [vmem:[#allocation2 + $0x328] sm:$0xff] %vm1005_vm1, %v628_v14  ;;  %v258_v26 = vld [vmem:[%s11738_s17 + $0x2b0] sm:$0xff] }
  0x87   : > { %1105 = vst.msk [vmem:[#allocation2 + $0x310] sm:$0xff] %vm1005_vm1, %v625_v15  ;;  %v251_v9 = vld [vmem:[%s11738_s17 + $0x278] sm:$0xff]  ;;  %v630_v15 = vsel %vm492_vm0, %v627_v6, %v629_v7  ;;  %v962_v54 = vsel %vm492_vm0, %v353_v34, %v640_v35  ;;  %v1781_v17 = vld [vmem:[#allocation2 + $0x1e1] ss:$2 sm:$0xff] }
  0x88   : > { %1109 = vst.msk [vmem:[#allocation2 + $0x330] sm:$0xff] %vm1005_vm1, %v630_v15  ;;  %v631_v22 = vrot.slane %v251_v9, 7  ;;  %v896_v25 = vrot.slane %v251_v9, 5  ;;  %1117 = vst.msk [vmem:[#allocation2 + $0x370] sm:$0xff] %vm1005_vm1, %v962_v54  ;;  %v1841_v15 = vld [vmem:[#allocation2 + $0x192] ss:$2 sm:$0xff] }
  0x89   : > { %10032 = vrot.lane.b32.xlu0 %v10031_v44, %s11681_s18  ;;  %v2091_v44 = vld [vmem:[#allocation2 + $0x12a] ss:$2 sm:$0xff] }
  0x8a   : > { %10037 = vrot.lane.b32.xlu1 %v10036_v43, %s11683_s20  ;;  %v2089_v43 = vld [vmem:[#allocation2 + $0x11a] ss:$2 sm:$0xff]  ;;  %v632_v30 = vsel %vm492_vm0, %v629_v7, %v631_v22  ;;  %v992_v31 = vsel %vm492_vm0, %v631_v22, %v896_v25  ;;  %v10151_v7 = vpack.i.bf16 %v1719_v61, %v1717_v60  ;;  %v12191_v22 = vld [vmem:[#allocation2 + $0x193] ss:$2 sm:$0xff]  ;;  %v12193_v25 = vld [vmem:[#allocation2 + $0x1a3] ss:$2 sm:$0xff] }
  0x8b   : > { %v10106_v55 = vpack.i.bf16 %v2091_v44, %v2089_v43  ;;  %1110 = vst.msk [vmem:[#allocation2 + $0x338] sm:$0xff] %vm1005_vm1, %v632_v30  ;;  %v10131_v43 = vpack.i.bf16 %v1655_v21, %v1653_v16  ;;  %v641_v44 = vrot.slane %v257_v18, 7  ;;  %v1843_v16 = vld [vmem:[#allocation2 + $0x1a2] ss:$2 sm:$0xff]  ;;  %v1783_v18 = vld [vmem:[#allocation2 + $0x1f1] ss:$2 sm:$0xff] }
  0x8c   : > { %1111 = vst.msk [vmem:[#allocation2 + $0x340] sm:$0x3] %vm1010_vm2, %v992_v31  ;;  %v12199_v30 = vld [vmem:[#allocation2 + $0x1e3] ss:$2 sm:$0xff]  ;;  %v12201_v31 = vld [vmem:[#allocation2 + $0x1f3] ss:$2 sm:$0xff] }
  0x8d   : > { %10042 = vrot.lane.b32.xlu0 %v10041_v57, %s11690_s27  ;;  %v1591_v57 = vld [vmem:[#allocation2 + $0x1ca] ss:$2 sm:$0xff]  ;;  %v642_v51 = vsel %vm492_vm0, %v640_v35, %v641_v44  ;;  %v12241_v60 = vld [vmem:[#allocation2 + $0x1b9] ss:$2 sm:$0xff]  ;;  %v12243_v61 = vld [vmem:[#allocation2 + $0x1c9] ss:$2 sm:$0xff] }
  0x8e   : > { %10047 = vrot.lane.b32.xlu1 %v10046_v56, %s11691_s28  ;;  %v10101_v56 = vpack.i.bf16 %v2031_v48, %v2029_v45  ;;  %v10111_v5 = vpack.i.bf16 %v1591_v57, %v1589_v53  ;;  %v643_v45 = vrot.slane %v258_v26, 7  ;;  %1118 = vst.msk [vmem:[#allocation2 + $0x378] sm:$0xff] %vm1005_vm1, %v642_v51  ;;  %v12195_v26 = vld [vmem:[#allocation2 + $0x1b8] ss:$2 sm:$0xff]  ;;  %v12225_v51 = vld [vmem:[#allocation2 + $0x243] ss:$2 sm:$0xff] }
  0x8f   : > { %v12203_v34 = vld [vmem:[#allocation2 + $0x232] ss:$2 sm:$0xff]  ;;  %v12205_v35 = vld [vmem:[#allocation2 + $0x242] ss:$2 sm:$0xff] }
  0x90   : > { %v644_v52 = vsel %vm492_vm0, %v641_v44, %v643_v45  ;;  %v12219_v44 = vld [vmem:[#allocation2 + $0x208] ss:$2 sm:$0xff] }
  0x91   : > { %10052 = vrot.lane.b32.xlu0 %v10051_v11, %s11683_s20  ;;  %1119 = vst.msk [vmem:[#allocation2 + $0x380] sm:$0xff] %vm1005_vm1, %v644_v52  ;;  %v12227_v52 = vld [vmem:[#allocation2 + $0x1e3] ss:$2 sm:$0xff] }
  0x92   : > { %10057 = vrot.lane.b32.xlu1 %v10056_v10, %s11684_s21 }
  0x93   : > { %v12096_v24 = vpop.permute.xlu0 %9772 }
  0x94   : > { %v12094_v23 = vpop.permute.xlu1 %9782 }
  0x95   : > { %10062 = vrot.lane.b32.xlu0 %v10061_v20, %s11691_s28  ;;  %v10121_v20 = vpack.i.bf16 %v2095_v8, %v2093_v3  ;;  %v1337_v3 = vld [vmem:[#allocation2 + $0x1e2] ss:$2 sm:$0xff]  ;;  %v1279_v8 = vld [vmem:[#allocation2 + $0x241] ss:$2 sm:$0xff] }
  0x96   : > { %10067 = vrot.lane.b32.xlu1 %v10066_v19, %s11692_s29  ;;  %v10126_v19 = vpack.i.bf16 %v2155_v2, %v2153_v1 }
  0x97   : > { %v12102_v33 = vpop.permute.xlu0 %9777 }
  0x98   : > { %v12100_v32 = vpop.permute.xlu1 %9787 }
  0x99   : > { %10072 = vrot.lane.b32.xlu0 %v10071_v28, %s11684_s21 }
  0x9a   : > { %10077 = vrot.lane.b32.xlu1 %v10076_v27, %s11685_s22  ;;  %v259_v27 = vld [vmem:[%s11738_s17 + $0x2b8] sm:$0xff] }
  0x9b   : > { %v12110_v42 = vpop.permute.xlu0 %9792  ;;  %v898_v59 = vrot.slane %v259_v27, 5 }
  0x9c   : > { %v12108_v41 = vpop.permute.xlu1 %9797 }
  0x9d   : > { %10082 = vrot.lane.b32.xlu0 %v10081_v39, %s11692_s29  ;;  %v2157_v39 = vld [vmem:[#allocation2 + $0x16b] ss:$2 sm:$0xff] }
  0x9e   : > { %10087 = vrot.lane.b32.xlu1 %v10086_v38, %s11693_s30  ;;  %v1275_v38 = vld [vmem:[#allocation2 + $0x1f1] ss:$2 sm:$0xff]  ;;  %v10141_v58 = vpack.i.bf16 %v2159_v40, %v2157_v39  ;;  %v10171_v39 = vpack.i.bf16 %v1783_v18, %v1781_v17  ;;  %v12215_v40 = vld [vmem:[#allocation2 + $0x1e2] ss:$2 sm:$0xff]  ;;  %v10186_v17 = vpack.i.bf16 %v12201_v31, %v12199_v30  ;;  %v10181_v18 = vpack.i.bf16 %v12205_v35, %v12203_v34 }
  0x9f   : > { %v12116_v50 = vpop.permute.xlu0 %9802  ;;  %v10146_v57 = vpack.i.bf16 %v1275_v38, %v1273_v37  ;;  %v12211_v37 = vld [vmem:[%s11738_s17 + $0x290] sm:$0xff]  ;;  %v10176_v38 = vpack.i.bf16 %v1843_v16, %v1841_v15  ;;  %v12263_v15 = vld [vmem:[%s11738_s17 + $0x298] sm:$0xff]  ;;  %v12267_v16 = vld [vmem:[%s11738_s17 + $0x2c0] sm:$0xff] }
  0xa0   : > { %v12114_v49 = vpop.permute.xlu1 %9807  ;;  %v12308_v31 = vld [vmem:[#allocation2 + $0x25a] ss:$2 sm:$0xff]  ;;  %v12310_v34 = vld [vmem:[#allocation2 + $0x26a] ss:$2 sm:$0xff]  ;;  %v12312_v35 = vld [vmem:[#allocation2 + $0x25b] ss:$2 sm:$0xff] }
  0xa1   : > { %10092 = vrot.lane.b32.xlu0 %v10091_v47, %s11685_s22  ;;  %16127 = vst [vmem:[#allocation26_spill] sm:$0xff] %v12312_v35 }
  0xa2   : > { %10097 = vrot.lane.b32.xlu1 %v10096_v46, %s11686_s23  ;;  %v645_v46 = vrot.slane %v259_v27, 7  ;;  %v12197_v27 = vld [vmem:[#allocation2 + $0x1c8] ss:$2 sm:$0xff] }
  0xa3   : > { %v12125_v63 = vpop.permute.xlu0 %9812 }
  0xa4   : > { %v12123_v62 = vpop.permute.xlu1 %9817  ;;  %v646_v53 = vsel %vm492_vm0, %v643_v45, %v645_v46  ;;  %v994_v2 = vsel %vm492_vm0, %v645_v46, %v898_v59  ;;  %v12221_v45 = vld [vmem:[#allocation2 + $0x218] ss:$2 sm:$0xff]  ;;  %v12223_v46 = vld [vmem:[#allocation2 + $0x233] ss:$2 sm:$0xff] }
  0xa5   : > { %10102 = vrot.lane.b32.xlu0 %v10101_v56, %s11693_s30  ;;  %v1779_v56 = vld [vmem:[#allocation2 + $0x1a1] ss:$2 sm:$0xff]  ;;  %1120 = vst.msk [vmem:[#allocation2 + $0x388] sm:$0xff] %vm1005_vm1, %v646_v53 }
  0xa6   : > { %10107 = vrot.lane.b32.xlu1 %v10106_v55, %s11694_s4  ;;  %v1777_v55 = vld [vmem:[#allocation2 + $0x191] ss:$2 sm:$0xff]  ;;  %1121 = vst.msk [vmem:[#allocation2 + $0x390] sm:$0x3] %vm1010_vm2, %v994_v2  ;;  %v12245_v2 = vld [vmem:[#allocation2 + $0x208] ss:$2 sm:$0xff] }
  0xa7   : > { %v12134_v11 = vpop.permute.xlu0 %9822  ;;  %v10156_v6 = vpack.i.bf16 %v1779_v56, %v1777_v55  ;;  %v12229_v53 = vld [vmem:[#allocation2 + $0x1f3] ss:$2 sm:$0xff] }
  0xa8   : > { %v12132_v10 = vpop.permute.xlu1 %9827  ;;  %v12239_v59 = vld [vmem:[#allocation2 + $0x219] ss:$2 sm:$0xff] }
  0xa9   : > { %10112 = vrot.lane.b32.xlu0 %v10111_v5, %s11686_s23  ;;  %v1277_v5 = vld [vmem:[#allocation2 + $0x231] ss:$2 sm:$0xff] }
  0xaa   : > { %10117 = vrot.lane.b32.xlu1 %v10116_v4, %s11687_s24  ;;  %v1339_v4 = vld [vmem:[#allocation2 + $0x1f2] ss:$2 sm:$0xff]  ;;  %v10161_v14 = vpack.i.bf16 %v1279_v8, %v1277_v5 }
  0xab   : > { %v12148_v29 = vpop.permute.xlu0 %9832  ;;  %v10166_v13 = vpack.i.bf16 %v1339_v4, %v1337_v3  ;;  %v12247_v3 = vld [vmem:[#allocation2 + $0x218] ss:$2 sm:$0xff] }
  0xac   : > { %v12146_v28 = vpop.permute.xlu1 %9837  ;;  %16108 = vst [vmem:[#allocation7_spill] sm:$0xff] %v12148_v29  ;;  %v12249_v4 = vld [vmem:[#allocation2 + $0x1ba] ss:$2 sm:$0xff]  ;;  %v12251_v5 = vld [vmem:[#allocation2 + $0x1ca] ss:$2 sm:$0xff] }
  0xad   : > { %10122 = vrot.lane.b32.xlu0 %v10121_v20, %s11694_s4  ;;  %16119 = vst [vmem:[#allocation18_spill] sm:$0xff] %v12249_v4  ;;  %16120 = vst [vmem:[#allocation19_spill] sm:$0xff] %v12251_v5  ;;  %v12279_v8 = vld [vmem:[#allocation2 + $0x230] ss:$2 sm:$0xff]  ;;  %v9775_v4 = vunpack.i.h.bf16 %v12096_v24  ;;  %v9774_v5 = vunpack.i.l.bf16 %v12096_v24 }
  0xae   : > { %10127 = vrot.lane.b32.xlu1 %v10126_v19, %s11695_s7  ;;  %v12185_v19 = vld [vmem:[%s11738_s17 + $0x280] sm:$0xff]  ;;  %16123 = vst [vmem:[#allocation22_spill] sm:$0xff] %v12279_v8  ;;  %v12366_v8 = vld [vmem:[#allocation2 + $0x20b] ss:$2 sm:$0xff] }
  0xaf   : > { %v12158_v48 = vpop.permute.xlu0 %9842  ;;  %v352_v54 = vrot.slane %v12185_v19, 1  ;;  %v633_v55 = vrot.slane %v12185_v19, 7  ;;  %v12275_v19 = vld [vmem:[#allocation2 + $0x1bb] ss:$2 sm:$0xff]  ;;  %v12328_v29 = vld [vmem:[#allocation2 + $0x21a] ss:$2 sm:$0xff] }
  0xb0   : > { %v12156_v47 = vpop.permute.xlu1 %9847  ;;  %16110 = vst [vmem:[#allocation9_spill] sm:$0xff] %v12158_v48  ;;  %v12326_v48 = vld [vmem:[#allocation2 + $0x20a] ss:$2 sm:$0xff] }
  0xb1   : > { %16109 = vst [vmem:[#allocation8_spill] sm:$0xff] %v12156_v47  ;;  %10132 = vrot.lane.b32.xlu0 %v10131_v43, %s11687_s24  ;;  %v12217_v43 = vld [vmem:[#allocation2 + $0x1f2] ss:$2 sm:$0xff]  ;;  %v10246_v24 = vpack.i.bf16 %v12328_v29, %v12326_v48 }
  0xb2   : > { %10137 = vrot.lane.b32.xlu1 %v10136_v36, %s11688_s25  ;;  %v12208_v36 = vld [vmem:[%s11738_s17 + $0x288] sm:$0xff] }
  0xb3   : > { %v12172_v1 = vpop.permute.xlu0 %9852 }
  0xb4   : > { %v12170_v0 = vpop.permute.xlu1 %9857  ;;  %16112 = vst [vmem:[#allocation11_spill] sm:$0xff] %v12172_v1  ;;  %v16129_v1 = vrot.slane %v12263_v15, 7 }
  0xb5   : > { %16111 = vst [vmem:[#allocation10_spill] sm:$0xff] %v12170_v0  ;;  %10142 = vrot.lane.b32.xlu0 %v10141_v58, %s11695_s7  ;;  %v12237_v58 = vld [vmem:[#allocation2 + $0x209] ss:$2 sm:$0xff]  ;;  %v1185_v0 = vld [vmem:[#allocation2] ss:$2 sm:$0xff] }
  0xb6   : > { %10147 = vrot.lane.b32.xlu1 %v10146_v57, %s11682_s19 }
  0xb7   : > { %v12180_v12 = vpop.permute.xlu0 %9862 }
  0xb8   : > { %v12178_v9 = vpop.permute.xlu1 %9867  ;;  %16114 = vst [vmem:[#allocation13_spill] sm:$0xff] %v12180_v12 }
  0xb9   : > { %16113 = vst [vmem:[#allocation12_spill] sm:$0xff] %v12178_v9  ;;  %10152 = vrot.lane.b32.xlu0 %v10151_v7, %s11688_s25  ;;  %v12281_v7 = vld [vmem:[#allocation2 + $0x240] ss:$2 sm:$0xff]  ;;  %v12314_v9 = vld [vmem:[#allocation2 + $0x26b] ss:$2 sm:$0xff] }
  0xba   : > { %10157 = vrot.lane.b32.xlu1 %v10156_v6, %s11689_s26  ;;  %v961_v6 = vsel %vm492_vm0, %v352_v54, %v633_v55  ;;  %v12277_v54 = vld [vmem:[#allocation2 + $0x1cb] ss:$2 sm:$0xff]  ;;  %16124 = vst [vmem:[#allocation23_spill] sm:$0xff] %v12281_v7  ;;  %16128 = vst [vmem:[#allocation27_spill] sm:$0xff] %v12314_v9  ;;  %v12368_v7 = vld [vmem:[#allocation2 + $0x21b] ss:$2 sm:$0xff]  ;;  %v4128_v9 = vsel %vm1005_vm1, %v1185_v0, %v9774_v5  ;;  %v9800_v0 = vunpack.i.h.bf16 %v12108_v41  ;;  %v9799_v5 = vunpack.i.l.bf16 %v12108_v41 }
  0xbb   : > { %v12189_v21 = vpop.permute.xlu0 %9872  ;;  %1112 = vst.msk [vmem:[#allocation2 + $0x348] sm:$0xff] %vm1005_vm1, %v961_v6  ;;  %v634_v6 = vrot.slane %v12208_v36, 7  ;;  %v12300_v36 = vld [vmem:[#allocation2 + $0x259] ss:$2 sm:$0xff] }
  0xbc   : > { %v12187_v20 = vpop.permute.xlu1 %9877  ;;  %16116 = vst [vmem:[#allocation15_spill] sm:$0xff] %v12189_v21 }
  0xbd   : > { %16115 = vst [vmem:[#allocation14_spill] sm:$0xff] %v12187_v20  ;;  %10162 = vrot.lane.b32.xlu0 %v10161_v14, %s11682_s19  ;;  %v12260_v14 = vld [vmem:[#allocation2 + $0x219] ss:$2 sm:$0xff]  ;;  %v635_v47 = vsel %vm492_vm0, %v633_v55, %v634_v6 }
  0xbe   : > { %10167 = vrot.lane.b32.xlu1 %v10166_v13, %s11681_s18  ;;  %v12258_v13 = vld [vmem:[#allocation2 + $0x209] ss:$2 sm:$0xff]  ;;  %16122 = vst [vmem:[#allocation21_spill] sm:$0xff] %v12260_v14  ;;  %1113 = vst.msk [vmem:[#allocation2 + $0x350] sm:$0xff] %vm1005_vm1, %v635_v47  ;;  %v12336_v20 = vld [vmem:[%s11738_s17 + $0x2d8] sm:$0xff]  ;;  %v647_v47 = vrot.slane %v12267_v16, 7 }
  0xbf   : > { %v12235_v57 = vpop.permute.xlu0 %9882  ;;  %16121 = vst [vmem:[#allocation20_spill] sm:$0xff] %v12258_v13  ;;  %v1189_v13 = vld [vmem:[#allocation2 + $0x50] ss:$2 sm:$0xff]  ;;  %v1191_v14 = vld [vmem:[#allocation2 + $0x60] ss:$2 sm:$0xff] }
  0xc0   : > { %v12233_v56 = vpop.permute.xlu1 %9887  ;;  %16118 = vst [vmem:[#allocation17_spill] sm:$0xff] %v12235_v57  ;;  %v12286_v57 = vld [vmem:[%s11738_s17 + $0x2c8] sm:$0xff] }
  0xc1   : > { %16117 = vst [vmem:[#allocation16_spill] sm:$0xff] %v12233_v56  ;;  %10172 = vrot.lane.b32.xlu0 %v10171_v39, %s11689_s26  ;;  %v12296_v39 = vld [vmem:[#allocation2 + $0x258] ss:$2 sm:$0xff]  ;;  %v12298_v56 = vld [vmem:[#allocation2 + $0x268] ss:$2 sm:$0xff] }
  0xc2   : > { %10177 = vrot.lane.b32.xlu1 %v10176_v38, %s11690_s27  ;;  %v636_v38 = vrot.slane %v12211_v37, 7  ;;  %v12302_v37 = vld [vmem:[#allocation2 + $0x269] ss:$2 sm:$0xff] }
  0xc3   : > { %v12306_v30 = vpop.permute.xlu0 %9892 }
  0xc4   : > { %v12304_v12 = vpop.permute.xlu1 %9897  ;;  %16126 = vst [vmem:[#allocation25_spill] sm:$0xff] %v12306_v30  ;;  %v637_v21 = vsel %vm492_vm0, %v634_v6, %v636_v38  ;;  %v262_v6 = vld [vmem:[%s11738_s17 + $0x2d0] sm:$0xff]  ;;  %v639_v55 = vsel %vm492_vm0, %v636_v38, %v16129_v1 }
  0xc5   : > { %16125 = vst [vmem:[#allocation24_spill] sm:$0xff] %v12304_v12  ;;  %v354_v12 = vrot.slane %v12267_v16, 1  ;;  %1114 = vst.msk [vmem:[#allocation2 + $0x358] sm:$0xff] %vm1005_vm1, %v637_v21  ;;  %v1187_v30 = vld [vmem:[#allocation2 + $0x10] ss:$2 sm:$0xff]  ;;  %10182 = vrot.lane.b32.xlu0 %v10181_v18, %s11681_s18  ;;  %v648_v21 = vrot.slane %v12286_v57, 7 }
  0xc6   : > { %10187 = vrot.lane.b32.xlu1 %v10186_v17, %s11683_s20  ;;  %1115 = vst.msk [vmem:[#allocation2 + $0x360] sm:$0xff] %vm1005_vm1, %v639_v55  ;;  %v9780_v55 = vunpack.i.h.bf16 %v12102_v33  ;;  %v9779_v17 = vunpack.i.l.bf16 %v12102_v33  ;;  %v12374_v57 = vld [vmem:[#allocation2 + $0x21a] ss:$2 sm:$0xff]  ;;  %v9785_v33 = vunpack.i.h.bf16 %v12094_v23  ;;  %v4129_v35 = vsel %vm1005_vm1, %v1187_v30, %v9775_v4 }
  0xc7   : > { %v12356_v16 = vpop.permute.xlu0 %9902  ;;  %v649_v38 = vsel %vm492_vm0, %v647_v47, %v648_v21  ;;  %v963_v18 = vsel %vm492_vm0, %v354_v12, %v647_v47  ;;  %v16132_v12 = vpack.i.bf16 %v12193_v25, %v12191_v22  ;;  %v16133_v47 = vpack.i.bf16 %v12217_v43, %v12215_v40 }
  0xc8   : > { %v12354_v1 = vpop.permute.xlu1 %9907  ;;  %16131 = vst [vmem:[#allocation29_spill] sm:$0xff] %v12356_v16  ;;  %1122 = vst.msk [vmem:[#allocation2 + $0x398] sm:$0xff] %vm1005_vm1, %v963_v18  ;;  %v650_v16 = vrot.slane %v262_v6, 7  ;;  %v652_v18 = vrot.slane %v12336_v20, 7  ;;  %v9790_v22 = vunpack.i.h.bf16 %v12100_v32  ;;  %v9789_v25 = vunpack.i.l.bf16 %v12100_v32 }
  0xc9   : > { %16130 = vst [vmem:[#allocation28_spill] sm:$0xff] %v12354_v1  ;;  %v12372_v1 = vld [vmem:[#allocation2 + $0x20a] ss:$2 sm:$0xff]  ;;  %1123 = vst.msk [vmem:[#allocation2 + $0x3a0] sm:$0xff] %vm1005_vm1, %v649_v38  ;;  %10192 = vrot.lane.b32.xlu0 %v16133_v47, %s11690_s27  ;;  %v9784_v38 = vunpack.i.l.bf16 %v12094_v23  ;;  %v897_v47 = vrot.slane %v12263_v15, 5  ;;  %v4131_v23 = vsel %vm1005_vm1, %v1191_v14, %v9780_v55  ;;  %v4130_v4 = vsel %vm1005_vm1, %v1189_v13, %v9779_v17 }
  0xca   : > { %10197 = vrot.lane.b32.xlu1 %v16132_v12, %s11691_s28  ;;  %v651_v43 = vsel %vm492_vm0, %v648_v21, %v650_v16  ;;  %v653_v6 = vsel %vm492_vm0, %v650_v16, %v652_v18  ;;  %v9794_v32 = vunpack.i.l.bf16 %v12110_v42  ;;  %v16134_v30 = vpack.i.bf16 %v12221_v45, %v12219_v44 }
  0xcb   : > { %v12399_v40 = vpop.permute.xlu0 %9912  ;;  %1124 = vst.msk [vmem:[#allocation2 + $0x3a8] sm:$0xff] %vm1005_vm1, %v651_v43  ;;  %1125 = vst.msk [vmem:[#allocation2 + $0x3b0] sm:$0xff] %vm1005_vm1, %v653_v6  ;;  %v16135_v14 = vpack.i.bf16 %v12225_v51, %v12223_v46  ;;  %v10266_v13 = vpack.i.bf16 %v12368_v7, %v12366_v8  ;;  %v10271_v41 = vpack.i.bf16 %v12374_v57, %v12372_v1  ;;  %v16136_v21 = vrot.slane %v12263_v15, 7 }
  0xcc   : > { %v12397_v12 = vpop.permute.xlu1 %9917  ;;  %v9795_v16 = vunpack.i.h.bf16 %v12110_v42  ;;  %v4161_v44 = vsel %vm16051_vm3, %v4128_v9, %v9784_v38  ;;  %v4162_v45 = vsel %vm16051_vm3, %v4129_v35, %v9785_v33  ;;  %v9809_v55 = vunpack.i.l.bf16 %v12114_v49 }
  0xcd   : > { %10202 = vrot.lane.b32.xlu0 %v16135_v14, %s11683_s20  ;;  %v993_v17 = vsel %vm492_vm0, %v16136_v21, %v897_v47  ;;  %v4163_v46 = vsel %vm16051_vm3, %v4130_v4, %v9789_v25  ;;  %v4164_v51 = vsel %vm16051_vm3, %v4131_v23, %v9790_v22  ;;  %v9810_v43 = vunpack.i.h.bf16 %v12114_v49 }
  0xce   : > { %10207 = vrot.lane.b32.xlu1 %v16134_v30, %s11684_s21  ;;  %1116 = vst.msk [vmem:[#allocation2 + $0x368] sm:$0x3] %vm1010_vm2, %v993_v17  ;;  %v9805_v15 = vunpack.i.h.bf16 %v12116_v50  ;;  %v4196_v9 = vsel %vm16050_vm4, %v4163_v46, %v9799_v5  ;;  %v4197_v35 = vsel %vm16050_vm4, %v4164_v51, %v9800_v0  ;;  %v9804_v33 = vunpack.i.l.bf16 %v12116_v50 }
  0xcf   : > { %v12437_v42 = vpop.permute.xlu0 %9922  ;;  %v9819_v38 = vunpack.i.l.bf16 %v12123_v62  ;;  %v4194_v22 = vsel %vm16050_vm4, %v4161_v44, %v9794_v32  ;;  %v9820_v49 = vunpack.i.h.bf16 %v12123_v62  ;;  %v9814_v25 = vunpack.i.l.bf16 %v12125_v63  ;;  %v16139_v44 = vld [vmem:[#allocation7_spill] sm:$0xff] }
  0xd0   : > { %v12435_v6 = vpop.permute.xlu1 %9927  ;;  %v16137_v47 = vpack.i.bf16 %v12197_v27, %v12195_v26  ;;  %v16138_v23 = vpack.i.bf16 %v12229_v53, %v12227_v52  ;;  %v899_v50 = vrot.slane %v12336_v20, 5  ;;  %v4195_v4 = vsel %vm16050_vm4, %v4162_v45, %v9795_v16 }
  0xd1   : > { %v4229_v0 = vsel %vm4226_vm5, %v4196_v9, %v9809_v55  ;;  %v9815_v62 = vunpack.i.h.bf16 %v12125_v63  ;;  %v9829_v5 = vunpack.i.l.bf16 %v12132_v10  ;;  %v4230_v32 = vsel %vm4226_vm5, %v4197_v35, %v9810_v43  ;;  %v16142_v43 = vld [vmem:[#allocation9_spill] sm:$0xff] }
  0xd2   : > { %10217 = vrot.lane.b32.xlu1 %v16137_v47, %s11692_s29  ;;  %10212 = vrot.lane.b32.xlu0 %v16138_v23, %s11691_s28  ;;  %v4228_v26 = vsel %vm4226_vm5, %v4195_v4, %v9805_v15  ;;  %v9830_v27 = vunpack.i.h.bf16 %v12132_v10  ;;  %v995_v20 = vsel %vm492_vm0, %v652_v18, %v899_v50  ;;  %v4227_v53 = vsel %vm4226_vm5, %v4194_v22, %v9804_v33  ;;  %v16145_v4 = vld [vmem:[#allocation14_spill] sm:$0xff] }
  0xd3   : > { %v12464_v52 = vpop.permute.xlu0 %9932  ;;  %v4262_v14 = vsel %vm16052_vm6, %v4229_v0, %v9819_v38  ;;  %v9825_v63 = vunpack.i.h.bf16 %v12134_v11  ;;  %v9824_v21 = vunpack.i.l.bf16 %v12134_v11  ;;  %1126 = vst.msk [vmem:[#allocation2 + $0x3b8] sm:$0x3] %vm1010_vm2, %v995_v20  ;;  %v4263_v17 = vsel %vm16052_vm6, %v4230_v32, %v9820_v49  ;;  %v16148_v20 = vld [vmem:[#allocation15_spill] sm:$0xff] }
  0xd4   : > { %v12462_v30 = vpop.permute.xlu1 %9937  ;;  %v4260_v10 = vsel %vm16052_vm6, %v4227_v53, %v9814_v25  ;;  %v9839_v16 = vunpack.i.l.bf16 %v12146_v28  ;;  %v9834_v45 = vunpack.i.l.bf16 %v16139_v44  ;;  %v16140_v18 = vpack.i.bf16 %v12239_v59, %v12237_v58  ;;  %v16143_v59 = vld [vmem:[#allocation10_spill] sm:$0xff]  ;;  %v16144_v25 = vld [vmem:[#allocation11_spill] sm:$0xff] }
  0xd5   : > { %v16141_v11 = vpack.i.bf16 %v12298_v56, %v12296_v39  ;;  %v4261_v55 = vsel %vm16052_vm6, %v4228_v26, %v9815_v62  ;;  %v4295_v46 = vsel %vm16026_vm7, %v4262_v14, %v9829_v5  ;;  %v9835_v51 = vunpack.i.h.bf16 %v16139_v44 }
  0xd6   : > { %10227 = vrot.lane.b32.xlu1 %v16140_v18, %s11685_s22  ;;  %v9844_v15 = vunpack.i.l.bf16 %v16142_v43  ;;  %v4296_v9 = vsel %vm16026_vm7, %v4263_v17, %v9830_v27  ;;  %v9840_v35 = vunpack.i.h.bf16 %v12146_v28  ;;  %v9845_v58 = vunpack.i.h.bf16 %v16142_v43 }
  0xd7   : > { %10222 = vrot.lane.b32.xlu0 %v16141_v11, %s11684_s21  ;;  %v9859_v33 = vunpack.i.l.bf16 %v16143_v59  ;;  %v12494_v56 = vpop.permute.xlu0 %9942  ;;  %v4293_v39 = vsel %vm16026_vm7, %v4260_v10, %v9824_v21  ;;  %v4294_v22 = vsel %vm16026_vm7, %v4261_v55, %v9825_v63  ;;  %v9860_v49 = vunpack.i.h.bf16 %v16143_v59  ;;  %v16149_v10 = vld [vmem:[#allocation24_spill] sm:$0xff] }
  0xd8   : > { %v12492_v38 = vpop.permute.xlu1 %9947  ;;  %v9855_v47 = vunpack.i.h.bf16 %v16144_v25  ;;  %v4328_v23 = vsel %vm4325_vm8, %v4295_v46, %v9839_v16  ;;  %v4326_v28 = vsel %vm4325_vm8, %v4293_v39, %v9834_v45  ;;  %v9854_v50 = vunpack.i.l.bf16 %v16144_v25  ;;  %v264_v45 = vld [vmem:[%s11738_s17 + $0x2e0] sm:$0xff]  ;;  %v265_v46 = vld [vmem:[%s11738_s17 + $0x2e8] sm:$0xff] }
  0xd9   : > { %v9879_v0 = vunpack.i.l.bf16 %v16145_v4  ;;  %v16146_v62 = vpack.i.bf16 %v12243_v61, %v12241_v60  ;;  %v16147_v5 = vpack.i.bf16 %v12247_v3, %v12245_v2  ;;  %v4327_v32 = vsel %vm4325_vm8, %v4294_v22, %v9835_v51  ;;  %v12539_v51 = vld [vmem:[%s11738_s17 + $0x2f0] sm:$0xff] }
  0xda   : > { %v4359_v26 = vsel %vm16027_vm9, %v4326_v28, %v9844_v15  ;;  %v9880_v27 = vunpack.i.h.bf16 %v16145_v4  ;;  %v9874_v53 = vunpack.i.l.bf16 %v16148_v20  ;;  %v4329_v14 = vsel %vm4325_vm8, %v4296_v9, %v9840_v35  ;;  %v16152_v28 = vld [vmem:[#allocation19_spill] sm:$0xff] }
  0xdb   : > { %10237 = vrot.lane.b32.xlu1 %v16146_v62, %s11693_s30  ;;  %10232 = vrot.lane.b32.xlu0 %v16147_v5, %s11692_s29  ;;  %v4360_v60 = vsel %vm16027_vm9, %v4327_v32, %v9845_v58  ;;  %v4392_v61 = vsel %vm4391_vm10, %v4359_v26, %v9859_v33  ;;  %v9875_v2 = vunpack.i.h.bf16 %v16148_v20  ;;  %v12520_v63 = vpop.permute.xlu0 %9952  ;;  %vm16074_vm7 = vcmask 490496   ;;  %v16151_v58 = vld [vmem:[#allocation25_spill] sm:$0xff]  ;;  %v16156_v62 = vld [vmem:[#allocation20_spill] sm:$0xff] }
  0xdc   : > { %v9958_v3 = vpop.permute.xlu1 %9957  ;;  %v4393_v21 = vsel %vm4391_vm10, %v4360_v60, %v9860_v49  ;;  %v4362_v17 = vsel %vm16027_vm9, %v4329_v14, %v9855_v47  ;;  %v9900_v16 = vunpack.i.h.bf16 %v16149_v10  ;;  %v9899_v44 = vunpack.i.l.bf16 %v16149_v10  ;;  %v267_v14 = vld [vmem:[%s11738_s17 + $0x2f8] sm:$0xff] }
  0xdd   : > { %v4361_v18 = vsel %vm16027_vm9, %v4328_v23, %v9854_v50  ;;  %v4425_v11 = vsel %vm4424_vm11, %v4392_v61, %v9879_v0  ;;  %v16150_v55 = vpack.i.bf16 %v12302_v37, %v12300_v36  ;;  %v355_v43 = vrot.slane %v264_v45, 1  ;;  %v16153_v50 = vld [vmem:[#allocation18_spill] sm:$0xff]  ;;  %v16155_v0 = vld [vmem:[#allocation21_spill] sm:$0xff] }
  0xde   : > { %v654_v15 = vrot.slane %v264_v45, 7  ;;  %v4426_v9 = vsel %vm4424_vm11, %v4393_v21, %v9880_v27  ;;  %v4394_v35 = vsel %vm4391_vm10, %v4361_v18, %v9874_v53  ;;  %v9895_v59 = vunpack.i.h.bf16 %v16151_v58  ;;  %v272_v45 = vld [vmem:[%s11738_s17 + $0x320] sm:$0xff] }
  0xdf   : > { %10247 = vrot.lane.b32.xlu1 %v10246_v24, %s11686_s23  ;;  %10242 = vrot.lane.b32.xlu0 %v16150_v55, %s11685_s22  ;;  %v9894_v33 = vunpack.i.l.bf16 %v16151_v58  ;;  %v4395_v29 = vsel %vm4391_vm10, %v4362_v17, %v9875_v2  ;;  %v9920_v48 = vunpack.i.h.bf16 %v12397_v12  ;;  %v9919_v36 = vunpack.i.l.bf16 %v12397_v12  ;;  %v12550_v24 = vpop.permute.xlu0 %9962 }
  0xe0   : > { %v12548_v37 = vpop.permute.xlu1 %9967  ;;  %vm16073_vm9 = vcmask 523264   ;;  %v964_v39 = vsel %vm492_vm0, %v355_v43, %v654_v15  ;;  %v4458_v22 = vsel %vm4457_vm12, %v4425_v11, %v9899_v44  ;;  %v4459_v49 = vsel %vm4457_vm12, %v4426_v9, %v9900_v16  ;;  %v273_v9 = vld [vmem:[%s11738_s17 + $0x328] sm:$0xff] }
  0xe1   : > { %v9940_v25 = vunpack.i.h.bf16 %v12462_v30  ;;  %v9939_v47 = vunpack.i.l.bf16 %v12462_v30  ;;  %1127 = vst.msk [vmem:[#allocation2 + $0x3c0] sm:$0xff] %vm1005_vm1, %v964_v39  ;;  %v9960_v23 = vunpack.i.h.bf16 %v9958_v3  ;;  %v9959_v12 = vunpack.i.l.bf16 %v9958_v3 }
  0xe2   : > { %v16154_v4 = vpack.i.bf16 %v16152_v28, %v16153_v50  ;;  %v16157_v5 = vpack.i.bf16 %v16155_v0, %v16156_v62  ;;  %v655_v32 = vrot.slane %v265_v46, 7  ;;  %v657_v26 = vrot.slane %v12539_v51, 7  ;;  %v12593_v46 = vld [vmem:[#allocation2 + $0x20b] ss:$2 sm:$0xff]  ;;  %v12595_v51 = vld [vmem:[#allocation2 + $0x21b] ss:$2 sm:$0xff] }
  0xe3   : > { %v4427_v27 = vsel %vm4424_vm11, %v4394_v35, %v9894_v33  ;;  %v4428_v30 = vsel %vm4424_vm11, %v4395_v29, %v9895_v59  ;;  %v9915_v20 = vunpack.i.h.bf16 %v12399_v40  ;;  %v9914_v53 = vunpack.i.l.bf16 %v12399_v40  ;;  %v12574_v3 = vpop.permute.xlu0 %9972  ;;  %v274_v35 = vld [vmem:[%s11738_s17 + $0x330] sm:$0xff]  ;;  %v1281_v33 = vld [vmem:[#allocation2 + $0x281] ss:$2 sm:$0xff] }
  0xe4   : > { %10257 = vrot.lane.b32.xlu1 %v16154_v4, %s11694_s4  ;;  %10252 = vrot.lane.b32.xlu0 %v16157_v5, %s11693_s30  ;;  %v4491_v60 = vsel %vm4490_vm13, %v4458_v22, %v9919_v36  ;;  %v4492_v61 = vsel %vm4490_vm13, %v4459_v49, %v9920_v48  ;;  %v9978_v2 = vpop.permute.xlu1 %9977  ;;  %v656_v21 = vsel %vm492_vm0, %v654_v15, %v655_v32  ;;  %v659_v43 = vrot.slane %v267_v14, 7  ;;  %v1283_v29 = vld [vmem:[#allocation2 + $0x291] ss:$2 sm:$0xff] }
  0xe5   : > { %v658_v17 = vsel %vm492_vm0, %v655_v32, %v657_v26  ;;  %v9980_v10 = vunpack.i.h.bf16 %v9978_v2  ;;  %v9979_v16 = vunpack.i.l.bf16 %v9978_v2  ;;  %v4524_v44 = vsel %vm4523_vm14, %v4491_v60, %v9939_v47  ;;  %1128 = vst.msk [vmem:[#allocation2 + $0x3c8] sm:$0xff] %vm1005_vm1, %v656_v21  ;;  %v16161_v2 = vld [vmem:[#allocation23_spill] sm:$0xff] }
  0xe6   : > { %v4525_v40 = vsel %vm4523_vm14, %v4492_v61, %v9940_v25  ;;  %1129 = vst.msk [vmem:[#allocation2 + $0x3d0] sm:$0xff] %vm1005_vm1, %v658_v17  ;;  %v16158_v18 = vpack.i.bf16 %v12310_v34, %v12308_v31  ;;  %v4557_v11 = vsel %vm16107_vm15, %v4524_v44, %v9959_v12  ;;  %v900_v15 = vrot.slane %v267_v14, 5  ;;  %v275_v12 = vld [vmem:[%s11738_s17 + $0x338] sm:$0xff]  ;;  %v1787_v14 = vld [vmem:[#allocation2 + $0x241] ss:$2 sm:$0xff] }
  0xe7   : > { %v4558_v55 = vsel %vm16107_vm15, %v4525_v40, %v9960_v23  ;;  %v9935_v7 = vunpack.i.h.bf16 %v12464_v52  ;;  %v9934_v8 = vunpack.i.l.bf16 %v12464_v52  ;;  %v12605_v58 = vpop.permute.xlu0 %9982  ;;  %v660_v48 = vsel %vm492_vm0, %v657_v26, %v659_v43  ;;  %v16164_v17 = vld [vmem:[#allocation27_spill] sm:$0xff] }
  0xe8   : > { %10267 = vrot.lane.b32.xlu1 %v10266_v13, %s11687_s24  ;;  %10262 = vrot.lane.b32.xlu0 %v16158_v18, %s11686_s23  ;;  %v4590_v13 = vsel %vm16074_vm7, %v4557_v11, %v9979_v16  ;;  %v4591_v31 = vsel %vm16074_vm7, %v4558_v55, %v9980_v10  ;;  %v12603_v34 = vpop.permute.xlu1 %9987  ;;  %v996_v36 = vsel %vm492_vm0, %v659_v43, %v900_v15  ;;  %v357_v39 = vrot.slane %v272_v45, 1  ;;  %v16165_v10 = vld [vmem:[#allocation26_spill] sm:$0xff]  ;;  %v1725_v11 = vld [vmem:[#allocation2 + $0x280] ss:$2 sm:$0xff] }
  0xe9   : > { %v4622_v59 = vpack.c.bf16 %v4591_v31, %v4590_v13  ;;  %v4460_v22 = vsel %vm4457_vm12, %v4427_v27, %v9914_v53  ;;  %v9955_v52 = vunpack.i.h.bf16 %v12520_v63  ;;  %v9954_v49 = vunpack.i.l.bf16 %v12520_v63  ;;  %1130 = vst.msk [vmem:[#allocation2 + $0x3d8] sm:$0xff] %vm1005_vm1, %v660_v48  ;;  %v1785_v53 = vld [vmem:[#allocation2 + $0x231] ss:$2 sm:$0xff]  ;;  %v1727_v55 = vld [vmem:[#allocation2 + $0x290] ss:$2 sm:$0xff] }
  0xea   : > { %v9975_v25 = vunpack.i.h.bf16 %v12574_v3  ;;  %1131 = vst.msk [vmem:[#allocation2 + $0x3e0] sm:$0x3] %vm1010_vm2, %v996_v36  ;;  %v9974_v47 = vunpack.i.l.bf16 %v12574_v3  ;;  %v16159_v23 = vpack.i.bf16 %v12277_v54, %v12275_v19  ;;  %v668_v63 = vrot.slane %v272_v45, 7  ;;  %v16162_v3 = vld [vmem:[#allocation22_spill] sm:$0xff]  ;;  %v1851_v36 = vld [vmem:[#allocation2 + $0x242] ss:$2 sm:$0xff] }
  0xeb   : > { %v669_v28 = vrot.slane %v273_v9, 7  ;;  %v671_v50 = vrot.slane %v274_v35, 7  ;;  %v4461_v4 = vsel %vm4457_vm12, %v4428_v30, %v9915_v20  ;;  %v4493_v0 = vsel %vm4490_vm13, %v4460_v22, %v9934_v8  ;;  %9684 = vmatprep.mubr.msk.bf16.mxu0 %vm16073_vm9, %v4622_v59  ;;  %v9993_v1 = vpop.permute.xlu0 %9992  ;;  %v1345_v35 = vld [vmem:[#allocation2 + $0x282] ss:$2 sm:$0xff]  ;;  %v1285_v8 = vld [vmem:[#allocation2 + $0x2d1] ss:$2 sm:$0xff] }
  0xec   : > { %10277 = vrot.lane.b32.xlu1 %v16159_v23, %s11695_s7  ;;  %10272 = vrot.lane.b32.xlu0 %v10271_v41, %s11694_s4  ;;  %v10296_v62 = vpack.i.bf16 %v1283_v29, %v1281_v33  ;;  %v10291_v19 = vpack.i.bf16 %v12595_v51, %v12593_v46  ;;  %v4494_v54 = vsel %vm4490_vm13, %v4461_v4, %v9935_v7  ;;  %v12631_v5 = vpop.permute.xlu1 %9997  ;;  %v9995_v30 = vunpack.i.h.bf16 %v9993_v1  ;;  %v1347_v7 = vld [vmem:[#allocation2 + $0x292] ss:$2 sm:$0xff]  ;;  %v1287_v59 = vld [vmem:[#allocation2 + $0x2e1] ss:$2 sm:$0xff] }
  0xed   : > { %16160 = vst [vmem:[#allocation7_spill] sm:$0xff] %v12631_v5  ;;  %v670_v57 = vsel %vm492_vm0, %v668_v63, %v669_v28  ;;  %v672_v41 = vsel %vm492_vm0, %v669_v28, %v671_v50  ;;  %v966_v32 = vsel %vm492_vm0, %v357_v39, %v668_v63  ;;  %v4526_v26 = vsel %vm4523_vm14, %v4493_v0, %v9954_v49  ;;  %v1849_v48 = vld [vmem:[#allocation2 + $0x232] ss:$2 sm:$0xff]  ;;  %v1789_v49 = vld [vmem:[#allocation2 + $0x281] ss:$2 sm:$0xff] }
  0xee   : > { %v4527_v27 = vsel %vm4523_vm14, %v4494_v54, %v9955_v52  ;;  %v9994_v20 = vunpack.i.l.bf16 %v9993_v1  ;;  %1137 = vst.msk [vmem:[#allocation2 + $0x410] sm:$0xff] %vm1005_vm1, %v966_v32  ;;  %1138 = vst.msk [vmem:[#allocation2 + $0x418] sm:$0xff] %vm1005_vm1, %v670_v57  ;;  %v4559_v60 = vsel %vm16107_vm15, %v4526_v26, %v9974_v47  ;;  %v16163_v21 = vpack.i.bf16 %v16161_v2, %v16162_v3  ;;  %v268_v39 = vld [vmem:[%s11738_s17 + $0x300] sm:$0xff]  ;;  %v270_v54 = vld [vmem:[%s11738_s17 + $0x310] sm:$0xff] }
  0xef   : > { %1139 = vst.msk [vmem:[#allocation2 + $0x420] sm:$0xff] %vm1005_vm1, %v672_v41  ;;  %v4560_v61 = vsel %vm16107_vm15, %v4527_v27, %v9975_v25  ;;  %v16166_v16 = vpack.i.bf16 %v16164_v17, %v16165_v10  ;;  %v673_v44 = vrot.slane %v275_v12, 7  ;;  %v902_v40 = vrot.slane %v275_v12, 5  ;;  %v12655_v51 = vpop.permute.xlu0 %10002  ;;  %v1791_v25 = vld [vmem:[#allocation2 + $0x291] ss:$2 sm:$0xff]  ;;  %v12672_v12 = vld [vmem:[%s11738_s17 + $0x308] sm:$0xff] }
  0xf0   : > { %10287 = vrot.lane.b32.xlu1 %v16163_v21, %s11688_s25  ;;  %v4592_v45 = vsel %vm16074_vm7, %v4559_v60, %v9994_v20  ;;  %v4593_v18 = vsel %vm16074_vm7, %v4560_v61, %v9995_v30  ;;  %v12653_v46 = vpop.permute.xlu1 %10007  ;;  %v10306_v13 = vpack.i.bf16 %v1787_v14, %v1785_v53  ;;  %v10301_v31 = vpack.i.bf16 %v1727_v55, %v1725_v11  ;;  %v12679_v4 = vld [vmem:[#allocation2 + $0x283] ss:$2 sm:$0xff]  ;;  %v12681_v0 = vld [vmem:[#allocation2 + $0x293] ss:$2 sm:$0xff]  ;;  %v12698_v27 = vld [vmem:[#allocation2 + $0x282] ss:$2 sm:$0xff] }
  0xf1   : > { %10282 = vrot.lane.b32.xlu0 %v16166_v16, %s11687_s24  ;;  %v4623_v43 = vpack.c.bf16 %v4593_v18, %v4592_v45  ;;  %v674_v15 = vsel %vm492_vm0, %v671_v50, %v673_v44  ;;  %v998_v9 = vsel %vm492_vm0, %v673_v44, %v902_v40  ;;  %v10316_v22 = vpack.i.bf16 %v1347_v7, %v1345_v35  ;;  %v12689_v1 = vld [vmem:[%s11738_s17 + $0x318] sm:$0xff]  ;;  %v12696_v26 = vld [vmem:[#allocation2 + $0x243] ss:$2 sm:$0xff]  ;;  %v12708_v60 = vld [vmem:[#allocation2 + $0x268] ss:$2 sm:$0xff] }
  0xf2   : > { %1140 = vst.msk [vmem:[#allocation2 + $0x428] sm:$0xff] %vm1005_vm1, %v674_v15  ;;  %v10311_v52 = vpack.i.bf16 %v1287_v59, %v1285_v8  ;;  %v356_v47 = vrot.slane %v268_v39, 1  ;;  %v661_v23 = vrot.slane %v268_v39, 7  ;;  %v10326_v57 = vpack.i.bf16 %v1851_v36, %v1849_v48  ;;  %v12694_v32 = vld [vmem:[#allocation2 + $0x233] ss:$2 sm:$0xff] }
  0xf3   : > { %1141 = vst.msk [vmem:[#allocation2 + $0x430] sm:$0x3] %vm1010_vm2, %v998_v9  ;;  %9685 = vmatmul.mubr.msk.bf16.vlgmr.msra.gmra.mxu0 %vm16073_vm9, %v4623_v43  ;;  %v12666_v29 = vpop.permute.xlu0 %10012  ;;  %v10321_v41 = vpack.i.bf16 %v1791_v25, %v1789_v49  ;;  %v12700_v30 = vld [vmem:[#allocation2 + $0x292] ss:$2 sm:$0xff]  ;;  %v12702_v20 = vld [vmem:[#allocation2 + $0x2d3] ss:$2 sm:$0xff]  ;;  %v10336_v35 = vpack.i.bf16 %v12681_v0, %v12679_v4 }
  0xf4   : > { %10297 = vrot.lane.b32.xlu1 %v10296_v62, %s11682_s19  ;;  %v12664_v33 = vpop.permute.xlu1 %10017  ;;  %16168 = vst [vmem:[#allocation10_spill] sm:$0xff] %v12666_v29  ;;  %v965_v50 = vsel %vm492_vm0, %v356_v47, %v661_v23  ;;  %v12683_v62 = vld [vmem:[#allocation2 + $0x2d2] ss:$2 sm:$0xff]  ;;  %v12704_v53 = vld [vmem:[#allocation2 + $0x2e3] ss:$2 sm:$0xff]  ;;  %v662_v61 = vrot.slane %v12672_v12, 7  ;;  %v10341_v12 = vpack.i.bf16 %v12700_v30, %v12698_v27 }
  0xf5   : > { %10292 = vrot.lane.b32.xlu0 %v10291_v19, %s11695_s7  ;;  %16167 = vst [vmem:[#allocation9_spill] sm:$0xff] %v12664_v33  ;;  %v12685_v19 = vld [vmem:[#allocation2 + $0x2e2] ss:$2 sm:$0xff]  ;;  %1132 = vst.msk [vmem:[#allocation2 + $0x3e8] sm:$0xff] %vm1005_vm1, %v965_v50  ;;  %v12719_v10 = vld [vmem:[#allocation2 + $0x283] ss:$2 sm:$0xff] }
  0xf6   : > { %v12706_v14 = vld [vmem:[#allocation2 + $0x258] ss:$2 sm:$0xff]  ;;  %v12715_v21 = vld [vmem:[#allocation2 + $0x2a8] ss:$2 sm:$0xff]  ;;  %v12721_v16 = vld [vmem:[#allocation2 + $0x293] ss:$2 sm:$0xff]  ;;  %v663_v11 = vsel %vm492_vm0, %v661_v23, %v662_v61  ;;  %v10331_v7 = vpack.i.bf16 %v12685_v19, %v12683_v62  ;;  %v10346_v23 = vpack.i.bf16 %v12696_v26, %v12694_v32 }
  0xf7   : > { %v12676_v28 = vpop.permute.xlu0 %10022  ;;  %v12717_v17 = vld [vmem:[#allocation2 + $0x2b8] ss:$2 sm:$0xff]  ;;  %v12723_v44 = vld [vmem:[#allocation2 + $0x2a9] ss:$2 sm:$0xff]  ;;  %v12725_v40 = vld [vmem:[#allocation2 + $0x2b9] ss:$2 sm:$0xff] }
  0xf8   : > { %10307 = vrot.lane.b32.xlu1 %v10306_v13, %s11689_s26  ;;  %v12674_v63 = vpop.permute.xlu1 %10027  ;;  %v12727_v45 = vld [vmem:[#allocation2 + $0x259] ss:$2 sm:$0xff]  ;;  %v12729_v18 = vld [vmem:[#allocation2 + $0x269] ss:$2 sm:$0xff]  ;;  %v12732_v55 = vld [vmem:[#allocation2 + $0x2a8] ss:$2 sm:$0xff] }
  0xf9   : > { %10302 = vrot.lane.b32.xlu0 %v10301_v31, %s11688_s25  ;;  %v12734_v43 = vld [vmem:[#allocation2 + $0x2b8] ss:$2 sm:$0xff]  ;;  %1133 = vst.msk [vmem:[#allocation2 + $0x3f0] sm:$0xff] %vm1005_vm1, %v663_v11  ;;  %v277_v9 = vld [vmem:[%s11738_s17 + $0x348] sm:$0xff]  ;;  %v12755_v48 = vld [vmem:[#allocation2 + $0x2f9] ss:$2 sm:$0xff] }
  0xfa   : > { %v12738_v15 = vld [vmem:[%s11738_s17 + $0x340] sm:$0xff]  ;;  %v12749_v13 = vld [vmem:[#allocation2 + $0x308] ss:$2 sm:$0xff]  ;;  %16172 = vst [vmem:[#allocation24_spill] sm:$0xff] %v12755_v48  ;;  %v12757_v36 = vld [vmem:[#allocation2 + $0x309] ss:$2 sm:$0xff] }
  0xfb   : > { %v12713_v3 = vpop.permute.xlu0 %10032  ;;  %v12747_v8 = vld [vmem:[#allocation2 + $0x2f8] ss:$2 sm:$0xff]  ;;  %16173 = vst [vmem:[#allocation25_spill] sm:$0xff] %v12757_v36  ;;  %v16030_v49 = vrot.slane %v12689_v1, 7  ;;  %v278_v25 = vld [vmem:[%s11738_s17 + $0x350] sm:$0xff]  ;;  %v358_v27 = vrot.slane %v12738_v15, 1 }
  0xfc   : > { %10317 = vrot.lane.b32.xlu1 %v10316_v22, %s11681_s18  ;;  %v12711_v2 = vpop.permute.xlu1 %10037  ;;  %16170 = vst [vmem:[#allocation14_spill] sm:$0xff] %v12713_v3  ;;  %v12751_v31 = vld [vmem:[#allocation2 + $0x2aa] ss:$2 sm:$0xff]  ;;  %v12753_v59 = vld [vmem:[#allocation2 + $0x2ba] ss:$2 sm:$0xff]  ;;  %v675_v30 = vrot.slane %v12738_v15, 7 }
  0xfd   : > { %10312 = vrot.lane.b32.xlu0 %v10311_v52, %s11682_s19  ;;  %16169 = vst [vmem:[#allocation11_spill] sm:$0xff] %v12711_v2  ;;  %16171 = vst [vmem:[#allocation15_spill] sm:$0xff] %v12751_v31  ;;  %v12759_v39 = vld [vmem:[#allocation2 + $0x25a] ss:$2 sm:$0xff]  ;;  %v12761_v22 = vld [vmem:[#allocation2 + $0x26a] ss:$2 sm:$0xff] }
  0xfe   : > { %16174 = vst [vmem:[#allocation19_spill] sm:$0xff] %v12759_v39  ;;  %16175 = vst [vmem:[#allocation18_spill] sm:$0xff] %v12761_v22  ;;  %v664_v52 = vrot.slane %v270_v54, 7  ;;  %v12766_v47 = vld [vmem:[%s11738_s17 + $0x358] sm:$0xff]  ;;  %v12780_v19 = vld [vmem:[#allocation2 + $0x2a9] ss:$2 sm:$0xff]  ;;  %v967_v39 = vsel %vm492_vm0, %v358_v27, %v675_v30 }
  0xff   : > { %v12778_v62 = vpop.permute.xlu0 %10042  ;;  %v12782_v54 = vld [vmem:[#allocation2 + $0x2b9] ss:$2 sm:$0xff]  ;;  %v12802_v3 = vld [vmem:[#allocation2 + $0x2fa] ss:$2 sm:$0xff]  ;;  %v12804_v2 = vld [vmem:[#allocation2 + $0x30a] ss:$2 sm:$0xff] }
 0x100   : > { %10327 = vrot.lane.b32.xlu1 %v10326_v57, %s11690_s27  ;;  %v12776_v0 = vpop.permute.xlu1 %10047  ;;  %16176 = vst [vmem:[#allocation21_spill] sm:$0xff] %v12778_v62  ;;  %v12784_v57 = vld [vmem:[#allocation2 + $0x2ab] ss:$2 sm:$0xff]  ;;  %v665_v32 = vsel %vm492_vm0, %v662_v61, %v664_v52  ;;  %v667_v26 = vsel %vm492_vm0, %v664_v52, %v16030_v49  ;;  %16179 = vst [vmem:[#allocation22_spill] sm:$0xff] %v12802_v3  ;;  %v12812_v52 = vld [vmem:[#allocation2 + $0x25b] ss:$2 sm:$0xff] }
 0x101   : > { %10322 = vrot.lane.b32.xlu0 %v10321_v41, %s11689_s26  ;;  %16177 = vst [vmem:[#allocation20_spill] sm:$0xff] %v12784_v57  ;;  %v12786_v41 = vld [vmem:[#allocation2 + $0x2bb] ss:$2 sm:$0xff]  ;;  %16180 = vst [vmem:[#allocation27_spill] sm:$0xff] %v12804_v2  ;;  %v12814_v50 = vld [vmem:[#allocation2 + $0x26b] ss:$2 sm:$0xff] }
 0x102   : > { %16178 = vst [vmem:[#allocation23_spill] sm:$0xff] %v12786_v41  ;;  %1134 = vst.msk [vmem:[#allocation2 + $0x3f8] sm:$0xff] %vm1005_vm1, %v665_v32  ;;  %v12816_v61 = vld [vmem:[#allocation2 + $0x2aa] ss:$2 sm:$0xff]  ;;  %v676_v4 = vrot.slane %v277_v9, 7  ;;  %v678_v11 = vrot.slane %v278_v25, 7 }
 0x103   : > { %1135 = vst.msk [vmem:[#allocation2 + $0x400] sm:$0xff] %vm1005_vm1, %v667_v26  ;;  %16181 = vst [vmem:[#allocation26_spill] sm:$0xff] %v12812_v52  ;;  %v1193_v15 = vld [vmem:[#allocation2 + $0xa0] ss:$2 sm:$0xff]  ;;  %v1195_v29 = vld [vmem:[#allocation2 + $0xb0] ss:$2 sm:$0xff]  ;;  %v12829_v9 = vpop.permute.xlu0 %10052 }
 0x104   : > { %10337 = vrot.lane.b32.xlu1 %v10336_v35, %s11683_s20  ;;  %16182 = vst [vmem:[#allocation30_spill] sm:$0xff] %v12814_v50  ;;  %16183 = vst [vmem:[#allocation31_spill] sm:$0xff] %v12816_v61  ;;  %v12827_v33 = vpop.permute.xlu1 %10057  ;;  %v12831_v25 = vld [vmem:[#allocation2 + $0x2ba] ss:$2 sm:$0xff]  ;;  %v677_v35 = vsel %vm492_vm0, %v675_v30, %v676_v4  ;;  %v679_v5 = vsel %vm492_vm0, %v676_v4, %v678_v11  ;;  %v12849_v36 = vld [vmem:[#allocation2 + $0x2fb] ss:$2 sm:$0xff] }
 0x105   : > { %10332 = vrot.lane.b32.xlu0 %v10331_v7, %s11681_s18  ;;  %16184 = vst [vmem:[#allocation32_spill] sm:$0xff] %v12827_v33  ;;  %16185 = vst [vmem:[#allocation33_spill] sm:$0xff] %v12829_v9  ;;  %v12833_v49 = vld [vmem:[#allocation2 + $0x2d0] ss:$2 sm:$0xff]  ;;  %v12835_v32 = vld [vmem:[#allocation2 + $0x2e0] ss:$2 sm:$0xff] }
 0x106   : > { %16186 = vst [vmem:[#allocation34_spill] sm:$0xff] %v12831_v25  ;;  %v16187_v7 = vrot.slane %v12766_v47, 7  ;;  %v16188_v22 = vld [vmem:[#allocation8_spill] sm:$0xff]  ;;  %1142 = vst.msk [vmem:[#allocation2 + $0x438] sm:$0xff] %vm1005_vm1, %v967_v39  ;;  %v16190_v39 = vld [vmem:[#allocation13_spill] sm:$0xff] }
 0x107   : > { %v9850_v33 = vunpack.i.h.bf16 %v16188_v22  ;;  %v9849_v9 = vunpack.i.l.bf16 %v16188_v22  ;;  %v12851_v31 = vld [vmem:[#allocation2 + $0x30b] ss:$2 sm:$0xff]  ;;  %1143 = vst.msk [vmem:[#allocation2 + $0x440] sm:$0xff] %vm1005_vm1, %v677_v35  ;;  %1144 = vst.msk [vmem:[#allocation2 + $0x448] sm:$0xff] %vm1005_vm1, %v679_v5  ;;  %v9864_v35 = vunpack.i.l.bf16 %v16190_v39  ;;  %v1199_v48 = vld [vmem:[#allocation2 + $0x100] ss:$2 sm:$0xff]  ;;  %v12874_v30 = vpop.permute.xlu0 %10062 }
 0x108   : > { %v681_v26 = vsel %vm492_vm0, %v678_v11, %v16187_v7  ;;  %v16189_v4 = vld [vmem:[#allocation12_spill] sm:$0xff]  ;;  %10347 = vrot.lane.b32.xlu1 %v10346_v23, %s11691_s28  ;;  %v901_v11 = vrot.slane %v12689_v1, 5  ;;  %v9865_v7 = vunpack.i.h.bf16 %v16190_v39  ;;  %v12872_v57 = vpop.permute.xlu1 %10067  ;;  %v16192_v39 = vrot.slane %v12689_v1, 7  ;;  %v16193_v61 = vld [vmem:[#allocation17_spill] sm:$0xff] }
 0x109   : > { %1145 = vst.msk [vmem:[#allocation2 + $0x450] sm:$0xff] %vm1005_vm1, %v681_v26  ;;  %v9870_v22 = vunpack.i.h.bf16 %v16189_v4  ;;  %v9869_v27 = vunpack.i.l.bf16 %v16189_v4  ;;  %10342 = vrot.lane.b32.xlu0 %v10341_v12, %s11690_s27  ;;  %v1197_v4 = vld [vmem:[#allocation2 + $0xf0] ss:$2 sm:$0xff]  ;;  %v16191_v23 = vld [vmem:[#allocation16_spill] sm:$0xff]  ;;  %v4133_v52 = vsel %vm1005_vm1, %v1195_v29, %v9850_v33  ;;  %v4132_v26 = vsel %vm1005_vm1, %v1193_v15, %v9849_v9 }
 0x10a   : > { %v9890_v62 = vunpack.i.h.bf16 %v16191_v23  ;;  %v9889_v12 = vunpack.i.l.bf16 %v16191_v23  ;;  %v997_v5 = vsel %vm492_vm0, %v16192_v39, %v901_v11  ;;  %v9885_v25 = vunpack.i.h.bf16 %v16193_v61  ;;  %v16194_v41 = vld [vmem:[#allocation28_spill] sm:$0xff]  ;;  %v16197_v9 = vld [vmem:[#allocation29_spill] sm:$0xff] }
 0x10b   : > { %v9884_v50 = vunpack.i.l.bf16 %v16193_v61  ;;  %1136 = vst.msk [vmem:[#allocation2 + $0x408] sm:$0x3] %vm1010_vm2, %v997_v5  ;;  %v4165_v23 = vsel %vm16051_vm3, %v4132_v26, %v9869_v27  ;;  %v4166_v2 = vsel %vm16051_vm3, %v4133_v52, %v9870_v22  ;;  %v9909_v3 = vunpack.i.l.bf16 %v16194_v41  ;;  %v12909_v11 = vpop.permute.xlu0 %10072 }
 0x10c   : > { %v16195_v1 = vpack.i.bf16 %v12717_v17, %v12715_v21  ;;  %v16196_v33 = vpack.i.bf16 %v12704_v53, %v12702_v20  ;;  %v10431_v29 = vpack.i.bf16 %v12851_v31, %v12849_v36  ;;  %v4135_v61 = vsel %vm1005_vm1, %v1199_v48, %v9865_v7  ;;  %v12907_v53 = vpop.permute.xlu1 %10077  ;;  %v1355_v31 = vld [vmem:[#allocation2 + $0x332] ss:$2 sm:$0xff]  ;;  %v1293_v36 = vld [vmem:[#allocation2 + $0x371] ss:$2 sm:$0xff] }
 0x10d   : > { %v4134_v15 = vsel %vm1005_vm1, %v1197_v4, %v9864_v35  ;;  %v9910_v52 = vunpack.i.h.bf16 %v16194_v41  ;;  %v9904_v22 = vunpack.i.l.bf16 %v16197_v9  ;;  %v4198_v27 = vsel %vm16050_vm4, %v4165_v23, %v9889_v12 }
 0x10e   : > { %10357 = vrot.lane.b32.xlu1 %v16195_v1, %s11684_s21  ;;  %10352 = vrot.lane.b32.xlu0 %v16196_v33, %s11683_s20  ;;  %v4199_v21 = vsel %vm16050_vm4, %v4166_v2, %v9890_v62  ;;  %v9905_v17 = vunpack.i.h.bf16 %v16197_v9  ;;  %v9929_v20 = vunpack.i.l.bf16 %v12435_v6  ;;  %v4167_v48 = vsel %vm16051_vm3, %v4134_v15, %v9884_v50 }
 0x10f   : > { %v4168_v7 = vsel %vm16051_vm3, %v4135_v61, %v9885_v25  ;;  %v9930_v41 = vunpack.i.h.bf16 %v12435_v6  ;;  %v9924_v35 = vunpack.i.l.bf16 %v12437_v42  ;;  %v4231_v5 = vsel %vm4226_vm5, %v4198_v27, %v9909_v3 }
 0x110   : > { %v9925_v2 = vunpack.i.h.bf16 %v12437_v42  ;;  %v9949_v62 = vunpack.i.l.bf16 %v12492_v38  ;;  %v16198_v26 = vpack.i.bf16 %v12708_v60, %v12706_v14  ;;  %v16199_v50 = vpack.i.bf16 %v12721_v16, %v12719_v10  ;;  %v12934_v39 = vpop.permute.xlu1 %10087  ;;  %v12936_v10 = vpop.permute.xlu0 %10082 }
 0x111   : > { %v903_v6 = vrot.slane %v12766_v47, 5  ;;  %v4232_v25 = vsel %vm4226_vm5, %v4199_v21, %v9910_v52  ;;  %v4200_v3 = vsel %vm16050_vm4, %v4167_v48, %v9904_v22  ;;  %v9950_v42 = vunpack.i.h.bf16 %v12492_v38 }
 0x112   : > { %10367 = vrot.lane.b32.xlu1 %v16198_v26, %s11692_s29  ;;  %10362 = vrot.lane.b32.xlu0 %v16199_v50, %s11691_s28  ;;  %v9944_v4 = vunpack.i.l.bf16 %v12494_v56  ;;  %v4201_v12 = vsel %vm16050_vm4, %v4168_v7, %v9905_v17  ;;  %v4264_v14 = vsel %vm16052_vm6, %v4231_v5, %v9929_v20  ;;  %v9945_v60 = vunpack.i.h.bf16 %v12494_v56 }
 0x113   : > { %v16200_v16 = vrot.slane %v12766_v47, 7  ;;  %v4265_v1 = vsel %vm16052_vm6, %v4232_v25, %v9930_v41  ;;  %v4233_v38 = vsel %vm4226_vm5, %v4200_v3, %v9924_v35  ;;  %v9970_v33 = vunpack.i.h.bf16 %v12548_v37 }
 0x114   : > { %v9969_v61 = vunpack.i.l.bf16 %v12548_v37  ;;  %v4234_v56 = vsel %vm4226_vm5, %v4201_v12, %v9925_v2  ;;  %vm16201_vm4 = vcmask 195584   ;;  %v9965_v52 = vunpack.i.h.bf16 %v12550_v24  ;;  %v12966_v48 = vpop.permute.xlu1 %10097 }
 0x115   : > { %v999_v23 = vsel %vm492_vm0, %v16200_v16, %v903_v6  ;;  %v4297_v15 = vsel %vm16201_vm4, %v4264_v14, %v9949_v62  ;;  %v9964_v47 = vunpack.i.l.bf16 %v12550_v24  ;;  %v16202_v9 = vpack.i.bf16 %v12725_v40, %v12723_v44  ;;  %vm16204_vm3 = vmmov %vm16201_vm4  ;;  %v280_v14 = vld [vmem:[%s11738_s17 + $0x360] sm:$0xff] }
 0x116   : > { %1146 = vst.msk [vmem:[#allocation2 + $0x458] sm:$0x3] %vm1010_vm2, %v999_v23  ;;  %v16203_v22 = vpack.i.bf16 %v12749_v13, %v12747_v8  ;;  %v4298_v37 = vsel %vm16204_vm3, %v4265_v1, %v9950_v42  ;;  %v4266_v27 = vsel %vm16052_vm6, %v4233_v38, %v9944_v4  ;;  %v9990_v21 = vunpack.i.h.bf16 %v12603_v34  ;;  %v12968_v8 = vpop.permute.xlu0 %10092  ;;  %vm16205_vm4 = vmmov %vm16204_vm3  ;;  %v16212_v23 = vld [vmem:[#allocation15_spill] sm:$0xff]  ;;  %v16214_v1 = vld [vmem:[#allocation25_spill] sm:$0xff] }
 0x117   : > { %10377 = vrot.lane.b32.xlu1 %v16202_v9, %s11685_s22  ;;  %v9989_v17 = vunpack.i.l.bf16 %v12603_v34  ;;  %v4267_v24 = vsel %vm16052_vm6, %v4234_v56, %v9945_v60  ;;  %v9985_v20 = vunpack.i.h.bf16 %v12605_v58  ;;  %v9984_v44 = vunpack.i.l.bf16 %v12605_v58  ;;  %v16215_v38 = vld [vmem:[#allocation24_spill] sm:$0xff]  ;;  %v13013_v56 = vld [vmem:[%s11738_s17 + $0x370] sm:$0xff] }
 0x118   : > { %10372 = vrot.lane.b32.xlu0 %v16203_v22, %s11684_s21  ;;  %v10009_v40 = vunpack.i.l.bf16 %v12653_v46  ;;  %v4330_v13 = vsel %vm4325_vm8, %v4297_v15, %v9969_v61  ;;  %v4331_v7 = vsel %vm4325_vm8, %v4298_v37, %v9970_v33  ;;  %v10010_v41 = vunpack.i.h.bf16 %v12653_v46  ;;  %v281_v61 = vld [vmem:[%s11738_s17 + $0x368] sm:$0xff]  ;;  %v16217_v9 = vld [vmem:[#allocation21_spill] sm:$0xff] }
 0x119   : > { %v10004_v34 = vunpack.i.l.bf16 %v12655_v51  ;;  %v4299_v35 = vsel %vm16204_vm3, %v4266_v27, %v9964_v47  ;;  %v4300_v5 = vsel %vm16205_vm4, %v4267_v24, %v9965_v52  ;;  %v10005_v58 = vunpack.i.h.bf16 %v12655_v51 }
 0x11a   : > { %v10029_v2 = vunpack.i.l.bf16 %v12674_v63  ;;  %v16206_v62 = vpack.i.bf16 %v12729_v18, %v12727_v45  ;;  %v16207_v26 = vpack.i.bf16 %v12734_v43, %v12732_v55  ;;  %vm16208_vm6 = vcmask 261120   ;;  %v10108_v43 = vpop.permute.xlu1 %10107  ;;  %v12994_v3 = vpop.permute.xlu0 %10102 }
 0x11b   : > { %v4363_v46 = vsel %vm16208_vm6, %v4330_v13, %v9989_v17  ;;  %vm16209_vm3 = vmmov %vm16208_vm6  ;;  %v10030_v6 = vunpack.i.h.bf16 %v12674_v63  ;;  %v10024_v51 = vunpack.i.l.bf16 %v12676_v28  ;;  %v4332_v25 = vsel %vm4325_vm8, %v4299_v35, %v9984_v44  ;;  %v16219_v35 = vld [vmem:[#allocation19_spill] sm:$0xff] }
 0x11c   : > { %10387 = vrot.lane.b32.xlu1 %v16206_v62, %s11693_s30  ;;  %10382 = vrot.lane.b32.xlu0 %v16207_v26, %s11692_s29  ;;  %v4364_v50 = vsel %vm16209_vm3, %v4331_v7, %v9990_v21  ;;  %v4333_v45 = vsel %vm4325_vm8, %v4300_v5, %v9985_v20  ;;  %v4396_v18 = vsel %vm4391_vm10, %v4363_v46, %v10009_v40  ;;  %v10025_v55 = vunpack.i.h.bf16 %v12676_v28  ;;  %vm16210_vm6 = vmmov %vm16209_vm3 }
 0x11d   : > { %v4397_v42 = vsel %vm4391_vm10, %v4364_v50, %v10010_v41  ;;  %v4365_v4 = vsel %vm16210_vm6, %v4332_v25, %v10004_v34  ;;  %v10050_v63 = vunpack.i.h.bf16 %v12776_v0  ;;  %v10049_v12 = vunpack.i.l.bf16 %v12776_v0  ;;  %vm16211_vm4 = vmmov %vm16209_vm3 }
 0x11e   : > { %v4366_v60 = vsel %vm16211_vm4, %v4333_v45, %v10005_v58  ;;  %v4429_v16 = vsel %vm4424_vm11, %v4396_v18, %v10029_v2  ;;  %v16213_v28 = vpack.i.bf16 %v12753_v59, %v16212_v23  ;;  %v16216_v33 = vpack.i.bf16 %v16214_v1, %v16215_v38  ;;  %v13022_v17 = vpop.permute.xlu1 %10117  ;;  %v13024_v24 = vpop.permute.xlu0 %10112  ;;  %v16225_v23 = vld [vmem:[#allocation27_spill] sm:$0xff]  ;;  %v13067_v38 = vld [vmem:[#allocation2 + $0x2ab] ss:$2 sm:$0xff] }
 0x11f   : > { %v359_v15 = vrot.slane %v280_v14, 1  ;;  %v682_v0 = vrot.slane %v280_v14, 7  ;;  %v4430_v52 = vsel %vm4424_vm11, %v4397_v42, %v10030_v6  ;;  %v4398_v47 = vsel %vm4391_vm10, %v4365_v4, %v10024_v51  ;;  %v283_v6 = vld [vmem:[%s11738_s17 + $0x378] sm:$0xff]  ;;  %v288_v4 = vld [vmem:[%s11738_s17 + $0x3a0] sm:$0xff] }
 0x120   : > { %10397 = vrot.lane.b32.xlu1 %v16213_v28, %s11686_s23  ;;  %10392 = vrot.lane.b32.xlu0 %v16216_v33, %s11685_s22  ;;  %v10045_v22 = vunpack.i.h.bf16 %v16217_v9  ;;  %v10044_v37 = vunpack.i.l.bf16 %v16217_v9  ;;  %v4399_v59 = vsel %vm4391_vm10, %v4366_v60, %v10025_v55  ;;  %v10070_v27 = vunpack.i.h.bf16 %v12872_v57  ;;  %v16222_v14 = vld [vmem:[#allocation23_spill] sm:$0xff]  ;;  %v16223_v60 = vld [vmem:[#allocation20_spill] sm:$0xff]  ;;  %v16226_v28 = vld [vmem:[#allocation22_spill] sm:$0xff] }
 0x121   : > { %v10069_v21 = vunpack.i.l.bf16 %v12872_v57  ;;  %v968_v20 = vsel %vm492_vm0, %v359_v15, %v682_v0  ;;  %v4462_v44 = vsel %vm4457_vm12, %v4429_v16, %v10049_v12  ;;  %v4463_v40 = vsel %vm4457_vm12, %v4430_v52, %v10050_v63  ;;  %v16218_v57 = vld [vmem:[#allocation18_spill] sm:$0xff]  ;;  %v289_v15 = vld [vmem:[%s11738_s17 + $0x3a8] sm:$0xff] }
 0x122   : > { %v10090_v13 = vunpack.i.h.bf16 %v12934_v39  ;;  %v10089_v7 = vunpack.i.l.bf16 %v12934_v39  ;;  %1147 = vst.msk [vmem:[#allocation2 + $0x460] sm:$0xff] %vm1005_vm1, %v968_v20  ;;  %v10110_v41 = vunpack.i.h.bf16 %v10108_v43  ;;  %v10109_v34 = vunpack.i.l.bf16 %v10108_v43  ;;  %v10128_v45 = vpop.permute.xlu1 %10127  ;;  %v13069_v33 = vld [vmem:[#allocation2 + $0x2bb] ss:$2 sm:$0xff] }
 0x123   : > { %v16220_v5 = vpack.i.bf16 %v16218_v57, %v16219_v35  ;;  %v16221_v58 = vpack.i.bf16 %v12782_v54, %v12780_v19  ;;  %v683_v2 = vrot.slane %v281_v61, 7  ;;  %v685_v62 = vrot.slane %v13013_v56, 7  ;;  %v13048_v19 = vpop.permute.xlu0 %10122  ;;  %v1291_v20 = vld [vmem:[#allocation2 + $0x331] ss:$2 sm:$0xff] }
 0x124   : > { %v4431_v26 = vsel %vm4424_vm11, %v4398_v47, %v10044_v37  ;;  %v4432_v39 = vsel %vm4424_vm11, %v4399_v59, %v10045_v22  ;;  %v10065_v46 = vunpack.i.h.bf16 %v12874_v30  ;;  %v10064_v50 = vunpack.i.l.bf16 %v12874_v30  ;;  %v16228_v35 = vld [vmem:[#allocation30_spill] sm:$0xff] }
 0x125   : > { %10407 = vrot.lane.b32.xlu1 %v16220_v5, %s11694_s4  ;;  %10402 = vrot.lane.b32.xlu0 %v16221_v58, %s11693_s30  ;;  %v4495_v51 = vsel %vm4490_vm13, %v4462_v44, %v10069_v21  ;;  %v4496_v25 = vsel %vm4490_vm13, %v4463_v40, %v10070_v27  ;;  %v684_v54 = vsel %vm492_vm0, %v682_v0, %v683_v2  ;;  %v10130_v42 = vunpack.i.h.bf16 %v10128_v45  ;;  %v290_v0 = vld [vmem:[%s11738_s17 + $0x3b0] sm:$0xff]  ;;  %v1289_v21 = vld [vmem:[#allocation2 + $0x321] ss:$2 sm:$0xff]  ;;  %v16229_v5 = vld [vmem:[#allocation26_spill] sm:$0xff] }
 0x126   : > { %v686_v18 = vsel %vm492_vm0, %v683_v2, %v685_v62  ;;  %v4528_v55 = vsel %vm4523_vm14, %v4495_v51, %v10089_v7  ;;  %v4529_v43 = vsel %vm4523_vm14, %v4496_v25, %v10090_v13  ;;  %v10129_v30 = vunpack.i.l.bf16 %v10128_v45  ;;  %1148 = vst.msk [vmem:[#allocation2 + $0x468] sm:$0xff] %vm1005_vm1, %v684_v54  ;;  %v13077_v37 = vpop.permute.xlu1 %10137  ;;  %v16231_v2 = vld [vmem:[#allocation34_spill] sm:$0xff] }
 0x127   : > { %1149 = vst.msk [vmem:[#allocation2 + $0x470] sm:$0xff] %vm1005_vm1, %v686_v18  ;;  %v4561_v63 = vsel %vm16107_vm15, %v4528_v55, %v10109_v34  ;;  %v4562_v12 = vsel %vm16107_vm15, %v4529_v43, %v10110_v41  ;;  %v16224_v16 = vpack.i.bf16 %v16222_v14, %v16223_v60  ;;  %v16227_v1 = vpack.i.bf16 %v16225_v23, %v16226_v28  ;;  %v13079_v59 = vpop.permute.xlu0 %10132  ;;  %v1793_v14 = vld [vmem:[#allocation2 + $0x2d1] ss:$2 sm:$0xff]  ;;  %v1795_v60 = vld [vmem:[#allocation2 + $0x2e1] ss:$2 sm:$0xff] }
 0x128   : > { %v687_v61 = vrot.slane %v283_v6, 7  ;;  %v904_v56 = vrot.slane %v283_v6, 5  ;;  %v10085_v52 = vunpack.i.h.bf16 %v12936_v10  ;;  %v10084_v47 = vunpack.i.l.bf16 %v12936_v10 }
 0x129   : > { %10417 = vrot.lane.b32.xlu1 %v16224_v16, %s11687_s24  ;;  %10412 = vrot.lane.b32.xlu0 %v16227_v1, %s11686_s23  ;;  %v4594_v9 = vsel %vm16074_vm7, %v4561_v63, %v10129_v30  ;;  %v4595_v22 = vsel %vm16074_vm7, %v4562_v12, %v10130_v42  ;;  %v361_v13 = vrot.slane %v288_v4, 1  ;;  %v4464_v7 = vsel %vm4457_vm12, %v4431_v26, %v10064_v50  ;;  %v291_v50 = vld [vmem:[%s11738_s17 + $0x3b8] sm:$0xff] }
 0x12a   : > { %v4624_v27 = vpack.c.bf16 %v4595_v22, %v4594_v9  ;;  %v688_v44 = vsel %vm492_vm0, %v685_v62, %v687_v61  ;;  %v1000_v40 = vsel %vm492_vm0, %v687_v61, %v904_v56  ;;  %v10105_v10 = vunpack.i.h.bf16 %v12994_v3  ;;  %v16232_v62 = vld [vmem:[#allocation31_spill] sm:$0xff]  ;;  %v13105_v55 = vpop.permute.xlu1 %10147 }
 0x12b   : > { %v10104_v41 = vunpack.i.l.bf16 %v12994_v3  ;;  %v10125_v34 = vunpack.i.h.bf16 %v13048_v19  ;;  %1150 = vst.msk [vmem:[#allocation2 + $0x478] sm:$0xff] %vm1005_vm1, %v688_v44  ;;  %v10124_v57 = vunpack.i.l.bf16 %v13048_v19  ;;  %v16230_v58 = vpack.i.bf16 %v16228_v35, %v16229_v5  ;;  %16234 = vst [vmem:[#allocation8_spill] sm:$0xff] %v13105_v55  ;;  %v10143_v43 = vpop.permute.xlu0 %10142  ;;  %v1733_v56 = vld [vmem:[#allocation2 + $0x320] ss:$2 sm:$0xff]  ;;  %v13148_v35 = vld [vmem:[#allocation2 + $0x323] ss:$2 sm:$0xff] }
 0x12c   : > { %1151 = vst.msk [vmem:[#allocation2 + $0x480] sm:$0x3] %vm1010_vm2, %v1000_v40  ;;  %v16233_v26 = vpack.i.bf16 %v16231_v2, %v16232_v62  ;;  %v696_v3 = vrot.slane %v288_v4, 7  ;;  %v697_v6 = vrot.slane %v289_v15, 7  ;;  %v699_v51 = vrot.slane %v290_v0, 7  ;;  %9688 = vmatprep.mubr.msk.bf16.mxu0 %vm16073_vm9, %v4624_v27  ;;  %v284_v2 = vld [vmem:[%s11738_s17 + $0x380] sm:$0xff] }
 0x12d   : > { %10427 = vrot.lane.b32.xlu1 %v16230_v58, %s11695_s7  ;;  %v4465_v25 = vsel %vm4457_vm12, %v4432_v39, %v10065_v46  ;;  %v4497_v45 = vsel %vm4490_vm13, %v4464_v7, %v10084_v47  ;;  %v10446_v19 = vpack.i.bf16 %v1291_v20, %v1289_v21  ;;  %v10441_v54 = vpack.i.bf16 %v13069_v33, %v13067_v38  ;;  %v1735_v15 = vld [vmem:[#allocation2 + $0x330] ss:$2 sm:$0xff]  ;;  %v1295_v27 = vld [vmem:[#allocation2 + $0x381] ss:$2 sm:$0xff] }
 0x12e   : > { %10422 = vrot.lane.b32.xlu0 %v16233_v26, %s11694_s4  ;;  %v4498_v18 = vsel %vm4490_vm13, %v4465_v25, %v10085_v52  ;;  %v698_v42 = vsel %vm492_vm0, %v696_v3, %v697_v6  ;;  %v700_v30 = vsel %vm492_vm0, %v697_v6, %v699_v51  ;;  %v970_v4 = vsel %vm492_vm0, %v361_v13, %v696_v3  ;;  %v13127_v0 = vpop.permute.xlu1 %10157  ;;  %v1353_v9 = vld [vmem:[#allocation2 + $0x322] ss:$2 sm:$0xff]  ;;  %v1857_v44 = vld [vmem:[#allocation2 + $0x2d2] ss:$2 sm:$0xff]  ;;  %v13150_v5 = vld [vmem:[#allocation2 + $0x333] ss:$2 sm:$0xff] }
 0x12f   : > { %v4530_v39 = vsel %vm4523_vm14, %v4497_v45, %v10104_v41  ;;  %v4531_v46 = vsel %vm4523_vm14, %v4498_v18, %v10105_v10  ;;  %v10145_v63 = vunpack.i.h.bf16 %v10143_v43  ;;  %v10144_v12 = vunpack.i.l.bf16 %v10143_v43  ;;  %1157 = vst.msk [vmem:[#allocation2 + $0x4b0] sm:$0xff] %vm1005_vm1, %v970_v4  ;;  %1158 = vst.msk [vmem:[#allocation2 + $0x4b8] sm:$0xff] %vm1005_vm1, %v698_v42  ;;  %v13129_v52 = vpop.permute.xlu0 %10152  ;;  %v1859_v40 = vld [vmem:[#allocation2 + $0x2e2] ss:$2 sm:$0xff]  ;;  %v1797_v10 = vld [vmem:[#allocation2 + $0x321] ss:$2 sm:$0xff] }
 0x130   : > { %1159 = vst.msk [vmem:[#allocation2 + $0x4c0] sm:$0xff] %vm1005_vm1, %v700_v30  ;;  %v4563_v16 = vsel %vm16107_vm15, %v4530_v39, %v10124_v57  ;;  %v4564_v23 = vsel %vm16107_vm15, %v4531_v46, %v10125_v34  ;;  %v16235_v28 = vpack.i.bf16 %v12835_v32, %v12833_v49  ;;  %v701_v1 = vrot.slane %v291_v50, 7  ;;  %v1799_v41 = vld [vmem:[#allocation2 + $0x331] ss:$2 sm:$0xff]  ;;  %v13152_v58 = vld [vmem:[#allocation2 + $0x372] ss:$2 sm:$0xff] }
 0x131   : > { %v906_v38 = vrot.slane %v291_v50, 5  ;;  %v4596_v33 = vsel %vm16074_vm7, %v4563_v16, %v10144_v12  ;;  %v4597_v61 = vsel %vm16074_vm7, %v4564_v23, %v10145_v63  ;;  %v10451_v22 = vpack.i.bf16 %v1735_v15, %v1733_v56  ;;  %v1359_v50 = vld [vmem:[#allocation2 + $0x382] ss:$2 sm:$0xff]  ;;  %v13161_v25 = vld [vmem:[#allocation2 + $0x2e3] ss:$2 sm:$0xff]  ;;  %v13164_v45 = vld [vmem:[%s11738_s17 + $0x398] sm:$0xff] }
 0x132   : > { %10437 = vrot.lane.b32.xlu1 %v16235_v28, %s11688_s25  ;;  %10432 = vrot.lane.b32.xlu0 %v10431_v29, %s11687_s24  ;;  %v4625_v47 = vpack.c.bf16 %v4597_v61, %v4596_v33  ;;  %v702_v49 = vsel %vm492_vm0, %v699_v51, %v701_v1  ;;  %v10456_v29 = vpack.i.bf16 %v1795_v60, %v1793_v14  ;;  %v13138_v21 = vpop.permute.xlu1 %10167  ;;  %v285_v3 = vld [vmem:[%s11738_s17 + $0x388] sm:$0xff]  ;;  %v286_v6 = vld [vmem:[%s11738_s17 + $0x390] sm:$0xff]  ;;  %v13178_v39 = vld [vmem:[#allocation2 + $0x2f8] ss:$2 sm:$0xff]  ;;  %v689_v12 = vrot.slane %v284_v2, 7 }
 0x133   : > { %v1002_v32 = vsel %vm492_vm0, %v701_v1, %v906_v38  ;;  %1160 = vst.msk [vmem:[#allocation2 + $0x4c8] sm:$0xff] %vm1005_vm1, %v702_v49  ;;  %16236 = vst [vmem:[#allocation12_spill] sm:$0xff] %v13138_v21  ;;  %v13140_v20 = vpop.permute.xlu0 %10162  ;;  %v10466_v13 = vpack.i.bf16 %v1355_v31, %v1353_v9  ;;  %v10461_v7 = vpack.i.bf16 %v1295_v27, %v1293_v36  ;;  %v13159_v51 = vld [vmem:[#allocation2 + $0x2d3] ss:$2 sm:$0xff]  ;;  %v13170_v43 = vld [vmem:[#allocation2 + $0x322] ss:$2 sm:$0xff] }
 0x134   : > { %1161 = vst.msk [vmem:[#allocation2 + $0x4d0] sm:$0x3] %vm1010_vm2, %v1002_v32  ;;  %9689 = vmatmul.mubr.msk.bf16.gmra.mxu0 %vm16073_vm9, %v4625_v47  ;;  %16237 = vst [vmem:[#allocation13_spill] sm:$0xff] %v13140_v20  ;;  %v10476_v62 = vpack.i.bf16 %v1859_v40, %v1857_v44  ;;  %v10471_v26 = vpack.i.bf16 %v1799_v41, %v1797_v10  ;;  %v13172_v42 = vld [vmem:[#allocation2 + $0x332] ss:$2 sm:$0xff]  ;;  %v690_v14 = vrot.slane %v285_v3, 7 }
 0x135   : > { %v13174_v30 = vld [vmem:[#allocation2 + $0x373] ss:$2 sm:$0xff]  ;;  %v13176_v4 = vld [vmem:[#allocation2 + $0x383] ss:$2 sm:$0xff]  ;;  %v13180_v46 = vld [vmem:[#allocation2 + $0x308] ss:$2 sm:$0xff]  ;;  %v10486_v23 = vpack.i.bf16 %v13150_v5, %v13148_v35  ;;  %v10481_v28 = vpack.i.bf16 %v1359_v50, %v13152_v58  ;;  %v10496_v10 = vpack.i.bf16 %v13161_v25, %v13159_v51 }
 0x136   : > { %10447 = vrot.lane.b32.xlu1 %v10446_v19, %s11682_s19  ;;  %10442 = vrot.lane.b32.xlu0 %v10441_v54, %s11695_s7  ;;  %v13144_v34 = vpop.permute.xlu1 %10177  ;;  %v360_v19 = vrot.slane %v284_v2, 1  ;;  %v13182_v63 = vld [vmem:[#allocation2 + $0x323] ss:$2 sm:$0xff]  ;;  %v692_v60 = vrot.slane %v286_v6, 7  ;;  %v16053_v16 = vrot.slane %v13164_v45, 7  ;;  %v691_v36 = vsel %vm492_vm0, %v689_v12, %v690_v14 }
 0x137   : > { %v13146_v57 = vpop.permute.xlu0 %10172  ;;  %v13188_v1 = vld [vmem:[#allocation2 + $0x348] ss:$2 sm:$0xff]  ;;  %v13190_v38 = vld [vmem:[#allocation2 + $0x358] ss:$2 sm:$0xff]  ;;  %v13192_v33 = vld [vmem:[#allocation2 + $0x333] ss:$2 sm:$0xff]  ;;  %v10491_v2 = vpack.i.bf16 %v13172_v42, %v13170_v43 }
 0x138   : > { %v13196_v61 = vld [vmem:[#allocation2 + $0x349] ss:$2 sm:$0xff]  ;;  %v13198_v56 = vld [vmem:[#allocation2 + $0x359] ss:$2 sm:$0xff]  ;;  %v13200_v15 = vld [vmem:[#allocation2 + $0x398] ss:$2 sm:$0xff]  ;;  %v969_v35 = vsel %vm492_vm0, %v360_v19, %v689_v12 }
 0x139   : > { %v13202_v47 = vld [vmem:[#allocation2 + $0x3a8] ss:$2 sm:$0xff]  ;;  %v13204_v49 = vld [vmem:[#allocation2 + $0x2f9] ss:$2 sm:$0xff]  ;;  %v13206_v32 = vld [vmem:[#allocation2 + $0x309] ss:$2 sm:$0xff] }
 0x13a   : > { %10457 = vrot.lane.b32.xlu1 %v10456_v29, %s11689_s26  ;;  %10452 = vrot.lane.b32.xlu0 %v10451_v22, %s11688_s25  ;;  %v13166_v54 = vpop.permute.xlu1 %10187  ;;  %v13208_v9 = vld [vmem:[#allocation2 + $0x348] ss:$2 sm:$0xff]  ;;  %v13210_v31 = vld [vmem:[#allocation2 + $0x358] ss:$2 sm:$0xff]  ;;  %v693_v29 = vsel %vm492_vm0, %v690_v14, %v692_v60  ;;  %v695_v22 = vsel %vm492_vm0, %v692_v60, %v16053_v16  ;;  %v13219_v44 = vld [vmem:[#allocation2 + $0x399] ss:$2 sm:$0xff] }
 0x13b   : > { %16238 = vst [vmem:[#allocation16_spill] sm:$0xff] %v13166_v54  ;;  %v13168_v18 = vpop.permute.xlu0 %10182  ;;  %v13217_v27 = vld [vmem:[#allocation2 + $0x34a] ss:$2 sm:$0xff]  ;;  %16241 = vst [vmem:[#allocation29_spill] sm:$0xff] %v13219_v44  ;;  %v13221_v40 = vld [vmem:[#allocation2 + $0x3a9] ss:$2 sm:$0xff] }
 0x13c   : > { %16239 = vst [vmem:[#allocation17_spill] sm:$0xff] %v13168_v18  ;;  %16240 = vst [vmem:[#allocation28_spill] sm:$0xff] %v13217_v27  ;;  %v13232_v41 = vld [vmem:[#allocation2 + $0x35a] ss:$2 sm:$0xff]  ;;  %v13247_v6 = vld [vmem:[#allocation2 + $0x30a] ss:$2 sm:$0xff] }
 0x13d   : > { %16242 = vst [vmem:[#allocation15_spill] sm:$0xff] %v13221_v40  ;;  %1153 = vst.msk [vmem:[#allocation2 + $0x490] sm:$0xff] %vm1005_vm1, %v691_v36  ;;  %v292_v5 = vld [vmem:[%s11738_s17 + $0x3c0] sm:$0xff]  ;;  %v293_v58 = vld [vmem:[%s11738_s17 + $0x3c8] sm:$0xff]  ;;  %vm16255_vm3 = vcmask 64512   ;;  %vm16265_vm4 = vcmask 97280  }
 0x13e   : > { %10467 = vrot.lane.b32.xlu1 %v10466_v13, %s11681_s18  ;;  %10462 = vrot.lane.b32.xlu0 %v10461_v7, %s11682_s19  ;;  %1154 = vst.msk [vmem:[#allocation2 + $0x498] sm:$0xff] %vm1005_vm1, %v693_v29  ;;  %1155 = vst.msk [vmem:[#allocation2 + $0x4a0] sm:$0xff] %vm1005_vm1, %v695_v22  ;;  %v13226_v13 = vpop.permute.xlu1 %10197  ;;  %v13245_v3 = vld [vmem:[#allocation2 + $0x2fa] ss:$2 sm:$0xff]  ;;  %v294_v51 = vld [vmem:[%s11738_s17 + $0x3d0] sm:$0xff]  ;;  %v362_v60 = vrot.slane %v292_v5, 1 }
 0x13f   : > { %16243 = vst [vmem:[#allocation25_spill] sm:$0xff] %v13226_v13  ;;  %v13228_v7 = vpop.permute.xlu0 %10192  ;;  %16245 = vst [vmem:[#allocation21_spill] sm:$0xff] %v13245_v3  ;;  %v13255_v19 = vld [vmem:[#allocation2 + $0x349] ss:$2 sm:$0xff]  ;;  %v13257_v43 = vld [vmem:[#allocation2 + $0x359] ss:$2 sm:$0xff] }
 0x140   : > { %16244 = vst [vmem:[#allocation24_spill] sm:$0xff] %v13228_v7  ;;  %16246 = vst [vmem:[#allocation18_spill] sm:$0xff] %v13247_v6  ;;  %v13259_v42 = vld [vmem:[#allocation2 + $0x34b] ss:$2 sm:$0xff]  ;;  %v13261_v12 = vld [vmem:[#allocation2 + $0x35b] ss:$2 sm:$0xff] }
 0x141   : > { %1152 = vst.msk [vmem:[#allocation2 + $0x488] sm:$0xff] %vm1005_vm1, %v969_v35  ;;  %v13263_v14 = vld [vmem:[#allocation2 + $0x39a] ss:$2 sm:$0xff]  ;;  %v703_v36 = vrot.slane %v292_v5, 7  ;;  %v704_v29 = vrot.slane %v293_v58, 7  ;;  %v706_v54 = vrot.slane %v294_v51, 7  ;;  %vm16256_vm6 = vmmov %vm16255_vm3 }
 0x142   : > { %10477 = vrot.lane.b32.xlu1 %v10476_v62, %s11690_s27  ;;  %10472 = vrot.lane.b32.xlu0 %v10471_v26, %s11689_s26  ;;  %16247 = vst [vmem:[#allocation19_spill] sm:$0xff] %v13263_v14  ;;  %v13273_v50 = vld [vmem:[#allocation2 + $0x3aa] ss:$2 sm:$0xff]  ;;  %v13275_v26 = vld [vmem:[#allocation2 + $0x2fb] ss:$2 sm:$0xff]  ;;  %v13280_v62 = vpop.permute.xlu1 %10207  ;;  %vm16269_vm9 = vmmov %vm16256_vm6 }
 0x143   : > { %16248 = vst [vmem:[#allocation23_spill] sm:$0xff] %v13273_v50  ;;  %v13278_v16 = vld [vmem:[%s11738_s17 + $0x3d8] sm:$0xff]  ;;  %v1201_v5 = vld [vmem:[#allocation2 + $0x140] ss:$2 sm:$0xff]  ;;  %16249 = vst [vmem:[#allocation20_spill] sm:$0xff] %v13280_v62  ;;  %v705_v18 = vsel %vm492_vm0, %v703_v36, %v704_v29  ;;  %v971_v6 = vsel %vm492_vm0, %v362_v60, %v703_v36 }
 0x144   : > { %v1203_v58 = vld [vmem:[#allocation2 + $0x150] ss:$2 sm:$0xff]  ;;  %v13288_v25 = vld [vmem:[#allocation2 + $0x30b] ss:$2 sm:$0xff]  ;;  %v16251_v20 = vld [vmem:[#allocation7_spill] sm:$0xff]  ;;  %1163 = vst.msk [vmem:[#allocation2 + $0x4e0] sm:$0xff] %vm1005_vm1, %v705_v18 }
 0x145   : > { %v13290_v35 = vld [vmem:[#allocation2 + $0x34a] ss:$2 sm:$0xff]  ;;  %v10000_v21 = vunpack.i.h.bf16 %v16251_v20  ;;  %v9999_v55 = vunpack.i.l.bf16 %v16251_v20  ;;  %1173 = vst.msk [vmem:[#allocation2 + $0x530] sm:$0xff] %vm1005_vm1, %v705_v18  ;;  %v13309_v20 = vld [vmem:[#allocation2 + $0x39b] ss:$2 sm:$0xff]  ;;  %v16071_v3 = vrot.slane %v13278_v16, 7 }
 0x146   : > { %10487 = vrot.lane.b32.xlu1 %v10486_v23, %s11683_s20  ;;  %10482 = vrot.lane.b32.xlu0 %v10481_v28, %s11681_s18  ;;  %v13282_v23 = vpop.permute.xlu0 %10202  ;;  %v16252_v62 = vld [vmem:[#allocation9_spill] sm:$0xff]  ;;  %v13298_v28 = vld [vmem:[#allocation2 + $0x35a] ss:$2 sm:$0xff]  ;;  %1162 = vst.msk [vmem:[#allocation2 + $0x4d8] sm:$0xff] %vm1005_vm1, %v971_v6  ;;  %1172 = vst.msk [vmem:[#allocation2 + $0x528] sm:$0xff] %vm1005_vm1, %v971_v6  ;;  %v13327_v60 = vpop.permute.xlu1 %10217 }
 0x147   : > { %16250 = vst [vmem:[#allocation27_spill] sm:$0xff] %v13282_v23  ;;  %v10020_v7 = vunpack.i.h.bf16 %v16252_v62  ;;  %v13300_v13 = vld [vmem:[#allocation2 + $0x370] ss:$2 sm:$0xff]  ;;  %v13302_v22 = vld [vmem:[#allocation2 + $0x380] ss:$2 sm:$0xff]  ;;  %v10019_v51 = vunpack.i.l.bf16 %v16252_v62  ;;  %v707_v23 = vsel %vm492_vm0, %v704_v29, %v706_v54  ;;  %v709_v6 = vsel %vm492_vm0, %v706_v54, %v16071_v3 }
 0x148   : > { %16253 = vst [vmem:[#allocation22_spill] sm:$0xff] %v13300_v13  ;;  %v13311_v44 = vld [vmem:[#allocation2 + $0x3ab] ss:$2 sm:$0xff]  ;;  %1164 = vst.msk [vmem:[#allocation2 + $0x4e8] sm:$0xff] %vm1005_vm1, %v707_v23  ;;  %v1207_v62 = vld [vmem:[#allocation2 + $0x1a0] ss:$2 sm:$0xff]  ;;  %v4136_v18 = vsel %vm1005_vm1, %v1201_v5, %v9999_v55  ;;  %v16259_v55 = vpack.i.bf16 %v13176_v4, %v13174_v30 }
 0x149   : > { %v16254_v40 = vld [vmem:[#allocation10_spill] sm:$0xff]  ;;  %1174 = vst.msk [vmem:[#allocation2 + $0x538] sm:$0xff] %vm1005_vm1, %v707_v23  ;;  %v4137_v23 = vsel %vm1005_vm1, %v1203_v58, %v10000_v21  ;;  %1165 = vst.msk [vmem:[#allocation2 + $0x4f0] sm:$0xff] %vm1005_vm1, %v709_v6  ;;  %v16257_v29 = vld [vmem:[#allocation11_spill] sm:$0xff]  ;;  %v16258_v21 = vpack.i.bf16 %v13190_v38, %v13188_v1  ;;  %v905_v54 = vrot.slane %v13164_v45, 5  ;;  %v16264_v4 = vrot.slane %v13164_v45, 7 }
 0x14a   : > { %10497 = vrot.lane.b32.xlu1 %v10496_v10, %s11691_s28  ;;  %10492 = vrot.lane.b32.xlu0 %v10491_v2, %s11690_s27  ;;  %v10015_v27 = vunpack.i.h.bf16 %v16254_v40  ;;  %v13329_v36 = vpop.permute.xlu0 %10212  ;;  %v10014_v14 = vunpack.i.l.bf16 %v16254_v40  ;;  %1175 = vst.msk [vmem:[#allocation2 + $0x540] sm:$0xff] %vm1005_vm1, %v709_v6  ;;  %v4169_v10 = vsel %vm16255_vm3, %v4136_v18, %v10019_v51  ;;  %v4170_v2 = vsel %vm16256_vm6, %v4137_v23, %v10020_v7  ;;  %v1205_v40 = vld [vmem:[#allocation2 + $0x190] ss:$2 sm:$0xff]  ;;  %v16261_v6 = vld [vmem:[#allocation32_spill] sm:$0xff]  ;;  %v13366_v50 = vpop.permute.xlu1 %10227  ;;  %vm16268_vm3 = vmmov %vm16265_vm4 }
 0x14b   : > { %v10039_v13 = vunpack.i.l.bf16 %v16257_v29  ;;  %v10040_v58 = vunpack.i.h.bf16 %v16257_v29  ;;  %v16260_v7 = vld [vmem:[#allocation14_spill] sm:$0xff]  ;;  %v10060_v23 = vunpack.i.h.bf16 %v16261_v6  ;;  %v10059_v1 = vunpack.i.l.bf16 %v16261_v6  ;;  %v16262_v38 = vld [vmem:[#allocation33_spill] sm:$0xff]  ;;  %vm16271_vm7 = vmmov %vm16268_vm3 }
 0x14c   : > { %v4139_v5 = vsel %vm1005_vm1, %v1207_v62, %v10015_v27  ;;  %v10035_v51 = vunpack.i.h.bf16 %v16260_v7  ;;  %v10034_v18 = vunpack.i.l.bf16 %v16260_v7  ;;  %v1001_v27 = vsel %vm492_vm0, %v16264_v4, %v905_v54 }
 0x14d   : > { %v10055_v62 = vunpack.i.h.bf16 %v16262_v38  ;;  %v10080_v29 = vunpack.i.h.bf16 %v12907_v53  ;;  %v10074_v7 = vunpack.i.l.bf16 %v12909_v11  ;;  %1156 = vst.msk [vmem:[#allocation2 + $0x4a8] sm:$0x3] %vm1010_vm2, %v1001_v27  ;;  %v4138_v6 = vsel %vm1005_vm1, %v1205_v40, %v10014_v14 }
 0x14e   : > { %10507 = vrot.lane.b32.xlu1 %v16258_v21, %s11684_s21  ;;  %10502 = vrot.lane.b32.xlu0 %v16259_v55, %s11683_s20  ;;  %v10054_v21 = vunpack.i.l.bf16 %v16262_v38  ;;  %v13368_v30 = vpop.permute.xlu0 %10222  ;;  %v10079_v55 = vunpack.i.l.bf16 %v12907_v53  ;;  %v4202_v3 = vsel %vm16265_vm4, %v4169_v10, %v10039_v13  ;;  %v10099_v45 = vunpack.i.l.bf16 %v12966_v48  ;;  %vm16270_vm4 = vmmov %vm16268_vm3  ;;  %v13398_v4 = vpop.permute.xlu1 %10237 }
 0x14f   : > { %16263 = vst [vmem:[#allocation30_spill] sm:$0xff] %v13368_v30  ;;  %v10075_v30 = vunpack.i.h.bf16 %v12909_v11  ;;  %v16266_v54 = vpack.i.bf16 %v13180_v46, %v13178_v39  ;;  %v16267_v53 = vpack.i.bf16 %v13192_v33, %v13182_v63  ;;  %v4203_v38 = vsel %vm16268_vm3, %v4170_v2, %v10040_v58 }
 0x150   : > { %v4171_v14 = vsel %vm16256_vm6, %v4138_v6, %v10034_v18  ;;  %v4172_v13 = vsel %vm16269_vm9, %v4139_v5, %v10035_v51  ;;  %v10100_v11 = vunpack.i.h.bf16 %v12966_v48  ;;  %v4235_v10 = vsel %vm4226_vm5, %v4202_v3, %v10059_v1 }
 0x151   : > { %v4236_v40 = vsel %vm4226_vm5, %v4203_v38, %v10060_v23  ;;  %v4204_v39 = vsel %vm16270_vm4, %v4171_v14, %v10054_v21  ;;  %v10094_v46 = vunpack.i.l.bf16 %v12968_v8  ;;  %v4205_v33 = vsel %vm16271_vm7, %v4172_v13, %v10055_v62 }
 0x152   : > { %10517 = vrot.lane.b32.xlu1 %v16266_v54, %s11692_s29  ;;  %10512 = vrot.lane.b32.xlu0 %v16267_v53, %s11691_s28  ;;  %v13400_v63 = vpop.permute.xlu0 %10232  ;;  %vm16272_vm3 = vcmask 162816   ;;  %v4237_v48 = vsel %vm4226_vm5, %v4204_v39, %v10074_v7  ;;  %v4238_v3 = vsel %vm4226_vm5, %v4205_v33, %v10075_v30  ;;  %vm16274_vm9 = vcmask 195584  }
 0x153   : > { %v4268_v2 = vsel %vm16272_vm3, %v4235_v10, %v10079_v55  ;;  %vm16273_vm6 = vmmov %vm16272_vm3  ;;  %v10095_v51 = vunpack.i.h.bf16 %v12968_v8  ;;  %v16275_v18 = vpack.i.bf16 %v13198_v56, %v13196_v61  ;;  %v16276_v23 = vpack.i.bf16 %v13202_v47, %v13200_v15 }
 0x154   : > { %v4269_v5 = vsel %vm16273_vm6, %v4236_v40, %v10080_v29  ;;  %v4301_v58 = vsel %vm16274_vm9, %v4268_v2, %v10099_v45  ;;  %v907_v1 = vrot.slane %v13278_v16, 5  ;;  %vm16277_vm7 = vmmov %vm16274_vm9  ;;  %v10120_v30 = vunpack.i.h.bf16 %v13022_v17  ;;  %v13425_v29 = vpop.permute.xlu1 %10247 }
 0x155   : > { %v4302_v21 = vsel %vm16277_vm7, %v4269_v5, %v10100_v11  ;;  %v10119_v27 = vunpack.i.l.bf16 %v13022_v17  ;;  %v10114_v8 = vunpack.i.l.bf16 %v13024_v24  ;;  %vm16278_vm4 = vmmov %vm16272_vm3  ;;  %v10115_v61 = vunpack.i.h.bf16 %v13024_v24  ;;  %v16288_v5 = vld [vmem:[#allocation28_spill] sm:$0xff] }
 0x156   : > { %10527 = vrot.lane.b32.xlu1 %v16275_v18, %s11685_s22  ;;  %10522 = vrot.lane.b32.xlu0 %v16276_v23, %s11684_s21  ;;  %v4270_v62 = vsel %vm16278_vm4, %v4237_v48, %v10094_v46  ;;  %v10139_v56 = vunpack.i.l.bf16 %v13077_v37  ;;  %v13427_v15 = vpop.permute.xlu0 %10242  ;;  %v16279_v47 = vrot.slane %v13278_v16, 7  ;;  %v10140_v7 = vunpack.i.h.bf16 %v13077_v37  ;;  %vm16282_vm6 = vmmov %vm16277_vm7 }
 0x157   : > { %v10135_v17 = vunpack.i.h.bf16 %v13079_v59  ;;  %v10134_v6 = vunpack.i.l.bf16 %v13079_v59  ;;  %v10159_v45 = vunpack.i.l.bf16 %v13127_v0  ;;  %v4271_v24 = vsel %vm16272_vm3, %v4238_v3, %v10095_v51  ;;  %vm16283_vm9 = vmmov %vm16282_vm6  ;;  %v16290_v3 = vld [vmem:[#allocation15_spill] sm:$0xff] }
 0x158   : > { %v1003_v55 = vsel %vm492_vm0, %v16279_v47, %v907_v1  ;;  %v10160_v54 = vunpack.i.h.bf16 %v13127_v0  ;;  %v10155_v16 = vunpack.i.h.bf16 %v13129_v52  ;;  %v10154_v53 = vunpack.i.l.bf16 %v13129_v52  ;;  %v10258_v10 = vpop.permute.xlu1 %10257  ;;  %v16293_v1 = vld [vmem:[#allocation25_spill] sm:$0xff]  ;;  %v296_v47 = vld [vmem:[%s11738_s17 + $0x3e0] sm:$0xff] }
 0x159   : > { %1166 = vst.msk [vmem:[#allocation2 + $0x4f8] sm:$0x3] %vm1010_vm2, %v1003_v55  ;;  %1176 = vst.msk [vmem:[#allocation2 + $0x548] sm:$0x3] %vm1010_vm2, %v1003_v55  ;;  %v16280_v37 = vpack.i.bf16 %v13206_v32, %v13204_v49  ;;  %v16281_v59 = vpack.i.bf16 %v13210_v31, %v13208_v9  ;;  %v4334_v38 = vsel %vm4325_vm8, %v4301_v58, %v10119_v27  ;;  %v10179_v13 = vunpack.i.l.bf16 %v13144_v34  ;;  %v16291_v58 = vld [vmem:[#allocation29_spill] sm:$0xff]  ;;  %v297_v55 = vld [vmem:[%s11738_s17 + $0x3e8] sm:$0xff] }
 0x15a   : > { %v4335_v14 = vsel %vm4325_vm8, %v4302_v21, %v10120_v30  ;;  %v4303_v0 = vsel %vm16282_vm6, %v4270_v62, %v10114_v8  ;;  %v4304_v52 = vsel %vm16283_vm9, %v4271_v24, %v10115_v61  ;;  %vm16284_vm7 = vcmask 261120   ;;  %v13458_v40 = vpop.permute.xlu0 %10252 }
 0x15b   : > { %10537 = vrot.lane.b32.xlu1 %v16280_v37, %s11693_s30  ;;  %10532 = vrot.lane.b32.xlu0 %v16281_v59, %s11692_s29  ;;  %v4367_v11 = vsel %vm16284_vm7, %v4334_v38, %v10139_v56  ;;  %v10180_v49 = vunpack.i.h.bf16 %v13144_v34  ;;  %v10174_v32 = vunpack.i.l.bf16 %v13146_v57  ;;  %vm16285_vm4 = vmmov %vm16284_vm7  ;;  %v4336_v31 = vsel %vm4325_vm8, %v4303_v0, %v10134_v6 }
 0x15c   : > { %v4368_v9 = vsel %vm16285_vm4, %v4335_v14, %v10140_v7  ;;  %v4337_v39 = vsel %vm4325_vm8, %v4304_v52, %v10135_v17  ;;  %v4400_v46 = vsel %vm4391_vm10, %v4367_v11, %v10159_v45  ;;  %vm16286_vm3 = vmmov %vm16285_vm4  ;;  %v16289_v48 = vpack.i.bf16 %v13232_v41, %v16288_v5  ;;  %v13483_v61 = vpop.permute.xlu1 %10267  ;;  %v298_v52 = vld [vmem:[%s11738_s17 + $0x3f0] sm:$0xff]  ;;  %v299_v11 = vld [vmem:[%s11738_s17 + $0x3f8] sm:$0xff] }
 0x15d   : > { %v4401_v33 = vsel %vm4391_vm10, %v4368_v9, %v10160_v54  ;;  %v4369_v2 = vsel %vm16286_vm3, %v4336_v31, %v10154_v53  ;;  %vm16287_vm6 = vmmov %vm16286_vm3  ;;  %v16292_v51 = vpack.i.bf16 %v16290_v3, %v16291_v58  ;;  %v4433_v18 = vsel %vm4424_vm11, %v4400_v46, %v10179_v13  ;;  %v16295_v54 = vld [vmem:[#allocation18_spill] sm:$0xff]  ;;  %v16300_v3 = vld [vmem:[#allocation23_spill] sm:$0xff] }
 0x15e   : > { %v4370_v34 = vsel %vm16287_vm6, %v4337_v39, %v10155_v16  ;;  %v10175_v23 = vunpack.i.h.bf16 %v13146_v57  ;;  %v10200_v21 = vunpack.i.h.bf16 %v16293_v1  ;;  %v10199_v30 = vunpack.i.l.bf16 %v16293_v1  ;;  %v13485_v56 = vpop.permute.xlu0 %10262  ;;  %v16294_v57 = vld [vmem:[#allocation24_spill] sm:$0xff]  ;;  %v16296_v16 = vld [vmem:[#allocation21_spill] sm:$0xff]  ;;  %v16301_v58 = vld [vmem:[#allocation19_spill] sm:$0xff] }
 0x15f   : > { %10547 = vrot.lane.b32.xlu1 %v16289_v48, %s11686_s23  ;;  %10542 = vrot.lane.b32.xlu0 %v16292_v51, %s11685_s22  ;;  %v4434_v27 = vsel %vm4424_vm11, %v4401_v33, %v10180_v49  ;;  %v4402_v8 = vsel %vm4391_vm10, %v4369_v2, %v10174_v32  ;;  %v10220_v41 = vunpack.i.h.bf16 %v13327_v60  ;;  %v10219_v62 = vunpack.i.l.bf16 %v13327_v60 }
 0x160   : > { %v10195_v7 = vunpack.i.h.bf16 %v16294_v57  ;;  %v10240_v17 = vunpack.i.h.bf16 %v13398_v4  ;;  %v10239_v6 = vunpack.i.l.bf16 %v13398_v4  ;;  %v10260_v45 = vunpack.i.h.bf16 %v10258_v10 }
 0x161   : > { %v10259_v24 = vunpack.i.l.bf16 %v10258_v10  ;;  %v16297_v60 = vpack.i.bf16 %v16295_v54, %v16296_v16  ;;  %v16298_v53 = vpack.i.bf16 %v13257_v43, %v13255_v19  ;;  %v363_v37 = vrot.slane %v296_v47, 1  ;;  %v10278_v10 = vpop.permute.xlu1 %10277  ;;  %v2183_v54 = vld [vmem:[#allocation2 + $0x35b] ss:$2 sm:$0xff] }
 0x162   : > { %v710_v59 = vrot.slane %v296_v47, 7  ;;  %v711_v38 = vrot.slane %v297_v55, 7  ;;  %v4466_v14 = vsel %vm4457_vm12, %v4433_v18, %v10199_v30  ;;  %v4467_v0 = vsel %vm4457_vm12, %v4434_v27, %v10200_v21  ;;  %v10273_v19 = vpop.permute.xlu0 %10272 }
 0x163   : > { %10557 = vrot.lane.b32.xlu1 %v16297_v60, %s11694_s4  ;;  %10552 = vrot.lane.b32.xlu0 %v16298_v53, %s11693_s30  ;;  %v10194_v4 = vunpack.i.l.bf16 %v16294_v57  ;;  %v10215_v13 = vunpack.i.h.bf16 %v13329_v36  ;;  %v4499_v49 = vsel %vm4490_vm13, %v4466_v14, %v10219_v62  ;;  %v4500_v32 = vsel %vm4490_vm13, %v4467_v0, %v10220_v41 }
 0x164   : > { %v712_v43 = vsel %vm492_vm0, %v710_v59, %v711_v38  ;;  %v972_v9 = vsel %vm492_vm0, %v363_v37, %v710_v59  ;;  %v4532_v31 = vsel %vm4523_vm14, %v4499_v49, %v10239_v6  ;;  %v4533_v39 = vsel %vm4523_vm14, %v4500_v32, %v10240_v17  ;;  %v1299_v37 = vld [vmem:[#allocation2 + $0x3d1] ss:$2 sm:$0xff] }
 0x165   : > { %v10280_v46 = vunpack.i.h.bf16 %v10278_v10  ;;  %v10279_v33 = vunpack.i.l.bf16 %v10278_v10  ;;  %1167 = vst.msk [vmem:[#allocation2 + $0x500] sm:$0xff] %vm1005_vm1, %v972_v9  ;;  %1168 = vst.msk [vmem:[#allocation2 + $0x508] sm:$0xff] %vm1005_vm1, %v712_v43  ;;  %v4565_v2 = vsel %vm16107_vm15, %v4532_v31, %v10259_v24  ;;  %v4566_v5 = vsel %vm16107_vm15, %v4533_v39, %v10260_v45  ;;  %v13529_v47 = vpop.permute.xlu1 %10287  ;;  %v2181_v24 = vld [vmem:[#allocation2 + $0x34b] ss:$2 sm:$0xff] }
 0x166   : > { %v16299_v48 = vpack.i.bf16 %v13261_v12, %v13259_v42  ;;  %v16302_v51 = vpack.i.bf16 %v16300_v3, %v16301_v58  ;;  %v713_v18 = vrot.slane %v298_v52, 7  ;;  %v715_v1 = vrot.slane %v299_v11, 7  ;;  %v13531_v42 = vpop.permute.xlu0 %10282  ;;  %v16309_v49 = vld [vmem:[#allocation22_spill] sm:$0xff]  ;;  %v1803_v39 = vld [vmem:[#allocation2 + $0x381] ss:$2 sm:$0xff] }
 0x167   : > { %v10214_v21 = vunpack.i.l.bf16 %v13329_v36  ;;  %v10235_v30 = vunpack.i.h.bf16 %v13400_v63  ;;  %vm16303_vm9 = vcmask 490496   ;;  %v10234_v62 = vunpack.i.l.bf16 %v13400_v63  ;;  %v1801_v43 = vld [vmem:[#allocation2 + $0x371] ss:$2 sm:$0xff]  ;;  %v1363_v3 = vld [vmem:[#allocation2 + $0x3d2] ss:$2 sm:$0xff] }
 0x168   : > { %10567 = vrot.lane.b32.xlu1 %v16299_v48, %s11687_s24  ;;  %10562 = vrot.lane.b32.xlu0 %v16302_v51, %s11686_s23  ;;  %v4598_v27 = vsel %vm16303_vm9, %v4565_v2, %v10279_v33  ;;  %vm16304_vm7 = vmmov %vm16303_vm9  ;;  %v714_v55 = vsel %vm492_vm0, %v711_v38, %v713_v18  ;;  %v716_v57 = vsel %vm492_vm0, %v713_v18, %v715_v1  ;;  %v10255_v6 = vunpack.i.h.bf16 %v13458_v40  ;;  %v1743_v33 = vld [vmem:[#allocation2 + $0x3d0] ss:$2 sm:$0xff]  ;;  %v1301_v58 = vld [vmem:[#allocation2 + $0x411] ss:$2 sm:$0xff] }
 0x169   : > { %v4599_v41 = vsel %vm16304_vm7, %v4566_v5, %v10280_v46  ;;  %v4403_v17 = vsel %vm4391_vm10, %v4370_v34, %v10175_v23  ;;  %v4435_v36 = vsel %vm4424_vm11, %v4402_v8, %v10194_v4  ;;  %v10254_v45 = vunpack.i.l.bf16 %v13458_v40  ;;  %1169 = vst.msk [vmem:[#allocation2 + $0x510] sm:$0xff] %vm1005_vm1, %v714_v55  ;;  %1170 = vst.msk [vmem:[#allocation2 + $0x518] sm:$0xff] %vm1005_vm1, %v716_v57  ;;  %v1741_v46 = vld [vmem:[#allocation2 + $0x3c0] ss:$2 sm:$0xff]  ;;  %v1303_v51 = vld [vmem:[#allocation2 + $0x421] ss:$2 sm:$0xff] }
 0x16a   : > { %v4626_v12 = vpack.c.bf16 %v4599_v41, %v4598_v27  ;;  %v4436_v63 = vsel %vm4424_vm11, %v4403_v17, %v10195_v7  ;;  %v10275_v16 = vunpack.i.h.bf16 %v10273_v19  ;;  %v10274_v60 = vunpack.i.l.bf16 %v10273_v19  ;;  %v1297_v7 = vld [vmem:[#allocation2 + $0x3c1] ss:$2 sm:$0xff]  ;;  %vm16312_vm3 = vmmov %vm16304_vm7  ;;  %v1361_v48 = vld [vmem:[#allocation2 + $0x3c2] ss:$2 sm:$0xff] }
 0x16b   : > { %v16305_v34 = vpack.i.bf16 %v13288_v25, %v13275_v26  ;;  %v16306_v23 = vpack.i.bf16 %v13298_v28, %v13290_v35  ;;  %v908_v40 = vrot.slane %v299_v11, 5  ;;  %v4468_v8 = vsel %vm4457_vm12, %v4435_v36, %v10214_v21  ;;  %v13555_v26 = vpop.permute.xlu1 %10297  ;;  %v10293_v25 = vpop.permute.xlu0 %10292  ;;  %vm16313_vm6 = vmmov %vm16312_vm3  ;;  %v1865_v27 = vld [vmem:[#allocation2 + $0x372] ss:$2 sm:$0xff]  ;;  %v1867_v41 = vld [vmem:[#allocation2 + $0x382] ss:$2 sm:$0xff] }
 0x16c   : > { %v4469_v53 = vsel %vm4457_vm12, %v4436_v63, %v10215_v13  ;;  %vm16307_vm4 = vcmask 523264   ;;  %v4501_v59 = vsel %vm4490_vm13, %v4468_v8, %v10234_v62  ;;  %16308 = vst [vmem:[#allocation26_spill] sm:$0xff] %v13555_v26  ;;  %v10591_v14 = vpack.i.bf16 %v2183_v54, %v2181_v24  ;;  %v1805_v62 = vld [vmem:[#allocation2 + $0x3c1] ss:$2 sm:$0xff]  ;;  %v1365_v24 = vld [vmem:[#allocation2 + $0x412] ss:$2 sm:$0xff] }
 0x16d   : > { %10577 = vrot.lane.b32.xlu1 %v16305_v34, %s11695_s7  ;;  %10572 = vrot.lane.b32.xlu0 %v16306_v23, %s11694_s4  ;;  %v4502_v38 = vsel %vm4490_vm13, %v4469_v53, %v10235_v30  ;;  %v1004_v28 = vsel %vm492_vm0, %v715_v1, %v908_v40  ;;  %v4534_v35 = vsel %vm4523_vm14, %v4501_v59, %v10254_v45  ;;  %v10295_v4 = vunpack.i.h.bf16 %v10293_v25  ;;  %v1427_v45 = vld [vmem:[#allocation2 + $0x3d3] ss:$2 sm:$0xff]  ;;  %v1367_v54 = vld [vmem:[#allocation2 + $0x422] ss:$2 sm:$0xff]  ;;  %v1931_v40 = vld [vmem:[#allocation2 + $0x383] ss:$2 sm:$0xff] }
 0x16e   : > { %9692 = vmatprep.mubr.msk.bf16.mxu0 %vm16307_vm4, %v4626_v12  ;;  %v4535_v0 = vsel %vm4523_vm14, %v4502_v38, %v10255_v6  ;;  %v10294_v13 = vunpack.i.l.bf16 %v10293_v25  ;;  %1171 = vst.msk [vmem:[#allocation2 + $0x520] sm:$0x3] %vm1010_vm2, %v1004_v28  ;;  %v4567_v52 = vsel %vm16107_vm15, %v4534_v35, %v10274_v60  ;;  %v16310_v32 = vpack.i.bf16 %v13302_v22, %v16309_v49  ;;  %vm16314_vm2 = vmmov %vm16307_vm4  ;;  %v1807_v12 = vld [vmem:[#allocation2 + $0x3d1] ss:$2 sm:$0xff]  ;;  %v1869_v8 = vld [vmem:[#allocation2 + $0x3c2] ss:$2 sm:$0xff] }
 0x16f   : > { %v4568_v11 = vsel %vm16107_vm15, %v4535_v0, %v10275_v16  ;;  %v16311_v10 = vpack.i.bf16 %v13311_v44, %v13309_v20  ;;  %v10596_v19 = vpack.i.bf16 %v1299_v37, %v1297_v7  ;;  %v13573_v2 = vpop.permute.xlu1 %10307  ;;  %v13575_v5 = vpop.permute.xlu0 %10302  ;;  %v10606_v44 = vpack.i.bf16 %v1803_v39, %v1801_v43  ;;  %v1425_v6 = vld [vmem:[#allocation2 + $0x3c3] ss:$2 sm:$0xff]  ;;  %v1929_v23 = vld [vmem:[#allocation2 + $0x373] ss:$2 sm:$0xff]  ;;  %v1871_v53 = vld [vmem:[#allocation2 + $0x3d2] ss:$2 sm:$0xff] }
 0x170   : > { %v4600_v9 = vsel %vm16312_vm3, %v4567_v52, %v10294_v13  ;;  %v4601_v31 = vsel %vm16313_vm6, %v4568_v11, %v10295_v4  ;;  %v10601_v20 = vpack.i.bf16 %v1743_v33, %v1741_v46  ;;  %v10616_v21 = vpack.i.bf16 %v1363_v3, %v1361_v48  ;;  %v1489_v59 = vld [vmem:[#allocation2 + $0x3e8] ss:$2 sm:$0xff]  ;;  %v1429_v38 = vld [vmem:[#allocation2 + $0x413] ss:$2 sm:$0xff]  ;;  %v1431_v25 = vld [vmem:[#allocation2 + $0x423] ss:$2 sm:$0xff] }
 0x171   : > { %10587 = vrot.lane.b32.xlu1 %v16310_v32, %s11688_s25  ;;  %10582 = vrot.lane.b32.xlu0 %v16311_v10, %s11687_s24  ;;  %v4627_v22 = vpack.c.bf16 %v4601_v31, %v4600_v9  ;;  %v10611_v30 = vpack.i.bf16 %v1303_v51, %v1301_v58  ;;  %v10626_v17 = vpack.i.bf16 %v1867_v41, %v1865_v27  ;;  %v1491_v35 = vld [vmem:[#allocation2 + $0x3f8] ss:$2 sm:$0xff]  ;;  %v13606_v4 = vld [vmem:[#allocation2 + $0x3a8] ss:$2 sm:$0xff]  ;;  %v13608_v13 = vld [vmem:[#allocation2 + $0x3c3] ss:$2 sm:$0xff] }
 0x172   : > { %v10621_v36 = vpack.i.bf16 %v1807_v12, %v1805_v62  ;;  %v10636_v60 = vpack.i.bf16 %v1427_v45, %v1425_v6  ;;  %v10631_v34 = vpack.i.bf16 %v1367_v54, %v1365_v24  ;;  %v10641_v28 = vpack.i.bf16 %v1871_v53, %v1869_v8  ;;  %v13604_v0 = vld [vmem:[#allocation2 + $0x398] ss:$2 sm:$0xff]  ;;  %v13610_v52 = vld [vmem:[#allocation2 + $0x3d3] ss:$2 sm:$0xff]  ;;  %v13618_v10 = vld [vmem:[#allocation2 + $0x448] ss:$2 sm:$0xff] }
 0x173   : > { %9693 = vmatmul.mubr.msk.bf16.gmra.mxu0 %vm16314_vm2, %v4627_v22  ;;  %v13580_v18 = vpop.permute.xlu1 %10317  ;;  %v13582_v1 = vpop.permute.xlu0 %10312  ;;  %v13612_v11 = vld [vmem:[#allocation2 + $0x3e9] ss:$2 sm:$0xff]  ;;  %v13614_v49 = vld [vmem:[#allocation2 + $0x3f9] ss:$2 sm:$0xff]  ;;  %v13616_v32 = vld [vmem:[#allocation2 + $0x438] ss:$2 sm:$0xff]  ;;  %v10656_v3 = vpack.i.bf16 %v1491_v35, %v1489_v59  ;;  %v10651_v58 = vpack.i.bf16 %v1431_v25, %v1429_v38  ;;  %v10666_v27 = vpack.i.bf16 %v13606_v4, %v13604_v0  ;;  %v10661_v6 = vpack.i.bf16 %v13610_v52, %v13608_v13 }
 0x174   : > { %16315 = vst [vmem:[#allocation34_spill] sm:$0xff] %v13580_v18  ;;  %16316 = vst [vmem:[#allocation31_spill] sm:$0xff] %v13582_v1  ;;  %v13622_v43 = vld [vmem:[#allocation2 + $0x3a9] ss:$2 sm:$0xff]  ;;  %v13628_v39 = vld [vmem:[#allocation2 + $0x3e8] ss:$2 sm:$0xff] }
 0x175   : > { %10597 = vrot.lane.b32.xlu1 %v10596_v19, %s11682_s19  ;;  %10592 = vrot.lane.b32.xlu0 %v10591_v14, %s11695_s7  ;;  %v10646_v14 = vpack.i.bf16 %v1931_v40, %v1929_v23  ;;  %v13620_v19 = vld [vmem:[#allocation2 + $0x399] ss:$2 sm:$0xff]  ;;  %v13630_v46 = vld [vmem:[#allocation2 + $0x3f8] ss:$2 sm:$0xff]  ;;  %v16327_v54 = vld [vmem:[#allocation12_spill] sm:$0xff]  ;;  %vm16334_vm9 = vcmask 64512  }
 0x176   : > { %v13632_v33 = vld [vmem:[#allocation2 + $0x3ea] ss:$2 sm:$0xff]  ;;  %v13634_v22 = vld [vmem:[#allocation2 + $0x3fa] ss:$2 sm:$0xff]  ;;  %v13652_v41 = vld [vmem:[#allocation2 + $0x3eb] ss:$2 sm:$0xff] }
 0x177   : > { %v13586_v55 = vpop.permute.xlu1 %10327  ;;  %v13588_v57 = vpop.permute.xlu0 %10322  ;;  %v13640_v48 = vld [vmem:[#allocation2 + $0x39a] ss:$2 sm:$0xff]  ;;  %v13644_v51 = vld [vmem:[#allocation2 + $0x3aa] ss:$2 sm:$0xff]  ;;  %v13654_v62 = vld [vmem:[#allocation2 + $0x3fb] ss:$2 sm:$0xff] }
 0x178   : > { %v13656_v12 = vld [vmem:[#allocation2 + $0x43a] ss:$2 sm:$0xff]  ;;  %v13674_v23 = vld [vmem:[#allocation2 + $0x3ab] ss:$2 sm:$0xff]  ;;  %v13684_v38 = vld [vmem:[#allocation2 + $0x3ea] ss:$2 sm:$0xff] }
 0x179   : > { %10607 = vrot.lane.b32.xlu1 %v10606_v44, %s11689_s26  ;;  %10602 = vrot.lane.b32.xlu0 %v10601_v20, %s11688_s25  ;;  %v13636_v44 = vld [vmem:[#allocation2 + $0x439] ss:$2 sm:$0xff]  ;;  %v13638_v20 = vld [vmem:[#allocation2 + $0x449] ss:$2 sm:$0xff]  ;;  %16321 = vst [vmem:[#allocation14_spill] sm:$0xff] %v13656_v12  ;;  %16324 = vst [vmem:[#allocation28_spill] sm:$0xff] %v13674_v23 }
 0x17a   : > { %v13686_v25 = vld [vmem:[#allocation2 + $0x3fa] ss:$2 sm:$0xff]  ;;  %v13700_v59 = vld [vmem:[#allocation2 + $0x43b] ss:$2 sm:$0xff]  ;;  %v13702_v53 = vld [vmem:[#allocation2 + $0x44b] ss:$2 sm:$0xff] }
 0x17b   : > { %v13592_v63 = vpop.permute.xlu1 %10337  ;;  %v13594_v16 = vpop.permute.xlu0 %10332  ;;  %v13698_v52 = vld [vmem:[#allocation2 + $0x420] ss:$2 sm:$0xff]  ;;  %16326 = vst [vmem:[#allocation15_spill] sm:$0xff] %v13700_v59  ;;  %v1211_v40 = vld [vmem:[#allocation2 + $0x1f0] ss:$2 sm:$0xff]  ;;  %vm16335_vm7 = vmmov %vm16334_vm9  ;;  %vm16336_vm4 = vcmask 97280  }
 0x17c   : > { %16317 = vst [vmem:[#allocation7_spill] sm:$0xff] %v13592_v63  ;;  %16318 = vst [vmem:[#allocation9_spill] sm:$0xff] %v13594_v16  ;;  %v1209_v8 = vld [vmem:[#allocation2 + $0x1e0] ss:$2 sm:$0xff]  ;;  %v16328_v24 = vld [vmem:[#allocation13_spill] sm:$0xff] }
 0x17d   : > { %10617 = vrot.lane.b32.xlu1 %v10616_v21, %s11681_s18  ;;  %10612 = vrot.lane.b32.xlu0 %v10611_v30, %s11682_s19  ;;  %v13646_v21 = vld [vmem:[#allocation2 + $0x3e9] ss:$2 sm:$0xff]  ;;  %v13648_v30 = vld [vmem:[#allocation2 + $0x3f9] ss:$2 sm:$0xff]  ;;  %v1215_v45 = vld [vmem:[#allocation2 + $0x240] ss:$2 sm:$0xff]  ;;  %v10164_v13 = vunpack.i.l.bf16 %v16328_v24 }
 0x17e   : > { %v1213_v18 = vld [vmem:[#allocation2 + $0x230] ss:$2 sm:$0xff]  ;;  %vm16338_vm3 = vmmov %vm16336_vm4 }
 0x17f   : > { %v13598_v7 = vpop.permute.xlu1 %10347  ;;  %v13600_v37 = vpop.permute.xlu0 %10342  ;;  %vm16339_vm6 = vmmov %vm16335_vm7 }
 0x180   : > { %vm16340_vm2 = vmmov %vm16339_vm6 }
 0x181   : > { %10627 = vrot.lane.b32.xlu1 %v10626_v17, %s11690_s27  ;;  %10622 = vrot.lane.b32.xlu0 %v10621_v36, %s11689_s26 }
 0x183   : > { %v13624_v9 = vpop.permute.xlu1 %10357  ;;  %v13626_v31 = vpop.permute.xlu0 %10352 }
 0x184   : > { %16319 = vst [vmem:[#allocation10_spill] sm:$0xff] %v13624_v9  ;;  %16320 = vst [vmem:[#allocation11_spill] sm:$0xff] %v13626_v31  ;;  %v16329_v31 = vld [vmem:[#allocation16_spill] sm:$0xff] }
 0x185   : > { %10637 = vrot.lane.b32.xlu1 %v10636_v60, %s11683_s20  ;;  %10632 = vrot.lane.b32.xlu0 %v10631_v34, %s11681_s18  ;;  %v13670_v60 = vld [vmem:[#allocation2 + $0x44a] ss:$2 sm:$0xff]  ;;  %v13672_v34 = vld [vmem:[#allocation2 + $0x39b] ss:$2 sm:$0xff]  ;;  %v10189_v9 = vunpack.i.l.bf16 %v16329_v31  ;;  %v10190_v26 = vunpack.i.h.bf16 %v16329_v31 }
 0x186   : > { %16323 = vst [vmem:[#allocation33_spill] sm:$0xff] %v13672_v34  ;;  %v16333_v34 = vld [vmem:[#allocation20_spill] sm:$0xff] }
 0x187   : > { %v13658_v17 = vpop.permute.xlu1 %10367  ;;  %v13660_v36 = vpop.permute.xlu0 %10362  ;;  %v10209_v23 = vunpack.i.l.bf16 %v16333_v34  ;;  %v10210_v12 = vunpack.i.h.bf16 %v16333_v34  ;;  %v16341_v34 = vld [vmem:[#allocation30_spill] sm:$0xff] }
 0x188   : > { %16322 = vst [vmem:[#allocation32_spill] sm:$0xff] %v13660_v36  ;;  %v16332_v36 = vld [vmem:[#allocation17_spill] sm:$0xff] }
 0x189   : > { %10647 = vrot.lane.b32.xlu1 %v10646_v14, %s11691_s28  ;;  %10642 = vrot.lane.b32.xlu0 %v10641_v28, %s11690_s27  ;;  %v13688_v14 = vld [vmem:[#allocation2 + $0x410] ss:$2 sm:$0xff]  ;;  %v16325_v28 = vld [vmem:[#allocation8_spill] sm:$0xff]  ;;  %v10184_v4 = vunpack.i.l.bf16 %v16332_v36  ;;  %v10185_v1 = vunpack.i.h.bf16 %v16332_v36 }
 0x18a   : > { %v10150_v35 = vunpack.i.h.bf16 %v16325_v28  ;;  %v10149_v0 = vunpack.i.l.bf16 %v16325_v28  ;;  %v10170_v28 = vunpack.i.h.bf16 %v16327_v54 }
 0x18b   : > { %v13711_v16 = vpop.permute.xlu1 %10377  ;;  %v13713_v63 = vpop.permute.xlu0 %10372 }
 0x18c   : > { %16330 = vst [vmem:[#allocation29_spill] sm:$0xff] %v13711_v16  ;;  %16331 = vst [vmem:[#allocation25_spill] sm:$0xff] %v13713_v63  ;;  %v4141_v16 = vsel %vm1005_vm1, %v1211_v40, %v10150_v35  ;;  %v4140_v63 = vsel %vm1005_vm1, %v1209_v8, %v10149_v0  ;;  %v4142_v40 = vsel %vm1005_vm1, %v1213_v18, %v10164_v13  ;;  %v16337_v35 = vld [vmem:[#allocation27_spill] sm:$0xff]  ;;  %v10225_v13 = vunpack.i.h.bf16 %v16341_v34 }
 0x18d   : > { %10657 = vrot.lane.b32.xlu1 %v10656_v3, %s11684_s21  ;;  %10652 = vrot.lane.b32.xlu0 %v10651_v58, %s11683_s20  ;;  %v10169_v3 = vunpack.i.l.bf16 %v16327_v54  ;;  %v10165_v58 = vunpack.i.h.bf16 %v16328_v24  ;;  %v4174_v54 = vsel %vm16335_vm7, %v4141_v16, %v10170_v28  ;;  %v10205_v36 = vunpack.i.h.bf16 %v16337_v35  ;;  %vm16345_vm7 = vmmov %vm16338_vm3 }
 0x18e   : > { %v10204_v0 = vunpack.i.l.bf16 %v16337_v35  ;;  %v4175_v16 = vsel %vm16339_vm6, %v4142_v40, %v10184_v4  ;;  %v10224_v28 = vunpack.i.l.bf16 %v16341_v34  ;;  %v10244_v4 = vunpack.i.l.bf16 %v13427_v15 }
 0x18f   : > { %v4173_v31 = vsel %vm16334_vm9, %v4140_v63, %v10169_v3  ;;  %v4143_v24 = vsel %vm1005_vm1, %v1215_v45, %v10165_v58  ;;  %v13739_v59 = vpop.permute.xlu1 %10387  ;;  %v4207_v63 = vsel %vm16338_vm3, %v4174_v54, %v10190_v26  ;;  %v10229_v45 = vunpack.i.l.bf16 %v13366_v50  ;;  %vm16344_vm9 = vmmov %vm16338_vm3 }
 0x190   : > { %v4206_v8 = vsel %vm16336_vm4, %v4173_v31, %v10189_v9  ;;  %v4176_v18 = vsel %vm16340_vm2, %v4143_v24, %v10185_v1  ;;  %v16342_v3 = vpack.i.bf16 %v13614_v49, %v13612_v11  ;;  %v16343_v26 = vpack.i.bf16 %v13618_v10, %v13616_v32 }
 0x191   : > { %10667 = vrot.lane.b32.xlu1 %v10666_v27, %s11692_s29  ;;  %10662 = vrot.lane.b32.xlu0 %v10661_v6, %s11691_s28  ;;  %v13741_v27 = vpop.permute.xlu0 %10382  ;;  %v10230_v6 = vunpack.i.h.bf16 %v13366_v50  ;;  %v4239_v9 = vsel %vm4226_vm5, %v4206_v8, %v10209_v23  ;;  %v4240_v50 = vsel %vm4226_vm5, %v4207_v63, %v10210_v12  ;;  %v10250_v1 = vunpack.i.h.bf16 %v13425_v29 }
 0x192   : > { %v10249_v23 = vunpack.i.l.bf16 %v13425_v29  ;;  %v4208_v58 = vsel %vm16344_vm9, %v4175_v16, %v10204_v0  ;;  %v4209_v54 = vsel %vm16345_vm7, %v4176_v18, %v10205_v36  ;;  %v10245_v11 = vunpack.i.h.bf16 %v13427_v15 }
 0x193   : > { %v10269_v49 = vunpack.i.l.bf16 %v13483_v61  ;;  %v13767_v24 = vpop.permute.xlu1 %10397  ;;  %vm16346_vm4 = vcmask 162816   ;;  %v10270_v29 = vunpack.i.h.bf16 %v13483_v61  ;;  %v10264_v31 = vunpack.i.l.bf16 %v13485_v56 }
 0x194   : > { %v4272_v10 = vsel %vm16346_vm4, %v4239_v9, %v10229_v45  ;;  %vm16347_vm3 = vmmov %vm16346_vm4  ;;  %v4241_v40 = vsel %vm4226_vm5, %v4208_v58, %v10224_v28  ;;  %v4242_v8 = vsel %vm4226_vm5, %v4209_v54, %v10225_v13  ;;  %v10265_v15 = vunpack.i.h.bf16 %v13485_v56 }
 0x195   : > { %10677 = vrot.lane.b32.xlu1 %v16342_v3, %s11685_s22  ;;  %10672 = vrot.lane.b32.xlu0 %v16343_v26, %s11684_s21  ;;  %v13769_v32 = vpop.permute.xlu0 %10392  ;;  %v4273_v12 = vsel %vm16347_vm3, %v4240_v50, %v10230_v6  ;;  %v10289_v35 = vunpack.i.l.bf16 %v13529_v47  ;;  %v16348_v36 = vpack.i.bf16 %v13622_v43, %v13620_v19  ;;  %v16349_v0 = vpack.i.bf16 %v13630_v46, %v13628_v39  ;;  %vm16352_vm9 = vmmov %vm16347_vm3 }
 0x196   : > { %vm16350_vm6 = vcmask 195584   ;;  %v4274_v16 = vsel %vm16352_vm9, %v4241_v40, %v10244_v4  ;;  %v10290_v56 = vunpack.i.h.bf16 %v13529_v47  ;;  %vm16353_vm7 = vmmov %vm16347_vm3  ;;  %v10285_v19 = vunpack.i.h.bf16 %v13531_v42 }
 0x197   : > { %v4305_v61 = vsel %vm16350_vm6, %v4272_v10, %v10249_v23  ;;  %vm16351_vm2 = vmmov %vm16350_vm6  ;;  %v4275_v6 = vsel %vm16353_vm7, %v4242_v8, %v10245_v11  ;;  %v10284_v43 = vunpack.i.l.bf16 %v13531_v42  ;;  %v10408_v18 = vpop.permute.xlu1 %10407  ;;  %v10310_v34 = vunpack.i.h.bf16 %v13573_v2 }
 0x198   : > { %v4306_v63 = vsel %vm16351_vm2, %v4273_v12, %v10250_v1  ;;  %v4338_v45 = vsel %vm4325_vm8, %v4305_v61, %v10269_v49  ;;  %vm16354_vm4 = vmmov %vm16351_vm2  ;;  %v10309_v13 = vunpack.i.l.bf16 %v13573_v2  ;;  %vm16356_vm6 = vcmask 261120  }
 0x199   : > { %10687 = vrot.lane.b32.xlu1 %v16348_v36, %s11693_s30  ;;  %10682 = vrot.lane.b32.xlu0 %v16349_v0, %s11692_s29  ;;  %v13795_v9 = vpop.permute.xlu0 %10402  ;;  %v4339_v39 = vsel %vm4325_vm8, %v4306_v63, %v10270_v29  ;;  %v4307_v46 = vsel %vm16354_vm4, %v4274_v16, %v10264_v31  ;;  %vm16355_vm3 = vmmov %vm16351_vm2  ;;  %v4371_v28 = vsel %vm16356_vm6, %v4338_v45, %v10289_v35  ;;  %v10330_v3 = vunpack.i.h.bf16 %v13586_v55 }
 0x19a   : > { %v4308_v47 = vsel %vm16355_vm3, %v4275_v6, %v10265_v15  ;;  %v10329_v26 = vunpack.i.l.bf16 %v13586_v55  ;;  %v16357_v42 = vpack.i.bf16 %v13634_v22, %v13632_v33  ;;  %v16358_v50 = vpack.i.bf16 %v13638_v20, %v13636_v44  ;;  %vm16359_vm2 = vmmov %vm16356_vm6 }
 0x19b   : > { %v4372_v2 = vsel %vm16359_vm2, %v4339_v39, %v10290_v56  ;;  %v10304_v1 = vunpack.i.l.bf16 %v13575_v5  ;;  %v10350_v23 = vunpack.i.h.bf16 %v13598_v7  ;;  %v10349_v4 = vunpack.i.l.bf16 %v13598_v7  ;;  %v13821_v54 = vpop.permute.xlu1 %10417  ;;  %vm16362_vm9 = vmmov %vm16359_vm2  ;;  %v16366_v39 = vld [vmem:[#allocation32_spill] sm:$0xff] }
 0x19c   : > { %v4340_v55 = vsel %vm4325_vm8, %v4307_v46, %v10284_v43  ;;  %v4341_v58 = vsel %vm4325_vm8, %v4308_v47, %v10285_v19  ;;  %v10370_v33 = vunpack.i.h.bf16 %v13658_v17  ;;  %v10369_v22 = vunpack.i.l.bf16 %v13658_v17  ;;  %v16364_v43 = vld [vmem:[#allocation14_spill] sm:$0xff]  ;;  %vm16369_vm3 = vmmov %vm16359_vm2 }
 0x19d   : > { %10697 = vrot.lane.b32.xlu1 %v16357_v42, %s11686_s23  ;;  %10692 = vrot.lane.b32.xlu0 %v16358_v50, %s11685_s22  ;;  %v13823_v44 = vpop.permute.xlu0 %10412  ;;  %v4404_v20 = vsel %vm4391_vm10, %v4371_v28, %v10309_v13  ;;  %v4405_v11 = vsel %vm4391_vm10, %v4372_v2, %v10310_v34  ;;  %v10390_v49 = vunpack.i.h.bf16 %v13739_v59  ;;  %v10389_v7 = vunpack.i.l.bf16 %v13739_v59 }
 0x19e   : > { %v4437_v10 = vsel %vm4424_vm11, %v4404_v20, %v10329_v26  ;;  %v4438_v12 = vsel %vm4424_vm11, %v4405_v11, %v10330_v3  ;;  %v10410_v29 = vunpack.i.h.bf16 %v10408_v18  ;;  %v10409_v31 = vunpack.i.l.bf16 %v10408_v18 }
 0x19f   : > { %v16360_v17 = vpack.i.bf16 %v13644_v51, %v13640_v48  ;;  %v16361_v40 = vpack.i.bf16 %v13648_v30, %v13646_v21  ;;  %v10305_v8 = vunpack.i.h.bf16 %v13575_v5  ;;  %v4373_v59 = vsel %vm16362_vm9, %v4340_v55, %v10304_v1  ;;  %v10428_v61 = vpop.permute.xlu1 %10427  ;;  %v2189_v1 = vld [vmem:[#allocation2 + $0x3eb] ss:$2 sm:$0xff] }
 0x1a0   : > { %v4470_v15 = vsel %vm4457_vm12, %v4437_v10, %v10349_v4  ;;  %v4471_v35 = vsel %vm4457_vm12, %v4438_v12, %v10350_v23  ;;  %v10325_v36 = vunpack.i.h.bf16 %v13588_v57  ;;  %v10324_v0 = vunpack.i.l.bf16 %v13588_v57  ;;  %v2191_v23 = vld [vmem:[#allocation2 + $0x3fb] ss:$2 sm:$0xff] }
 0x1a1   : > { %10707 = vrot.lane.b32.xlu1 %v16360_v17, %s11694_s4  ;;  %10702 = vrot.lane.b32.xlu0 %v16361_v40, %s11693_s30  ;;  %v4503_v48 = vsel %vm4490_vm13, %v4470_v15, %v10369_v22  ;;  %v4504_v51 = vsel %vm4490_vm13, %v4471_v35, %v10370_v33  ;;  %v10423_v63 = vpop.permute.xlu0 %10422  ;;  %v10430_v30 = vunpack.i.h.bf16 %v10428_v61  ;;  %v10429_v16 = vunpack.i.l.bf16 %v10428_v61  ;;  %v16370_v33 = vld [vmem:[#allocation28_spill] sm:$0xff]  ;;  %v16371_v22 = vld [vmem:[#allocation33_spill] sm:$0xff] }
 0x1a2   : > { %v4536_v21 = vsel %vm4523_vm14, %v4503_v48, %v10389_v7  ;;  %v4537_v5 = vsel %vm4523_vm14, %v4504_v51, %v10390_v49  ;;  %v10345_v56 = vunpack.i.h.bf16 %v13600_v37  ;;  %v10344_v6 = vunpack.i.l.bf16 %v13600_v37  ;;  %v1305_v7 = vld [vmem:[#allocation2 + $0x461] ss:$2 sm:$0xff]  ;;  %v1307_v10 = vld [vmem:[#allocation2 + $0x471] ss:$2 sm:$0xff] }
 0x1a3   : > { %v4569_v45 = vsel %vm16107_vm15, %v4536_v21, %v10409_v31  ;;  %v4570_v57 = vsel %vm16107_vm15, %v4537_v5, %v10410_v29  ;;  %v16363_v19 = vpack.i.bf16 %v13654_v62, %v13652_v41  ;;  %v16365_v18 = vpack.i.bf16 %v13670_v60, %v16364_v43  ;;  %v1809_v61 = vld [vmem:[#allocation2 + $0x411] ss:$2 sm:$0xff]  ;;  %v1811_v5 = vld [vmem:[#allocation2 + $0x421] ss:$2 sm:$0xff] }
 0x1a4   : > { %v10365_v46 = vunpack.i.h.bf16 %v16366_v39  ;;  %v10364_v34 = vunpack.i.l.bf16 %v16366_v39  ;;  %vm16367_vm7 = vcmask 490496   ;;  %v4374_v47 = vsel %vm16369_vm3, %v4341_v58, %v10305_v8  ;;  %v13868_v62 = vpop.permute.xlu1 %10437  ;;  %v1311_v43 = vld [vmem:[#allocation2 + $0x4c1] ss:$2 sm:$0xff] }
 0x1a5   : > { %10717 = vrot.lane.b32.xlu1 %v16363_v19, %s11687_s24  ;;  %10712 = vrot.lane.b32.xlu0 %v16365_v18, %s11686_s23  ;;  %v4602_v37 = vsel %vm16367_vm7, %v4569_v45, %v10429_v16  ;;  %vm16368_vm4 = vmmov %vm16367_vm7  ;;  %v10385_v28 = vunpack.i.h.bf16 %v13741_v27  ;;  %v10384_v41 = vunpack.i.l.bf16 %v13741_v27  ;;  %v13870_v3 = vpop.permute.xlu0 %10432  ;;  %v4406_v26 = vsel %vm4391_vm10, %v4373_v59, %v10324_v0  ;;  %v16377_v0 = vld [vmem:[#allocation15_spill] sm:$0xff]  ;;  %v1751_v16 = vld [vmem:[#allocation2 + $0x470] ss:$2 sm:$0xff] }
 0x1a6   : > { %v4603_v13 = vsel %vm16368_vm4, %v4570_v57, %v10430_v30  ;;  %v4407_v42 = vsel %vm4391_vm10, %v4374_v47, %v10325_v36  ;;  %v10405_v50 = vunpack.i.h.bf16 %v13795_v9  ;;  %v10404_v2 = vunpack.i.l.bf16 %v13795_v9  ;;  %vm16379_vm2 = vmmov %vm16368_vm4  ;;  %v1749_v30 = vld [vmem:[#allocation2 + $0x460] ss:$2 sm:$0xff]  ;;  %v1309_v19 = vld [vmem:[#allocation2 + $0x4b1] ss:$2 sm:$0xff] }
 0x1a7   : > { %v4628_v60 = vpack.c.bf16 %v4603_v13, %v4602_v37  ;;  %v4439_v4 = vsel %vm4424_vm11, %v4406_v26, %v10344_v6  ;;  %v4440_v55 = vsel %vm4424_vm11, %v4407_v42, %v10345_v56  ;;  %v10425_v27 = vunpack.i.h.bf16 %v10423_v63  ;;  %vm16380_vm9 = vmmov %vm16379_vm2  ;;  %v1369_v45 = vld [vmem:[#allocation2 + $0x462] ss:$2 sm:$0xff]  ;;  %v1371_v57 = vld [vmem:[#allocation2 + $0x472] ss:$2 sm:$0xff] }
 0x1a8   : > { %v10424_v58 = vunpack.i.l.bf16 %v10423_v63  ;;  %v16372_v20 = vpack.i.bf16 %v16370_v33, %v16371_v22  ;;  %v16373_v11 = vpack.i.bf16 %v13686_v25, %v13684_v38  ;;  %v4472_v9 = vsel %vm4457_vm12, %v4439_v4, %v10364_v34  ;;  %v13891_v31 = vpop.permute.xlu1 %10447  ;;  %v1873_v37 = vld [vmem:[#allocation2 + $0x412] ss:$2 sm:$0xff]  ;;  %v1875_v13 = vld [vmem:[#allocation2 + $0x422] ss:$2 sm:$0xff]  ;;  %v1813_v47 = vld [vmem:[#allocation2 + $0x461] ss:$2 sm:$0xff] }
 0x1a9   : > { %v4473_v49 = vsel %vm4457_vm12, %v4440_v55, %v10365_v46  ;;  %vm16374_vm6 = vcmask 523264   ;;  %v4505_v12 = vsel %vm4490_vm13, %v4472_v9, %v10384_v41  ;;  %16375 = vst [vmem:[#allocation24_spill] sm:$0xff] %v13891_v31  ;;  %v10443_v17 = vpop.permute.xlu0 %10442  ;;  %v10741_v40 = vpack.i.bf16 %v2191_v23, %v2189_v1  ;;  %v13924_v26 = vld [vmem:[#allocation2 + $0x463] ss:$2 sm:$0xff]  ;;  %v13926_v42 = vld [vmem:[#allocation2 + $0x473] ss:$2 sm:$0xff] }
 0x1aa   : > { %10727 = vrot.lane.b32.xlu1 %v16372_v20, %s11695_s7  ;;  %10722 = vrot.lane.b32.xlu0 %v16373_v11, %s11694_s4  ;;  %v4506_v29 = vsel %vm4490_vm13, %v4473_v49, %v10385_v28  ;;  %v4538_v8 = vsel %vm4523_vm14, %v4505_v12, %v10404_v2  ;;  %v10445_v25 = vunpack.i.h.bf16 %v10443_v17  ;;  %v10444_v59 = vunpack.i.l.bf16 %v10443_v17  ;;  %vm16381_vm7 = vmmov %vm16374_vm6  ;;  %v1815_v28 = vld [vmem:[#allocation2 + $0x471] ss:$2 sm:$0xff]  ;;  %v13930_v2 = vld [vmem:[#allocation2 + $0x4c2] ss:$2 sm:$0xff] }
 0x1ab   : > { %9696 = vmatprep.mubr.msk.bf16.mxu0 %vm16374_vm6, %v4628_v60  ;;  %v4539_v38 = vsel %vm4523_vm14, %v4506_v29, %v10405_v50  ;;  %v4571_v15 = vsel %vm16107_vm15, %v4538_v8, %v10424_v58  ;;  %v16376_v36 = vpack.i.bf16 %v13698_v52, %v13688_v14  ;;  %v16378_v48 = vpack.i.bf16 %v13702_v53, %v16377_v0  ;;  %v13928_v50 = vld [vmem:[#allocation2 + $0x4b2] ss:$2 sm:$0xff]  ;;  %v13934_v4 = vld [vmem:[#allocation2 + $0x413] ss:$2 sm:$0xff]  ;;  %v13936_v55 = vld [vmem:[#allocation2 + $0x423] ss:$2 sm:$0xff] }
 0x1ac   : > { %v4572_v35 = vsel %vm16107_vm15, %v4539_v38, %v10425_v27  ;;  %v10746_v51 = vpack.i.bf16 %v1307_v10, %v1305_v7  ;;  %v4604_v63 = vsel %vm16379_vm2, %v4571_v15, %v10444_v59  ;;  %v13907_v56 = vpop.permute.xlu1 %10457  ;;  %v10756_v53 = vpack.i.bf16 %v1811_v5, %v1809_v61  ;;  %v13938_v27 = vld [vmem:[#allocation2 + $0x462] ss:$2 sm:$0xff]  ;;  %v13940_v58 = vld [vmem:[#allocation2 + $0x472] ss:$2 sm:$0xff]  ;;  %v13942_v33 = vld [vmem:[#allocation2 + $0x4b3] ss:$2 sm:$0xff] }
 0x1ad   : > { %v4605_v21 = vsel %vm16380_vm9, %v4572_v35, %v10445_v25  ;;  %v13909_v6 = vpop.permute.xlu0 %10452  ;;  %v10751_v52 = vpack.i.bf16 %v1751_v16, %v1749_v30  ;;  %v10766_v46 = vpack.i.bf16 %v1371_v57, %v1369_v45  ;;  %v10761_v34 = vpack.i.bf16 %v1311_v43, %v1309_v19  ;;  %v13944_v22 = vld [vmem:[#allocation2 + $0x4c3] ss:$2 sm:$0xff]  ;;  %v13949_v20 = vld [vmem:[%s16001_s2] ss:$0 sm:$0xff]  ;;  %v13951_v11 = vld [vmem:[#allocation2 + $0x488] ss:$2 sm:$0xff] }
 0x1ae   : > { %10737 = vrot.lane.b32.xlu1 %v16376_v36, %s11688_s25  ;;  %10732 = vrot.lane.b32.xlu0 %v16378_v48, %s11687_s24  ;;  %v4629_v14 = vpack.c.bf16 %v4605_v21, %v4604_v63  ;;  %v10776_v1 = vpack.i.bf16 %v1875_v13, %v1873_v37  ;;  %v10771_v23 = vpack.i.bf16 %v1815_v28, %v1813_v47  ;;  %v13953_v9 = vld [vmem:[#allocation2 + $0x498] ss:$2 sm:$0xff]  ;;  %v13957_v7 = vld [vmem:[#allocation2 + $0x448] ss:$2 sm:$0xff]  ;;  %v13959_v10 = vld [vmem:[#allocation2 + $0x463] ss:$2 sm:$0xff] }
 0x1af   : > { %16384 = vst [vmem:[#allocation23_spill] sm:$0xff] %v13949_v20  ;;  %v13955_v49 = vld [vmem:[#allocation2 + $0x438] ss:$2 sm:$0xff]  ;;  %v13961_v12 = vld [vmem:[#allocation2 + $0x473] ss:$2 sm:$0xff]  ;;  %v10786_v0 = vpack.i.bf16 %v13926_v42, %v13924_v26  ;;  %v10781_v48 = vpack.i.bf16 %v13930_v2, %v13928_v50  ;;  %v10796_v30 = vpack.i.bf16 %v13936_v55, %v13934_v4  ;;  %v10791_v16 = vpack.i.bf16 %v13940_v58, %v13938_v27 }
 0x1b0   : > { %9697 = vmatmul.mubr.msk.bf16.gmra.mxu0 %vm16381_vm7, %v4629_v14  ;;  %v13914_v18 = vpop.permute.xlu1 %10467  ;;  %v13969_v8 = vld [vmem:[#allocation2 + $0x499] ss:$2 sm:$0xff]  ;;  %v13971_v38 = vld [vmem:[#allocation2 + $0x4d8] ss:$2 sm:$0xff]  ;;  %v13975_v59 = vld [vmem:[#allocation2 + $0x449] ss:$2 sm:$0xff] }
 0x1b1   : > { %16382 = vst [vmem:[#allocation18_spill] sm:$0xff] %v13914_v18  ;;  %v13916_v39 = vpop.permute.xlu0 %10462  ;;  %v13973_v25 = vld [vmem:[#allocation2 + $0x439] ss:$2 sm:$0xff]  ;;  %v13977_v15 = vld [vmem:[#allocation2 + $0x4e8] ss:$2 sm:$0xff]  ;;  %vm5231_vm4 = vcmask 58368  }
 0x1b2   : > { %10747 = vrot.lane.b32.xlu1 %v10746_v51, %s11682_s19  ;;  %10742 = vrot.lane.b32.xlu0 %v10741_v40, %s11695_s7  ;;  %16383 = vst [vmem:[#allocation21_spill] sm:$0xff] %v13916_v39  ;;  %v13967_v40 = vld [vmem:[#allocation2 + $0x489] ss:$2 sm:$0xff]  ;;  %v13979_v35 = vld [vmem:[#allocation2 + $0x488] ss:$2 sm:$0xff]  ;;  %vm16399_vm9 = vcmask 64512  }
 0x1b3   : > { %v13981_v36 = vld [vmem:[#allocation2 + $0x498] ss:$2 sm:$0xff]  ;;  %v13993_v63 = vld [vmem:[#allocation2 + $0x4d9] ss:$2 sm:$0xff]  ;;  %v13995_v21 = vld [vmem:[#allocation2 + $0x4e9] ss:$2 sm:$0xff]  ;;  %v9686_v5 = vpop.f32.mrf.mxu0 }
 0x1b4   : > { %v13920_v41 = vpop.permute.xlu1 %10477  ;;  %v13989_v51 = vld [vmem:[#allocation2 + $0x48a] ss:$2 sm:$0xff]  ;;  %v13991_v61 = vld [vmem:[#allocation2 + $0x49a] ss:$2 sm:$0xff]  ;;  %v14007_v45 = vld [vmem:[#allocation2 + $0x489] ss:$2 sm:$0xff]  ;;  %v4879_v57 = vadd.f32 %v9686_v5, %v13949_v20 }
 0x1b5   : > { %v13922_v60 = vpop.permute.xlu0 %10472  ;;  %v14020_v13 = vld [vmem:[#allocation2 + $0x499] ss:$2 sm:$0xff]  ;;  %v4745_v26 = vpop.f32.mrf.mxu0  ;;  %v14036_v4 = vld [vmem:[#allocation2 + $0x4ea] ss:$2 sm:$0xff]  ;;  %v14062_v50 = vld [vmem:[#allocation2 + $0x49a] ss:$2 sm:$0xff] }
 0x1b6   : > { %10757 = vrot.lane.b32.xlu1 %v10756_v53, %s11689_s26  ;;  %10752 = vrot.lane.b32.xlu0 %v10751_v52, %s11688_s25  ;;  %v14003_v53 = vld [vmem:[#allocation2 + $0x43a] ss:$2 sm:$0xff]  ;;  %v14005_v52 = vld [vmem:[#allocation2 + $0x44a] ss:$2 sm:$0xff]  ;;  %v14022_v47 = vld [vmem:[#allocation2 + $0x48b] ss:$2 sm:$0xff]  ;;  %v4877_v58 = vadd.f32 %v13949_v20, %v4745_v26 }
 0x1b7   : > { %16387 = vst [vmem:[#allocation8_spill] sm:$0xff] %v14022_v47  ;;  %v14024_v28 = vld [vmem:[#allocation2 + $0x49b] ss:$2 sm:$0xff]  ;;  %16390 = vst [vmem:[#allocation16_spill] sm:$0xff] %v14036_v4  ;;  %vm4911_vm3 = vcmp.gt.f32.partialorder %v4879_v57, 0.0 }
 0x1b8   : > { %v13963_v29 = vpop.permute.xlu1 %10487  ;;  %16388 = vst [vmem:[#allocation12_spill] sm:$0xff] %v14024_v28  ;;  %v14038_v55 = vld [vmem:[#allocation2 + $0x43b] ss:$2 sm:$0xff]  ;;  %v4943_v27 = vmul.f32 0.2, %v4879_v57  ;;  %vm4909_vm6 = vcmp.gt.f32.partialorder %v4877_v58, 0.0  ;;  %vm16400_vm7 = vmmov %vm16399_vm9 }
 0x1b9   : > { %16385 = vst [vmem:[#allocation19_spill] sm:$0xff] %v13963_v29  ;;  %v13965_v17 = vpop.permute.xlu0 %10482  ;;  %16391 = vst [vmem:[#allocation17_spill] sm:$0xff] %v14038_v55  ;;  %v14045_v2 = vld [vmem:[#allocation2 + $0x44b] ss:$2 sm:$0xff]  ;;  %v14055_v26 = vld [vmem:[#allocation2 + $0x48a] ss:$2 sm:$0xff] }
 0x1ba   : > { %10767 = vrot.lane.b32.xlu1 %v10766_v46, %s11681_s18  ;;  %10762 = vrot.lane.b32.xlu0 %v10761_v34, %s11682_s19  ;;  %16386 = vst [vmem:[#allocation22_spill] sm:$0xff] %v13965_v17  ;;  %16392 = vst [vmem:[#allocation20_spill] sm:$0xff] %v14045_v2  ;;  %v4941_v5 = vmul.f32 0.2, %v4877_v58  ;;  %v16397_v29 = vld [vmem:[#allocation26_spill] sm:$0xff]  ;;  %v16403_v4 = vld [vmem:[#allocation7_spill] sm:$0xff] }
 0x1bb   : > { %16393 = vst [vmem:[#allocation27_spill] sm:$0xff] %v14055_v26  ;;  %16396 = vst [vmem:[#allocation32_spill] sm:$0xff] %v14062_v50  ;;  %v1219_v18 = vld [vmem:[#allocation2 + $0x290] ss:$2 sm:$0xff]  ;;  %v14094_v2 = vld [vmem:[#allocation2 + $0x4db] ss:$2 sm:$0xff]  ;;  %v10339_v47 = vunpack.i.l.bf16 %v16403_v4 }
 0x1bc   : > { %v14010_v19 = vpop.permute.xlu1 %10497  ;;  %v1223_v28 = vld [vmem:[#allocation2 + $0x2e0] ss:$2 sm:$0xff]  ;;  %s11696_s19 = smov 64  }
 0x1bd   : > { %v14012_v43 = vpop.permute.xlu0 %10492 }
 0x1be   : > { %10777 = vrot.lane.b32.xlu1 %v10776_v1, %s11690_s27  ;;  %10772 = vrot.lane.b32.xlu0 %v10771_v23, %s11689_s26  ;;  %v14034_v23 = vld [vmem:[#allocation2 + $0x4da] ss:$2 sm:$0xff]  ;;  %v9687_v1 = vpop.f32.mrf.mxu0 }
 0x1bf   : > { %16389 = vst [vmem:[#allocation13_spill] sm:$0xff] %v14034_v23  ;;  %v4880_v34 = vadd.f32 %v9687_v1, %v13949_v20  ;;  %v14096_v23 = vld [vmem:[#allocation2 + $0x4eb] ss:$2 sm:$0xff] }
 0x1c0   : > { %v14058_v14 = vpop.permute.xlu1 %10507  ;;  %v4748_v39 = vpop.f32.mrf.mxu0 }
 0x1c1   : > { %16394 = vst [vmem:[#allocation30_spill] sm:$0xff] %v14058_v14  ;;  %v14060_v46 = vpop.permute.xlu0 %10502  ;;  %vm4912_vm2 = vcmp.gt.f32.partialorder %v4880_v34, 0.0  ;;  %v4944_v1 = vmul.f32 0.2, %v4880_v34 }
 0x1c2   : > { %10787 = vrot.lane.b32.xlu1 %v10786_v0, %s11683_s20  ;;  %10782 = vrot.lane.b32.xlu0 %v10781_v48, %s11681_s18  ;;  %v4975_v48 = vsel %vm4911_vm3, %v4879_v57, %v4943_v27  ;;  %16395 = vst [vmem:[#allocation14_spill] sm:$0xff] %v14060_v46  ;;  %v10299_v57 = vunpack.i.l.bf16 %v16397_v29  ;;  %v14069_v27 = vsel %vm4909_vm6, %v4877_v58, %v4941_v5  ;;  %v1217_v46 = vld [vmem:[#allocation2 + $0x280] ss:$2 sm:$0xff]  ;;  %v10300_v58 = vunpack.i.h.bf16 %v16397_v29  ;;  %v16398_v5 = vld [vmem:[#allocation34_spill] sm:$0xff]  ;;  %vm16404_vm3 = vmmov %vm16400_vm7 }
 0x1c3   : > { %v5021_v42 = vrot.slane %v4975_v48, 1  ;;  %v5069_v17 = vrot.slane %v4975_v48, 7  ;;  %v5022_v14 = vrot.slane %v14069_v27, 1  ;;  %v5072_v37 = vrot.slane %v14069_v27, 7  ;;  %v14088_v27 = vld [vmem:[#allocation2 + $0x4b0] ss:$2 sm:$0xff] }
 0x1c4   : > { %v10320_v31 = vunpack.i.h.bf16 %v16398_v5  ;;  %v10319_v55 = vunpack.i.l.bf16 %v16398_v5  ;;  %v14090_v0 = vld [vmem:[#allocation2 + $0x4c0] ss:$2 sm:$0xff]  ;;  %v4878_v5 = vadd.f32 %v13949_v20, %v4748_v39  ;;  %v16406_v39 = vpack.i.bf16 %v13944_v22, %v13942_v33  ;;  %v1221_v20 = vld [vmem:[#allocation2 + $0x2d0] ss:$2 sm:$0xff] }
 0x1c5   : > { %v5197_v48 = vsel %vm492_vm0, %v5021_v42, %v5069_v17  ;;  %v14086_v42 = vpop.permute.xlu0 %10512  ;;  %v5198_v29 = vsel %vm492_vm0, %v5022_v14, %v5072_v37  ;;  %v16405_v14 = vpack.i.bf16 %v13953_v9, %v13951_v11  ;;  %v10886_v11 = vpack.i.bf16 %v14090_v0, %v14088_v27  ;;  %v1885_v27 = vld [vmem:[#allocation2 + $0x502] ss:$2 sm:$0xff] }
 0x1c6   : > { %10797 = vrot.lane.b32.xlu1 %v10796_v30, %s11691_s28  ;;  %10792 = vrot.lane.b32.xlu0 %v10791_v16, %s11690_s27  ;;  %5229 = vst.msk [vmem:[#allocation3] sm:$0xff] %vm16399_vm9, %v5197_v48  ;;  %v4976_v30 = vsel %vm4912_vm2, %v4880_v34, %v4944_v1  ;;  %v14084_v16 = vpop.permute.xlu1 %10517  ;;  %16401 = vst [vmem:[#allocation28_spill] sm:$0xff] %v14086_v42  ;;  %v4144_v34 = vsel %vm1005_vm1, %v1217_v46, %v10299_v57  ;;  %v16402_v1 = vld [vmem:[#allocation31_spill] sm:$0xff]  ;;  %vm4910_vm6 = vcmp.gt.f32.partialorder %v4878_v5, 0.0 }
 0x1c7   : > { %5236 = vst.msk [vmem:[#allocation3 + $0x30] sm:$0xff] %vm16400_vm7, %v5197_v48  ;;  %v5070_v26 = vrot.slane %v4976_v30, 7  ;;  %v5165_v50 = vrot.slane %v4976_v30, 5  ;;  %v10315_v48 = vunpack.i.h.bf16 %v16402_v1  ;;  %v10314_v42 = vunpack.i.l.bf16 %v16402_v1  ;;  %vm16407_vm2 = vmmov %vm16404_vm3 }
 0x1c8   : > { %5233 = vst.msk [vmem:[#allocation3 + $0x18] sm:$0xff] %vm16404_vm3, %v5198_v29  ;;  %v4942_v30 = vmul.f32 0.2, %v4878_v5  ;;  %v4145_v1 = vsel %vm1005_vm1, %v1219_v18, %v10300_v58  ;;  %v4177_v29 = vsel %vm16407_vm2, %v4144_v34, %v10319_v55  ;;  %vm16408_vm9 = vmmov %vm16407_vm2  ;;  %v16412_v34 = vld [vmem:[#allocation10_spill] sm:$0xff] }
 0x1c9   : > { %v5071_v46 = vsel %vm492_vm0, %v5069_v17, %v5070_v26  ;;  %v5213_v57 = vsel %vm492_vm0, %v5070_v26, %v5165_v50  ;;  %vm16409_vm7 = vmmov %vm16407_vm2  ;;  %v14121_v22 = vpop.permute.xlu0 %10522  ;;  %v10340_v17 = vunpack.i.h.bf16 %v16403_v4  ;;  %v16411_v50 = vld [vmem:[#allocation9_spill] sm:$0xff]  ;;  %v4147_v4 = vsel %vm1005_vm1, %v1223_v28, %v10315_v48 }
 0x1ca   : > { %10807 = vrot.lane.b32.xlu1 %v16405_v14, %s11684_s21  ;;  %10802 = vrot.lane.b32.xlu0 %v16406_v39, %s11683_s20  ;;  %5230 = vst.msk [vmem:[#allocation3 + $0x8] sm:$0xff] %vm16408_vm9, %v5071_v46  ;;  %v14119_v33 = vpop.permute.xlu1 %10527  ;;  %vm16410_vm3 = vmmov %vm16407_vm2  ;;  %v10334_v55 = vunpack.i.l.bf16 %v16411_v50  ;;  %v4974_v26 = vsel %vm4910_vm6, %v4878_v5, %v4942_v30  ;;  %v10335_v58 = vunpack.i.h.bf16 %v16411_v50  ;;  %v10359_v14 = vunpack.i.l.bf16 %v16412_v34  ;;  %v16416_v50 = vld [vmem:[#allocation11_spill] sm:$0xff]  ;;  %v16419_v28 = vld [vmem:[#allocation29_spill] sm:$0xff]  ;;  %s170_s20 = scalar_lea.vmem %s16002_s3, %s9471_s11 }
 0x1cb   : > { %5232 = vst.msk [vmem:[#allocation3 + $0x10] sm:$0x3] %vm5231_vm4, %v5213_v57  ;;  %5238 = vst.msk [vmem:[#allocation3 + $0x40] sm:$0x3] %vm5231_vm4, %v5213_v57  ;;  %v4178_v9 = vsel %vm16410_vm3, %v4145_v1, %v10320_v31  ;;  %v5073_v39 = vrot.slane %v4974_v26, 7  ;;  %v16413_v57 = vpack.i.bf16 %v13957_v7, %v13955_v49  ;;  %v16414_v31 = vpack.i.bf16 %v13961_v12, %v13959_v10 }
 0x1cc   : > { %5237 = vst.msk [vmem:[#allocation3 + $0x38] sm:$0xff] %vm16409_vm7, %v5071_v46  ;;  %v5166_v46 = vrot.slane %v4974_v26, 5  ;;  %v4146_v5 = vsel %vm1005_vm1, %v1221_v20, %v10314_v42  ;;  %vm16415_vm6 = vcmask 97280   ;;  %v10360_v1 = vunpack.i.h.bf16 %v16412_v34  ;;  %vm16418_vm9 = vmmov %vm16410_vm3 }
 0x1cd   : > { %v4210_v30 = vsel %vm16415_vm6, %v4177_v29, %v10339_v47  ;;  %v10355_v26 = vunpack.i.h.bf16 %v16416_v50  ;;  %v10354_v18 = vunpack.i.l.bf16 %v16416_v50  ;;  %v5074_v49 = vsel %vm492_vm0, %v5072_v37, %v5073_v39  ;;  %v14151_v10 = vpop.permute.xlu0 %10532  ;;  %vm16417_vm2 = vmmov %vm16415_vm6  ;;  %v16421_v29 = vld [vmem:[#allocation25_spill] sm:$0xff] }
 0x1ce   : > { %10817 = vrot.lane.b32.xlu1 %v16413_v57, %s11692_s29  ;;  %10812 = vrot.lane.b32.xlu0 %v16414_v31, %s11691_s28  ;;  %v5214_v7 = vsel %vm492_vm0, %v5073_v39, %v5166_v46  ;;  %v14149_v57 = vpop.permute.xlu1 %10537  ;;  %v4211_v12 = vsel %vm16417_vm2, %v4178_v9, %v10340_v17  ;;  %v4179_v20 = vsel %vm16418_vm9, %v4146_v5, %v10334_v55  ;;  %v10380_v47 = vunpack.i.h.bf16 %v16419_v28  ;;  %vm16420_vm7 = vmmov %vm16410_vm3 }
 0x1cf   : > { %v10379_v42 = vunpack.i.l.bf16 %v16419_v28  ;;  %5234 = vst.msk [vmem:[#allocation3 + $0x20] sm:$0xff] %vm16420_vm7, %v5074_v49  ;;  %v4180_v37 = vsel %vm16410_vm3, %v4147_v4, %v10335_v58  ;;  %v4243_v48 = vsel %vm4226_vm5, %v4210_v30, %v10359_v14  ;;  %v10375_v34 = vunpack.i.h.bf16 %v16421_v29  ;;  %vm16424_vm6 = vmmov %vm16417_vm2 }
 0x1d0   : > { %5235 = vst.msk [vmem:[#allocation3 + $0x28] sm:$0x3] %vm5231_vm4, %v5214_v7  ;;  %v10374_v39 = vunpack.i.l.bf16 %v16421_v29  ;;  %v16422_v9 = vpack.i.bf16 %v13969_v8, %v13967_v40  ;;  %v16423_v17 = vpack.i.bf16 %v13977_v15, %v13971_v38  ;;  %v4244_v55 = vsel %vm4226_vm5, %v4211_v12, %v10360_v1 }
 0x1d1   : > { %v10400_v58 = vunpack.i.h.bf16 %v13767_v24  ;;  %v10399_v14 = vunpack.i.l.bf16 %v13767_v24  ;;  %v10394_v46 = vunpack.i.l.bf16 %v13769_v32  ;;  %v4212_v31 = vsel %vm16424_vm6, %v4179_v20, %v10354_v18  ;;  %v14181_v38 = vpop.permute.xlu0 %10542 }
 0x1d2   : > { %10827 = vrot.lane.b32.xlu1 %v16422_v9, %s11685_s22  ;;  %10822 = vrot.lane.b32.xlu0 %v16423_v17, %s11684_s21  ;;  %v4213_v4 = vsel %vm16417_vm2, %v4180_v37, %v10355_v26  ;;  %v10395_v40 = vunpack.i.h.bf16 %v13769_v32  ;;  %v10419_v8 = vunpack.i.l.bf16 %v13821_v54  ;;  %v14179_v5 = vpop.permute.xlu1 %10547  ;;  %vm16425_vm9 = vcmask 162816  }
 0x1d3   : > { %v4276_v15 = vsel %vm16425_vm9, %v4243_v48, %v10379_v42  ;;  %vm16426_vm7 = vmmov %vm16425_vm9  ;;  %v10420_v24 = vunpack.i.h.bf16 %v13821_v54  ;;  %v10414_v1 = vunpack.i.l.bf16 %v13823_v44  ;;  %v4245_v18 = vsel %vm4226_vm5, %v4212_v31, %v10374_v39 }
 0x1d4   : > { %v4277_v30 = vsel %vm16426_vm7, %v4244_v55, %v10380_v47  ;;  %v4246_v50 = vsel %vm4226_vm5, %v4213_v4, %v10375_v34  ;;  %v10415_v32 = vunpack.i.h.bf16 %v13823_v44  ;;  %v10439_v26 = vunpack.i.l.bf16 %v13868_v62  ;;  %vm16431_vm2 = vmmov %vm16426_vm7 }
 0x1d5   : > { %v16427_v49 = vpack.i.bf16 %v13975_v59, %v13973_v25  ;;  %v16428_v7 = vpack.i.bf16 %v13981_v36, %v13979_v35  ;;  %vm16429_vm3 = vcmask 195584   ;;  %v4278_v20 = vsel %vm16431_vm2, %v4245_v18, %v10394_v46  ;;  %vm16432_vm9 = vmmov %vm16431_vm2  ;;  %v14207_v37 = vpop.permute.xlu0 %10552 }
 0x1d6   : > { %v4309_v54 = vsel %vm16429_vm3, %v4276_v15, %v10399_v14  ;;  %vm16430_vm6 = vmmov %vm16429_vm3  ;;  %v10440_v44 = vunpack.i.h.bf16 %v13868_v62  ;;  %v4279_v28 = vsel %vm16432_vm9, %v4246_v50, %v10395_v40  ;;  %v10435_v25 = vunpack.i.h.bf16 %v13870_v3  ;;  %v10558_v42 = vpop.permute.xlu1 %10557 }
 0x1d7   : > { %10837 = vrot.lane.b32.xlu1 %v16427_v49, %s11693_s30  ;;  %10832 = vrot.lane.b32.xlu0 %v16428_v7, %s11692_s29  ;;  %v4310_v12 = vsel %vm16430_vm6, %v4277_v30, %v10400_v58  ;;  %v4342_v47 = vsel %vm4325_vm8, %v4309_v54, %v10419_v8  ;;  %v10434_v59 = vunpack.i.l.bf16 %v13870_v3  ;;  %vm16433_vm7 = vmmov %vm16429_vm3  ;;  %v10460_v48 = vunpack.i.h.bf16 %v13907_v56 }
 0x1d8   : > { %v4343_v35 = vsel %vm4325_vm8, %v4310_v12, %v10420_v24  ;;  %v4311_v36 = vsel %vm16433_vm7, %v4278_v20, %v10414_v1  ;;  %v10459_v29 = vunpack.i.l.bf16 %v13907_v56  ;;  %v4312_v62 = vsel %vm16429_vm3, %v4279_v28, %v10415_v32 }
 0x1d9   : > { %vm16434_vm6 = vcmask 261120   ;;  %v10480_v39 = vunpack.i.h.bf16 %v13920_v41  ;;  %v10479_v9 = vunpack.i.l.bf16 %v13920_v41  ;;  %v16435_v3 = vpack.i.bf16 %v13991_v61, %v13989_v51 }
 0x1da   : > { %v4375_v34 = vsel %vm16434_vm6, %v4342_v47, %v10439_v26  ;;  %v16436_v17 = vpack.i.bf16 %v13995_v21, %v13993_v63  ;;  %vm16437_vm2 = vmmov %vm16434_vm6  ;;  %v10454_v55 = vunpack.i.l.bf16 %v13909_v6  ;;  %v10500_v58 = vunpack.i.h.bf16 %v14010_v19  ;;  %v14233_v31 = vpop.permute.xlu1 %10567  ;;  %v14235_v63 = vpop.permute.xlu0 %10562  ;;  %v16441_v47 = vld [vmem:[#allocation12_spill] sm:$0xff] }
 0x1db   : > { %10847 = vrot.lane.b32.xlu1 %v16435_v3, %s11686_s23  ;;  %v4376_v56 = vsel %vm16437_vm2, %v4343_v35, %v10440_v44  ;;  %v10499_v14 = vunpack.i.l.bf16 %v14010_v19  ;;  %v4344_v41 = vsel %vm4325_vm8, %v4311_v36, %v10434_v59  ;;  %v4345_v46 = vsel %vm4325_vm8, %v4312_v62, %v10435_v25  ;;  %vm16440_vm9 = vmmov %vm16437_vm2  ;;  %v16442_v25 = vld [vmem:[#allocation8_spill] sm:$0xff]  ;;  %v16445_v35 = vld [vmem:[#allocation13_spill] sm:$0xff] }
 0x1dc   : > { %10842 = vrot.lane.b32.xlu0 %v16436_v17, %s11685_s22  ;;  %v10520_v51 = vunpack.i.h.bf16 %v14084_v16  ;;  %v10519_v61 = vunpack.i.l.bf16 %v14084_v16  ;;  %v4408_v21 = vsel %vm4391_vm10, %v4375_v34, %v10459_v29  ;;  %v4409_v4 = vsel %vm4391_vm10, %v4376_v56, %v10460_v48  ;;  %v16447_v48 = vld [vmem:[#allocation28_spill] sm:$0xff]  ;;  %vm16450_vm6 = vmmov %vm16437_vm2 }
 0x1dd   : > { %v10540_v40 = vunpack.i.h.bf16 %v14149_v57  ;;  %v10539_v19 = vunpack.i.l.bf16 %v14149_v57  ;;  %v4441_v8 = vsel %vm4424_vm11, %v4408_v21, %v10479_v9  ;;  %v4442_v15 = vsel %vm4424_vm11, %v4409_v4, %v10480_v39  ;;  %v2199_v21 = vld [vmem:[#allocation2 + $0x49b] ss:$2 sm:$0xff] }
 0x1de   : > { %v10560_v30 = vunpack.i.h.bf16 %v10558_v42  ;;  %v10559_v24 = vunpack.i.l.bf16 %v10558_v42  ;;  %v16438_v16 = vpack.i.bf16 %v14005_v52, %v14003_v53  ;;  %v16439_v1 = vpack.i.bf16 %v14020_v13, %v14007_v45  ;;  %v16444_v42 = vld [vmem:[#allocation16_spill] sm:$0xff] }
 0x1df   : > { %v10455_v18 = vunpack.i.h.bf16 %v13909_v6  ;;  %v4377_v57 = vsel %vm16440_vm9, %v4344_v41, %v10454_v55  ;;  %v4474_v50 = vsel %vm4457_vm12, %v4441_v8, %v10499_v14  ;;  %v4475_v32 = vsel %vm4457_vm12, %v4442_v15, %v10500_v58  ;;  %v10578_v7 = vpop.permute.xlu1 %10577  ;;  %v10573_v54 = vpop.permute.xlu0 %10572  ;;  %v16452_v8 = vld [vmem:[#allocation17_spill] sm:$0xff] }
 0x1e0   : > { %10857 = vrot.lane.b32.xlu1 %v16438_v16, %s11694_s4  ;;  %10852 = vrot.lane.b32.xlu0 %v16439_v1, %s11693_s30  ;;  %v10475_v26 = vunpack.i.h.bf16 %v13922_v60  ;;  %v10474_v49 = vunpack.i.l.bf16 %v13922_v60  ;;  %v4507_v53 = vsel %vm4490_vm13, %v4474_v50, %v10519_v61  ;;  %v4508_v52 = vsel %vm4490_vm13, %v4475_v32, %v10520_v51  ;;  %v2197_v61 = vld [vmem:[#allocation2 + $0x48b] ss:$2 sm:$0xff] }
 0x1e1   : > { %v4540_v45 = vsel %vm4523_vm14, %v4507_v53, %v10539_v19  ;;  %v4541_v6 = vsel %vm4523_vm14, %v4508_v52, %v10540_v40  ;;  %v10580_v13 = vunpack.i.h.bf16 %v10578_v7  ;;  %v10579_v12 = vunpack.i.l.bf16 %v10578_v7  ;;  %v16451_v19 = vld [vmem:[#allocation20_spill] sm:$0xff] }
 0x1e2   : > { %v10495_v20 = vunpack.i.h.bf16 %v14012_v43  ;;  %v10494_v44 = vunpack.i.l.bf16 %v14012_v43  ;;  %v4573_v28 = vsel %vm16107_vm15, %v4540_v45, %v10559_v24  ;;  %v4574_v60 = vsel %vm16107_vm15, %v4541_v6, %v10560_v30  ;;  %v16454_v30 = vld [vmem:[#allocation32_spill] sm:$0xff]  ;;  %v16455_v24 = vld [vmem:[#allocation27_spill] sm:$0xff] }
 0x1e3   : > { %v16443_v59 = vpack.i.bf16 %v16441_v47, %v16442_v25  ;;  %v16446_v36 = vpack.i.bf16 %v16444_v42, %v16445_v35  ;;  %v10515_v29 = vunpack.i.h.bf16 %v16447_v48  ;;  %v10514_v62 = vunpack.i.l.bf16 %v16447_v48  ;;  %v14280_v17 = vpop.permute.xlu1 %10587  ;;  %v14282_v56 = vpop.permute.xlu0 %10582  ;;  %v1823_v47 = vld [vmem:[#allocation2 + $0x511] ss:$2 sm:$0xff]  ;;  %v1883_v48 = vld [vmem:[#allocation2 + $0x4c2] ss:$2 sm:$0xff] }
 0x1e4   : > { %vm16448_vm7 = vcmask 490496   ;;  %v4378_v39 = vsel %vm16450_vm6, %v4345_v46, %v10455_v18  ;;  %v10535_v9 = vunpack.i.h.bf16 %v14151_v10  ;;  %v10534_v3 = vunpack.i.l.bf16 %v14151_v10  ;;  %v1757_v18 = vld [vmem:[#allocation2 + $0x500] ss:$2 sm:$0xff]  ;;  %v1817_v25 = vld [vmem:[#allocation2 + $0x4b1] ss:$2 sm:$0xff] }
 0x1e5   : > { %10867 = vrot.lane.b32.xlu1 %v16443_v59, %s11687_s24  ;;  %10862 = vrot.lane.b32.xlu0 %v16446_v36, %s11686_s23  ;;  %v4606_v43 = vsel %vm16448_vm7, %v4573_v28, %v10579_v12  ;;  %vm16449_vm3 = vmmov %vm16448_vm7  ;;  %v4410_v58 = vsel %vm4391_vm10, %v4377_v57, %v10474_v49  ;;  %v4411_v14 = vsel %vm4391_vm10, %v4378_v39, %v10475_v26  ;;  %v10555_v41 = vunpack.i.h.bf16 %v14207_v37  ;;  %v1759_v57 = vld [vmem:[#allocation2 + $0x510] ss:$2 sm:$0xff]  ;;  %v1819_v59 = vld [vmem:[#allocation2 + $0x4c1] ss:$2 sm:$0xff] }
 0x1e6   : > { %v4607_v34 = vsel %vm16449_vm3, %v4574_v60, %v10580_v13  ;;  %v10554_v51 = vunpack.i.l.bf16 %v14207_v37  ;;  %v4443_v46 = vsel %vm4424_vm11, %v4410_v58, %v10494_v44  ;;  %v4444_v4 = vsel %vm4424_vm11, %v4411_v14, %v10495_v20  ;;  %v1821_v44 = vld [vmem:[#allocation2 + $0x501] ss:$2 sm:$0xff]  ;;  %vm16459_vm9 = vmmov %vm16449_vm3  ;;  %v1881_v36 = vld [vmem:[#allocation2 + $0x4b2] ss:$2 sm:$0xff] }
 0x1e7   : > { %v4630_v55 = vpack.c.bf16 %v4607_v34, %v4606_v43  ;;  %v10575_v10 = vunpack.i.h.bf16 %v10573_v54  ;;  %v10574_v40 = vunpack.i.l.bf16 %v10573_v54  ;;  %v16453_v15 = vpack.i.bf16 %v16451_v19, %v16452_v8  ;;  %v14303_v26 = vpop.permute.xlu1 %10597  ;;  %v10593_v49 = vpop.permute.xlu0 %10592  ;;  %vm16460_vm7 = vmmov %vm16449_vm3  ;;  %v1949_v39 = vld [vmem:[#allocation2 + $0x503] ss:$2 sm:$0xff] }
 0x1e8   : > { %v16456_v16 = vpack.i.bf16 %v16454_v30, %v16455_v24  ;;  %v4476_v37 = vsel %vm4457_vm12, %v4443_v46, %v10514_v62  ;;  %v4477_v1 = vsel %vm4457_vm12, %v4444_v4, %v10515_v29  ;;  %vm16457_vm2 = vcmask 523264   ;;  %v2009_v46 = vld [vmem:[#allocation2 + $0x4d8] ss:$2 sm:$0xff]  ;;  %v2011_v4 = vld [vmem:[#allocation2 + $0x4e8] ss:$2 sm:$0xff] }
 0x1e9   : > { %10877 = vrot.lane.b32.xlu1 %v16453_v15, %s11695_s7  ;;  %9700 = vmatprep.mubr.msk.bf16.mxu0 %vm16457_vm2, %v4630_v55  ;;  %v4509_v50 = vsel %vm4490_vm13, %v4476_v37, %v10534_v3  ;;  %v4510_v32 = vsel %vm4490_vm13, %v4477_v1, %v10535_v9  ;;  %v10891_v53 = vpack.i.bf16 %v2199_v21, %v2197_v61  ;;  %v10595_v54 = vunpack.i.h.bf16 %v10593_v49  ;;  %vm16461_vm3 = vmmov %vm16457_vm2  ;;  %v1951_v9 = vld [vmem:[#allocation2 + $0x513] ss:$2 sm:$0xff]  ;;  %v1947_v55 = vld [vmem:[#allocation2 + $0x4c3] ss:$2 sm:$0xff] }
 0x1ea   : > { %10872 = vrot.lane.b32.xlu0 %v16456_v16, %s11694_s4  ;;  %v4542_v52 = vsel %vm4523_vm14, %v4509_v50, %v10554_v51  ;;  %v4543_v7 = vsel %vm4523_vm14, %v4510_v32, %v10555_v41  ;;  %v10594_v45 = vunpack.i.l.bf16 %v10593_v49  ;;  %v16458_v12 = vpack.i.bf16 %v14096_v23, %v14094_v2  ;;  %v1945_v3 = vld [vmem:[#allocation2 + $0x4b3] ss:$2 sm:$0xff]  ;;  %v2013_v61 = vld [vmem:[#allocation2 + $0x528] ss:$2 sm:$0xff]  ;;  %v2015_v21 = vld [vmem:[#allocation2 + $0x538] ss:$2 sm:$0xff] }
 0x1eb   : > { %v4575_v6 = vsel %vm16107_vm15, %v4542_v52, %v10574_v40  ;;  %v4576_v13 = vsel %vm16107_vm15, %v4543_v7, %v10575_v10  ;;  %v10896_v20 = vpack.i.bf16 %v1759_v57, %v1757_v18  ;;  %v14319_v42 = vpop.permute.xlu1 %10607  ;;  %v14321_v35 = vpop.permute.xlu0 %10602  ;;  %v10906_v2 = vpack.i.bf16 %v1823_v47, %v1821_v44  ;;  %v2077_v19 = vld [vmem:[#allocation2 + $0x529] ss:$2 sm:$0xff]  ;;  %v2079_v30 = vld [vmem:[#allocation2 + $0x539] ss:$2 sm:$0xff]  ;;  %v14344_v1 = vld [vmem:[#allocation2 + $0x52a] ss:$2 sm:$0xff] }
 0x1ec   : > { %v4608_v28 = vsel %vm16459_vm9, %v4575_v6, %v10594_v45  ;;  %v4609_v60 = vsel %vm16460_vm7, %v4576_v13, %v10595_v54  ;;  %v10901_v23 = vpack.i.bf16 %v1819_v59, %v1817_v25  ;;  %v10911_v34 = vpack.i.bf16 %v1883_v48, %v1881_v36  ;;  %v2073_v24 = vld [vmem:[#allocation2 + $0x4d9] ss:$2 sm:$0xff]  ;;  %v2075_v16 = vld [vmem:[#allocation2 + $0x4e9] ss:$2 sm:$0xff]  ;;  %v14346_v18 = vld [vmem:[#allocation2 + $0x53a] ss:$2 sm:$0xff] }
 0x1ed   : > { %10887 = vrot.lane.b32.xlu1 %v10886_v11, %s11688_s25  ;;  %v4631_v0 = vpack.c.bf16 %v4609_v60, %v4608_v28  ;;  %v1887_v11 = vld [vmem:[#allocation2 + $0x512] ss:$2 sm:$0xff]  ;;  %v10926_v41 = vpack.i.bf16 %v1951_v9, %v1949_v39  ;;  %v10921_v51 = vpack.i.bf16 %v1947_v55, %v1945_v3  ;;  %v10936_v8 = vpack.i.bf16 %v2015_v21, %v2013_v61  ;;  %v14355_v7 = vld [vmem:[#allocation2 + $0x52b] ss:$2 sm:$0xff]  ;;  %v14357_v54 = vld [vmem:[#allocation2 + $0x53b] ss:$2 sm:$0xff] }
 0x1ee   : > { %10882 = vrot.lane.b32.xlu0 %v16458_v12, %s11687_s24  ;;  %v10916_v43 = vpack.i.bf16 %v1887_v11, %v1885_v27  ;;  %v10931_v15 = vpack.i.bf16 %v2011_v4, %v2009_v46  ;;  %v14348_v57 = vld [vmem:[#allocation2 + $0x4da] ss:$2 sm:$0xff]  ;;  %v2139_v52 = vld [vmem:[#allocation2 + $0x4ea] ss:$2 sm:$0xff]  ;;  %v14360_v44 = vld [vmem:[#allocation2 + $0x4db] ss:$2 sm:$0xff]  ;;  %v10941_v47 = vpack.i.bf16 %v2075_v16, %v2073_v24  ;;  %v10966_v27 = vpack.i.bf16 %v14357_v54, %v14355_v7 }
 0x1ef   : > { %9701 = vmatmul.mubr.msk.bf16.gmra.mxu0 %vm16461_vm3, %v4631_v0  ;;  %v14326_v29 = vpop.permute.xlu1 %10617  ;;  %v14328_v62 = vpop.permute.xlu0 %10612  ;;  %v16462_v50 = vld [vmem:[#allocation23_spill] sm:$0xff]  ;;  %v1227_v45 = vld [vmem:[#allocation2 + $0x330] ss:$2 sm:$0xff]  ;;  %v16463_v6 = vld [vmem:[#allocation24_spill] sm:$0xff]  ;;  %vm16466_vm7 = vcmask 64512   ;;  %s11697_s24 = smov 72  }
 0x1f0   : > { %v10450_v13 = vunpack.i.h.bf16 %v16463_v6  ;;  %v14365_v25 = vld [vmem:[#allocation2 + $0x4eb] ss:$2 sm:$0xff]  ;;  %v10449_v59 = vunpack.i.l.bf16 %v16463_v6  ;;  %v1225_v11 = vld [vmem:[#allocation2 + $0x320] ss:$2 sm:$0xff]  ;;  %vm16467_vm3 = vmmov %vm16466_vm7 }
 0x1f1   : > { %10897 = vrot.lane.b32.xlu1 %v10896_v20, %s11688_s25  ;;  %v10946_v20 = vpack.i.bf16 %v2079_v30, %v2077_v19  ;;  %v16465_v16 = vld [vmem:[#allocation21_spill] sm:$0xff] }
 0x1f2   : > { %10892 = vrot.lane.b32.xlu0 %v10891_v53, %s11695_s7  ;;  %v4149_v9 = vsel %vm1005_vm1, %v1227_v45, %v10450_v13  ;;  %v4148_v19 = vsel %vm1005_vm1, %v1225_v11, %v10449_v59  ;;  %v1231_v45 = vld [vmem:[#allocation2 + $0x380] ss:$2 sm:$0xff] }
 0x1f3   : > { %v14332_v58 = vpop.permute.xlu1 %10627  ;;  %v14334_v14 = vpop.permute.xlu0 %10622 }
 0x1f4   : > { %v9690_v37 = vpop.f32.mrf.mxu0 }
 0x1f5   : > { %10907 = vrot.lane.b32.xlu1 %v10906_v2, %s11689_s26  ;;  %v4883_v32 = vadd.f32 %v9690_v37, %v16462_v50  ;;  %v10956_v2 = vpack.i.bf16 %v14346_v18, %v14344_v1  ;;  %v10465_v37 = vunpack.i.h.bf16 %v16465_v16  ;;  %v10464_v1 = vunpack.i.l.bf16 %v16465_v16 }
 0x1f6   : > { %10902 = vrot.lane.b32.xlu0 %v10901_v23, %s11689_s26  ;;  %v4761_v12 = vpop.f32.mrf.mxu0  ;;  %v10951_v23 = vpack.i.bf16 %v2139_v52, %v14348_v57  ;;  %v1229_v52 = vld [vmem:[#allocation2 + $0x370] ss:$2 sm:$0xff]  ;;  %s11698_s26 = smov 80  }
 0x1f7   : > { %v14338_v10 = vpop.permute.xlu1 %10637  ;;  %v14340_v40 = vpop.permute.xlu0 %10632  ;;  %vm4915_vm6 = vcmp.gt.f32.partialorder %v4883_v32, 0.0  ;;  %v4947_v28 = vmul.f32 0.2, %v4883_v32  ;;  %v4881_v60 = vadd.f32 %v16462_v50, %v4761_v12 }
 0x1f8   : > { %v9691_v0 = vpop.f32.mrf.mxu0 }
 0x1f9   : > { %10917 = vrot.lane.b32.xlu1 %v10916_v43, %s11690_s27  ;;  %v4979_v36 = vsel %vm4915_vm6, %v4883_v32, %v4947_v28  ;;  %vm4913_vm2 = vcmp.gt.f32.partialorder %v4881_v60, 0.0  ;;  %v4945_v48 = vmul.f32 0.2, %v4881_v60  ;;  %v4884_v43 = vadd.f32 %v9691_v0, %v16462_v50  ;;  %v16468_v28 = vld [vmem:[#allocation19_spill] sm:$0xff]  ;;  %vm16470_vm6 = vmmov %vm16467_vm3 }
 0x1fa   : > { %10912 = vrot.lane.b32.xlu0 %v10911_v34, %s11690_s27  ;;  %v5024_v3 = vrot.slane %v4979_v36, 1  ;;  %v5078_v55 = vrot.slane %v4979_v36, 7  ;;  %v4764_v4 = vpop.f32.mrf.mxu0 }
 0x1fb   : > { %v14351_v49 = vpop.permute.xlu1 %10647  ;;  %v14353_v53 = vpop.permute.xlu0 %10642  ;;  %v4977_v21 = vsel %vm4913_vm2, %v4881_v60, %v4945_v48  ;;  %vm4916_vm9 = vcmp.gt.f32.partialorder %v4884_v43, 0.0  ;;  %v4948_v46 = vmul.f32 0.2, %v4884_v43  ;;  %v10490_v60 = vunpack.i.h.bf16 %v16468_v28 }
 0x1fc   : > { %v5075_v30 = vrot.slane %v4977_v21, 7  ;;  %v4151_v48 = vsel %vm1005_vm1, %v1231_v45, %v10465_v37 }
 0x1fd   : > { %10927 = vrot.lane.b32.xlu1 %v10926_v41, %s11691_s28  ;;  %v10961_v41 = vpack.i.bf16 %v14365_v25, %v14360_v44  ;;  %v4980_v18 = vsel %vm4916_vm9, %v4884_v43, %v4948_v46  ;;  %v16469_v25 = vld [vmem:[#allocation22_spill] sm:$0xff]  ;;  %vm16471_vm9 = vmmov %vm16467_vm3  ;;  %v4150_v43 = vsel %vm1005_vm1, %v1229_v52, %v10464_v1  ;;  %v10530_v52 = vunpack.i.h.bf16 %v14119_v33 }
 0x1fe   : > { %10922 = vrot.lane.b32.xlu0 %v10921_v51, %s11691_s28  ;;  %v16464_v51 = vld [vmem:[#allocation18_spill] sm:$0xff]  ;;  %v5079_v13 = vrot.slane %v4980_v18, 7  ;;  %v5168_v12 = vrot.slane %v4980_v18, 5  ;;  %v10484_v59 = vunpack.i.l.bf16 %v16469_v25  ;;  %s11699_s28 = smov 88  }
 0x1ff   : > { %v14374_v34 = vpop.permute.xlu1 %10657  ;;  %v14376_v39 = vpop.permute.xlu0 %10652  ;;  %v10469_v61 = vunpack.i.l.bf16 %v16464_v51  ;;  %v10470_v24 = vunpack.i.h.bf16 %v16464_v51 }
 0x200   : > { %v5080_v0 = vsel %vm492_vm0, %v5078_v55, %v5079_v13  ;;  %v5216_v11 = vsel %vm492_vm0, %v5079_v13, %v5168_v12 }
 0x201   : > { %10937 = vrot.lane.b32.xlu1 %v10936_v8, %s11692_s29  ;;  %v5200_v8 = vsel %vm492_vm0, %v5024_v3, %v5078_v55  ;;  %v4181_v44 = vsel %vm16467_vm3, %v4148_v19, %v10469_v61  ;;  %v4182_v36 = vsel %vm16471_vm9, %v4149_v9, %v10470_v24  ;;  %v10485_v3 = vunpack.i.h.bf16 %v16469_v25  ;;  %5244 = vst.msk [vmem:[#allocation3 + $0x70] sm:$0x3] %vm5231_vm4, %v5216_v11  ;;  %v16473_v55 = vld [vmem:[#allocation30_spill] sm:$0xff]  ;;  %v5318_v19 = vld [vmem:[#allocation3 + $0x31] ss:$2 sm:$0xff] }
 0x202   : > { %10932 = vrot.lane.b32.xlu0 %v10931_v15, %s11692_s29  ;;  %v5023_v15 = vrot.slane %v4977_v21, 1  ;;  %5242 = vst.msk [vmem:[#allocation3 + $0x60] sm:$0xff] %vm16466_vm7, %v5200_v8  ;;  %vm16472_vm7 = vmmov %vm16467_vm3  ;;  %v10510_v51 = vunpack.i.h.bf16 %v16473_v55  ;;  %v10509_v61 = vunpack.i.l.bf16 %v16473_v55  ;;  %v16474_v21 = vld [vmem:[#allocation14_spill] sm:$0xff]  ;;  %vm16475_vm3 = vcmask 97280  }
 0x203   : > { %v14390_v57 = vpop.permute.xlu1 %10667  ;;  %v14392_v32 = vpop.permute.xlu0 %10662  ;;  %5243 = vst.msk [vmem:[#allocation3 + $0x68] sm:$0xff] %vm16472_vm7, %v5080_v0  ;;  %v10505_v9 = vunpack.i.h.bf16 %v16474_v21  ;;  %v10504_v8 = vunpack.i.l.bf16 %v16474_v21  ;;  %v10549_v25 = vunpack.i.l.bf16 %v14179_v5  ;;  %v10545_v0 = vunpack.i.h.bf16 %v14181_v38 }
 0x204   : > { %v5199_v6 = vsel %vm492_vm0, %v5023_v15, %v5075_v30  ;;  %v10529_v15 = vunpack.i.l.bf16 %v14119_v33  ;;  %v5332_v33 = vld [vmem:[#allocation3 + $0x2] ss:$2 sm:$0xff]  ;;  %v10544_v11 = vunpack.i.l.bf16 %v14181_v38  ;;  %v10589_v38 = vunpack.i.l.bf16 %v14280_v17 }
 0x205   : > { %10947 = vrot.lane.b32.xlu1 %v10946_v20, %s11693_s30  ;;  %v4882_v20 = vadd.f32 %v16462_v50, %v4764_v4  ;;  %5239 = vst.msk [vmem:[#allocation3 + $0x48] sm:$0xff] %vm16470_vm6, %v5199_v6  ;;  %v5316_v4 = vld [vmem:[#allocation3 + $0x1] ss:$2 sm:$0xff]  ;;  %vm16476_vm6 = vmmov %vm16475_vm3 }
 0x206   : > { %10942 = vrot.lane.b32.xlu0 %v10941_v47, %s11693_s30  ;;  %v10489_v47 = vunpack.i.l.bf16 %v16468_v28  ;;  %v4215_v1 = vsel %vm16476_vm6, %v4182_v36, %v10490_v60  ;;  %v10971_v54 = vpack.i.bf16 %v5318_v19, %v5316_v4  ;;  %vm16480_vm6 = vmmov %vm16475_vm3  ;;  %v5350_v36 = vld [vmem:[#allocation3 + $0x33] ss:$2 sm:$0xff]  ;;  %v10590_v4 = vunpack.i.h.bf16 %v14280_v17  ;;  %s11700_s30 = smov 96  }
 0x207   : > { %vm4914_vm2 = vcmp.gt.f32.partialorder %v4882_v20, 0.0  ;;  %v4946_v50 = vmul.f32 0.2, %v4882_v20  ;;  %v10609_v17 = vunpack.i.l.bf16 %v14319_v42 }
 0x208   : > { %v4214_v37 = vsel %vm16475_vm3, %v4181_v44, %v10489_v47  ;;  %v10524_v44 = vunpack.i.l.bf16 %v14121_v22 }
 0x209   : > { %10957 = vrot.lane.b32.xlu1 %v10956_v2, %s11694_s4  ;;  %v14411_v2 = vpop.permute.xlu1 %10677  ;;  %v4978_v46 = vsel %vm4914_vm2, %v4882_v20, %v4946_v50  ;;  %vm16477_vm2 = vmmov %vm16472_vm7  ;;  %v10525_v20 = vunpack.i.h.bf16 %v14121_v22  ;;  %v10550_v22 = vunpack.i.h.bf16 %v14179_v5  ;;  %v5348_v50 = vld [vmem:[#allocation3 + $0x3] ss:$2 sm:$0xff] }
 0x20a   : > { %10952 = vrot.lane.b32.xlu0 %v10951_v23, %s11694_s4  ;;  %v14413_v23 = vpop.permute.xlu0 %10672  ;;  %v5076_v24 = vrot.slane %v4978_v46, 7  ;;  %v5167_v16 = vrot.slane %v4978_v46, 5  ;;  %v4183_v18 = vsel %vm16477_vm2, %v4150_v43, %v10484_v59  ;;  %vm16478_vm9 = vmmov %vm16477_vm2  ;;  %v10569_v43 = vunpack.i.l.bf16 %v14233_v31 }
 0x20b   : > { %v4184_v45 = vsel %vm16478_vm9, %v4151_v48, %v10485_v3  ;;  %vm16479_vm7 = vmmov %vm16477_vm2  ;;  %v4216_v28 = vsel %vm16475_vm3, %v4183_v18, %v10504_v8  ;;  %vm16481_vm2 = vcmask 162816   ;;  %v10570_v48 = vunpack.i.h.bf16 %v14233_v31 }
 0x20c   : > { %v5077_v6 = vsel %vm492_vm0, %v5075_v30, %v5076_v24  ;;  %v5215_v13 = vsel %vm492_vm0, %v5076_v24, %v5167_v16  ;;  %v5334_v30 = vld [vmem:[#allocation3 + $0x32] ss:$2 sm:$0xff]  ;;  %v4217_v60 = vsel %vm16480_vm6, %v4184_v45, %v10505_v9  ;;  %vm16482_vm9 = vmmov %vm16481_vm2  ;;  %v10564_v3 = vunpack.i.l.bf16 %v14235_v63 }
 0x20d   : > { %10967 = vrot.lane.b32.xlu1 %v10966_v27, %s11695_s7  ;;  %v14432_v12 = vpop.permute.xlu1 %10687  ;;  %v4247_v27 = vsel %vm4226_vm5, %v4214_v37, %v10509_v61  ;;  %5240 = vst.msk [vmem:[#allocation3 + $0x50] sm:$0xff] %vm16479_vm7, %v5077_v6  ;;  %v10981_v61 = vpack.i.bf16 %v5334_v30, %v5332_v33  ;;  %v4249_v21 = vsel %vm4226_vm5, %v4216_v28, %v10524_v44  ;;  %v10565_v9 = vunpack.i.h.bf16 %v14235_v63  ;;  %vm16485_vm6 = vmmov %vm16481_vm2 }
 0x20e   : > { %10962 = vrot.lane.b32.xlu0 %v10961_v41, %s11695_s7  ;;  %v14434_v7 = vpop.permute.xlu0 %10682  ;;  %v4248_v41 = vsel %vm4226_vm5, %v4215_v1, %v10510_v51  ;;  %5241 = vst.msk [vmem:[#allocation3 + $0x58] sm:$0x3] %vm5231_vm4, %v5215_v13  ;;  %v4280_v47 = vsel %vm16481_vm2, %v4247_v27, %v10529_v15  ;;  %v4250_v5 = vsel %vm4226_vm5, %v4217_v60, %v10525_v20  ;;  %vm16483_vm7 = vcmask 195584   ;;  %v5364_v60 = vld [vmem:[#allocation3 + $0x18] ss:$2 sm:$0xff]  ;;  %s11703_s7 = smov 120  }
 0x20f   : > { %v4281_v59 = vsel %vm16482_vm9, %v4248_v41, %v10530_v52  ;;  %v4313_v46 = vsel %vm16483_vm7, %v4280_v47, %v10549_v25  ;;  %v10584_v31 = vunpack.i.l.bf16 %v14282_v56  ;;  %v10991_v19 = vpack.i.bf16 %v5350_v36, %v5348_v50  ;;  %vm16484_vm3 = vmmov %vm16483_vm7 }
 0x210   : > { %v4314_v8 = vsel %vm16484_vm3, %v4281_v59, %v10550_v22  ;;  %v4282_v15 = vsel %vm16485_vm6, %v4249_v21, %v10544_v11  ;;  %v4283_v24 = vsel %vm16481_vm2, %v4250_v5, %v10545_v0  ;;  %v10585_v16 = vunpack.i.h.bf16 %v14282_v56  ;;  %vm16486_vm9 = vmmov %vm16484_vm3 }
 0x211   : > { %v14454_v55 = vpop.permute.xlu1 %10697  ;;  %v4346_v63 = vsel %vm4325_vm8, %v4313_v46, %v10569_v43  ;;  %v4347_v37 = vsel %vm4325_vm8, %v4314_v8, %v10570_v48  ;;  %v4315_v1 = vsel %vm16486_vm9, %v4282_v15, %v10564_v3  ;;  %vm16487_vm7 = vmmov %vm16484_vm3  ;;  %vm16488_vm3 = vcmask 261120  }
 0x212   : > { %10972 = vrot.lane.b32.xlu0 %v10971_v54, %s11681_s18  ;;  %v14456_v51 = vpop.permute.xlu0 %10692  ;;  %v4316_v45 = vsel %vm16487_vm7, %v4283_v24, %v10565_v9  ;;  %v4379_v6 = vsel %vm16488_vm3, %v4346_v63, %v10589_v38  ;;  %v10610_v13 = vunpack.i.h.bf16 %v14319_v42  ;;  %v10604_v54 = vunpack.i.l.bf16 %v14321_v35  ;;  %vm16489_vm6 = vmmov %vm16488_vm3  ;;  %v5380_v38 = vld [vmem:[#allocation3 + $0x19] ss:$2 sm:$0xff] }
 0x213   : > { %v4380_v27 = vsel %vm16489_vm6, %v4347_v37, %v10590_v4  ;;  %v4348_v41 = vsel %vm4325_vm8, %v4315_v1, %v10584_v31  ;;  %v10630_v20 = vunpack.i.h.bf16 %v14332_v58  ;;  %v10629_v44 = vunpack.i.l.bf16 %v14332_v58  ;;  %vm16490_vm2 = vmmov %vm16488_vm3 }
 0x214   : > { %v5366_v56 = vld [vmem:[#allocation3 + $0x48] ss:$2 sm:$0xff]  ;;  %v4349_v33 = vsel %vm4325_vm8, %v4316_v45, %v10585_v16  ;;  %v10605_v30 = vunpack.i.h.bf16 %v14321_v35  ;;  %v10650_v28 = vunpack.i.h.bf16 %v14351_v49  ;;  %v10649_v42 = vunpack.i.l.bf16 %v14351_v49  ;;  %v5382_v36 = vld [vmem:[#allocation3 + $0x49] ss:$2 sm:$0xff]  ;;  %vm16491_vm9 = vmmov %vm16490_vm2 }
 0x215   : > { %v10708_v18 = vpop.permute.xlu1 %10707  ;;  %v4412_v47 = vsel %vm4391_vm10, %v4379_v6, %v10609_v17  ;;  %v10670_v25 = vunpack.i.h.bf16 %v14390_v57  ;;  %v10669_v59 = vunpack.i.l.bf16 %v14390_v57  ;;  %v11001_v0 = vpack.i.bf16 %v5366_v56, %v5364_v60  ;;  %v5398_v37 = vld [vmem:[#allocation3 + $0x4a] ss:$2 sm:$0xff]  ;;  %v5396_v56 = vld [vmem:[#allocation3 + $0x1a] ss:$2 sm:$0xff]  ;;  %v5414_v60 = vld [vmem:[#allocation3 + $0x4b] ss:$2 sm:$0xff] }
 0x216   : > { %10982 = vrot.lane.b32.xlu0 %v10981_v61, %s11684_s21  ;;  %v14474_v52 = vpop.permute.xlu0 %10702  ;;  %v4413_v11 = vsel %vm4391_vm10, %v4380_v27, %v10610_v13  ;;  %v4381_v35 = vsel %vm16490_vm2, %v4348_v41, %v10604_v54  ;;  %v10690_v50 = vunpack.i.h.bf16 %v14432_v12  ;;  %v10689_v49 = vunpack.i.l.bf16 %v14432_v12 }
 0x217   : > { %v4445_v48 = vsel %vm4424_vm11, %v4412_v47, %v10629_v44  ;;  %v4446_v43 = vsel %vm4424_vm11, %v4413_v11, %v10630_v20  ;;  %v10710_v3 = vunpack.i.h.bf16 %v10708_v18  ;;  %v10709_v57 = vunpack.i.l.bf16 %v10708_v18 }
 0x218   : > { %v4382_v61 = vsel %vm16491_vm9, %v4349_v33, %v10605_v30  ;;  %v10625_v21 = vunpack.i.h.bf16 %v14334_v14  ;;  %v4478_v5 = vsel %vm4457_vm12, %v4445_v48, %v10649_v42  ;;  %v4479_v9 = vsel %vm4457_vm12, %v4446_v43, %v10650_v28 }
 0x219   : > { %v14492_v22 = vpop.permute.xlu1 %10717  ;;  %v10624_v12 = vunpack.i.l.bf16 %v14334_v14  ;;  %v4511_v46 = vsel %vm4490_vm13, %v4478_v5, %v10669_v59  ;;  %v4512_v4 = vsel %vm4490_vm13, %v4479_v9, %v10670_v25  ;;  %v11011_v8 = vpack.i.bf16 %v5382_v36, %v5380_v38 }
 0x21a   : > { %10992 = vrot.lane.b32.xlu0 %v10991_v19, %s11686_s23  ;;  %v14494_v58 = vpop.permute.xlu0 %10712  ;;  %v4544_v15 = vsel %vm4523_vm14, %v4511_v46, %v10689_v49  ;;  %v4545_v24 = vsel %vm4523_vm14, %v4512_v4, %v10690_v50  ;;  %v10645_v1 = vunpack.i.h.bf16 %v14353_v53  ;;  %v10644_v17 = vunpack.i.l.bf16 %v14353_v53  ;;  %v5428_v46 = vld [vmem:[#allocation3 + $0x30] ss:$2 sm:$0xff] }
 0x21b   : > { %v4577_v14 = vsel %vm16107_vm15, %v4544_v15, %v10709_v57  ;;  %v4578_v18 = vsel %vm16107_vm15, %v4545_v24, %v10710_v3  ;;  %v10665_v45 = vunpack.i.h.bf16 %v14392_v32  ;;  %v10664_v6 = vunpack.i.l.bf16 %v14392_v32 }
 0x21c   : > { %vm16492_vm7 = vcmask 490496   ;;  %v10685_v27 = vunpack.i.h.bf16 %v14434_v7  ;;  %v10684_v41 = vunpack.i.l.bf16 %v14434_v7  ;;  %v11021_v33 = vpack.i.bf16 %v5398_v37, %v5396_v56  ;;  %v1239_v56 = vld [vmem:[#allocation2 + $0x420] ss:$2 sm:$0xff] }
 0x21d   : > { %v10728_v31 = vpop.permute.xlu1 %10727  ;;  %vm16493_vm3 = vmmov %vm16492_vm7  ;;  %v4414_v30 = vsel %vm4391_vm10, %v4381_v35, %v10624_v12  ;;  %v4415_v28 = vsel %vm4391_vm10, %v4382_v61, %v10625_v21  ;;  %v10705_v32 = vunpack.i.h.bf16 %v14474_v52  ;;  %v10704_v42 = vunpack.i.l.bf16 %v14474_v52  ;;  %v5412_v35 = vld [vmem:[#allocation3 + $0x1b] ss:$2 sm:$0xff]  ;;  %v5430_v21 = vld [vmem:[#allocation3 + $0x60] ss:$2 sm:$0xff] }
 0x21e   : > { %11002 = vrot.lane.b32.xlu0 %v11001_v0, %s11688_s25  ;;  %v10723_v19 = vpop.permute.xlu0 %10722  ;;  %v10730_v16 = vunpack.i.h.bf16 %v10728_v31  ;;  %v10729_v63 = vunpack.i.l.bf16 %v10728_v31  ;;  %v4447_v47 = vsel %vm4424_vm11, %v4414_v30, %v10644_v17  ;;  %v4448_v25 = vsel %vm4424_vm11, %v4415_v28, %v10645_v1  ;;  %vm16495_vm2 = vmmov %vm16493_vm3  ;;  %v1237_v28 = vld [vmem:[#allocation2 + $0x410] ss:$2 sm:$0xff] }
 0x21f   : > { %v10725_v7 = vunpack.i.h.bf16 %v10723_v19  ;;  %v10724_v59 = vunpack.i.l.bf16 %v10723_v19  ;;  %vm16494_vm6 = vcmask 523264   ;;  %v4480_v0 = vsel %vm4457_vm12, %v4447_v47, %v10664_v6  ;;  %vm16496_vm9 = vmmov %vm16495_vm2 }
 0x220   : > { %v4610_v13 = vsel %vm16492_vm7, %v4577_v14, %v10729_v63  ;;  %v4611_v54 = vsel %vm16493_vm3, %v4578_v18, %v10730_v16  ;;  %v4481_v11 = vsel %vm4457_vm12, %v4448_v25, %v10665_v45  ;;  %v4513_v50 = vsel %vm4490_vm13, %v4480_v0, %v10684_v41  ;;  %vm16497_vm7 = vmmov %vm16494_vm6  ;;  %v1233_v18 = vld [vmem:[#allocation2 + $0x3c0] ss:$2 sm:$0xff]  ;;  %v1235_v45 = vld [vmem:[#allocation2 + $0x3d0] ss:$2 sm:$0xff] }
 0x221   : > { %v14523_v53 = vpop.permute.xlu1 %10737  ;;  %v4632_v44 = vpack.c.bf16 %v4611_v54, %v4610_v13  ;;  %v4514_v52 = vsel %vm4490_vm13, %v4481_v11, %v10685_v27  ;;  %v11031_v48 = vpack.i.bf16 %v5414_v60, %v5412_v35  ;;  %v4546_v43 = vsel %vm4523_vm14, %v4513_v50, %v10704_v42 }
 0x222   : > { %11012 = vrot.lane.b32.xlu0 %v11011_v8, %s11690_s27  ;;  %v14525_v20 = vpop.permute.xlu0 %10732  ;;  %v4547_v3 = vsel %vm4523_vm14, %v4514_v52, %v10705_v32  ;;  %v4579_v5 = vsel %vm16107_vm15, %v4546_v43, %v10724_v59  ;;  %v11041_v8 = vpack.i.bf16 %v5430_v21, %v5428_v46  ;;  %v10600_v37 = vunpack.i.h.bf16 %v14303_v26  ;;  %v14579_v32 = vld [vmem:[%s16001_s2] ss:$0 sm:$0xff] }
 0x223   : > { %9704 = vmatprep.mubr.msk.bf16.mxu0 %vm16494_vm6, %v4632_v44  ;;  %v4580_v9 = vsel %vm16107_vm15, %v4547_v3, %v10725_v7  ;;  %v10599_v1 = vunpack.i.l.bf16 %v14303_v26  ;;  %v10620_v6 = vunpack.i.h.bf16 %v14326_v29  ;;  %v10619_v13 = vunpack.i.l.bf16 %v14326_v29 }
 0x224   : > { %v10615_v54 = vunpack.i.h.bf16 %v14328_v62  ;;  %v10614_v27 = vunpack.i.l.bf16 %v14328_v62  ;;  %v10640_v41 = vunpack.i.h.bf16 %v14338_v10  ;;  %v10639_v44 = vunpack.i.l.bf16 %v14338_v10 }
 0x225   : > { %v14539_v49 = vpop.permute.xlu1 %10747  ;;  %v4152_v30 = vsel %vm1005_vm1, %v1233_v18, %v10599_v1  ;;  %vm16498_vm3 = vcmask 64512   ;;  %v10634_v47 = vunpack.i.l.bf16 %v14340_v40  ;;  %v10635_v52 = vunpack.i.h.bf16 %v14340_v40 }
 0x226   : > { %11022 = vrot.lane.b32.xlu0 %v11021_v33, %s11692_s29  ;;  %v10743_v36 = vpop.permute.xlu0 %10742  ;;  %v4153_v33 = vsel %vm1005_vm1, %v1235_v45, %v10600_v37  ;;  %v4185_v60 = vsel %vm16498_vm3, %v4152_v30, %v10619_v13  ;;  %vm16499_vm6 = vmmov %vm16498_vm3  ;;  %v4155_v7 = vsel %vm1005_vm1, %v1239_v56, %v10615_v54  ;;  %v4154_v11 = vsel %vm1005_vm1, %v1237_v28, %v10614_v27 }
 0x227   : > { %v10745_v57 = vunpack.i.h.bf16 %v10743_v36  ;;  %v10744_v61 = vunpack.i.l.bf16 %v10743_v36  ;;  %v4186_v10 = vsel %vm16499_vm6, %v4153_v33, %v10620_v6  ;;  %v4187_v21 = vsel %vm16499_vm6, %v4154_v11, %v10634_v47 }
 0x228   : > { %v10655_v45 = vunpack.i.h.bf16 %v14376_v39  ;;  %v10654_v6 = vunpack.i.l.bf16 %v14376_v39  ;;  %v10679_v13 = vunpack.i.l.bf16 %v14411_v2  ;;  %v10680_v39 = vunpack.i.h.bf16 %v14411_v2 }
 0x229   : > { %v4612_v38 = vsel %vm16495_vm2, %v4579_v5, %v10744_v61  ;;  %v4613_v12 = vsel %vm16496_vm9, %v4580_v9, %v10745_v57  ;;  %v14548_v4 = vpop.permute.xlu1 %10757  ;;  %vm16500_vm9 = vcmask 97280   ;;  %v10660_v5 = vunpack.i.h.bf16 %v14374_v34 }
 0x22a   : > { %11032 = vrot.lane.b32.xlu0 %v11031_v48, %s11694_s4  ;;  %v14550_v31 = vpop.permute.xlu0 %10752  ;;  %v4633_v19 = vpack.c.bf16 %v4613_v12, %v4612_v38  ;;  %v4218_v35 = vsel %vm16500_vm9, %v4185_v60, %v10639_v44  ;;  %v10659_v12 = vunpack.i.l.bf16 %v14374_v34  ;;  %v10675_v28 = vunpack.i.h.bf16 %v14413_v23 }
 0x22b   : > { %v10700_v11 = vunpack.i.h.bf16 %v14454_v55 }
 0x22c   : > { %9705 = vmatmul.mubr.msk.bf16.gmra.mxu0 %vm16497_vm7, %v4633_v19  ;;  %vm16501_vm7 = vmmov %vm16500_vm9  ;;  %v4251_v33 = vsel %vm4226_vm5, %v4218_v35, %v10659_v12  ;;  %v10699_v35 = vunpack.i.l.bf16 %v14454_v55  ;;  %v10715_v55 = vunpack.i.h.bf16 %v14494_v58 }
 0x22d   : > { %v14554_v15 = vpop.permute.xlu1 %10767  ;;  %v4219_v50 = vsel %vm16501_vm7, %v4186_v10, %v10640_v41 }
 0x22e   : > { %11042 = vrot.lane.b32.xlu0 %v11041_v8, %s11696_s19  ;;  %v14556_v24 = vpop.permute.xlu0 %10762  ;;  %v4252_v30 = vsel %vm4226_vm5, %v4219_v50, %v10660_v5  ;;  %v10695_v50 = vunpack.i.h.bf16 %v14456_v51  ;;  %v10720_v5 = vunpack.i.h.bf16 %v14492_v22 }
 0x231   : > { %v14558_v16 = vpop.permute.xlu1 %10777 }
 0x232   : > { %v14560_v63 = vpop.permute.xlu0 %10772 }
 0x233   : > { %v9694_v26 = vpop.f32.mrf.mxu0 }
 0x234   : > { %v4887_v29 = vadd.f32 %v14579_v32, %v9694_v26 }
 0x235   : > { %v14564_v17 = vpop.permute.xlu1 %10787  ;;  %v4777_v25 = vpop.f32.mrf.mxu0 }
 0x236   : > { %v14566_v14 = vpop.permute.xlu0 %10782  ;;  %vm4919_vm2 = vcmp.gt.f32.partialorder %v4887_v29, 0.0  ;;  %v4951_v59 = vmul.f32 0.2, %v4887_v29  ;;  %v4885_v0 = vadd.f32 %v14579_v32, %v4777_v25 }
 0x237   : > { %v9695_v36 = vpop.f32.mrf.mxu0 }
 0x238   : > { %v4983_v48 = vsel %vm4919_vm2, %v4887_v29, %v4951_v59  ;;  %vm4917_vm3 = vcmp.gt.f32.partialorder %v4885_v0, 0.0  ;;  %v4949_v43 = vmul.f32 0.2, %v4885_v0  ;;  %v4888_v3 = vadd.f32 %v14579_v32, %v9695_v36  ;;  %vm16502_vm2 = vmmov %vm16499_vm6 }
 0x239   : > { %v14582_v42 = vpop.permute.xlu1 %10797  ;;  %v5026_v9 = vrot.slane %v4983_v48, 1  ;;  %v5084_v38 = vrot.slane %v4983_v48, 7  ;;  %v4780_v19 = vpop.f32.mrf.mxu0  ;;  %v4188_v8 = vsel %vm16502_vm2, %v4155_v7, %v10635_v52  ;;  %vm16503_vm7 = vmmov %vm16502_vm2  ;;  %v10674_v59 = vunpack.i.l.bf16 %v14413_v23 }
 0x23a   : > { %v14584_v62 = vpop.permute.xlu0 %10792  ;;  %v4981_v46 = vsel %vm4917_vm3, %v4885_v0, %v4949_v43  ;;  %vm4920_vm9 = vcmp.gt.f32.partialorder %v4888_v3, 0.0  ;;  %v4952_v40 = vmul.f32 0.2, %v4888_v3  ;;  %v4886_v26 = vadd.f32 %v14579_v32, %v4780_v19  ;;  %vm16504_vm3 = vmmov %vm16502_vm2 }
 0x23b   : > { %v5202_v37 = vsel %vm492_vm0, %v5026_v9, %v5084_v38  ;;  %v5025_v1 = vrot.slane %v4981_v46, 1  ;;  %v5081_v18 = vrot.slane %v4981_v46, 7  ;;  %vm16508_vm15 = vmmov %vm16504_vm3  ;;  %v10694_v36 = vunpack.i.l.bf16 %v14456_v51 }
 0x23c   : > { %5248 = vst.msk [vmem:[#allocation3 + $0x90] sm:$0xff] %vm16503_vm7, %v5202_v37  ;;  %v4984_v54 = vsel %vm4920_vm9, %v4888_v3, %v4952_v40  ;;  %vm4918_vm6 = vcmp.gt.f32.partialorder %v4886_v26, 0.0  ;;  %v4950_v10 = vmul.f32 0.2, %v4886_v26  ;;  %vm16505_vm9 = vcmask 97280  }
 0x23d   : > { %v14596_v57 = vpop.permute.xlu1 %10807  ;;  %v5201_v27 = vsel %vm492_vm0, %v5025_v1, %v5081_v18  ;;  %v5085_v41 = vrot.slane %v4984_v54, 7  ;;  %v5170_v44 = vrot.slane %v4984_v54, 5  ;;  %v4220_v47 = vsel %vm16505_vm9, %v4187_v21, %v10654_v6  ;;  %vm16506_vm2 = vmmov %vm16505_vm9 }
 0x23e   : > { %v14598_v61 = vpop.permute.xlu0 %10802  ;;  %5245 = vst.msk [vmem:[#allocation3 + $0x78] sm:$0xff] %vm16504_vm3, %v5201_v27  ;;  %v4221_v25 = vsel %vm16506_vm2, %v4188_v8, %v10655_v45  ;;  %vm16507_vm7 = vcmask 162816   ;;  %v4982_v52 = vsel %vm4918_vm6, %v4886_v26, %v4950_v10  ;;  %v10719_v48 = vunpack.i.l.bf16 %v14492_v22  ;;  %v5320_v27 = vld [vmem:[#allocation3 + $0x61] ss:$2 sm:$0xff]  ;;  %v1243_v26 = vld [vmem:[#allocation2 + $0x470] ss:$2 sm:$0xff] }
 0x23f   : > { %v5086_v29 = vsel %vm492_vm0, %v5084_v38, %v5085_v41  ;;  %v5218_v60 = vsel %vm492_vm0, %v5085_v41, %v5170_v44  ;;  %v4284_v7 = vsel %vm16507_vm7, %v4251_v33, %v10679_v13  ;;  %v5082_v23 = vrot.slane %v4982_v52, 7  ;;  %vm16513_vm2 = vmmov %vm16507_vm7  ;;  %v1241_v10 = vld [vmem:[#allocation2 + $0x460] ss:$2 sm:$0xff] }
 0x240   : > { %5249 = vst.msk [vmem:[#allocation3 + $0x98] sm:$0xff] %vm16508_vm15, %v5086_v29  ;;  %v5169_v43 = vrot.slane %v4982_v52, 5  ;;  %vm16509_vm15 = vmmov %vm16507_vm7  ;;  %v4254_v21 = vsel %vm4226_vm5, %v4221_v25, %v10675_v28  ;;  %v10714_v9 = vunpack.i.l.bf16 %v14494_v58  ;;  %v4253_v38 = vsel %vm4226_vm5, %v4220_v47, %v10674_v59 }
 0x241   : > { %v14609_v34 = vpop.permute.xlu1 %10817  ;;  %5250 = vst.msk [vmem:[#allocation3 + $0xa0] sm:$0x3] %vm5231_vm4, %v5218_v60  ;;  %v4285_v3 = vsel %vm16509_vm15, %v4252_v30, %v10680_v39  ;;  %v5083_v12 = vsel %vm492_vm0, %v5081_v18, %v5082_v23  ;;  %vm16510_vm3 = vcmask 195584   ;;  %v10740_v22 = vunpack.i.h.bf16 %v14523_v53  ;;  %vm16514_vm7 = vmmov %vm16513_vm2 }
 0x242   : > { %v14611_v56 = vpop.permute.xlu0 %10812  ;;  %v5217_v51 = vsel %vm492_vm0, %v5082_v23, %v5169_v43  ;;  %v4317_v19 = vsel %vm16510_vm3, %v4284_v7, %v10699_v35  ;;  %vm16511_vm6 = vmmov %vm16510_vm3  ;;  %v10739_v37 = vunpack.i.l.bf16 %v14523_v53  ;;  %vm16512_vm9 = vcmask 64512  }
 0x243   : > { %v4318_v8 = vsel %vm16511_vm6, %v4285_v3, %v10700_v11  ;;  %5246 = vst.msk [vmem:[#allocation3 + $0x80] sm:$0xff] %vm16512_vm9, %v5083_v12  ;;  %v4286_v58 = vsel %vm16513_vm2, %v4253_v38, %v10694_v36  ;;  %v4287_v1 = vsel %vm16514_vm7, %v4254_v21, %v10695_v50  ;;  %v4350_v18 = vsel %vm4325_vm8, %v4317_v19, %v10719_v48  ;;  %vm16515_vm15 = vmmov %vm16510_vm3  ;;  %v5336_v48 = vld [vmem:[#allocation3 + $0x62] ss:$2 sm:$0xff] }
 0x244   : > { %5247 = vst.msk [vmem:[#allocation3 + $0x88] sm:$0x3] %vm5231_vm4, %v5217_v51  ;;  %v10734_v45 = vunpack.i.l.bf16 %v14525_v20  ;;  %v4351_v6 = vsel %vm4325_vm8, %v4318_v8, %v10720_v5  ;;  %v4319_v13 = vsel %vm16515_vm15, %v4286_v58, %v10714_v9  ;;  %v10735_v54 = vunpack.i.h.bf16 %v14525_v20  ;;  %v1247_v3 = vld [vmem:[#allocation2 + $0x4c0] ss:$2 sm:$0xff] }
 0x245   : > { %v14628_v2 = vpop.permute.xlu1 %10827  ;;  %v10750_v53 = vunpack.i.h.bf16 %v14539_v49  ;;  %v4320_v44 = vsel %vm16510_vm3, %v4287_v1, %v10715_v55  ;;  %v10749_v33 = vunpack.i.l.bf16 %v14539_v49  ;;  %v10759_v30 = vunpack.i.l.bf16 %v14548_v4 }
 0x246   : > { %v14630_v0 = vpop.permute.xlu0 %10822  ;;  %vm16516_vm6 = vcmask 261120   ;;  %v10760_v47 = vunpack.i.h.bf16 %v14548_v4  ;;  %v10754_v25 = vunpack.i.l.bf16 %v14550_v31  ;;  %v4352_v59 = vsel %vm4325_vm8, %v4319_v13, %v10734_v45  ;;  %v5352_v45 = vld [vmem:[#allocation3 + $0x63] ss:$2 sm:$0xff] }
 0x247   : > { %v5322_v41 = vld [vmem:[#allocation3 + $0x91] ss:$2 sm:$0xff]  ;;  %v4383_v60 = vsel %vm16516_vm6, %v4350_v18, %v10739_v37  ;;  %vm16517_vm9 = vmmov %vm16516_vm6  ;;  %v10755_v49 = vunpack.i.h.bf16 %v14550_v31  ;;  %v10770_v11 = vunpack.i.h.bf16 %v14554_v15  ;;  %v10769_v35 = vunpack.i.l.bf16 %v14554_v15  ;;  %v1245_v31 = vld [vmem:[#allocation2 + $0x4b0] ss:$2 sm:$0xff] }
 0x248   : > { %v10976_v29 = vpack.i.bf16 %v5322_v41, %v5320_v27  ;;  %v4384_v20 = vsel %vm16517_vm9, %v4351_v6, %v10740_v22  ;;  %v5338_v7 = vld [vmem:[#allocation3 + $0x92] ss:$2 sm:$0xff]  ;;  %v4353_v50 = vsel %vm4325_vm8, %v4320_v44, %v10735_v54  ;;  %v4157_v52 = vsel %vm1005_vm1, %v1243_v26, %v10750_v53  ;;  %vm16518_vm2 = vmmov %vm16516_vm6  ;;  %v5354_v51 = vld [vmem:[#allocation3 + $0x93] ss:$2 sm:$0xff] }
 0x249   : > { %v14645_v46 = vpop.permute.xlu1 %10837  ;;  %v10765_v36 = vunpack.i.h.bf16 %v14556_v24  ;;  %v10764_v4 = vunpack.i.l.bf16 %v14556_v24  ;;  %v4156_v23 = vsel %vm1005_vm1, %v1241_v10, %v10749_v33  ;;  %v4416_v43 = vsel %vm4391_vm10, %v4383_v60, %v10759_v30  ;;  %vm16519_vm7 = vmmov %vm16518_vm2 }
 0x24a   : > { %v14647_v40 = vpop.permute.xlu0 %10832  ;;  %10977 = vrot.lane.b32.xlu1 %v10976_v29, %s11681_s18  ;;  %v10779_v21 = vunpack.i.l.bf16 %v14558_v16  ;;  %v10986_v9 = vpack.i.bf16 %v5338_v7, %v5336_v48  ;;  %v4417_v38 = vsel %vm4391_vm10, %v4384_v20, %v10760_v47  ;;  %v4385_v55 = vsel %vm16518_vm2, %v4352_v59, %v10754_v25 }
 0x24b   : > { %v10780_v12 = vunpack.i.h.bf16 %v14558_v16  ;;  %v10774_v24 = vunpack.i.l.bf16 %v14560_v63  ;;  %v4386_v19 = vsel %vm16519_vm7, %v4353_v50, %v10755_v49  ;;  %vm16520_vm15 = vcmask 64512  }
 0x24c   : > { %v4189_v8 = vsel %vm16520_vm15, %v4156_v23, %v10769_v35  ;;  %vm16521_vm3 = vmmov %vm16520_vm15  ;;  %v10775_v37 = vunpack.i.h.bf16 %v14560_v63  ;;  %v14698_v58 = vsel %vm1005_vm1, %v1247_v3, %v10765_v36  ;;  %v4158_v1 = vsel %vm1005_vm1, %v1245_v31, %v10764_v4 }
 0x24d   : > { %v14666_v39 = vpop.permute.xlu1 %10847  ;;  %v4190_v22 = vsel %vm16521_vm3, %v4157_v52, %v10770_v11  ;;  %v10800_v16 = vunpack.i.h.bf16 %v14582_v42  ;;  %v10799_v18 = vunpack.i.l.bf16 %v14582_v42  ;;  %v4449_v6 = vsel %vm4424_vm11, %v4416_v43, %v10779_v21 }
 0x24e   : > { %v14668_v28 = vpop.permute.xlu0 %10842  ;;  %10987 = vrot.lane.b32.xlu1 %v10986_v9, %s11684_s21  ;;  %v10820_v13 = vunpack.i.h.bf16 %v14609_v34  ;;  %v10819_v54 = vunpack.i.l.bf16 %v14609_v34  ;;  %v10996_v27 = vpack.i.bf16 %v5354_v51, %v5352_v45  ;;  %v4450_v41 = vsel %vm4424_vm11, %v4417_v38, %v10780_v12 }
 0x24f   : > { %v4418_v44 = vsel %vm4391_vm10, %v4385_v55, %v10774_v24  ;;  %v10840_v26 = vunpack.i.h.bf16 %v14645_v46  ;;  %v10839_v42 = vunpack.i.l.bf16 %v14645_v46  ;;  %v4419_v33 = vsel %vm4391_vm10, %v4386_v19, %v10775_v37 }
 0x250   : > { %v10789_v30 = vunpack.i.l.bf16 %v14564_v17  ;;  %v10790_v34 = vunpack.i.h.bf16 %v14564_v17  ;;  %v10785_v20 = vunpack.i.h.bf16 %v14566_v14  ;;  %v4482_v10 = vsel %vm4457_vm12, %v4449_v6, %v10799_v18 }
 0x251   : > { %v4483_v47 = vsel %vm4457_vm12, %v4450_v41, %v10800_v16  ;;  %v10784_v25 = vunpack.i.l.bf16 %v14566_v14  ;;  %v10794_v46 = vunpack.i.l.bf16 %v14584_v62  ;;  %v4515_v7 = vsel %vm4490_vm13, %v4482_v10, %v10819_v54 }
 0x252   : > { %v10858_v15 = vpop.permute.xlu1 %10857  ;;  %v14686_v5 = vpop.permute.xlu0 %10852  ;;  %10997 = vrot.lane.b32.xlu1 %v10996_v27, %s11686_s23  ;;  %v4516_v59 = vsel %vm4490_vm13, %v4483_v47, %v10820_v13  ;;  %v4548_v35 = vsel %vm4523_vm14, %v4515_v7, %v10839_v42  ;;  %vm16522_vm1 = vcmask 97280   ;;  %v10795_v4 = vunpack.i.h.bf16 %v14584_v62 }
 0x253   : > { %v10860_v29 = vunpack.i.h.bf16 %v10858_v15  ;;  %v10859_v60 = vunpack.i.l.bf16 %v10858_v15  ;;  %v4549_v17 = vsel %vm4523_vm14, %v4516_v59, %v10840_v26  ;;  %v4222_v36 = vsel %vm16522_vm1, %v4189_v8, %v10789_v30  ;;  %vm16527_vm15 = vmmov %vm16522_vm1 }
 0x254   : > { %vm16523_vm6 = vcmask 457728   ;;  %v10815_v23 = vunpack.i.h.bf16 %v14611_v56  ;;  %v10814_v43 = vunpack.i.l.bf16 %v14611_v56  ;;  %vm16525_vm2 = vcmask 490496  }
 0x255   : > { %v4581_v14 = vsel %vm16523_vm6, %v4548_v35, %v10859_v60  ;;  %vm16524_vm9 = vmmov %vm16523_vm6  ;;  %v4223_v21 = vsel %vm16527_vm15, %v4190_v22, %v10790_v34  ;;  %v10835_v15 = vunpack.i.h.bf16 %v14647_v40  ;;  %v10834_v9 = vunpack.i.l.bf16 %v14647_v40 }
 0x256   : > { %v4582_v48 = vsel %vm16524_vm9, %v4549_v17, %v10860_v29  ;;  %vm16526_vm7 = vmmov %vm16525_vm2  ;;  %v4191_v12 = vsel %vm16521_vm3, %v4158_v1, %v10784_v25  ;;  %v4451_v24 = vsel %vm4424_vm11, %v4418_v44, %v10794_v46  ;;  %v10855_v56 = vunpack.i.h.bf16 %v14686_v5 }
 0x257   : > { %v14706_v53 = vpop.permute.xlu1 %10867  ;;  %v14708_v63 = vpop.permute.xlu0 %10862  ;;  %v10854_v51 = vunpack.i.l.bf16 %v14686_v5  ;;  %v4452_v19 = vsel %vm4424_vm11, %v4419_v33, %v10795_v4  ;;  %v10810_v8 = vunpack.i.h.bf16 %v14596_v57  ;;  %vm16528_vm1 = vcmask 523264   ;;  %vm16529_vm6 = vmmov %vm16521_vm3 }
 0x258   : > { %v10809_v40 = vunpack.i.l.bf16 %v14596_v57  ;;  %v10805_v16 = vunpack.i.h.bf16 %v14598_v61  ;;  %v4484_v1 = vsel %vm4457_vm12, %v4451_v24, %v10814_v43  ;;  %v4485_v18 = vsel %vm4457_vm12, %v4452_v19, %v10815_v23  ;;  %vm16531_vm15 = vmmov %vm16526_vm7 }
 0x259   : > { %v10804_v45 = vunpack.i.l.bf16 %v14598_v61  ;;  %v10829_v5 = vunpack.i.l.bf16 %v14628_v2  ;;  %v4517_v6 = vsel %vm4490_vm13, %v4484_v1, %v10834_v9  ;;  %v4518_v13 = vsel %vm4490_vm13, %v4485_v18, %v10835_v15 }
 0x25a   : > { %v4550_v41 = vsel %vm4523_vm14, %v4517_v6, %v10854_v51  ;;  %v4551_v57 = vsel %vm4523_vm14, %v4518_v13, %v10855_v56  ;;  %v4192_v42 = vsel %vm16529_vm6, %v14698_v58, %v10785_v20  ;;  %v10830_v61 = vunpack.i.h.bf16 %v14628_v2 }
 0x25b   : > { %v10878_v49 = vpop.permute.xlu1 %10877  ;;  %v4255_v29 = vsel %vm4226_vm5, %v4222_v36, %v10809_v40  ;;  %v4256_v60 = vsel %vm4226_vm5, %v4223_v21, %v10810_v8  ;;  %v10825_v47 = vunpack.i.h.bf16 %v14630_v0  ;;  %v10824_v25 = vunpack.i.l.bf16 %v14630_v0 }
 0x25c   : > { %v10873_v11 = vpop.permute.xlu0 %10872  ;;  %v10880_v50 = vunpack.i.h.bf16 %v10878_v49  ;;  %v10879_v52 = vunpack.i.l.bf16 %v10878_v49  ;;  %v10849_v58 = vunpack.i.l.bf16 %v14666_v39  ;;  %vm16532_vm3 = vcmask 97280  }
 0x25d   : > { %v10875_v22 = vunpack.i.h.bf16 %v10873_v11  ;;  %v10874_v37 = vunpack.i.l.bf16 %v10873_v11  ;;  %v4224_v7 = vsel %vm16532_vm3, %v4191_v12, %v10804_v45  ;;  %vm16534_vm6 = vcmask 162816  }
 0x25e   : > { %v4614_v31 = vsel %vm16525_vm2, %v4581_v14, %v10879_v52  ;;  %v4615_v3 = vsel %vm16526_vm7, %v4582_v48, %v10880_v50  ;;  %vm16530_vm2 = vmmov %vm16524_vm9  ;;  %v4288_v49 = vsel %vm16534_vm6, %v4255_v29, %v10829_v5  ;;  %v10850_v11 = vunpack.i.h.bf16 %v14666_v39 }
 0x25f   : > { %v14738_v38 = vpop.permute.xlu1 %10887  ;;  %v4634_v55 = vpack.c.bf16 %v4615_v3, %v4614_v31  ;;  %v4583_v33 = vsel %vm16524_vm9, %v4550_v41, %v10874_v37  ;;  %v4584_v30 = vsel %vm16530_vm2, %v4551_v57, %v10875_v22  ;;  %vm16535_vm9 = vmmov %vm16534_vm6  ;;  %v10845_v17 = vunpack.i.h.bf16 %v14668_v28 }
 0x260   : > { %v14740_v62 = vpop.permute.xlu0 %10882  ;;  %v4289_v35 = vsel %vm16535_vm9, %v4256_v60, %v10830_v61  ;;  %v10844_v50 = vunpack.i.l.bf16 %v14668_v28  ;;  %v10869_v0 = vunpack.i.l.bf16 %v14706_v53  ;;  %vm16536_vm2 = vcmask 523264  }
 0x261   : > { %9708 = vmatprep.mubr.msk.bf16.mxu0 %vm16528_vm1, %v4634_v55  ;;  %vm16533_vm1 = vmmov %vm16532_vm3  ;;  %v10870_v52 = vunpack.i.h.bf16 %v14706_v53  ;;  %v10865_v36 = vunpack.i.h.bf16 %v14708_v63  ;;  %v10864_v4 = vunpack.i.l.bf16 %v14708_v63  ;;  %v10889_v14 = vunpack.i.l.bf16 %v14738_v38 }
 0x262   : > { %v4225_v59 = vsel %vm16533_vm1, %v4192_v42, %v10805_v16  ;;  %v4257_v39 = vsel %vm4226_vm5, %v4224_v7, %v10824_v25  ;;  %v10884_v28 = vunpack.i.l.bf16 %v14740_v62  ;;  %v10890_v53 = vunpack.i.h.bf16 %v14738_v38  ;;  %vm16539_vm3 = vmmov %vm16534_vm6 }
 0x263   : > { %v14757_v54 = vpop.permute.xlu1 %10897  ;;  %v4258_v48 = vsel %vm4226_vm5, %v4225_v59, %v10825_v47  ;;  %v10885_v21 = vunpack.i.h.bf16 %v14740_v62  ;;  %v4290_v15 = vsel %vm16539_vm3, %v4257_v39, %v10844_v50  ;;  %vm16540_vm1 = vmmov %vm16539_vm3 }
 0x264   : > { %v10893_v27 = vpop.permute.xlu0 %10892  ;;  %v10899_v63 = vunpack.i.l.bf16 %v14757_v54  ;;  %v4291_v9 = vsel %vm16540_vm1, %v4258_v48, %v10845_v17  ;;  %v10900_v12 = vunpack.i.h.bf16 %v14757_v54  ;;  %vm16547_vm1 = vcmask 64512  }
 0x265   : > { %v10895_v44 = vunpack.i.h.bf16 %v10893_v27  ;;  %v10894_v26 = vunpack.i.l.bf16 %v10893_v27 }
 0x267   : > { %v4616_v34 = vsel %vm16526_vm7, %v4583_v33, %v10894_v26  ;;  %v4617_v10 = vsel %vm16531_vm15, %v4584_v30, %v10895_v44  ;;  %v10908_v20 = vpop.permute.xlu1 %10907  ;;  %vm16537_vm7 = vcmask 195584  }
 0x268   : > { %v10903_v2 = vpop.permute.xlu0 %10902  ;;  %v4635_v46 = vpack.c.bf16 %v4617_v10, %v4616_v34  ;;  %v4321_v23 = vsel %vm16537_vm7, %v4288_v49, %v10849_v58  ;;  %vm16538_vm15 = vmmov %vm16537_vm7  ;;  %v10910_v19 = vunpack.i.h.bf16 %v10908_v20  ;;  %v10909_v8 = vunpack.i.l.bf16 %v10908_v20 }
 0x269   : > { %v4322_v3 = vsel %vm16538_vm15, %v4289_v35, %v10850_v11  ;;  %v4354_v55 = vsel %vm4325_vm8, %v4321_v23, %v10869_v0  ;;  %vm16541_vm6 = vmmov %vm16537_vm7  ;;  %v10905_v22 = vunpack.i.h.bf16 %v10903_v2  ;;  %v10904_v45 = vunpack.i.l.bf16 %v10903_v2 }
 0x26a   : > { %9709 = vmatmul.mubr.msk.bf16.gmra.mxu0 %vm16536_vm2, %v4635_v46  ;;  %v4355_v24 = vsel %vm4325_vm8, %v4322_v3, %v10870_v52  ;;  %v4323_v56 = vsel %vm16541_vm6, %v4290_v15, %v10864_v4  ;;  %vm16542_vm9 = vmmov %vm16541_vm6  ;;  %vm16543_vm2 = vcmask 261120   ;;  %vm16548_vm6 = vcmask 457728  }
 0x26b   : > { %v10918_v43 = vpop.permute.xlu1 %10917  ;;  %v4324_v51 = vsel %vm16542_vm9, %v4291_v9, %v10865_v36  ;;  %v4387_v38 = vsel %vm16543_vm2, %v4354_v55, %v10889_v14  ;;  %v4356_v62 = vsel %vm4325_vm8, %v4323_v56, %v10884_v28  ;;  %vm16544_vm7 = vmmov %vm16543_vm2 }
 0x26c   : > { %v10913_v31 = vpop.permute.xlu0 %10912  ;;  %v4388_v16 = vsel %vm16544_vm7, %v4355_v24, %v10890_v53  ;;  %v4357_v1 = vsel %vm4325_vm8, %v4324_v51, %v10885_v21  ;;  %vm16545_vm15 = vmmov %vm16543_vm2  ;;  %v10920_v6 = vunpack.i.h.bf16 %v10918_v43  ;;  %v10919_v13 = vunpack.i.l.bf16 %v10918_v43 }
 0x26d   : > { %v4389_v18 = vsel %vm16545_vm15, %v4356_v62, %v10899_v63  ;;  %vm16546_vm3 = vmmov %vm16543_vm2  ;;  %v10914_v54 = vunpack.i.l.bf16 %v10913_v31  ;;  %v10915_v27 = vunpack.i.h.bf16 %v10913_v31  ;;  %v4421_v61 = vsel %vm4391_vm10, %v4388_v16, %v10905_v22 }
 0x26e   : > { %v4390_v5 = vsel %vm16546_vm3, %v4357_v1, %v10900_v12  ;;  %v4422_v26 = vsel %vm4391_vm10, %v4389_v18, %v10909_v8  ;;  %v4420_v60 = vsel %vm4391_vm10, %v4387_v38, %v10904_v45  ;;  %vm16549_vm9 = vmmov %vm16548_vm6  ;;  %vm16553_vm3 = vcmask 490496  }
 0x26f   : > { %v10928_v37 = vpop.permute.xlu1 %10927  ;;  %v4423_v42 = vsel %vm4391_vm10, %v4390_v5, %v10910_v19  ;;  %v4455_v25 = vsel %vm4424_vm11, %v4422_v26, %v10919_v13  ;;  %v4453_v20 = vsel %vm4424_vm11, %v4420_v60, %v10914_v54  ;;  %v4454_v46 = vsel %vm4424_vm11, %v4421_v61, %v10915_v27  ;;  %vm16550_vm2 = vmmov %vm16547_vm1 }
 0x270   : > { %v10923_v40 = vpop.permute.xlu0 %10922  ;;  %v10930_v41 = vunpack.i.h.bf16 %v10928_v37  ;;  %v10929_v57 = vunpack.i.l.bf16 %v10928_v37  ;;  %v4456_v58 = vsel %vm4424_vm11, %v4423_v42, %v10920_v6  ;;  %v9698_v11 = vpop.f32.mrf.mxu0  ;;  %vm16552_vm15 = vmmov %vm16547_vm1 }
 0x271   : > { %v10924_v44 = vunpack.i.l.bf16 %v10923_v40  ;;  %v10925_v33 = vunpack.i.h.bf16 %v10923_v40  ;;  %v4891_v0 = vadd.f32 %v14579_v32, %v9698_v11 }
 0x272   : > { %v4488_v7 = vsel %vm4457_vm12, %v4455_v25, %v10929_v57  ;;  %v4489_v59 = vsel %vm4457_vm12, %v4456_v58, %v10930_v41  ;;  %v4793_v23 = vpop.f32.mrf.mxu0 }
 0x273   : > { %v10938_v30 = vpop.permute.xlu1 %10937  ;;  %v4486_v49 = vsel %vm4457_vm12, %v4453_v20, %v10924_v44  ;;  %v4487_v35 = vsel %vm4457_vm12, %v4454_v46, %v10925_v33  ;;  %vm4923_vm8 = vcmp.gt.f32.partialorder %v4891_v0, 0.0  ;;  %v4955_v43 = vmul.f32 0.2, %v4891_v0 }
 0x274   : > { %v10933_v29 = vpop.permute.xlu0 %10932  ;;  %v10940_v34 = vunpack.i.h.bf16 %v10938_v30  ;;  %v10939_v10 = vunpack.i.l.bf16 %v10938_v30  ;;  %v4889_v31 = vadd.f32 %v14579_v32, %v4793_v23  ;;  %v9699_v15 = vpop.f32.mrf.mxu0  ;;  %v5384_v23 = vld [vmem:[#allocation3 + $0x79] ss:$2 sm:$0xff] }
 0x275   : > { %v10934_v47 = vunpack.i.l.bf16 %v10933_v29  ;;  %v10935_v2 = vunpack.i.h.bf16 %v10933_v29  ;;  %v4987_v9 = vsel %vm4923_vm8, %v4891_v0, %v4955_v43  ;;  %v4892_v12 = vadd.f32 %v14579_v32, %v9699_v15  ;;  %vm16554_vm8 = vmmov %vm16553_vm3  ;;  %v5432_v0 = vld [vmem:[#allocation3 + $0x90] ss:$2 sm:$0xff] }
 0x276   : > { %v4521_v17 = vsel %vm4490_vm13, %v4488_v7, %v10939_v10  ;;  %v4522_v50 = vsel %vm4490_vm13, %v4489_v59, %v10940_v34  ;;  %vm4921_vm10 = vcmp.gt.f32.partialorder %v4889_v31, 0.0  ;;  %v4953_v55 = vmul.f32 0.2, %v4889_v31  ;;  %v4796_v40 = vpop.f32.mrf.mxu0 }
 0x277   : > { %v10948_v52 = vpop.permute.xlu1 %10947  ;;  %v4519_v4 = vsel %vm4490_vm13, %v4486_v49, %v10934_v47  ;;  %v4520_v28 = vsel %vm4490_vm13, %v4487_v35, %v10935_v2  ;;  %v5028_v51 = vrot.slane %v4987_v9, 1  ;;  %v5090_v38 = vrot.slane %v4987_v9, 7 }
 0x278   : > { %v10943_v36 = vpop.permute.xlu0 %10942  ;;  %v10950_v14 = vunpack.i.h.bf16 %v10948_v52  ;;  %v10949_v39 = vunpack.i.l.bf16 %v10948_v52  ;;  %v4985_v8 = vsel %vm4921_vm10, %v4889_v31, %v4953_v55  ;;  %vm4924_vm12 = vcmp.gt.f32.partialorder %v4892_v12, 0.0  ;;  %vm16555_vm10 = vmmov %vm16553_vm3  ;;  %v5400_v31 = vld [vmem:[#allocation3 + $0x7a] ss:$2 sm:$0xff] }
 0x279   : > { %v10944_v48 = vunpack.i.l.bf16 %v10943_v36  ;;  %v10945_v21 = vunpack.i.h.bf16 %v10943_v36  ;;  %v4956_v22 = vmul.f32 0.2, %v4892_v12  ;;  %v5204_v16 = vsel %vm492_vm0, %v5028_v51, %v5090_v38 }
 0x27a   : > { %v4554_v3 = vsel %vm4523_vm14, %v4521_v17, %v10949_v39  ;;  %v4555_v53 = vsel %vm4523_vm14, %v4522_v50, %v10950_v14  ;;  %v5027_v18 = vrot.slane %v4985_v8, 1  ;;  %v5087_v45 = vrot.slane %v4985_v8, 7  ;;  %5254 = vst.msk [vmem:[#allocation3 + $0xc0] sm:$0xff] %vm16547_vm1, %v5204_v16  ;;  %vm16557_vm1 = vmmov %vm16553_vm3 }
 0x27b   : > { %v4552_v63 = vsel %vm4523_vm14, %v4519_v4, %v10944_v48  ;;  %v10958_v24 = vpop.permute.xlu1 %10957  ;;  %v4553_v1 = vsel %vm4523_vm14, %v4520_v28, %v10945_v21  ;;  %v4988_v5 = vsel %vm4924_vm12, %v4892_v12, %v4956_v22  ;;  %v4890_v42 = vadd.f32 %v14579_v32, %v4796_v40  ;;  %vm16551_vm14 = vmmov %vm16548_vm6  ;;  %v5368_v4 = vld [vmem:[#allocation3 + $0x78] ss:$2 sm:$0xff]  ;;  %v5416_v21 = vld [vmem:[#allocation3 + $0x7b] ss:$2 sm:$0xff] }
 0x27c   : > { %v10953_v56 = vpop.permute.xlu0 %10952  ;;  %v10960_v62 = vunpack.i.h.bf16 %v10958_v24  ;;  %v10959_v19 = vunpack.i.l.bf16 %v10958_v24  ;;  %v5203_v57 = vsel %vm492_vm0, %v5027_v18, %v5087_v45  ;;  %v5091_v44 = vrot.slane %v4988_v5, 7  ;;  %vm16556_vm12 = vmmov %vm16548_vm6 }
 0x27d   : > { %v10955_v37 = vunpack.i.h.bf16 %v10953_v56  ;;  %v10954_v54 = vunpack.i.l.bf16 %v10953_v56  ;;  %v5172_v26 = vrot.slane %v4988_v5, 5  ;;  %5251 = vst.msk [vmem:[#allocation3 + $0xa8] sm:$0xff] %vm16550_vm2, %v5203_v57  ;;  %vm4922_vm7 = vcmp.gt.f32.partialorder %v4890_v42, 0.0 }
 0x27e   : > { %v4587_v6 = vsel %vm16548_vm6, %v4554_v3, %v10959_v19  ;;  %v4588_v13 = vsel %vm16549_vm9, %v4555_v53, %v10960_v62  ;;  %v5092_v60 = vsel %vm492_vm0, %v5090_v38, %v5091_v44  ;;  %v4954_v10 = vmul.f32 0.2, %v4890_v42  ;;  %vm16558_vm6 = vmmov %vm16550_vm2 }
 0x27f   : > { %v10968_v27 = vpop.permute.xlu1 %10967  ;;  %v4586_v61 = vsel %vm16551_vm14, %v4553_v1, %v10955_v37  ;;  %v5220_v34 = vsel %vm492_vm0, %v5091_v44, %v5172_v26  ;;  %5255 = vst.msk [vmem:[#allocation3 + $0xc8] sm:$0xff] %vm16552_vm15, %v5092_v60  ;;  %v4585_v2 = vsel %vm16556_vm12, %v4552_v63, %v10954_v54  ;;  %vm16559_vm9 = vcmask 523264  }
 0x280   : > { %v10963_v41 = vpop.permute.xlu0 %10962  ;;  %v10970_v33 = vunpack.i.h.bf16 %v10968_v27  ;;  %v10969_v30 = vunpack.i.l.bf16 %v10968_v27  ;;  %5256 = vst.msk [vmem:[#allocation3 + $0xd0] sm:$0x3] %vm5231_vm4, %v5220_v34  ;;  %v4986_v46 = vsel %vm4922_vm7, %v4890_v42, %v4954_v10  ;;  %vm16560_vm2 = vmmov %vm16559_vm9  ;;  %v5446_v34 = vld [vmem:[#allocation3 + $0x61] ss:$2 sm:$0xff]  ;;  %v5444_v10 = vld [vmem:[#allocation3 + $0x31] ss:$2 sm:$0xff] }
 0x281   : > { %v10965_v29 = vunpack.i.h.bf16 %v10963_v41  ;;  %v10964_v58 = vunpack.i.l.bf16 %v10963_v41  ;;  %v5088_v7 = vrot.slane %v4986_v46, 7  ;;  %v5171_v59 = vrot.slane %v4986_v46, 5  ;;  %v5460_v46 = vld [vmem:[#allocation3 + $0x32] ss:$2 sm:$0xff] }
 0x282   : > { %v4620_v47 = vsel %vm16553_vm3, %v4587_v6, %v10969_v30  ;;  %v4621_v25 = vsel %vm16554_vm8, %v4588_v13, %v10970_v33  ;;  %vm16561_vm3 = vmmov %vm16558_vm6 }
 0x283   : > { %v4619_v20 = vsel %vm16555_vm10, %v4586_v61, %v10965_v29  ;;  %v4618_v49 = vsel %vm16557_vm1, %v4585_v2, %v10964_v58  ;;  %v4637_v11 = vpack.c.bf16 %v4621_v25, %v4620_v47  ;;  %v5089_v17 = vsel %vm492_vm0, %v5087_v45, %v5088_v7  ;;  %vm16562_vm10 = vmmov %vm16561_vm3  ;;  %v5462_v2 = vld [vmem:[#allocation3 + $0x62] ss:$2 sm:$0xff] }
 0x284   : > { %v4636_v35 = vpack.c.bf16 %v4619_v20, %v4618_v49  ;;  %v5219_v50 = vsel %vm492_vm0, %v5088_v7, %v5171_v59  ;;  %5252 = vst.msk [vmem:[#allocation3 + $0xb0] sm:$0xff] %vm16558_vm6, %v5089_v17  ;;  %vm16563_vm12 = vmmov %vm16561_vm3  ;;  %v11056_v47 = vpack.i.bf16 %v5446_v34, %v5444_v10  ;;  %v11076_v7 = vpack.i.bf16 %v5462_v2, %v5460_v46  ;;  %v5476_v17 = vld [vmem:[#allocation3 + $0x33] ss:$2 sm:$0xff] }
 0x285   : > { %5253 = vst.msk [vmem:[#allocation3 + $0xb8] sm:$0x3] %vm5231_vm4, %v5219_v50  ;;  %vm16564_vm1 = vmmov %vm16561_vm3 }
 0x286   : > { %9712 = vmatprep.mubr.msk.bf16.mxu0 %vm16559_vm9, %v4636_v35  ;;  %v5434_v52 = vld [vmem:[#allocation3 + $0xc0] ss:$2 sm:$0xff]  ;;  %v5324_v30 = vld [vmem:[#allocation3 + $0xc1] ss:$2 sm:$0xff] }
 0x287   : > { %9713 = vmatmul.mubr.msk.bf16.gmra.mxu0 %vm16560_vm2, %v4637_v11  ;;  %v11051_v36 = vpack.i.bf16 %v5434_v52, %v5432_v0  ;;  %v5340_v58 = vld [vmem:[#allocation3 + $0xc2] ss:$2 sm:$0xff]  ;;  %v5356_v49 = vld [vmem:[#allocation3 + $0xc3] ss:$2 sm:$0xff] }
 0x288   : > { %v5478_v35 = vld [vmem:[#allocation3 + $0x63] ss:$2 sm:$0xff] }
 0x289   : > { %11052 = vrot.lane.b32.xlu0 %v11051_v36, %s11696_s19  ;;  %v11096_v50 = vpack.i.bf16 %v5478_v35, %v5476_v17  ;;  %v14916_v17 = vld [vmem:[%s16001_s2] ss:$0 sm:$0xff] }
 0x28b   : > { %v5370_v14 = vld [vmem:[#allocation3 + $0xa8] ss:$2 sm:$0xff]  ;;  %v5386_v48 = vld [vmem:[#allocation3 + $0xa9] ss:$2 sm:$0xff] }
 0x28c   : > { %v11006_v39 = vpack.i.bf16 %v5370_v14, %v5368_v4  ;;  %v11016_v28 = vpack.i.bf16 %v5386_v48, %v5384_v23  ;;  %v5402_v43 = vld [vmem:[#allocation3 + $0xaa] ss:$2 sm:$0xff]  ;;  %v5418_v53 = vld [vmem:[#allocation3 + $0xab] ss:$2 sm:$0xff] }
 0x28d   : > { %v11026_v3 = vpack.i.bf16 %v5402_v43, %v5400_v31  ;;  %v11036_v63 = vpack.i.bf16 %v5418_v53, %v5416_v21 }
 0x28e   : > { %11007 = vrot.lane.b32.xlu1 %v11006_v39, %s11688_s25 }
 0x292   : > { %11017 = vrot.lane.b32.xlu1 %v11016_v28, %s11690_s27 }
 0x296   : > { %11027 = vrot.lane.b32.xlu1 %v11026_v3, %s11692_s29 }
 0x29a   : > { %11037 = vrot.lane.b32.xlu1 %v11036_v63, %s11694_s4 }
 0x2af   : > { %v9702_v15 = vpop.f32.mrf.mxu0 }
 0x2b0   : > { %v4895_v9 = vadd.f32 %v14579_v32, %v9702_v15 }
 0x2b1   : > { %v4809_v55 = vpop.f32.mrf.mxu0 }
 0x2b2   : > { %vm4927_vm14 = vcmp.gt.f32.partialorder %v4895_v9, 0.0  ;;  %v4959_v12 = vmul.f32 0.2, %v4895_v9  ;;  %v4893_v24 = vadd.f32 %v14579_v32, %v4809_v55 }
 0x2b3   : > { %v9703_v56 = vpop.f32.mrf.mxu0 }
 0x2b4   : > { %v4991_v51 = vsel %vm4927_vm14, %v4895_v9, %v4959_v12  ;;  %vm4925_vm7 = vcmp.gt.f32.partialorder %v4893_v24, 0.0  ;;  %v4957_v38 = vmul.f32 0.2, %v4893_v24  ;;  %v4896_v62 = vadd.f32 %v14579_v32, %v9703_v56  ;;  %vm16565_vm14 = vmmov %vm16564_vm1 }
 0x2b5   : > { %v5030_v19 = vrot.slane %v4991_v51, 1  ;;  %v5096_v8 = vrot.slane %v4991_v51, 7  ;;  %v4812_v22 = vpop.f32.mrf.mxu0 }
 0x2b6   : > { %v4989_v37 = vsel %vm4925_vm7, %v4893_v24, %v4957_v38  ;;  %vm4928_vm15 = vcmp.gt.f32.partialorder %v4896_v62, 0.0  ;;  %v4960_v40 = vmul.f32 0.2, %v4896_v62  ;;  %v4894_v16 = vadd.f32 %v14579_v32, %v4812_v22 }
 0x2b7   : > { %v5206_v1 = vsel %vm492_vm0, %v5030_v19, %v5096_v8  ;;  %v5029_v18 = vrot.slane %v4989_v37, 1  ;;  %v5093_v45 = vrot.slane %v4989_v37, 7 }
 0x2b8   : > { %5260 = vst.msk [vmem:[#allocation3 + $0xf0] sm:$0xff] %vm16561_vm3, %v5206_v1  ;;  %v4992_v5 = vsel %vm4928_vm15, %v4896_v62, %v4960_v40  ;;  %vm4926_vm8 = vcmp.gt.f32.partialorder %v4894_v16, 0.0  ;;  %v4958_v6 = vmul.f32 0.2, %v4894_v16  ;;  %vm16566_vm15 = vmmov %vm16564_vm1 }
 0x2b9   : > { %v5205_v13 = vsel %vm492_vm0, %v5029_v18, %v5093_v45  ;;  %v5097_v54 = vrot.slane %v4992_v5, 7  ;;  %v5174_v27 = vrot.slane %v4992_v5, 5  ;;  %vm16567_vm3 = vmmov %vm16564_vm1  ;;  %v5492_v5 = vld [vmem:[#allocation3 + $0x48] ss:$2 sm:$0xff] }
 0x2ba   : > { %5257 = vst.msk [vmem:[#allocation3 + $0xd8] sm:$0xff] %vm16562_vm10, %v5205_v13  ;;  %v4990_v41 = vsel %vm4926_vm8, %v4894_v16, %v4958_v6  ;;  %vm16568_vm8 = vmmov %vm16564_vm1 }
 0x2bb   : > { %v5098_v57 = vsel %vm492_vm0, %v5096_v8, %v5097_v54  ;;  %v5222_v44 = vsel %vm492_vm0, %v5097_v54, %v5174_v27  ;;  %v5094_v26 = vrot.slane %v4990_v41, 7  ;;  %v5173_v42 = vrot.slane %v4990_v41, 5  ;;  %v5510_v41 = vld [vmem:[#allocation3 + $0x79] ss:$2 sm:$0xff] }
 0x2bc   : > { %5261 = vst.msk [vmem:[#allocation3 + $0xf8] sm:$0xff] %vm16563_vm12, %v5098_v57  ;;  %v5508_v57 = vld [vmem:[#allocation3 + $0x49] ss:$2 sm:$0xff] }
 0x2bd   : > { %5262 = vst.msk [vmem:[#allocation3 + $0x100] sm:$0x3] %vm5231_vm4, %v5222_v44  ;;  %v5095_v61 = vsel %vm492_vm0, %v5093_v45, %v5094_v26  ;;  %v5221_v33 = vsel %vm492_vm0, %v5094_v26, %v5173_v42  ;;  %v5494_v45 = vld [vmem:[#allocation3 + $0x78] ss:$2 sm:$0xff]  ;;  %v11136_v44 = vpack.i.bf16 %v5510_v41, %v5508_v57 }
 0x2be   : > { %5258 = vst.msk [vmem:[#allocation3 + $0xe0] sm:$0xff] %vm16564_vm1, %v5095_v61  ;;  %v11116_v6 = vpack.i.bf16 %v5494_v45, %v5492_v5 }
 0x2bf   : > { %5259 = vst.msk [vmem:[#allocation3 + $0xe8] sm:$0x3] %vm5231_vm4, %v5221_v33  ;;  %v14900_v33 = vpop.permute.xlu1 %10977 }
 0x2c3   : > { %v5326_v29 = vld [vmem:[#allocation3 + $0xf1] ss:$2 sm:$0xff]  ;;  %v14904_v10 = vpop.permute.xlu1 %10987 }
 0x2c4   : > { %v11046_v60 = vpack.i.bf16 %v5326_v29, %v5324_v30  ;;  %v5342_v25 = vld [vmem:[#allocation3 + $0xf2] ss:$2 sm:$0xff]  ;;  %v5358_v59 = vld [vmem:[#allocation3 + $0xf3] ss:$2 sm:$0xff] }
 0x2c5   : > { %v11066_v20 = vpack.i.bf16 %v5342_v25, %v5340_v58  ;;  %v11086_v11 = vpack.i.bf16 %v5358_v59, %v5356_v49  ;;  %v5372_v16 = vld [vmem:[#allocation3 + $0xd8] ss:$2 sm:$0xff]  ;;  %v5388_v54 = vld [vmem:[#allocation3 + $0xd9] ss:$2 sm:$0xff] }
 0x2c6   : > { %11047 = vrot.lane.b32.xlu1 %v11046_v60, %s11681_s18  ;;  %v5404_v42 = vld [vmem:[#allocation3 + $0xda] ss:$2 sm:$0xff]  ;;  %v5524_v29 = vld [vmem:[#allocation3 + $0x4a] ss:$2 sm:$0xff]  ;;  %v5542_v58 = vld [vmem:[#allocation3 + $0x7b] ss:$2 sm:$0xff] }
 0x2c7   : > { %v5526_v30 = vld [vmem:[#allocation3 + $0x7a] ss:$2 sm:$0xff]  ;;  %v14907_v46 = vpop.permute.xlu1 %10997 }
 0x2c8   : > { %v11156_v60 = vpack.i.bf16 %v5526_v30, %v5524_v29  ;;  %v5436_v59 = vld [vmem:[#allocation3 + $0xf0] ss:$2 sm:$0xff] }
 0x2c9   : > { %v5466_v29 = vld [vmem:[#allocation3 + $0xc2] ss:$2 sm:$0xff] }
 0x2ca   : > { %11057 = vrot.lane.b32.xlu1 %v11056_v47, %s11697_s24  ;;  %v5420_v47 = vld [vmem:[#allocation3 + $0xdb] ss:$2 sm:$0xff] }
 0x2ce   : > { %11067 = vrot.lane.b32.xlu1 %v11066_v20, %s11684_s21  ;;  %v5540_v20 = vld [vmem:[#allocation3 + $0x4b] ss:$2 sm:$0xff] }
 0x2cf   : > { %v11176_v2 = vpack.i.bf16 %v5542_v58, %v5540_v20  ;;  %v5308_v58 = vld [vmem:[#allocation3 + $0xc0] ss:$2 sm:$0xff]  ;;  %v5310_v20 = vld [vmem:[#allocation3 + $0xf0] ss:$2 sm:$0xff] }
 0x2d2   : > { %11077 = vrot.lane.b32.xlu1 %v11076_v7, %s11698_s26 }
 0x2d6   : > { %11087 = vrot.lane.b32.xlu1 %v11086_v11, %s11686_s23 }
 0x2da   : > { %11097 = vrot.lane.b32.xlu1 %v11096_v50, %s11699_s28 }
 0x2ec   : > { %v9706_v0 = vpop.f32.mrf.mxu0 }
 0x2ed   : > { %v4899_v52 = vadd.f32 %v14579_v32, %v9706_v0 }
 0x2ee   : > { %v4825_v36 = vpop.f32.mrf.mxu0 }
 0x2ef   : > { %vm4931_vm6 = vcmp.gt.f32.partialorder %v4899_v52, 0.0  ;;  %v4963_v4 = vmul.f32 0.2, %v4899_v52  ;;  %v4897_v14 = vadd.f32 %v14579_v32, %v4825_v36 }
 0x2f0   : > { %v9707_v39 = vpop.f32.mrf.mxu0 }
 0x2f1   : > { %v4995_v48 = vsel %vm4931_vm6, %v4899_v52, %v4963_v4  ;;  %vm4929_vm9 = vcmp.gt.f32.partialorder %v4897_v14, 0.0  ;;  %v4961_v23 = vmul.f32 0.2, %v4897_v14  ;;  %v4900_v28 = vadd.f32 %v14579_v32, %v9707_v39  ;;  %vm16569_vm6 = vmmov %vm16567_vm3 }
 0x2f2   : > { %v5032_v43 = vrot.slane %v4995_v48, 1  ;;  %v5102_v31 = vrot.slane %v4995_v48, 7  ;;  %v4828_v3 = vpop.f32.mrf.mxu0 }
 0x2f3   : > { %v4993_v53 = vsel %vm4929_vm9, %v4897_v14, %v4961_v23  ;;  %vm4932_vm2 = vcmp.gt.f32.partialorder %v4900_v28, 0.0  ;;  %v4964_v21 = vmul.f32 0.2, %v4900_v28  ;;  %v4898_v63 = vadd.f32 %v14579_v32, %v4828_v3 }
 0x2f4   : > { %v5208_v15 = vsel %vm492_vm0, %v5032_v43, %v5102_v31  ;;  %v5031_v9 = vrot.slane %v4993_v53, 1  ;;  %v5099_v55 = vrot.slane %v4993_v53, 7 }
 0x2f5   : > { %5266 = vst.msk [vmem:[#allocation3 + $0x120] sm:$0xff] %vm16565_vm14, %v5208_v15  ;;  %v4996_v12 = vsel %vm4932_vm2, %v4900_v28, %v4964_v21  ;;  %vm4930_vm7 = vcmp.gt.f32.partialorder %v4898_v63, 0.0  ;;  %v4962_v24 = vmul.f32 0.2, %v4898_v63  ;;  %vm16570_vm2 = vmmov %vm16567_vm3 }
 0x2f6   : > { %v5207_v56 = vsel %vm492_vm0, %v5031_v9, %v5099_v55  ;;  %v5103_v51 = vrot.slane %v4996_v12, 7  ;;  %v5176_v38 = vrot.slane %v4996_v12, 5  ;;  %vm16571_vm14 = vmmov %vm16570_vm2 }
 0x2f7   : > { %5263 = vst.msk [vmem:[#allocation3 + $0x108] sm:$0xff] %vm16566_vm15, %v5207_v56  ;;  %v4994_v62 = vsel %vm4930_vm7, %v4898_v63, %v4962_v24  ;;  %vm16572_vm7 = vmmov %vm16570_vm2 }
 0x2f8   : > { %v5104_v19 = vsel %vm492_vm0, %v5102_v31, %v5103_v51  ;;  %v5224_v32 = vsel %vm492_vm0, %v5103_v51, %v5176_v38  ;;  %v5100_v8 = vrot.slane %v4994_v62, 7  ;;  %v5175_v22 = vrot.slane %v4994_v62, 5  ;;  %vm16573_vm15 = vmmov %vm16570_vm2 }
 0x2f9   : > { %5267 = vst.msk [vmem:[#allocation3 + $0x128] sm:$0xff] %vm16567_vm3, %v5104_v19  ;;  %vm16574_vm3 = vmmov %vm16570_vm2 }
 0x2fa   : > { %5268 = vst.msk [vmem:[#allocation3 + $0x130] sm:$0x3] %vm5231_vm4, %v5224_v32  ;;  %v5101_v37 = vsel %vm492_vm0, %v5099_v55, %v5100_v8  ;;  %v5223_v40 = vsel %vm492_vm0, %v5100_v8, %v5175_v22 }
 0x2fb   : > { %5264 = vst.msk [vmem:[#allocation3 + $0x110] sm:$0xff] %vm16568_vm8, %v5101_v37 }
 0x2fc   : > { %5265 = vst.msk [vmem:[#allocation3 + $0x118] sm:$0x3] %vm5231_vm4, %v5223_v40 }
 0x300   : > { %v5438_v7 = vld [vmem:[#allocation3 + $0x120] ss:$2 sm:$0xff]  ;;  %v14910_v11 = vpop.permute.xlu1 %11007 }
 0x301   : > { %v11186_v49 = vpack.i.bf16 %v5438_v7, %v5436_v59 }
 0x302   : > { %v5374_v1 = vld [vmem:[#allocation3 + $0x108] ss:$2 sm:$0xff]  ;;  %v5390_v13 = vld [vmem:[#allocation3 + $0x109] ss:$2 sm:$0xff] }
 0x303   : > { %v11106_v18 = vpack.i.bf16 %v5374_v1, %v5372_v16  ;;  %v11126_v27 = vpack.i.bf16 %v5390_v13, %v5388_v54  ;;  %v5406_v26 = vld [vmem:[#allocation3 + $0x10a] ss:$2 sm:$0xff]  ;;  %v5422_v34 = vld [vmem:[#allocation3 + $0x10b] ss:$2 sm:$0xff] }
 0x304   : > { %v11146_v61 = vpack.i.bf16 %v5406_v26, %v5404_v42  ;;  %v11166_v25 = vpack.i.bf16 %v5422_v34, %v5420_v47  ;;  %v14919_v0 = vpop.permute.xlu1 %11017  ;;  %v5450_v13 = vld [vmem:[#allocation3 + $0xc1] ss:$2 sm:$0xff]  ;;  %v5448_v54 = vld [vmem:[#allocation3 + $0x91] ss:$2 sm:$0xff] }
 0x305   : > { %11107 = vrot.lane.b32.xlu1 %v11106_v18, %s11688_s25  ;;  %v5328_v18 = vld [vmem:[#allocation3 + $0x121] ss:$2 sm:$0xff] }
 0x308   : > { %v14924_v63 = vpop.permute.xlu1 %11027 }
 0x309   : > { %11117 = vrot.lane.b32.xlu1 %v11116_v6, %s11700_s30 }
 0x30c   : > { %v14934_v37 = vpop.permute.xlu1 %11037 }
 0x30d   : > { %11127 = vrot.lane.b32.xlu1 %v11126_v27, %s11690_s27  ;;  %v11071_v27 = vpack.i.bf16 %v5450_v13, %v5448_v54 }
 0x311   : > { %11137 = vrot.lane.b32.xlu1 %v11136_v44, %s11701_s5  ;;  %v5344_v44 = vld [vmem:[#allocation3 + $0x122] ss:$2 sm:$0xff] }
 0x315   : > { %11147 = vrot.lane.b32.xlu1 %v11146_v61, %s11692_s29 }
 0x319   : > { %11157 = vrot.lane.b32.xlu1 %v11156_v60, %s11702_s6 }
 0x31d   : > { %11167 = vrot.lane.b32.xlu1 %v11166_v25, %s11694_s4  ;;  %v5464_v25 = vld [vmem:[#allocation3 + $0x92] ss:$2 sm:$0xff] }
 0x31e   : > { %v11091_v7 = vpack.i.bf16 %v5466_v29, %v5464_v25 }
 0x321   : > { %11177 = vrot.lane.b32.xlu1 %v11176_v2, %s11703_s7 }
 0x325   : > { %11187 = vrot.lane.b32.xlu1 %v11186_v49, %s11696_s19 }
 0x32a   : > { %v9710_v35 = vpop.f32.mrf.mxu0 }
 0x32b   : > { %v4903_v50 = vadd.f32 %v14916_v17, %v9710_v35 }
 0x32c   : > { %v4841_v52 = vpop.f32.mrf.mxu0 }
 0x32d   : > { %vm4935_vm10 = vcmp.gt.f32.partialorder %v4903_v50, 0.0  ;;  %v4967_v36 = vmul.f32 0.2, %v4903_v50  ;;  %v4901_v4 = vadd.f32 %v14916_v17, %v4841_v52 }
 0x32e   : > { %v9711_v14 = vpop.f32.mrf.mxu0 }
 0x32f   : > { %v4999_v39 = vsel %vm4935_vm10, %v4903_v50, %v4967_v36  ;;  %vm4933_vm12 = vcmp.gt.f32.partialorder %v4901_v4, 0.0  ;;  %v4965_v48 = vmul.f32 0.2, %v4901_v4  ;;  %v4904_v23 = vadd.f32 %v14916_v17, %v9711_v14 }
 0x330   : > { %v5034_v28 = vrot.slane %v4999_v39, 1  ;;  %v5108_v43 = vrot.slane %v4999_v39, 7  ;;  %v4844_v31 = vpop.f32.mrf.mxu0  ;;  %v5360_v39 = vld [vmem:[#allocation3 + $0x123] ss:$2 sm:$0xff] }
 0x331   : > { %v4997_v3 = vsel %vm4933_vm12, %v4901_v4, %v4965_v48  ;;  %vm4936_vm1 = vcmp.gt.f32.partialorder %v4904_v23, 0.0  ;;  %v4968_v53 = vmul.f32 0.2, %v4904_v23  ;;  %v4902_v21 = vadd.f32 %v14916_v17, %v4844_v31 }
 0x332   : > { %v5210_v15 = vsel %vm492_vm0, %v5034_v28, %v5108_v43  ;;  %v5033_v9 = vrot.slane %v4997_v3, 1  ;;  %v5105_v55 = vrot.slane %v4997_v3, 7  ;;  %vm16575_vm12 = vcmask 195584  }
 0x333   : > { %5272 = vst.msk [vmem:[#allocation3 + $0x150] sm:$0xff] %vm16569_vm6, %v5210_v15  ;;  %v5000_v12 = vsel %vm4936_vm1, %v4904_v23, %v4968_v53  ;;  %vm4934_vm9 = vcmp.gt.f32.partialorder %v4902_v21, 0.0  ;;  %v4966_v24 = vmul.f32 0.2, %v4902_v21  ;;  %vm16576_vm1 = vmmov %vm16575_vm12 }
 0x334   : > { %v5209_v56 = vsel %vm492_vm0, %v5033_v9, %v5105_v55  ;;  %v5109_v51 = vrot.slane %v5000_v12, 7  ;;  %v5178_v38 = vrot.slane %v5000_v12, 5 }
 0x335   : > { %5269 = vst.msk [vmem:[#allocation3 + $0x138] sm:$0xff] %vm16570_vm2, %v5209_v56  ;;  %v4998_v62 = vsel %vm4934_vm9, %v4902_v21, %v4966_v24  ;;  %v5482_v56 = vld [vmem:[#allocation3 + $0xc3] ss:$2 sm:$0xff]  ;;  %vm16577_vm9 = vmmov %vm16570_vm2 }
 0x336   : > { %v5110_v19 = vsel %vm492_vm0, %v5108_v43, %v5109_v51  ;;  %v5226_v32 = vsel %vm492_vm0, %v5109_v51, %v5178_v38  ;;  %v5106_v8 = vrot.slane %v4998_v62, 7  ;;  %v5177_v22 = vrot.slane %v4998_v62, 5 }
 0x337   : > { %5273 = vst.msk [vmem:[#allocation3 + $0x158] sm:$0xff] %vm16571_vm14, %v5110_v19  ;;  %vm16578_vm14 = vmmov %vm16574_vm3 }
 0x338   : > { %5274 = vst.msk [vmem:[#allocation3 + $0x160] sm:$0x3] %vm5231_vm4, %v5226_v32  ;;  %v5107_v40 = vsel %vm492_vm0, %v5105_v55, %v5106_v8  ;;  %v5225_v16 = vsel %vm492_vm0, %v5106_v8, %v5177_v22  ;;  %v11048_v1 = vpop.permute.xlu1 %11047  ;;  %v5480_v8 = vld [vmem:[#allocation3 + $0x93] ss:$2 sm:$0xff] }
 0x339   : > { %5270 = vst.msk [vmem:[#allocation3 + $0x140] sm:$0xff] %vm16572_vm7, %v5107_v40  ;;  %v11050_v42 = vunpack.i.h.bf16 %v11048_v1  ;;  %v11049_v61 = vunpack.i.l.bf16 %v11048_v1  ;;  %vm16579_vm7 = vmmov %vm16574_vm3 }
 0x33a   : > { %5271 = vst.msk [vmem:[#allocation3 + $0x148] sm:$0x3] %vm5231_vm4, %v5225_v16  ;;  %v11111_v16 = vpack.i.bf16 %v5482_v56, %v5480_v8 }
 0x33b   : > { %v6039_v49 = vsel %vm16573_vm15, %v5308_v58, %v11049_v61  ;;  %v6040_v35 = vsel %vm16574_vm3, %v5310_v20, %v11050_v42  ;;  %vm16580_vm15 = vmmov %vm16574_vm3  ;;  %v11546_v42 = vld [vmem:[%s16000_s1 + $0x50] sm:$0xff]   ;;  %v14985_v61 = vpop.permute.xlu0 %10972 }
 0x33c   : > { %v14940_v6 = vpop.permute.xlu1 %11057 }
 0x33e   : > { %v5330_v45 = vld [vmem:[#allocation3 + $0x151] ss:$2 sm:$0xff]  ;;  %v5440_v29 = vld [vmem:[#allocation3 + $0x150] ss:$2 sm:$0xff] }
 0x33f   : > { %v11061_v5 = vpack.i.bf16 %v5330_v45, %v5328_v18  ;;  %v5346_v57 = vld [vmem:[#allocation3 + $0x152] ss:$2 sm:$0xff]  ;;  %v5362_v59 = vld [vmem:[#allocation3 + $0x153] ss:$2 sm:$0xff] }
 0x340   : > { %v11068_v41 = vpop.permute.xlu1 %11067  ;;  %v11081_v26 = vpack.i.bf16 %v5346_v57, %v5344_v44  ;;  %v11101_v31 = vpack.i.bf16 %v5362_v59, %v5360_v39  ;;  %v5456_v59 = vld [vmem:[#allocation3 + $0x151] ss:$2 sm:$0xff]  ;;  %v5472_v39 = vld [vmem:[#allocation3 + $0x152] ss:$2 sm:$0xff] }
 0x341   : > { %11062 = vrot.lane.b32.xlu0 %v11061_v5, %s11681_s18  ;;  %v11070_v60 = vunpack.i.h.bf16 %v11068_v41  ;;  %v11069_v34 = vunpack.i.l.bf16 %v11068_v41 }
 0x343   : > { %v6047_v48 = vsel %vm4226_vm5, %v6039_v49, %v11069_v34  ;;  %v6048_v23 = vsel %vm4226_vm5, %v6040_v35, %v11070_v60  ;;  %v5376_v34 = vld [vmem:[#allocation3 + $0x138] ss:$2 sm:$0xff]  ;;  %v5496_v49 = vld [vmem:[#allocation3 + $0xa8] ss:$2 sm:$0xff] }
 0x344   : > { %v14944_v30 = vpop.permute.xlu1 %11077 }
 0x345   : > { %11072 = vrot.lane.b32.xlu0 %v11071_v27, %s11697_s24 }
 0x347   : > { %v9714_v47 = vpop.f32.mrf.mxu0 }
 0x348   : > { %v4907_v2 = vadd.f32 %v14916_v17, %v9714_v47  ;;  %v11088_v52 = vpop.permute.xlu1 %11087 }
 0x349   : > { %11082 = vrot.lane.b32.xlu0 %v11081_v26, %s11684_s21  ;;  %v4857_v50 = vpop.f32.mrf.mxu0  ;;  %v11090_v14 = vunpack.i.h.bf16 %v11088_v52  ;;  %v11089_v28 = vunpack.i.l.bf16 %v11088_v52  ;;  %v11545_v26 = vld [vmem:[%s16000_s1 + $0x58] sm:$0xff]   ;;  %v11547_v52 = vld [vmem:[%s16000_s1 + $0x48] sm:$0xff]  }
 0x34a   : > { %vm4939_vm8 = vcmp.gt.f32.partialorder %v4907_v2, 0.0  ;;  %v4971_v36 = vmul.f32 0.2, %v4907_v2  ;;  %v4905_v4 = vadd.f32 %v14916_v17, %v4857_v50  ;;  %9716 = vmatprep.subr.bf16.mxu1 %v11545_v26 }
 0x34b   : > { %v9715_v43 = vpop.f32.mrf.mxu0  ;;  %v14955_v21 = vsel %vm16575_vm12, %v6048_v23, %v11090_v14  ;;  %v14958_v55 = vsel %vm16576_vm1, %v6047_v48, %v11089_v28  ;;  %9717 = vmatpush3.bf16.msra.mxu1 %v11545_v26  ;;  %v11548_v14 = vld [vmem:[%s16000_s1 + $0x40] sm:$0xff]   ;;  %v5392_v48 = vld [vmem:[#allocation3 + $0x139] ss:$2 sm:$0xff]  ;;  %vm16584_vm12 = vmmov %vm16574_vm3 }
 0x34c   : > { %v5003_v3 = vsel %vm4939_vm8, %v4907_v2, %v4971_v36  ;;  %vm4937_vm10 = vcmp.gt.f32.partialorder %v4905_v4, 0.0  ;;  %v4969_v53 = vmul.f32 0.2, %v4905_v4  ;;  %v4908_v12 = vadd.f32 %v14916_v17, %v9715_v43  ;;  %vm16581_vm8 = vmmov %vm16574_vm3  ;;  %9718 = vmatprep.subr.bf16.mxu1 %v11546_v42  ;;  %v5498_v2 = vld [vmem:[#allocation3 + $0xd8] ss:$2 sm:$0xff] }
 0x34d   : > { %11092 = vrot.lane.b32.xlu0 %v11091_v7, %s11698_s26  ;;  %v5036_v15 = vrot.slane %v5003_v3, 1  ;;  %v5114_v9 = vrot.slane %v5003_v3, 7  ;;  %v4860_v24 = vpop.f32.mrf.mxu0  ;;  %v14987_v7 = vpop.permute.xlu0 %10982  ;;  %v11131_v50 = vpack.i.bf16 %v5498_v2, %v5496_v49  ;;  %v5514_v3 = vld [vmem:[#allocation3 + $0xd9] ss:$2 sm:$0xff]  ;;  %vm16585_vm1 = vmmov %vm16574_vm3 }
 0x34e   : > { %v5001_v51 = vsel %vm4937_vm10, %v4905_v4, %v4969_v53  ;;  %v4906_v38 = vadd.f32 %v14916_v17, %v4860_v24  ;;  %vm4940_vm6 = vcmp.gt.f32.partialorder %v4908_v12, 0.0  ;;  %v4972_v22 = vmul.f32 0.2, %v4908_v12  ;;  %v11549_v53 = vld [vmem:[%s16000_s1 + $0x38] sm:$0xff]  }
 0x34f   : > { %v5212_v62 = vsel %vm492_vm0, %v5036_v15, %v5114_v9  ;;  %v5035_v19 = vrot.slane %v5001_v51, 1  ;;  %v5111_v32 = vrot.slane %v5001_v51, 7  ;;  %9719 = vmatpush3.bf16.msra.mxu1 %v11546_v42  ;;  %v5488_v15 = vld [vmem:[#allocation3 + $0x153] ss:$2 sm:$0xff] }
 0x350   : > { %5278 = vst.msk [vmem:[#allocation3 + $0x180] sm:$0xff] %vm16577_vm9, %v5212_v62  ;;  %vm4938_vm2 = vcmp.gt.f32.partialorder %v4906_v38, 0.0  ;;  %v4970_v40 = vmul.f32 0.2, %v4906_v38  ;;  %v5004_v17 = vsel %vm4940_vm6, %v4908_v12, %v4972_v22  ;;  %9720 = vmatprep.subr.bf16.mxu1 %v11547_v52  ;;  %v11550_v62 = vld [vmem:[%s16000_s1 + $0x30] sm:$0xff]   ;;  %vm16586_vm6 = vcmask 195584  }
 0x351   : > { %11102 = vrot.lane.b32.xlu0 %v11101_v31, %s11686_s23  ;;  %v5211_v1 = vsel %vm492_vm0, %v5035_v19, %v5111_v32  ;;  %v5115_v45 = vrot.slane %v5004_v17, 7  ;;  %v5180_v5 = vrot.slane %v5004_v17, 5  ;;  %v14999_v23 = vpop.permute.xlu0 %10992  ;;  %v11551_v17 = vld [vmem:[%s16000_s1 + $0x28] sm:$0xff]   ;;  %vm16587_vm9 = vmmov %vm16586_vm6 }
 0x352   : > { %5275 = vst.msk [vmem:[#allocation3 + $0x168] sm:$0xff] %vm16578_vm14, %v5211_v1  ;;  %v5002_v18 = vsel %vm4938_vm2, %v4906_v38, %v4970_v40  ;;  %v5530_v40 = vld [vmem:[#allocation3 + $0xda] ss:$2 sm:$0xff]  ;;  %v5424_v26 = vld [vmem:[#allocation3 + $0x13b] ss:$2 sm:$0xff] }
 0x353   : > { %5281 = vst.msk [vmem:[#allocation3 + $0x198] sm:$0xff] %vm16579_vm7, %v5211_v1  ;;  %v5112_v13 = vrot.slane %v5002_v18, 7  ;;  %v5179_v54 = vrot.slane %v5002_v18, 5  ;;  %v5116_v27 = vsel %vm492_vm0, %v5114_v9, %v5115_v45  ;;  %v5228_v41 = vsel %vm492_vm0, %v5115_v45, %v5180_v5  ;;  %9721 = vmatpush3.bf16.msra.mxu1 %v11547_v52  ;;  %v5512_v9 = vld [vmem:[#allocation3 + $0xa9] ss:$2 sm:$0xff]  ;;  %v15020_v5 = vpop.permute.xlu1 %11097 }
 0x354   : > { %5279 = vst.msk [vmem:[#allocation3 + $0x188] sm:$0xff] %vm16580_vm15, %v5116_v27  ;;  %9722 = vmatprep.subr.bf16.mxu1 %v11548_v14  ;;  %v11151_v24 = vpack.i.bf16 %v5514_v3, %v5512_v9  ;;  %v5528_v18 = vld [vmem:[#allocation3 + $0xaa] ss:$2 sm:$0xff]  ;;  %v10984_v3 = vunpack.i.l.bf16 %v14987_v7  ;;  %vm16590_vm7 = vcmask 457728  }
 0x355   : > { %11112 = vrot.lane.b32.xlu0 %v11111_v16, %s11699_s28  ;;  %v5113_v57 = vsel %vm492_vm0, %v5111_v32, %v5112_v13  ;;  %v5227_v44 = vsel %vm492_vm0, %v5112_v13, %v5179_v54  ;;  %5280 = vst.msk [vmem:[#allocation3 + $0x190] sm:$0x3] %vm5231_vm4, %v5228_v41  ;;  %v15009_v19 = vpop.permute.xlu0 %11002  ;;  %v5408_v32 = vld [vmem:[#allocation3 + $0x13a] ss:$2 sm:$0xff]  ;;  %v11171_v54 = vpack.i.bf16 %v5530_v40, %v5528_v18  ;;  %v5486_v18 = vld [vmem:[#allocation3 + $0x123] ss:$2 sm:$0xff]  ;;  %vm16591_vm15 = vmmov %vm16590_vm7 }
 0x356   : > { %5276 = vst.msk [vmem:[#allocation3 + $0x170] sm:$0xff] %vm16574_vm3, %v5113_v57  ;;  %v5470_v9 = vld [vmem:[#allocation3 + $0x122] ss:$2 sm:$0xff]  ;;  %vm6099_vm3 = vcmask 588800  }
 0x357   : > { %5277 = vst.msk [vmem:[#allocation3 + $0x178] sm:$0x3] %vm5231_vm4, %v5227_v44  ;;  %5283 = vst.msk [vmem:[#allocation3 + $0x1a8] sm:$0x3] %vm5231_vm4, %v5227_v44  ;;  %9723 = vmatpush3.bf16.msra.mxu1 %v11548_v14  ;;  %v11552_v44 = vld [vmem:[%s16000_s1 + $0x20] sm:$0xff]   ;;  %vm16582_vm4 = vcmask 261120   ;;  %v10975_v14 = vunpack.i.h.bf16 %v14985_v61 }
 0x358   : > { %5282 = vst.msk [vmem:[#allocation3 + $0x1a0] sm:$0xff] %vm16581_vm8, %v5113_v57  ;;  %9724 = vmatprep.subr.bf16.mxu1 %v11549_v53  ;;  %vm16583_vm10 = vmmov %vm16582_vm4  ;;  %vm16592_vm8 = vcmask 523264  }
 0x359   : > { %v15018_v45 = vpop.permute.xlu0 %11012  ;;  %vm16588_vm2 = vmmov %vm16582_vm4 }
 0x35a   : > { %v11014_v40 = vunpack.i.l.bf16 %v15018_v45  ;;  %vm16589_vm14 = vmmov %vm16588_vm2 }
 0x35b   : > { %v5442_v60 = vld [vmem:[#allocation3 + $0x180] ss:$2 sm:$0xff]  ;;  %v5458_v20 = vld [vmem:[#allocation3 + $0x181] ss:$2 sm:$0xff]  ;;  %9725 = vmatpush3.bf16.msra.mxu1 %v11549_v53 }
 0x35c   : > { %v11196_v25 = vpack.i.bf16 %v5442_v60, %v5440_v29  ;;  %v11206_v35 = vpack.i.bf16 %v5458_v20, %v5456_v59  ;;  %v5474_v36 = vld [vmem:[#allocation3 + $0x182] ss:$2 sm:$0xff]  ;;  %v5490_v31 = vld [vmem:[#allocation3 + $0x183] ss:$2 sm:$0xff]  ;;  %9726 = vmatprep.subr.bf16.mxu1 %v11550_v62 }
 0x35d   : > { %v5378_v47 = vld [vmem:[#allocation3 + $0x168] ss:$2 sm:$0xff]  ;;  %v5394_v4 = vld [vmem:[#allocation3 + $0x169] ss:$2 sm:$0xff]  ;;  %v11216_v28 = vpack.i.bf16 %v5474_v36, %v5472_v39  ;;  %v11226_v12 = vpack.i.bf16 %v5490_v31, %v5488_v15  ;;  %v15027_v2 = vpop.permute.xlu0 %11022  ;;  %v10985_v31 = vunpack.i.h.bf16 %v14987_v7 }
 0x35e   : > { %v11121_v58 = vpack.i.bf16 %v5378_v47, %v5376_v34  ;;  %11197 = vrot.lane.b32.xlu1 %v11196_v25, %s11696_s19  ;;  %v11141_v43 = vpack.i.bf16 %v5394_v4, %v5392_v48  ;;  %v5504_v56 = vld [vmem:[#allocation3 + $0x168] ss:$2 sm:$0xff]  ;;  %v5520_v16 = vld [vmem:[#allocation3 + $0x169] ss:$2 sm:$0xff]  ;;  %v10974_v48 = vunpack.i.l.bf16 %v14985_v61 }
 0x35f   : > { %v5506_v51 = vld [vmem:[#allocation3 + $0x198] ss:$2 sm:$0xff]  ;;  %v5522_v1 = vld [vmem:[#allocation3 + $0x199] ss:$2 sm:$0xff]  ;;  %9727 = vmatpush3.bf16.msra.mxu1 %v11550_v62 }
 0x360   : > { %11122 = vrot.lane.b32.xlu0 %v11121_v58, %s11688_s25  ;;  %v5410_v38 = vld [vmem:[#allocation3 + $0x16a] ss:$2 sm:$0xff]  ;;  %v11236_v8 = vpack.i.bf16 %v5506_v51, %v5504_v56  ;;  %v11246_v13 = vpack.i.bf16 %v5522_v1, %v5520_v16  ;;  %v5538_v41 = vld [vmem:[#allocation3 + $0x19a] ss:$2 sm:$0xff]  ;;  %v5426_v57 = vld [vmem:[#allocation3 + $0x16b] ss:$2 sm:$0xff]  ;;  %9728 = vmatprep.subr.bf16.mxu1 %v11551_v17  ;;  %v10994_v56 = vunpack.i.l.bf16 %v14999_v23  ;;  %v11005_v51 = vunpack.i.h.bf16 %v15009_v19 }
 0x361   : > { %v11161_v22 = vpack.i.bf16 %v5410_v38, %v5408_v32  ;;  %v5536_v27 = vld [vmem:[#allocation3 + $0x16a] ss:$2 sm:$0xff]  ;;  %v11181_v29 = vpack.i.bf16 %v5426_v57, %v5424_v26  ;;  %v5552_v25 = vld [vmem:[#allocation3 + $0x16b] ss:$2 sm:$0xff]  ;;  %v5554_v58 = vld [vmem:[#allocation3 + $0x19b] ss:$2 sm:$0xff]  ;;  %v11004_v38 = vunpack.i.l.bf16 %v15009_v19 }
 0x362   : > { %11207 = vrot.lane.b32.xlu1 %v11206_v35, %s11697_s24  ;;  %v11256_v42 = vpack.i.bf16 %v5538_v41, %v5536_v27  ;;  %v5546_v20 = vld [vmem:[#allocation3 + $0xdb] ss:$2 sm:$0xff]  ;;  %v5544_v35 = vld [vmem:[#allocation3 + $0xab] ss:$2 sm:$0xff]  ;;  %v5300_v61 = vld [vmem:[#allocation3] ss:$2 sm:$0xff]  ;;  %v11024_v27 = vunpack.i.l.bf16 %v15027_v2 }
 0x363   : > { %9729 = vmatpush3.bf16.msra.mxu1 %v11551_v17  ;;  %v11191_v52 = vpack.i.bf16 %v5546_v20, %v5544_v35  ;;  %v5454_v4 = vld [vmem:[#allocation3 + $0x121] ss:$2 sm:$0xff]  ;;  %v5452_v39 = vld [vmem:[#allocation3 + $0xf1] ss:$2 sm:$0xff]  ;;  %v5468_v32 = vld [vmem:[#allocation3 + $0xf2] ss:$2 sm:$0xff] }
 0x364   : > { %11132 = vrot.lane.b32.xlu0 %v11131_v50, %s11700_s30  ;;  %9730 = vmatprep.subr.bf16.mxu1 %v11552_v44  ;;  %v11266_v50 = vpack.i.bf16 %v5554_v58, %v5552_v25  ;;  %v11211_v16 = vpack.i.bf16 %v5470_v9, %v5468_v32  ;;  %v5484_v26 = vld [vmem:[#allocation3 + $0xf3] ss:$2 sm:$0xff] }
 0x366   : > { %11217 = vrot.lane.b32.xlu1 %v11216_v28, %s11698_s26  ;;  %v11201_v28 = vpack.i.bf16 %v5454_v4, %v5452_v39  ;;  %v5500_v39 = vld [vmem:[#allocation3 + $0x108] ss:$2 sm:$0xff] }
 0x367   : > { %9731 = vmatpush3.bf16.msra.mxu1 %v11552_v44 }
 0x368   : > { %11142 = vrot.lane.b32.xlu0 %v11141_v43, %s11690_s27 }
 0x36a   : > { %11227 = vrot.lane.b32.xlu1 %v11226_v12, %s11699_s28 }
 0x36c   : > { %11152 = vrot.lane.b32.xlu0 %v11151_v24, %s11701_s5  ;;  %v10995_v24 = vunpack.i.h.bf16 %v14999_v23 }
 0x36e   : > { %11237 = vrot.lane.b32.xlu1 %v11236_v8, %s11700_s30  ;;  %v6035_v8 = vsel %vm16585_vm1, %v5300_v61, %v10974_v48  ;;  %vm6126_vm1 = vcmask 785408  }
 0x36f   : > { %v6043_v1 = vsel %vm4226_vm5, %v6035_v8, %v10984_v3  ;;  %v5518_v3 = vld [vmem:[#allocation3 + $0x139] ss:$2 sm:$0xff] }
 0x370   : > { %11162 = vrot.lane.b32.xlu0 %v11161_v22, %s11692_s29  ;;  %v11015_v22 = vunpack.i.h.bf16 %v15018_v45  ;;  %v6051_v19 = vsel %vm16586_vm6, %v6043_v1, %v10994_v56  ;;  %vm6135_vm6 = vcmask 850944  }
 0x371   : > { %v6059_v57 = vsel %vm16589_vm14, %v6051_v19, %v11004_v38  ;;  %v5532_v19 = vld [vmem:[#allocation3 + $0x10a] ss:$2 sm:$0xff] }
 0x372   : > { %11247 = vrot.lane.b32.xlu1 %v11246_v13, %s11701_s5 }
 0x374   : > { %11172 = vrot.lane.b32.xlu0 %v11171_v54, %s11702_s6  ;;  %v11025_v54 = vunpack.i.h.bf16 %v15027_v2 }
 0x376   : > { %11257 = vrot.lane.b32.xlu1 %v11256_v42, %s11702_s6  ;;  %v6067_v42 = vsel %vm4424_vm11, %v6059_v57, %v11014_v40 }
 0x377   : > { %v11108_v60 = vpop.permute.xlu1 %11107 }
 0x378   : > { %v11110_v34 = vunpack.i.h.bf16 %v11108_v60  ;;  %v11109_v47 = vunpack.i.l.bf16 %v11108_v60  ;;  %11182 = vrot.lane.b32.xlu0 %v11181_v29, %s11694_s4 }
 0x37a   : > { %v6064_v59 = vsel %vm16582_vm4, %v14955_v21, %v11110_v34  ;;  %v6063_v49 = vsel %vm16583_vm10, %v14958_v55, %v11109_v47  ;;  %11267 = vrot.lane.b32.xlu1 %v11266_v50, %s11703_s7  ;;  %v11033_v21 = vpop.permute.xlu0 %11032  ;;  %v5302_v55 = vld [vmem:[#allocation3 + $0x30] ss:$2 sm:$0xff]  ;;  %v11221_v34 = vpack.i.bf16 %v5486_v18, %v5484_v26  ;;  %vm16593_vm4 = vmmov %vm16592_vm8  ;;  %vm6108_vm10 = vcmask 654336  }
 0x37b   : > { %v15035_v36 = vpop.permute.xlu1 %11117  ;;  %v6036_v12 = vsel %vm16584_vm12, %v5302_v55, %v10975_v14  ;;  %v11034_v44 = vunpack.i.l.bf16 %v11033_v21  ;;  %v11035_v60 = vunpack.i.h.bf16 %v11033_v21  ;;  %v11059_v21 = vunpack.i.l.bf16 %v14940_v6 }
 0x37c   : > { %11192 = vrot.lane.b32.xlu0 %v11191_v52, %s11703_s7  ;;  %v6044_v17 = vsel %vm4226_vm5, %v6036_v12, %v10985_v31  ;;  %v11060_v52 = vunpack.i.h.bf16 %v14940_v6  ;;  %vm6117_vm12 = vcmask 719872   ;;  %v11100_v6 = vunpack.i.h.bf16 %v15020_v5 }
 0x37d   : > { %v6052_v13 = vsel %vm16587_vm9, %v6044_v17, %v10995_v24  ;;  %v11099_v12 = vunpack.i.l.bf16 %v15020_v5  ;;  %v5516_v24 = vld [vmem:[#allocation3 + $0x109] ss:$2 sm:$0xff]  ;;  %vm6144_vm9 = vcmask 916480   ;;  %v11120_v61 = vunpack.i.h.bf16 %v15035_v36 }
 0x37e   : > { %v11043_v41 = vpop.permute.xlu0 %11042  ;;  %v6060_v45 = vsel %vm16588_vm2, %v6052_v13, %v11005_v51  ;;  %v11119_v51 = vunpack.i.l.bf16 %v15035_v36  ;;  %v11241_v38 = vpack.i.bf16 %v5518_v3, %v5516_v24  ;;  %vm16594_vm2 = vmmov %vm16590_vm7  ;;  %v11000_v3 = vunpack.i.h.bf16 %v14907_v46 }
 0x37f   : > { %v11128_v43 = vpop.permute.xlu1 %11127  ;;  %v6068_v29 = vsel %vm4424_vm11, %v6060_v45, %v11015_v22  ;;  %v11045_v25 = vunpack.i.h.bf16 %v11043_v41  ;;  %v11044_v58 = vunpack.i.l.bf16 %v11043_v41  ;;  %v5534_v22 = vld [vmem:[#allocation3 + $0x13a] ss:$2 sm:$0xff]  ;;  %vm16595_vm14 = vmmov %vm16594_vm2 }
 0x380   : > { %v11130_v53 = vunpack.i.h.bf16 %v11128_v43  ;;  %v11129_v15 = vunpack.i.l.bf16 %v11128_v43  ;;  %11202 = vrot.lane.b32.xlu0 %v11201_v28, %s11697_s24  ;;  %v6076_v35 = vsel %vm4490_vm13, %v6068_v29, %v11025_v54 }
 0x381   : > { %v6084_v48 = vsel %vm16591_vm15, %v6076_v35, %v11035_v60  ;;  %vm16596_vm15 = vcmask 64512  }
 0x382   : > { %v6071_v62 = vsel %vm4424_vm11, %v6063_v49, %v11129_v15  ;;  %v6072_v7 = vsel %vm4424_vm11, %v6064_v59, %v11130_v53  ;;  %v5502_v59 = vld [vmem:[#allocation3 + $0x138] ss:$2 sm:$0xff]  ;;  %v6075_v49 = vsel %vm4490_vm13, %v6067_v42, %v11024_v27  ;;  %v6092_v31 = vsel %vm16593_vm4, %v6084_v48, %v11045_v25 }
 0x383   : > { %v15054_v23 = vpop.permute.xlu1 %11137  ;;  %v6083_v50 = vsel %vm16590_vm7, %v6075_v49, %v11034_v44  ;;  %v11231_v28 = vpack.i.bf16 %v5502_v59, %v5500_v39  ;;  %v11080_v53 = vunpack.i.h.bf16 %v14944_v30  ;;  %v11079_v15 = vunpack.i.l.bf16 %v14944_v30  ;;  %v5550_v44 = vld [vmem:[#allocation3 + $0x13b] ss:$2 sm:$0xff] }
 0x384   : > { %11212 = vrot.lane.b32.xlu0 %v11211_v16, %s11698_s26  ;;  %v6091_v55 = vsel %vm16592_vm8, %v6083_v50, %v11044_v58  ;;  %v6101_v9 = vsel %vm6099_vm3, %v6092_v31, %v11060_v52  ;;  %v11251_v27 = vpack.i.bf16 %v5534_v22, %v5532_v19  ;;  %vm6153_vm7 = vcmask 982016   ;;  %vm16597_vm8 = vmmov %vm16596_vm15 }
 0x385   : > { %v6100_v56 = vsel %vm6099_vm3, %v6091_v55, %v11059_v21  ;;  %v6110_v5 = vsel %vm6108_vm10, %v6101_v9, %v11080_v53  ;;  %v10980_v21 = vunpack.i.h.bf16 %v14900_v33  ;;  %v10990_v55 = vunpack.i.h.bf16 %v14904_v10  ;;  %v5306_v9 = vld [vmem:[#allocation3 + $0x90] ss:$2 sm:$0xff] }
 0x386   : > { %v6109_v40 = vsel %vm6108_vm10, %v6100_v56, %v11079_v15  ;;  %v6119_v36 = vsel %vm6117_vm12, %v6110_v5, %v11100_v6  ;;  %v10989_v31 = vunpack.i.l.bf16 %v14904_v10  ;;  %v10999_v53 = vunpack.i.l.bf16 %v14907_v46  ;;  %v5304_v15 = vld [vmem:[#allocation3 + $0x60] ss:$2 sm:$0xff] }
 0x387   : > { %v11148_v47 = vpop.permute.xlu1 %11147  ;;  %v6118_v17 = vsel %vm6117_vm12, %v6109_v40, %v11099_v12  ;;  %v6128_v13 = vsel %vm6126_vm1, %v6119_v36, %v11120_v61  ;;  %v11010_v6 = vunpack.i.h.bf16 %v14910_v11  ;;  %v11009_v12 = vunpack.i.l.bf16 %v14910_v11 }
 0x388   : > { %v11150_v20 = vunpack.i.h.bf16 %v11148_v47  ;;  %v11149_v2 = vunpack.i.l.bf16 %v11148_v47  ;;  %11222 = vrot.lane.b32.xlu0 %v11221_v34, %s11699_s28  ;;  %v6127_v54 = vsel %vm6126_vm1, %v6118_v17, %v11119_v51  ;;  %v5548_v34 = vld [vmem:[#allocation3 + $0x10b] ss:$2 sm:$0xff]  ;;  %v6038_v56 = vsel %vm16597_vm8, %v5306_v9, %v10980_v21 }
 0x389   : > { %v11261_v58 = vpack.i.bf16 %v5550_v44, %v5548_v34  ;;  %v11020_v61 = vunpack.i.h.bf16 %v14919_v0  ;;  %v11019_v10 = vunpack.i.l.bf16 %v14919_v0  ;;  %v11029_v11 = vunpack.i.l.bf16 %v14924_v63 }
 0x38a   : > { %v6079_v4 = vsel %vm4490_vm13, %v6071_v62, %v11149_v2  ;;  %v6080_v14 = vsel %vm4490_vm13, %v6072_v7, %v11150_v20  ;;  %v11140_v62 = vunpack.i.h.bf16 %v15054_v23  ;;  %v11139_v7 = vunpack.i.l.bf16 %v15054_v23  ;;  %v11053_v2 = vpop.permute.xlu0 %11052 }
 0x38b   : > { %v11158_v43 = vpop.permute.xlu1 %11157  ;;  %vm16598_vm4 = vcmask 195584   ;;  %v11055_v36 = vunpack.i.h.bf16 %v11053_v2  ;;  %v11054_v19 = vunpack.i.l.bf16 %v11053_v2  ;;  %vm16602_vm8 = vcmask 457728  }
 0x38c   : > { %11232 = vrot.lane.b32.xlu0 %v11231_v28, %s11700_s30  ;;  %v11160_v16 = vunpack.i.h.bf16 %v11158_v43  ;;  %v11159_v1 = vunpack.i.l.bf16 %v11158_v43  ;;  %v6136_v26 = vsel %vm6135_vm6, %v6127_v54, %v11139_v7  ;;  %v6137_v42 = vsel %vm6135_vm6, %v6128_v13, %v11140_v62 }
 0x38d   : > { %v10979_v28 = vunpack.i.l.bf16 %v14900_v33 }
 0x38e   : > { %v6145_v29 = vsel %vm6144_vm9, %v6136_v26, %v11159_v1  ;;  %v6146_v60 = vsel %vm6144_vm9, %v6137_v42, %v11160_v16 }
 0x38f   : > { %v11168_v30 = vpop.permute.xlu1 %11167  ;;  %v6037_v33 = vsel %vm16596_vm15, %v5304_v15, %v10979_v28 }
 0x390   : > { %v11170_v32 = vunpack.i.h.bf16 %v11168_v30  ;;  %v11169_v8 = vunpack.i.l.bf16 %v11168_v30  ;;  %11242 = vrot.lane.b32.xlu0 %v11241_v38, %s11701_s5  ;;  %v6045_v46 = vsel %vm4226_vm5, %v6037_v33, %v10989_v31  ;;  %v6046_v38 = vsel %vm4226_vm5, %v6038_v56, %v10990_v55 }
 0x391   : > { %v11030_v30 = vunpack.i.h.bf16 %v14924_v63  ;;  %v6053_v62 = vsel %vm16598_vm4, %v6045_v46, %v10999_v53 }
 0x392   : > { %v15095_v18 = vsel %vm16594_vm2, %v6079_v4, %v11169_v8  ;;  %v15098_v23 = vsel %vm16595_vm14, %v6080_v14, %v11170_v32  ;;  %vm16599_vm2 = vmmov %vm16598_vm4  ;;  %v11040_v32 = vunpack.i.h.bf16 %v14934_v37  ;;  %v11039_v8 = vunpack.i.l.bf16 %v14934_v37 }
 0x393   : > { %v11178_v41 = vpop.permute.xlu1 %11177  ;;  %v6054_v7 = vsel %vm16599_vm2, %v6046_v38, %v11000_v3  ;;  %vm16600_vm14 = vcmask 261120   ;;  %vm16603_vm4 = vmmov %vm16602_vm8  ;;  %vm16604_vm2 = vcmask 523264  }
 0x394   : > { %v11180_v45 = vunpack.i.h.bf16 %v11178_v41  ;;  %v11179_v57 = vunpack.i.l.bf16 %v11178_v41  ;;  %11252 = vrot.lane.b32.xlu0 %v11251_v27, %s11702_s6  ;;  %v6062_v0 = vsel %vm16600_vm14, %v6054_v7, %v11010_v6  ;;  %vm16601_vm15 = vmmov %vm16600_vm14 }
 0x395   : > { %v6061_v22 = vsel %vm16601_vm15, %v6053_v62, %v11009_v12  ;;  %v6070_v5 = vsel %vm4424_vm11, %v6062_v0, %v11020_v61  ;;  %vm16605_vm14 = vmmov %vm16604_vm2  ;;  %vm16606_vm15 = vcmask 64512  }
 0x396   : > { %v6154_v47 = vsel %vm6153_vm7, %v6145_v29, %v11179_v57  ;;  %v6155_v25 = vsel %vm6153_vm7, %v6146_v60, %v11180_v45  ;;  %v6069_v40 = vsel %vm4424_vm11, %v6061_v22, %v11019_v10  ;;  %v6078_v1 = vsel %vm4490_vm13, %v6070_v5, %v11030_v30 }
 0x397   : > { %v6162_v20 = vpack.c.bf16 %v6155_v25, %v6154_v47  ;;  %v15126_v48 = vpop.permute.xlu1 %11187  ;;  %v6077_v63 = vsel %vm4490_vm13, %v6069_v40, %v11029_v11  ;;  %v6086_v13 = vsel %vm16603_vm4, %v6078_v1, %v11040_v32  ;;  %v5312_v47 = vld [vmem:[#allocation3 + $0x120] ss:$2 sm:$0xff]  ;;  %v5314_v25 = vld [vmem:[#allocation3 + $0x150] ss:$2 sm:$0xff]  ;;  %vm16608_vm4 = vcmask 195584  }
 0x398   : > { %11262 = vrot.lane.b32.xlu0 %v11261_v58, %s11703_s7  ;;  %v6085_v37 = vsel %vm16602_vm8, %v6077_v63, %v11039_v8  ;;  %v6094_v29 = vsel %vm16605_vm14, %v6086_v13, %v11055_v36  ;;  %vm16607_vm8 = vmmov %vm16606_vm15  ;;  %vm16610_vm14 = vcmask 261120  }
 0x399   : > { %9732 = vmatprep.mubr.bf16.mxu1 %v6162_v20  ;;  %v6093_v42 = vsel %vm16604_vm2, %v6085_v37, %v11054_v19  ;;  %vm16609_vm2 = vmmov %vm16608_vm4 }
 0x3b3   : > { %v15110_v59 = vpop.permute.xlu0 %11062 }
 0x3b4   : > { %v11065_v54 = vunpack.i.h.bf16 %v15110_v59  ;;  %v11064_v27 = vunpack.i.l.bf16 %v15110_v59 }
 0x3b7   : > { %v15112_v49 = vpop.permute.xlu0 %11072 }
 0x3b8   : > { %v11075_v41 = vunpack.i.h.bf16 %v15112_v49  ;;  %v11074_v45 = vunpack.i.l.bf16 %v15112_v49  ;;  %v6041_v49 = vsel %vm16606_vm15, %v5312_v47, %v11064_v27  ;;  %vm16611_vm15 = vmmov %vm16610_vm14 }
 0x3ba   : > { %v6103_v21 = vsel %vm6099_vm3, %v6094_v29, %v11075_v41  ;;  %v6102_v28 = vsel %vm6099_vm3, %v6093_v42, %v11074_v45 }
 0x3bb   : > { %v15114_v35 = vpop.permute.xlu0 %11082 }
 0x3bc   : > { %v11085_v57 = vunpack.i.h.bf16 %v15114_v35  ;;  %v11084_v44 = vunpack.i.l.bf16 %v15114_v35  ;;  %v6042_v35 = vsel %vm16607_vm8, %v5314_v25, %v11065_v54  ;;  %vm16612_vm8 = vcmask 457728  }
 0x3be   : > { %v6050_v31 = vsel %vm4226_vm5, %v6042_v35, %v11085_v57 }
 0x3bf   : > { %v15116_v50 = vpop.permute.xlu0 %11092 }
 0x3c0   : > { %v11095_v60 = vunpack.i.h.bf16 %v15116_v50  ;;  %v11094_v34 = vunpack.i.l.bf16 %v15116_v50  ;;  %v6049_v50 = vsel %vm4226_vm5, %v6041_v49, %v11084_v44 }
 0x3c2   : > { %v6112_v15 = vsel %vm6108_vm10, %v6103_v21, %v11095_v60 }
 0x3c3   : > { %v15118_v52 = vpop.permute.xlu0 %11102 }
 0x3c4   : > { %v11105_v58 = vunpack.i.h.bf16 %v15118_v52  ;;  %v11104_v20 = vunpack.i.l.bf16 %v15118_v52 }
 0x3c6   : > { %v6057_v12 = vsel %vm16608_vm4, %v6049_v50, %v11104_v20  ;;  %v6058_v33 = vsel %vm16609_vm2, %v6050_v31, %v11105_v58  ;;  %vm16613_vm4 = vmmov %vm16612_vm8 }
 0x3c7   : > { %v15120_v4 = vpop.permute.xlu0 %11112 }
 0x3c8   : > { %v11115_v2 = vunpack.i.h.bf16 %v15120_v4  ;;  %v11114_v59 = vunpack.i.l.bf16 %v15120_v4  ;;  %v6111_v4 = vsel %vm6108_vm10, %v6102_v28, %v11094_v34 }
 0x3ca   : > { %v6120_v56 = vsel %vm6117_vm12, %v6111_v4, %v11114_v59  ;;  %v6121_v61 = vsel %vm6117_vm12, %v6112_v15, %v11115_v2 }
 0x3d0   : > { %v15138_v24 = vpop.permute.xlu1 %11197 }
 0x3d1   : > { %v11200_v29 = vunpack.i.h.bf16 %v15138_v24  ;;  %v11199_v60 = vunpack.i.l.bf16 %v15138_v24 }
 0x3d2   : > { %v15122_v14 = vpop.permute.xlu0 %11122 }
 0x3d3   : > { %v11125_v10 = vunpack.i.h.bf16 %v15122_v14 }
 0x3d4   : > { %v15162_v17 = vpop.permute.xlu1 %11207 }
 0x3d5   : > { %v6066_v36 = vsel %vm16610_vm14, %v6058_v33, %v11125_v10  ;;  %v11210_v20 = vunpack.i.h.bf16 %v15162_v17  ;;  %v11209_v2 = vunpack.i.l.bf16 %v15162_v17 }
 0x3d6   : > { %v15124_v39 = vpop.permute.xlu0 %11132 }
 0x3d7   : > { %v11135_v52 = vunpack.i.h.bf16 %v15124_v39  ;;  %v11134_v3 = vunpack.i.l.bf16 %v15124_v39  ;;  %v11124_v39 = vunpack.i.l.bf16 %v15122_v14 }
 0x3d8   : > { %v15184_v55 = vpop.permute.xlu1 %11217 }
 0x3d9   : > { %v6130_v30 = vsel %vm6126_vm1, %v6121_v61, %v11135_v52  ;;  %v6129_v11 = vsel %vm6126_vm1, %v6120_v56, %v11134_v3  ;;  %v6065_v19 = vsel %vm16611_vm15, %v6057_v12, %v11124_v39  ;;  %v11220_v21 = vunpack.i.h.bf16 %v15184_v55 }
 0x3da   : > { %v15130_v43 = vpop.permute.xlu0 %11142  ;;  %v11219_v24 = vunpack.i.l.bf16 %v15184_v55  ;;  %v11190_v52 = vunpack.i.h.bf16 %v15126_v48  ;;  %v11189_v3 = vunpack.i.l.bf16 %v15126_v48 }
 0x3db   : > { %v11144_v62 = vunpack.i.l.bf16 %v15130_v43 }
 0x3dc   : > { %v11228_v32 = vpop.permute.xlu1 %11227 }
 0x3dd   : > { %v6073_v13 = vsel %vm4424_vm11, %v6065_v19, %v11144_v62  ;;  %v11229_v17 = vunpack.i.l.bf16 %v11228_v32 }
 0x3de   : > { %v15144_v51 = vpop.permute.xlu0 %11152 }
 0x3df   : > { %v11155_v9 = vunpack.i.h.bf16 %v15144_v51  ;;  %v11154_v6 = vunpack.i.l.bf16 %v15144_v51  ;;  %v11145_v51 = vunpack.i.h.bf16 %v15130_v43 }
 0x3e0   : > { %v11238_v34 = vpop.permute.xlu1 %11237 }
 0x3e1   : > { %v6138_v8 = vsel %vm6135_vm6, %v6129_v11, %v11154_v6  ;;  %v6139_v0 = vsel %vm6135_vm6, %v6130_v30, %v11155_v9  ;;  %v6074_v54 = vsel %vm4424_vm11, %v6066_v36, %v11145_v51  ;;  %vm16614_vm11 = vcmask 523264  }
 0x3e2   : > { %v15158_v16 = vpop.permute.xlu0 %11162  ;;  %vm16615_vm2 = vmmov %vm16614_vm11  ;;  %v11240_v6 = vunpack.i.h.bf16 %v11238_v34  ;;  %v11239_v12 = vunpack.i.l.bf16 %v11238_v34 }
 0x3e3   : > { %v11165_v22 = vunpack.i.h.bf16 %v15158_v16  ;;  %v11164_v14 = vunpack.i.l.bf16 %v15158_v16  ;;  %vm16616_vm14 = vmmov %vm16615_vm2 }
 0x3e4   : > { %v11248_v28 = vpop.permute.xlu1 %11247  ;;  %v6095_v55 = vsel %vm16616_vm14, %v15095_v18, %v11189_v3  ;;  %vm16617_vm15 = vmmov %vm16615_vm2  ;;  %vm6473_vm14 = vcmask 123904  }
 0x3e5   : > { %v6081_v45 = vsel %vm4490_vm13, %v6073_v13, %v11164_v14  ;;  %v6082_v57 = vsel %vm4490_vm13, %v6074_v54, %v11165_v22  ;;  %v6096_v56 = vsel %vm16617_vm15, %v15098_v23, %v11190_v52  ;;  %v11249_v30 = vunpack.i.l.bf16 %v11248_v28 }
 0x3e6   : > { %v11173_v26 = vpop.permute.xlu0 %11172  ;;  %vm16618_vm15 = vcmask 261120  }
 0x3e7   : > { %v11175_v46 = vunpack.i.h.bf16 %v11173_v26  ;;  %v11174_v38 = vunpack.i.l.bf16 %v11173_v26 }
 0x3e8   : > { %v11258_v33 = vpop.permute.xlu1 %11257 }
 0x3e9   : > { %v6147_v43 = vsel %vm6144_vm9, %v6138_v8, %v11174_v38  ;;  %v6148_v37 = vsel %vm6144_vm9, %v6139_v0, %v11175_v46  ;;  %v11250_v38 = vunpack.i.h.bf16 %v11248_v28  ;;  %v11260_v62 = vunpack.i.h.bf16 %v11258_v33 }
 0x3ea   : > { %v11183_v53 = vpop.permute.xlu0 %11182 }
 0x3eb   : > { %v11185_v40 = vunpack.i.h.bf16 %v11183_v53  ;;  %v11184_v5 = vunpack.i.l.bf16 %v11183_v53  ;;  %v11230_v53 = vunpack.i.h.bf16 %v11228_v32 }
 0x3ed   : > { %v6089_v26 = vsel %vm16612_vm8, %v6081_v45, %v11184_v5  ;;  %v6090_v42 = vsel %vm16613_vm4, %v6082_v57, %v11185_v40  ;;  %v11268_v40 = vpop.permute.xlu1 %11267 }
 0x3ee   : > { %v11193_v7 = vpop.permute.xlu0 %11192  ;;  %v6097_v25 = vsel %vm16614_vm11, %v6089_v26, %v11199_v60  ;;  %v6098_v58 = vsel %vm16615_vm2, %v6090_v42, %v11200_v29  ;;  %v11270_v45 = vunpack.i.h.bf16 %v11268_v40  ;;  %v11269_v57 = vunpack.i.l.bf16 %v11268_v40 }
 0x3ef   : > { %v11195_v63 = vunpack.i.h.bf16 %v11193_v7  ;;  %v11194_v1 = vunpack.i.l.bf16 %v11193_v7  ;;  %v6106_v59 = vsel %vm6099_vm3, %v6097_v25, %v11209_v2  ;;  %v6107_v49 = vsel %vm6099_vm3, %v6098_v58, %v11210_v20 }
 0x3f0   : > { %v6115_v50 = vsel %vm6108_vm10, %v6106_v59, %v11219_v24  ;;  %v6116_v31 = vsel %vm6108_vm10, %v6107_v49, %v11220_v21  ;;  %v11259_v7 = vunpack.i.l.bf16 %v11258_v33 }
 0x3f1   : > { %v6156_v41 = vsel %vm6153_vm7, %v6147_v43, %v11194_v1  ;;  %v6157_v16 = vsel %vm6153_vm7, %v6148_v37, %v11195_v63  ;;  %v6124_v15 = vsel %vm6117_vm12, %v6115_v50, %v11229_v17  ;;  %v6125_v9 = vsel %vm6117_vm12, %v6116_v31, %v11230_v53 }
 0x3f2   : > { %v11203_v27 = vpop.permute.xlu0 %11202  ;;  %v6163_v44 = vpack.c.bf16 %v6157_v16, %v6156_v41  ;;  %v6133_v48 = vsel %vm6126_vm1, %v6124_v15, %v11239_v12  ;;  %v6134_v46 = vsel %vm6126_vm1, %v6125_v9, %v11240_v6 }
 0x3f3   : > { %v11205_v10 = vunpack.i.h.bf16 %v11203_v27  ;;  %v11204_v39 = vunpack.i.l.bf16 %v11203_v27  ;;  %v6142_v23 = vsel %vm6135_vm6, %v6133_v48, %v11249_v30  ;;  %v6143_v14 = vsel %vm6135_vm6, %v6134_v46, %v11250_v38 }
 0x3f4   : > { %9733 = vmatmul.mubr.bf16.vlgmr.msra.gmra.mxu1 %v6163_v44  ;;  %v6151_v41 = vsel %vm6144_vm9, %v6142_v23, %v11259_v7  ;;  %v6152_v16 = vsel %vm6144_vm9, %v6143_v14, %v11260_v62 }
 0x3f5   : > { %v6105_v5 = vsel %vm6099_vm3, %v6096_v56, %v11205_v10  ;;  %v6104_v63 = vsel %vm6099_vm3, %v6095_v55, %v11204_v39  ;;  %v6160_v20 = vsel %vm6153_vm7, %v6151_v41, %v11269_v57  ;;  %v6161_v2 = vsel %vm6153_vm7, %v6152_v16, %v11270_v45 }
 0x3f6   : > { %v11213_v47 = vpop.permute.xlu0 %11212  ;;  %v6165_v21 = vpack.c.bf16 %v6161_v2, %v6160_v20 }
 0x3f7   : > { %v11215_v11 = vunpack.i.h.bf16 %v11213_v47  ;;  %v11214_v51 = vunpack.i.l.bf16 %v11213_v47 }
 0x3f9   : > { %v6113_v19 = vsel %vm6108_vm10, %v6104_v63, %v11214_v51  ;;  %v6114_v43 = vsel %vm6108_vm10, %v6105_v5, %v11215_v11 }
 0x3fa   : > { %v11223_v35 = vpop.permute.xlu0 %11222 }
 0x3fb   : > { %v11225_v32 = vunpack.i.h.bf16 %v11223_v35  ;;  %v11224_v8 = vunpack.i.l.bf16 %v11223_v35 }
 0x3fd   : > { %v6122_v54 = vsel %vm6117_vm12, %v6113_v19, %v11224_v8  ;;  %v6123_v27 = vsel %vm6117_vm12, %v6114_v43, %v11225_v32 }
 0x3fe   : > { %v11233_v4 = vpop.permute.xlu0 %11232 }
 0x3ff   : > { %v11235_v0 = vunpack.i.h.bf16 %v11233_v4  ;;  %v11234_v18 = vunpack.i.l.bf16 %v11233_v4 }
 0x401   : > { %v6131_v44 = vsel %vm6126_vm1, %v6122_v54, %v11234_v18  ;;  %v6132_v26 = vsel %vm6126_vm1, %v6123_v27, %v11235_v0  ;;  %v11553_v54 = vld [vmem:[%s16000_s1 + $0xd8] sm:$0xff]  }
 0x402   : > { %v11243_v61 = vpop.permute.xlu0 %11242  ;;  %v11554_v27 = vld [vmem:[%s16000_s1 + $0x98] sm:$0xff]   ;;  %9504 = vmatprep.subr.bf16.mxu1 %v11553_v54 }
 0x403   : > { %v11245_v1 = vunpack.i.h.bf16 %v11243_v61  ;;  %v11244_v36 = vunpack.i.l.bf16 %v11243_v61  ;;  %9505 = vmatpush3.bf16.msra.mxu1 %v11554_v27 }
 0x405   : > { %v6140_v29 = vsel %vm6135_vm6, %v6131_v44, %v11244_v36  ;;  %v6141_v60 = vsel %vm6135_vm6, %v6132_v26, %v11245_v1 }
 0x406   : > { %v11253_v22 = vpop.permute.xlu0 %11252 }
 0x407   : > { %v11255_v37 = vunpack.i.h.bf16 %v11253_v22  ;;  %v11254_v13 = vunpack.i.l.bf16 %v11253_v22 }
 0x409   : > { %v6149_v25 = vsel %vm6144_vm9, %v6140_v29, %v11254_v13  ;;  %v6150_v58 = vsel %vm6144_vm9, %v6141_v60, %v11255_v37 }
 0x40a   : > { %v11263_v42 = vpop.permute.xlu0 %11262 }
 0x40b   : > { %v11265_v34 = vunpack.i.h.bf16 %v11263_v42  ;;  %v11264_v47 = vunpack.i.l.bf16 %v11263_v42 }
 0x40d   : > { %v6158_v59 = vsel %vm6153_vm7, %v6149_v25, %v11264_v47  ;;  %v6159_v49 = vsel %vm6153_vm7, %v6150_v58, %v11265_v34 }
 0x40e   : > { %v6164_v35 = vpack.c.bf16 %v6159_v49, %v6158_v59 }
 0x410   : > { %9736 = vmatprep.mubr.bf16.mxu1 %v6164_v35 }
 0x411   : > { %9737 = vmatmul.mubr.bf16.gmra.mxu1 %v6165_v21 }
 0x4b4   : > { %v9734_v24 = vpop.f32.mrf.mxu1 }
 0x4b5   : > { %v6284_v17 = vsel %vm4226_vm5, %v9734_v24, 0.0 }
 0x4b6   : > { %v6248_v28 = vpop.f32.mrf.mxu1 }
 0x4b7   : > { %v6281_v3 = vsel %vm4226_vm5, %v6248_v28, 0.0 }
 0x4b8   : > { %v9735_v50 = vpop.f32.mrf.mxu1 }
 0x4b9   : > { %v6286_v6 = vsel %vm4226_vm5, %v9735_v50, 0.0 }
 0x4ba   : > { %v6251_v31 = vpop.f32.mrf.mxu1 }
 0x4bb   : > { %v6282_v52 = vsel %vm4226_vm5, %v6251_v31, 0.0 }
 0x4bc   : > { %v6283_v53 = vadd.f32 %v6282_v52, %v6281_v3 }
 0x4be   : > { %v6285_v4 = vadd.f32 %v6284_v17, %v6283_v53 }
 0x4c0   : > { %v6287_v33 = vadd.f32 %v6286_v6, %v6285_v4  ;;  %v9349_v4 = vld [vmem:[%s16001_s2 + $0x1] ss:$0 sm:$0xff] }
 0x4d1   : > { %v9738_v15 = vpop.f32.mrf.mxu1 }
 0x4d2   : > { %v6292_v48 = vsel %vm4226_vm5, %v9738_v15, 0.0 }
 0x4d3   : > { %v6264_v9 = vpop.f32.mrf.mxu1 }
 0x4d4   : > { %v6288_v12 = vsel %vm4226_vm5, %v6264_v9, 0.0 }
 0x4d5   : > { %v9739_v55 = vpop.f32.mrf.mxu1  ;;  %v6289_v56 = vadd.f32 %v6288_v12, %v6287_v33  ;;  %v9350_v33 = vld [vmem:[%s16001_s2 + $0x2] ss:$0 sm:$0xff] }
 0x4d6   : > { %v6294_v38 = vsel %vm4226_vm5, %v9739_v55, 0.0 }
 0x4d7   : > { %v6267_v61 = vpop.f32.mrf.mxu1 }
 0x4d8   : > { %v6290_v10 = vsel %vm4226_vm5, %v6267_v61, 0.0 }
 0x4d9   : > { %v6291_v39 = vadd.f32 %v6290_v10, %v6289_v56 }
 0x4db   : > { %v6293_v46 = vadd.f32 %v6292_v48, %v6291_v39 }
 0x4dd   : > { %v6295_v30 = vadd.f32 %v6294_v38, %v6293_v46 }
 0x4df   : > { %v6296_v11 = vrot.slane %v6295_v30, 4 }
 0x4e1   : > { %v6297_v51 = vadd.f32 %v6296_v11, %v6295_v30 }
 0x4e3   : > { %v6298_v62 = vrot.slane %v6297_v51, 2 }
 0x4e5   : > { %v6299_v7 = vadd.f32 %v6298_v62, %v6297_v51 }
 0x4e7   : > { %v6300_v32 = vrot.slane %v6299_v7, 1 }
 0x4e9   : > { %v6301_v8 = vadd.f32 %v6300_v32, %v6299_v7 }
 0x4eb   : > { %v6303_v0 = vmul.f32 0.015625, %v6301_v8 }
 0x4ed   : > { %v6304_v18 = vsub.f32 %v6248_v28, %v6303_v0  ;;  %v6305_v22 = vsub.f32 %v6251_v31, %v6303_v0  ;;  %v6306_v23 = vsub.f32 %v9734_v24, %v6303_v0  ;;  %v6307_v14 = vsub.f32 %v9735_v50, %v6303_v0 }
 0x4ee   : > { %v6308_v40 = vsub.f32 %v6264_v9, %v6303_v0  ;;  %v6309_v36 = vsub.f32 %v6267_v61, %v6303_v0  ;;  %v6310_v41 = vsub.f32 %v9738_v15, %v6303_v0  ;;  %v6311_v44 = vsub.f32 %v9739_v55, %v6303_v0 }
 0x4ef   : > { %v6312_v5 = vmul.f32 %v6304_v18, %v6304_v18  ;;  %v6313_v63 = vmul.f32 %v6305_v22, %v6305_v22  ;;  %v6314_v1 = vmul.f32 %v6306_v23, %v6306_v23  ;;  %v6315_v19 = vmul.f32 %v6307_v14, %v6307_v14 }
 0x4f0   : > { %v6316_v16 = vmul.f32 %v6308_v40, %v6308_v40  ;;  %v6317_v26 = vmul.f32 %v6309_v36, %v6309_v36  ;;  %v6318_v60 = vmul.f32 %v6310_v41, %v6310_v41  ;;  %v6319_v25 = vmul.f32 %v6311_v44, %v6311_v44 }
 0x4f1   : > { %v6320_v43 = vsel %vm4226_vm5, %v6312_v5, 0.0  ;;  %v6321_v37 = vsel %vm4226_vm5, %v6313_v63, 0.0  ;;  %v6323_v45 = vsel %vm4226_vm5, %v6314_v1, 0.0  ;;  %v6325_v42 = vsel %vm4226_vm5, %v6315_v19, 0.0 }
 0x4f2   : > { %v6322_v13 = vadd.f32 %v6321_v37, %v6320_v43  ;;  %v6327_v34 = vsel %vm4226_vm5, %v6316_v16, 0.0  ;;  %v6329_v58 = vsel %vm4226_vm5, %v6317_v26, 0.0  ;;  %v6331_v2 = vsel %vm4226_vm5, %v6318_v60, 0.0 }
 0x4f3   : > { %v6333_v49 = vsel %vm4226_vm5, %v6319_v25, 0.0 }
 0x4f4   : > { %v6324_v57 = vadd.f32 %v6323_v45, %v6322_v13 }
 0x4f6   : > { %v6326_v29 = vadd.f32 %v6325_v42, %v6324_v57 }
 0x4f8   : > { %v6328_v47 = vadd.f32 %v6327_v34, %v6326_v29 }
 0x4fa   : > { %v6330_v20 = vadd.f32 %v6329_v58, %v6328_v47 }
 0x4fc   : > { %v6332_v59 = vadd.f32 %v6331_v2, %v6330_v20 }
 0x4fe   : > { %v6334_v35 = vadd.f32 %v6333_v49, %v6332_v59 }
 0x500   : > { %v6335_v21 = vrot.slane %v6334_v35, 4 }
 0x502   : > { %v6336_v24 = vadd.f32 %v6335_v21, %v6334_v35 }
 0x504   : > { %v6337_v28 = vrot.slane %v6336_v24, 2 }
 0x506   : > { %v6338_v50 = vadd.f32 %v6337_v28, %v6336_v24 }
 0x508   : > { %v6339_v31 = vrot.slane %v6338_v50, 1 }
 0x50a   : > { %v6340_v52 = vadd.f32 %v6339_v31, %v6338_v50 }
 0x50c   : > { %v6341_v3 = vmul.f32 0.015625, %v6340_v52 }
 0x50e   : > { %v6342_v53 = vadd.f32 1e-05, %v6341_v3 }
 0x510   : > { %11665 = vrsqrt.f32 %v6342_v53 }
 0x51d   : > { %v11666_v17 = vpop.eup %11665 }
 0x51e   : > { %v6344_v15 = vmul.f32 %v11666_v17, %v6304_v18  ;;  %v6345_v9 = vmul.f32 %v11666_v17, %v6305_v22  ;;  %v6346_v6 = vmul.f32 %v11666_v17, %v6306_v23  ;;  %v6347_v12 = vmul.f32 %v11666_v17, %v6307_v14 }
 0x51f   : > { %v6348_v55 = vmul.f32 %v11666_v17, %v6308_v40  ;;  %v6349_v56 = vmul.f32 %v11666_v17, %v6309_v36  ;;  %v6350_v61 = vmul.f32 %v11666_v17, %v6310_v41  ;;  %v6351_v10 = vmul.f32 %v11666_v17, %v6311_v44 }
 0x520   : > { %v6356_v39 = vmul.f32 %v9349_v4, %v6344_v15  ;;  %v6357_v48 = vmul.f32 %v9349_v4, %v6345_v9  ;;  %v6358_v46 = vmul.f32 %v9349_v4, %v6346_v6  ;;  %v6359_v38 = vmul.f32 %v9349_v4, %v6347_v12 }
 0x521   : > { %v6360_v30 = vmul.f32 %v9349_v4, %v6348_v55  ;;  %v6361_v11 = vmul.f32 %v9349_v4, %v6349_v56  ;;  %v6362_v51 = vmul.f32 %v9349_v4, %v6350_v61  ;;  %v6363_v62 = vmul.f32 %v9349_v4, %v6351_v10 }
 0x522   : > { %v6368_v7 = vadd.f32 %v9350_v33, %v6356_v39  ;;  %v6369_v32 = vadd.f32 %v9350_v33, %v6357_v48  ;;  %v6370_v8 = vadd.f32 %v9350_v33, %v6358_v46  ;;  %v6371_v0 = vadd.f32 %v9350_v33, %v6359_v38 }
 0x523   : > { %v6372_v18 = vadd.f32 %v9350_v33, %v6360_v30  ;;  %v6373_v22 = vadd.f32 %v9350_v33, %v6361_v11  ;;  %v6374_v23 = vadd.f32 %v9350_v33, %v6362_v51  ;;  %v6375_v14 = vadd.f32 %v9350_v33, %v6363_v62  ;;  %v11555_v51 = vld [vmem:[%s16000_s1 + $0xd0] sm:$0xff]  }
 0x524   : > { %vm6376_vm3 = vcmp.gt.f32.partialorder %v6368_v7, 0.0  ;;  %vm6377_vm12 = vcmp.gt.f32.partialorder %v6369_v32, 0.0  ;;  %vm6378_vm6 = vcmp.gt.f32.partialorder %v6370_v8, 0.0  ;;  %vm6379_vm7 = vcmp.gt.f32.partialorder %v6371_v0, 0.0  ;;  %v11556_v62 = vld [vmem:[%s16000_s1 + $0x90] sm:$0xff]   ;;  %9506 = vmatprep.subr.bf16.mxu1 %v11555_v51 }
 0x525   : > { %vm6380_vm8 = vcmp.gt.f32.partialorder %v6372_v18, 0.0  ;;  %vm6381_vm4 = vcmp.gt.f32.partialorder %v6373_v22, 0.0  ;;  %vm6382_vm11 = vcmp.gt.f32.partialorder %v6374_v23, 0.0  ;;  %vm6383_vm2 = vcmp.gt.f32.partialorder %v6375_v14, 0.0  ;;  %9507 = vmatpush3.bf16.msra.mxu1 %v11556_v62  ;;  %v11566_v62 = vld [vmem:[%s16000_s1 + $0x68] sm:$0xff]  }
 0x526   : > { %v6384_v40 = vmul.f32 0.2, %v6368_v7  ;;  %v6385_v5 = vmul.f32 0.2, %v6369_v32  ;;  %v6386_v63 = vmul.f32 0.2, %v6370_v8 }
 0x527   : > { %v6387_v1 = vmul.f32 0.2, %v6371_v0  ;;  %v6388_v36 = vmul.f32 0.2, %v6372_v18  ;;  %v6389_v19 = vmul.f32 0.2, %v6373_v22 }
 0x528   : > { %v6390_v43 = vmul.f32 0.2, %v6374_v23  ;;  %v6391_v37 = vmul.f32 0.2, %v6375_v14  ;;  %v6392_v13 = vsel %vm6376_vm3, %v6368_v7, %v6384_v40  ;;  %v6393_v54 = vsel %vm6377_vm12, %v6369_v32, %v6385_v5  ;;  %vm16619_vm3 = vmmov %vm16618_vm15 }
 0x529   : > { %v6394_v27 = vsel %vm6378_vm6, %v6370_v8, %v6386_v63  ;;  %v6395_v41 = vsel %vm6379_vm7, %v6371_v0, %v6387_v1  ;;  %v6396_v16 = vsel %vm6380_vm8, %v6372_v18, %v6388_v36  ;;  %v6397_v45 = vsel %vm6381_vm4, %v6373_v22, %v6389_v19  ;;  %v11557_v8 = vld [vmem:[%s16000_s1 + $0xc8] sm:$0xff]   ;;  %vm16620_vm12 = vmmov %vm16619_vm3 }
 0x52a   : > { %v6398_v57 = vsel %vm6382_vm11, %v6374_v23, %v6390_v43  ;;  %v6399_v44 = vsel %vm6383_vm2, %v6375_v14, %v6391_v37  ;;  %v6408_v26 = vrot.slane %v6393_v54, 1  ;;  %v6409_v42 = vrot.slane %v6392_v13, 1  ;;  %v11558_v0 = vld [vmem:[%s16000_s1 + $0x88] sm:$0xff]   ;;  %9508 = vmatprep.subr.bf16.mxu1 %v11557_v8  ;;  %vm16621_vm6 = vmmov %vm16619_vm3 }
 0x52b   : > { %v6410_v29 = vrot.slane %v6394_v27, 1  ;;  %v6411_v60 = vrot.slane %v6395_v41, 1  ;;  %v6412_v34 = vrot.slane %v6396_v16, 1  ;;  %v6413_v47 = vrot.slane %v6397_v45, 1  ;;  %9509 = vmatpush3.bf16.msra.mxu1 %v11558_v0  ;;  %vm16626_vm2 = vmmov %vm16619_vm3 }
 0x52c   : > { %v6414_v25 = vrot.slane %v6398_v57, 1  ;;  %v6415_v58 = vrot.slane %v6399_v44, 1  ;;  %v6424_v20 = vrot.slane %v6393_v54, 7  ;;  %v6425_v2 = vrot.slane %v6392_v13, 7 }
 0x52d   : > { %v6426_v59 = vrot.slane %v6394_v27, 7  ;;  %v6427_v49 = vrot.slane %v6395_v41, 7  ;;  %v6428_v35 = vrot.slane %v6396_v16, 7  ;;  %v6429_v21 = vrot.slane %v6397_v45, 7 }
 0x52e   : > { %v6430_v24 = vrot.slane %v6398_v57, 7  ;;  %v6431_v28 = vrot.slane %v6399_v44, 7  ;;  %v6440_v50 = vrot.slane %v6393_v54, 5  ;;  %v6441_v31 = vrot.slane %v6392_v13, 5 }
 0x52f   : > { %v6442_v52 = vrot.slane %v6394_v27, 5  ;;  %v6443_v3 = vrot.slane %v6395_v41, 5  ;;  %v6444_v53 = vrot.slane %v6396_v16, 5  ;;  %v6445_v17 = vrot.slane %v6397_v45, 5 }
 0x530   : > { %v6446_v4 = vrot.slane %v6398_v57, 5  ;;  %v6447_v15 = vrot.slane %v6399_v44, 5  ;;  %v6456_v9 = vsel %vm492_vm0, %v6408_v26, %v6424_v20  ;;  %v6457_v6 = vsel %vm492_vm0, %v6409_v42, %v6425_v2 }
 0x531   : > { %v6458_v12 = vsel %vm492_vm0, %v6410_v29, %v6426_v59  ;;  %v6459_v33 = vsel %vm492_vm0, %v6411_v60, %v6427_v49  ;;  %v6460_v55 = vsel %vm492_vm0, %v6412_v34, %v6428_v35  ;;  %v6461_v56 = vsel %vm492_vm0, %v6413_v47, %v6429_v21  ;;  %6472 = vst.msk [vmem:[#allocation4] sm:$0xff] %vm4226_vm5, %v6456_v9 }
 0x532   : > { %6475 = vst.msk [vmem:[#allocation4 + $0x18] sm:$0xff] %vm4226_vm5, %v6457_v6  ;;  %6477 = vst.msk [vmem:[#allocation4 + $0x30] sm:$0xff] %vm4226_vm5, %v6456_v9  ;;  %v6462_v61 = vsel %vm492_vm0, %v6414_v25, %v6430_v24  ;;  %v6463_v10 = vsel %vm492_vm0, %v6415_v58, %v6431_v28  ;;  %v6464_v39 = vsel %vm492_vm0, %v6424_v20, %v6440_v50  ;;  %v11561_v50 = vld [vmem:[%s16000_s1 + $0xb8] sm:$0xff]   ;;  %v11563_v9 = vld [vmem:[%s16000_s1 + $0xb0] sm:$0xff]   ;;  %vm16622_vm7 = vcmask 523264  }
 0x533   : > { %v6465_v48 = vsel %vm492_vm0, %v6425_v2, %v6441_v31  ;;  %6479 = vst.msk [vmem:[#allocation4 + $0x48] sm:$0xff] %vm4226_vm5, %v6458_v12  ;;  %6481 = vst.msk [vmem:[#allocation4 + $0x60] sm:$0xff] %vm4226_vm5, %v6459_v33  ;;  %v6466_v46 = vsel %vm492_vm0, %v6426_v59, %v6442_v52  ;;  %v6467_v38 = vsel %vm492_vm0, %v6427_v49, %v6443_v3 }
 0x534   : > { %6483 = vst.msk [vmem:[#allocation4 + $0x78] sm:$0xff] %vm4226_vm5, %v6460_v55  ;;  %6485 = vst.msk [vmem:[#allocation4 + $0x90] sm:$0xff] %vm4226_vm5, %v6461_v56  ;;  %v6468_v30 = vsel %vm492_vm0, %v6428_v35, %v6444_v53  ;;  %v6469_v11 = vsel %vm492_vm0, %v6429_v21, %v6445_v17  ;;  %v6470_v7 = vsel %vm492_vm0, %v6430_v24, %v6446_v4  ;;  %v11559_v24 = vld [vmem:[%s16000_s1 + $0xc0] sm:$0xff]  }
 0x535   : > { %6474 = vst.msk [vmem:[#allocation4 + $0x8] sm:$0x3] %vm6473_vm14, %v6464_v39  ;;  %6476 = vst.msk [vmem:[#allocation4 + $0x20] sm:$0x3] %vm6473_vm14, %v6465_v48  ;;  %v6471_v32 = vsel %vm492_vm0, %v6431_v28, %v6447_v15  ;;  %v11560_v28 = vld [vmem:[%s16000_s1 + $0x80] sm:$0xff]   ;;  %9510 = vmatprep.subr.bf16.mxu1 %v11559_v24  ;;  %v11562_v15 = vld [vmem:[%s16000_s1 + $0x78] sm:$0xff]  }
 0x536   : > { %6478 = vst.msk [vmem:[#allocation4 + $0x38] sm:$0x3] %vm6473_vm14, %v6464_v39  ;;  %6480 = vst.msk [vmem:[#allocation4 + $0x50] sm:$0x3] %vm6473_vm14, %v6466_v46  ;;  %9511 = vmatpush3.bf16.msra.mxu1 %v11560_v28  ;;  %v11565_v39 = vld [vmem:[%s16000_s1 + $0xa8] sm:$0xff]  }
 0x537   : > { %6487 = vst.msk [vmem:[#allocation4 + $0xa8] sm:$0xff] %vm4226_vm5, %v6462_v61  ;;  %6489 = vst.msk [vmem:[#allocation4 + $0xc0] sm:$0xff] %vm4226_vm5, %v6463_v10  ;;  %9512 = vmatprep.subr.bf16.mxu1 %v11561_v50  ;;  %v11564_v10 = vld [vmem:[%s16000_s1 + $0x70] sm:$0xff]  }
 0x538   : > { %6491 = vst.msk [vmem:[#allocation4 + $0xd8] sm:$0xff] %vm4226_vm5, %v6462_v61  ;;  %vm16623_vm8 = vmmov %vm16622_vm7 }
 0x539   : > { %6482 = vst.msk [vmem:[#allocation4 + $0x68] sm:$0x3] %vm6473_vm14, %v6467_v38  ;;  %6484 = vst.msk [vmem:[#allocation4 + $0x80] sm:$0x3] %vm6473_vm14, %v6468_v30 }
 0x53a   : > { %6486 = vst.msk [vmem:[#allocation4 + $0x98] sm:$0x3] %vm6473_vm14, %v6469_v11  ;;  %6488 = vst.msk [vmem:[#allocation4 + $0xb0] sm:$0x3] %vm6473_vm14, %v6470_v7  ;;  %9513 = vmatpush3.bf16.msra.mxu1 %v11562_v15 }
 0x53b   : > { %6490 = vst.msk [vmem:[#allocation4 + $0xc8] sm:$0x3] %vm6473_vm14, %v6471_v32  ;;  %6492 = vst.msk [vmem:[#allocation4 + $0xe0] sm:$0x3] %vm6473_vm14, %v6470_v7  ;;  %9514 = vmatprep.subr.bf16.mxu1 %v11563_v9  ;;  %v11567_v7 = vld [vmem:[%s16000_s1 + $0xa0] sm:$0xff]  }
 0x53c   : > { %v6533_v22 = vld [vmem:[#allocation4 + $0x1] ss:$2 sm:$0xff]  ;;  %v6541_v63 = vld [vmem:[#allocation4 + $0x2] ss:$2 sm:$0xff]  ;;  %vm16624_vm4 = vmmov %vm16622_vm7 }
 0x53d   : > { %v6597_v18 = vld [vmem:[#allocation4 + $0x31] ss:$2 sm:$0xff]  ;;  %v6543_v1 = vld [vmem:[#allocation4 + $0x32] ss:$2 sm:$0xff]  ;;  %vm16625_vm11 = vmmov %vm16624_vm4 }
 0x53e   : > { %v6535_v23 = vld [vmem:[#allocation4 + $0x31] ss:$2 sm:$0xff]  ;;  %v6605_v36 = vld [vmem:[#allocation4 + $0x32] ss:$2 sm:$0xff]  ;;  %v11286_v43 = vpack.i.bf16 %v6543_v1, %v6541_v63  ;;  %9515 = vmatpush3.bf16.msra.mxu1 %v11564_v10  ;;  %vm16627_vm14 = vmmov %vm16626_vm2 }
 0x53f   : > { %v11276_v40 = vpack.i.bf16 %v6535_v23, %v6533_v22  ;;  %v6549_v13 = vld [vmem:[#allocation4 + $0x3] ss:$2 sm:$0xff]  ;;  %v6551_v54 = vld [vmem:[#allocation4 + $0x33] ss:$2 sm:$0xff]  ;;  %v6557_v57 = vld [vmem:[#allocation4 + $0x18] ss:$2 sm:$0xff]  ;;  %9516 = vmatprep.subr.bf16.mxu1 %v11565_v39 }
 0x540   : > { %v6599_v14 = vld [vmem:[#allocation4 + $0x61] ss:$2 sm:$0xff]  ;;  %v6607_v19 = vld [vmem:[#allocation4 + $0x62] ss:$2 sm:$0xff]  ;;  %v11296_v16 = vpack.i.bf16 %v6551_v54, %v6549_v13 }
 0x541   : > { %v11271_v5 = vpack.i.bf16 %v6599_v14, %v6597_v18  ;;  %11277 = vrot.lane.b32.xlu1 %v11276_v40, %s11684_s21  ;;  %v11281_v37 = vpack.i.bf16 %v6607_v19, %v6605_v36  ;;  %v6613_v27 = vld [vmem:[#allocation4 + $0x33] ss:$2 sm:$0xff]  ;;  %v6615_v41 = vld [vmem:[#allocation4 + $0x63] ss:$2 sm:$0xff]  ;;  %v6559_v44 = vld [vmem:[#allocation4 + $0x48] ss:$2 sm:$0xff] }
 0x542   : > { %v11291_v45 = vpack.i.bf16 %v6615_v41, %v6613_v27  ;;  %v6621_v26 = vld [vmem:[#allocation4 + $0x48] ss:$2 sm:$0xff]  ;;  %v6623_v42 = vld [vmem:[#allocation4 + $0x78] ss:$2 sm:$0xff]  ;;  %v11306_v29 = vpack.i.bf16 %v6559_v44, %v6557_v57  ;;  %v6565_v34 = vld [vmem:[#allocation4 + $0x19] ss:$2 sm:$0xff]  ;;  %9517 = vmatpush3.bf16.msra.mxu1 %v11566_v62 }
 0x543   : > { %11272 = vrot.lane.b32.xlu0 %v11271_v5, %s11684_s21  ;;  %v11301_v60 = vpack.i.bf16 %v6623_v42, %v6621_v26  ;;  %v6567_v47 = vld [vmem:[#allocation4 + $0x49] ss:$2 sm:$0xff]  ;;  %v6631_v58 = vld [vmem:[#allocation4 + $0x79] ss:$2 sm:$0xff]  ;;  %v6573_v59 = vld [vmem:[#allocation4 + $0x1a] ss:$2 sm:$0xff]  ;;  %9518 = vmatprep.subr.bf16.mxu1 %v11567_v7 }
 0x544   : > { %v6629_v25 = vld [vmem:[#allocation4 + $0x49] ss:$2 sm:$0xff]  ;;  %v11316_v20 = vpack.i.bf16 %v6567_v47, %v6565_v34  ;;  %v6575_v49 = vld [vmem:[#allocation4 + $0x4a] ss:$2 sm:$0xff]  ;;  %v6639_v21 = vld [vmem:[#allocation4 + $0x7a] ss:$2 sm:$0xff] }
 0x545   : > { %11287 = vrot.lane.b32.xlu1 %v11286_v43, %s11688_s25  ;;  %v11311_v2 = vpack.i.bf16 %v6631_v58, %v6629_v25  ;;  %v6637_v35 = vld [vmem:[#allocation4 + $0x4a] ss:$2 sm:$0xff]  ;;  %v11326_v31 = vpack.i.bf16 %v6575_v49, %v6573_v59  ;;  %v6581_v3 = vld [vmem:[#allocation4 + $0x1b] ss:$2 sm:$0xff]  ;;  %v6583_v53 = vld [vmem:[#allocation4 + $0x4b] ss:$2 sm:$0xff] }
 0x546   : > { %v11321_v52 = vpack.i.bf16 %v6639_v21, %v6637_v35  ;;  %v6645_v17 = vld [vmem:[#allocation4 + $0x4b] ss:$2 sm:$0xff]  ;;  %v6647_v4 = vld [vmem:[#allocation4 + $0x7b] ss:$2 sm:$0xff]  ;;  %v11336_v6 = vpack.i.bf16 %v6583_v53, %v6581_v3  ;;  %v6545_v38 = vld [vmem:[#allocation4 + $0x62] ss:$2 sm:$0xff] }
 0x547   : > { %11282 = vrot.lane.b32.xlu0 %v11281_v37, %s11688_s25  ;;  %v11331_v12 = vpack.i.bf16 %v6647_v4, %v6645_v17  ;;  %v6537_v33 = vld [vmem:[#allocation4 + $0x61] ss:$2 sm:$0xff]  ;;  %v6539_v55 = vld [vmem:[#allocation4 + $0x91] ss:$2 sm:$0xff]  ;;  %v6547_v30 = vld [vmem:[#allocation4 + $0x92] ss:$2 sm:$0xff] }
 0x548   : > { %v6601_v56 = vld [vmem:[#allocation4 + $0x91] ss:$2 sm:$0xff]  ;;  %v6603_v61 = vld [vmem:[#allocation4 + $0xc1] ss:$2 sm:$0xff]  ;;  %v11346_v48 = vpack.i.bf16 %v6539_v55, %v6537_v33  ;;  %v6609_v11 = vld [vmem:[#allocation4 + $0x92] ss:$2 sm:$0xff]  ;;  %v11356_v32 = vpack.i.bf16 %v6547_v30, %v6545_v38 }
 0x549   : > { %11297 = vrot.lane.b32.xlu1 %v11296_v16, %s11692_s29  ;;  %v11341_v46 = vpack.i.bf16 %v6603_v61, %v6601_v56  ;;  %v6611_v51 = vld [vmem:[#allocation4 + $0xc2] ss:$2 sm:$0xff]  ;;  %v6553_v0 = vld [vmem:[#allocation4 + $0x63] ss:$2 sm:$0xff]  ;;  %v6555_v18 = vld [vmem:[#allocation4 + $0x93] ss:$2 sm:$0xff] }
 0x54a   : > { %v11351_v8 = vpack.i.bf16 %v6611_v51, %v6609_v11  ;;  %v6617_v22 = vld [vmem:[#allocation4 + $0x93] ss:$2 sm:$0xff]  ;;  %v6619_v23 = vld [vmem:[#allocation4 + $0xc3] ss:$2 sm:$0xff]  ;;  %v11366_v40 = vpack.i.bf16 %v6555_v18, %v6553_v0  ;;  %v6561_v63 = vld [vmem:[#allocation4 + $0x78] ss:$2 sm:$0xff] }
 0x54b   : > { %11292 = vrot.lane.b32.xlu0 %v11291_v45, %s11692_s29  ;;  %v11568_v14 = vld [vmem:[%s16000_s1 + $0x60] sm:$0xff]   ;;  %v11361_v5 = vpack.i.bf16 %v6619_v23, %v6617_v22  ;;  %v6563_v1 = vld [vmem:[#allocation4 + $0xa8] ss:$2 sm:$0xff]  ;;  %v6571_v54 = vld [vmem:[#allocation4 + $0xa9] ss:$2 sm:$0xff] }
 0x54c   : > { %v6625_v36 = vld [vmem:[#allocation4 + $0xa8] ss:$2 sm:$0xff]  ;;  %v6627_v19 = vld [vmem:[#allocation4 + $0xd8] ss:$2 sm:$0xff]  ;;  %9519 = vmatpush3.bf16.msra.mxu1 %v11568_v14  ;;  %v11376_v43 = vpack.i.bf16 %v6563_v1, %v6561_v63  ;;  %v6569_v13 = vld [vmem:[#allocation4 + $0x79] ss:$2 sm:$0xff] }
 0x54d   : > { %11307 = vrot.lane.b32.xlu1 %v11306_v29, %s11696_s19  ;;  %v11371_v37 = vpack.i.bf16 %v6627_v19, %v6625_v36  ;;  %v6633_v27 = vld [vmem:[#allocation4 + $0xa9] ss:$2 sm:$0xff]  ;;  %v6635_v41 = vld [vmem:[#allocation4 + $0xd9] ss:$2 sm:$0xff]  ;;  %v11386_v16 = vpack.i.bf16 %v6571_v54, %v6569_v13  ;;  %v6577_v57 = vld [vmem:[#allocation4 + $0x7a] ss:$2 sm:$0xff] }
 0x54e   : > { %v11381_v45 = vpack.i.bf16 %v6635_v41, %v6633_v27  ;;  %v6579_v44 = vld [vmem:[#allocation4 + $0xaa] ss:$2 sm:$0xff]  ;;  %v6643_v42 = vld [vmem:[#allocation4 + $0xda] ss:$2 sm:$0xff]  ;;  %v6585_v34 = vld [vmem:[#allocation4 + $0x7b] ss:$2 sm:$0xff] }
 0x54f   : > { %11302 = vrot.lane.b32.xlu0 %v11301_v60, %s11696_s19  ;;  %v6641_v26 = vld [vmem:[#allocation4 + $0xaa] ss:$2 sm:$0xff]  ;;  %v11396_v29 = vpack.i.bf16 %v6579_v44, %v6577_v57  ;;  %v6587_v47 = vld [vmem:[#allocation4 + $0xab] ss:$2 sm:$0xff]  ;;  %v6651_v58 = vld [vmem:[#allocation4 + $0xdb] ss:$2 sm:$0xff] }
 0x550   : > { %v11391_v60 = vpack.i.bf16 %v6643_v42, %v6641_v26  ;;  %v6649_v25 = vld [vmem:[#allocation4 + $0xab] ss:$2 sm:$0xff]  ;;  %v6527_v9 = vld [vmem:[#allocation4 + $0x30] ss:$2 sm:$0xff]  ;;  %v6591_v55 = vld [vmem:[#allocation4 + $0x60] ss:$2 sm:$0xff] }
 0x551   : > { %11317 = vrot.lane.b32.xlu1 %v11316_v20, %s11698_s26  ;;  %v11406_v20 = vpack.i.bf16 %v6587_v47, %v6585_v34  ;;  %v6589_v56 = vld [vmem:[#allocation4 + $0x30] ss:$2 sm:$0xff] }
 0x553   : > { %11312 = vrot.lane.b32.xlu0 %v11311_v2, %s11698_s26  ;;  %v11401_v2 = vpack.i.bf16 %v6651_v58, %v6649_v25 }
 0x555   : > { %11327 = vrot.lane.b32.xlu1 %v11326_v31, %s11700_s30 }
 0x557   : > { %11322 = vrot.lane.b32.xlu0 %v11321_v52, %s11700_s30 }
 0x559   : > { %11337 = vrot.lane.b32.xlu1 %v11336_v6, %s11702_s6  ;;  %v6525_v6 = vld [vmem:[#allocation4] ss:$2 sm:$0xff] }
 0x55b   : > { %11332 = vrot.lane.b32.xlu0 %v11331_v12, %s11702_s6 }
 0x55d   : > { %11347 = vrot.lane.b32.xlu1 %v11346_v48, %s11684_s21 }
 0x55f   : > { %11342 = vrot.lane.b32.xlu0 %v11341_v46, %s11684_s21 }
 0x561   : > { %11357 = vrot.lane.b32.xlu1 %v11356_v32, %s11688_s25 }
 0x563   : > { %11352 = vrot.lane.b32.xlu0 %v11351_v8, %s11688_s25 }
 0x565   : > { %11367 = vrot.lane.b32.xlu1 %v11366_v40, %s11692_s29 }
 0x567   : > { %11362 = vrot.lane.b32.xlu0 %v11361_v5, %s11692_s29 }
 0x569   : > { %11377 = vrot.lane.b32.xlu1 %v11376_v43, %s11696_s19 }
 0x56b   : > { %11372 = vrot.lane.b32.xlu0 %v11371_v37, %s11696_s19 }
 0x56d   : > { %11387 = vrot.lane.b32.xlu1 %v11386_v16, %s11698_s26 }
 0x56f   : > { %11382 = vrot.lane.b32.xlu0 %v11381_v45, %s11698_s26 }
 0x571   : > { %11397 = vrot.lane.b32.xlu1 %v11396_v29, %s11700_s30 }
 0x573   : > { %11392 = vrot.lane.b32.xlu0 %v11391_v60, %s11700_s30 }
 0x575   : > { %11407 = vrot.lane.b32.xlu1 %v11406_v20, %s11702_s6 }
 0x577   : > { %11402 = vrot.lane.b32.xlu0 %v11401_v2, %s11702_s6 }
 0x5b3   : > { %v11278_v59 = vpop.permute.xlu1 %11277 }
 0x5b4   : > { %v11280_v50 = vunpack.i.h.bf16 %v11278_v59  ;;  %v11279_v31 = vunpack.i.l.bf16 %v11278_v59 }
 0x5b5   : > { %v11273_v49 = vpop.permute.xlu0 %11272 }
 0x5b6   : > { %v11275_v3 = vunpack.i.h.bf16 %v11273_v49  ;;  %v11274_v53 = vunpack.i.l.bf16 %v11273_v49  ;;  %v6877_v61 = vsel %vm4226_vm5, %v6527_v9, %v11280_v50  ;;  %v6876_v10 = vsel %vm4226_vm5, %v6525_v6, %v11279_v31 }
 0x5b7   : > { %v11288_v35 = vpop.permute.xlu1 %11287 }
 0x5b8   : > { %v11290_v4 = vunpack.i.h.bf16 %v11288_v35  ;;  %v11289_v15 = vunpack.i.l.bf16 %v11288_v35  ;;  %v6905_v48 = vsel %vm4226_vm5, %v6591_v55, %v11275_v3  ;;  %v6904_v46 = vsel %vm4226_vm5, %v6589_v56, %v11274_v53 }
 0x5b9   : > { %v11283_v21 = vpop.permute.xlu0 %11282 }
 0x5ba   : > { %v11285_v12 = vunpack.i.h.bf16 %v11283_v21  ;;  %v11284_v33 = vunpack.i.l.bf16 %v11283_v21  ;;  %v6880_v51 = vsel %vm16618_vm15, %v6876_v10, %v11289_v15  ;;  %v6881_v62 = vsel %vm16619_vm3, %v6877_v61, %v11290_v4  ;;  %vm16628_vm15 = vmmov %vm16626_vm2 }
 0x5bb   : > { %v11298_v24 = vpop.permute.xlu1 %11297  ;;  %vm16629_vm3 = vmmov %vm16626_vm2 }
 0x5bc   : > { %v11300_v38 = vunpack.i.h.bf16 %v11298_v24  ;;  %v11299_v30 = vunpack.i.l.bf16 %v11298_v24  ;;  %v6908_v8 = vsel %vm16620_vm12, %v6904_v46, %v11284_v33  ;;  %v6909_v0 = vsel %vm16621_vm6, %v6905_v48, %v11285_v12  ;;  %vm16631_vm12 = vmmov %vm16624_vm4 }
 0x5bd   : > { %v11293_v28 = vpop.permute.xlu0 %11292  ;;  %vm16632_vm6 = vmmov %vm16624_vm4 }
 0x5be   : > { %v11295_v7 = vunpack.i.h.bf16 %v11293_v28  ;;  %v11294_v32 = vunpack.i.l.bf16 %v11293_v28  ;;  %v6884_v1 = vsel %vm4490_vm13, %v6880_v51, %v11299_v30  ;;  %v6885_v36 = vsel %vm4490_vm13, %v6881_v62, %v11300_v38  ;;  %v6529_v30 = vld [vmem:[#allocation4 + $0x60] ss:$2 sm:$0xff] }
 0x5bf   : > { %v11308_v52 = vpop.permute.xlu1 %11307 }
 0x5c0   : > { %v11310_v18 = vunpack.i.h.bf16 %v11308_v52  ;;  %v11309_v22 = vunpack.i.l.bf16 %v11308_v52  ;;  %v6912_v13 = vsel %vm4490_vm13, %v6908_v8, %v11294_v32  ;;  %v6913_v54 = vsel %vm4490_vm13, %v6909_v0, %v11295_v7  ;;  %v6593_v7 = vld [vmem:[#allocation4 + $0x90] ss:$2 sm:$0xff]  ;;  %v6595_v32 = vld [vmem:[#allocation4 + $0xc0] ss:$2 sm:$0xff] }
 0x5c1   : > { %v11303_v17 = vpop.permute.xlu0 %11302 }
 0x5c2   : > { %v11305_v23 = vunpack.i.h.bf16 %v11303_v17  ;;  %v11304_v14 = vunpack.i.l.bf16 %v11303_v17  ;;  %v6889_v16 = vsel %vm16622_vm7, %v6885_v36, %v11310_v18  ;;  %v6888_v45 = vsel %vm16623_vm8, %v6884_v1, %v11309_v22  ;;  %vm16633_vm7 = vmmov %vm16624_vm4 }
 0x5c3   : > { %v11318_v39 = vpop.permute.xlu1 %11317  ;;  %vm16640_vm8 = vmmov %vm16626_vm2 }
 0x5c4   : > { %v11320_v40 = vunpack.i.h.bf16 %v11318_v39  ;;  %v11319_v5 = vunpack.i.l.bf16 %v11318_v39  ;;  %v6916_v26 = vsel %vm16624_vm4, %v6912_v13, %v11304_v14  ;;  %v6917_v42 = vsel %vm16625_vm11, %v6913_v54, %v11305_v23  ;;  %vm16642_vm11 = vmmov %vm16626_vm2 }
 0x5c5   : > { %v11313_v11 = vpop.permute.xlu0 %11312 }
 0x5c6   : > { %v11315_v19 = vunpack.i.h.bf16 %v11313_v11  ;;  %v11314_v43 = vunpack.i.l.bf16 %v11313_v11  ;;  %v6892_v29 = vsel %vm6108_vm10, %v6888_v45, %v11319_v5  ;;  %v6893_v60 = vsel %vm6108_vm10, %v6889_v16, %v11320_v40  ;;  %v6531_v11 = vld [vmem:[#allocation4 + $0x90] ss:$2 sm:$0xff] }
 0x5c7   : > { %v11328_v63 = vpop.permute.xlu1 %11327 }
 0x5c8   : > { %v11330_v27 = vunpack.i.h.bf16 %v11328_v63  ;;  %v11329_v41 = vunpack.i.l.bf16 %v11328_v63  ;;  %v6920_v47 = vsel %vm6108_vm10, %v6916_v26, %v11314_v43  ;;  %v6921_v25 = vsel %vm6108_vm10, %v6917_v42, %v11315_v19 }
 0x5c9   : > { %v11323_v37 = vpop.permute.xlu0 %11322 }
 0x5ca   : > { %v11325_v57 = vunpack.i.h.bf16 %v11323_v37  ;;  %v11324_v44 = vunpack.i.l.bf16 %v11323_v37  ;;  %v6896_v59 = vsel %vm6126_vm1, %v6892_v29, %v11329_v41  ;;  %v6897_v49 = vsel %vm6126_vm1, %v6893_v60, %v11330_v27 }
 0x5cb   : > { %v11338_v34 = vpop.permute.xlu1 %11337 }
 0x5cc   : > { %v11340_v20 = vunpack.i.h.bf16 %v11338_v34  ;;  %v11339_v2 = vunpack.i.l.bf16 %v11338_v34  ;;  %v6924_v24 = vsel %vm6126_vm1, %v6920_v47, %v11324_v44  ;;  %v6925_v28 = vsel %vm6126_vm1, %v6921_v25, %v11325_v57 }
 0x5cd   : > { %v11333_v58 = vpop.permute.xlu0 %11332 }
 0x5ce   : > { %v11335_v35 = vunpack.i.h.bf16 %v11333_v58  ;;  %v11334_v21 = vunpack.i.l.bf16 %v11333_v58  ;;  %v6900_v50 = vsel %vm6144_vm9, %v6896_v59, %v11339_v2  ;;  %v6901_v31 = vsel %vm6144_vm9, %v6897_v49, %v11340_v20 }
 0x5cf   : > { %v6932_v52 = vpack.c.bf16 %v6901_v31, %v6900_v50  ;;  %v11348_v3 = vpop.permute.xlu1 %11347 }
 0x5d0   : > { %v6928_v53 = vsel %vm6144_vm9, %v6924_v24, %v11334_v21  ;;  %v6929_v17 = vsel %vm6144_vm9, %v6925_v28, %v11335_v35  ;;  %v11350_v55 = vunpack.i.h.bf16 %v11348_v3  ;;  %v11349_v56 = vunpack.i.l.bf16 %v11348_v3 }
 0x5d1   : > { %v11343_v4 = vpop.permute.xlu0 %11342  ;;  %v6933_v15 = vpack.c.bf16 %v6929_v17, %v6928_v53 }
 0x5d2   : > { %v11345_v10 = vunpack.i.h.bf16 %v11343_v4  ;;  %v11344_v39 = vunpack.i.l.bf16 %v11343_v4  ;;  %v6879_v8 = vsel %vm4226_vm5, %v6531_v11, %v11350_v55  ;;  %v6878_v0 = vsel %vm4226_vm5, %v6529_v30, %v11349_v56 }
 0x5d3   : > { %7064 = vmatprep.mubr.bf16.mxu1 %v6933_v15  ;;  %v11358_v9 = vpop.permute.xlu1 %11357 }
 0x5d4   : > { %7065 = vmatmul.mubr.bf16.vlgmr.msra.gmra.mxu1 %v6932_v52  ;;  %v11360_v46 = vunpack.i.h.bf16 %v11358_v9  ;;  %v11359_v38 = vunpack.i.l.bf16 %v11358_v9  ;;  %v6907_v22 = vsel %vm4226_vm5, %v6595_v32, %v11345_v10  ;;  %v6906_v23 = vsel %vm4226_vm5, %v6593_v7, %v11344_v39  ;;  %vm16630_vm5 = vmmov %vm16624_vm4 }
 0x5d5   : > { %v11353_v6 = vpop.permute.xlu0 %11352  ;;  %vm16641_vm4 = vmmov %vm16626_vm2 }
 0x5d6   : > { %v11355_v51 = vunpack.i.h.bf16 %v11353_v6  ;;  %v11354_v62 = vunpack.i.l.bf16 %v11353_v6  ;;  %v6882_v63 = vsel %vm16626_vm2, %v6878_v0, %v11359_v38  ;;  %v6883_v1 = vsel %vm16627_vm14, %v6879_v8, %v11360_v46  ;;  %vm16645_vm14 = vmmov %vm16629_vm3 }
 0x5d7   : > { %v11368_v12 = vpop.permute.xlu1 %11367  ;;  %v7083_v38 = vlaneseq }
 0x5d8   : > { %v11370_v14 = vunpack.i.h.bf16 %v11368_v12  ;;  %v11369_v40 = vunpack.i.l.bf16 %v11368_v12  ;;  %v6910_v43 = vsel %vm16628_vm15, %v6906_v23, %v11354_v62  ;;  %v6911_v37 = vsel %vm16629_vm3, %v6907_v22, %v11355_v51  ;;  %vm16646_vm15 = vmmov %vm16629_vm3 }
 0x5d9   : > { %v11363_v33 = vpop.permute.xlu0 %11362  ;;  %v15460_v11 = vshrl.u32 %v7083_v38, 7 }
 0x5da   : > { %v11365_v36 = vunpack.i.h.bf16 %v11363_v33  ;;  %v11364_v19 = vunpack.i.l.bf16 %v11363_v33  ;;  %v6886_v44 = vsel %vm4490_vm13, %v6882_v63, %v11369_v40  ;;  %v6887_v26 = vsel %vm4490_vm13, %v6883_v1, %v11370_v14  ;;  %v11570_v63 = vld [vmem:[%s16000_s1 + $0x118] sm:$0xff]   ;;  %v11571_v1 = vld [vmem:[%s16000_s1 + $0x150] sm:$0xff]  }
 0x5db   : > { %v11378_v61 = vpop.permute.xlu1 %11377  ;;  %v15463_v62 = vadd.s32 8, %v15460_v11  ;;  %v15467_v8 = vadd.s32 16, %v15460_v11  ;;  %v7088_v0 = vand.u32 7, %v15460_v11  ;;  %v7087_v14 = vadd.s32 24, %v15460_v11 }
 0x5dc   : > { %v11380_v13 = vunpack.i.h.bf16 %v11378_v61  ;;  %v11379_v54 = vunpack.i.l.bf16 %v11378_v61  ;;  %v6914_v34 = vsel %vm4490_vm13, %v6910_v43, %v11364_v19  ;;  %v6915_v47 = vsel %vm4490_vm13, %v6911_v37, %v11365_v36  ;;  %v11577_v37 = vld [vmem:[%s16000_s1 + $0x1d8] sm:$0xff]  }
 0x5dd   : > { %v11373_v48 = vpop.permute.xlu0 %11372  ;;  %v7089_v32 = vand.u32 7, %v15463_v62  ;;  %v7090_v23 = vand.u32 7, %v15467_v8  ;;  %9560 = vmatprep.subr.bf16.mxu1 %v11577_v37 }
 0x5de   : > { %v11375_v27 = vunpack.i.h.bf16 %v11373_v48  ;;  %v11374_v41 = vunpack.i.l.bf16 %v11373_v48  ;;  %v6890_v20 = vsel %vm16630_vm5, %v6886_v44, %v11379_v54  ;;  %v6891_v2 = vsel %vm16631_vm12, %v6887_v26, %v11380_v13  ;;  %v11573_v26 = vld [vmem:[%s16000_s1 + $0x148] sm:$0xff]   ;;  %vm16647_vm5 = vmmov %vm16629_vm3 }
 0x5df   : > { %v11388_v18 = vpop.permute.xlu1 %11387  ;;  %vm15472_vm13 = vcmp.lt.s32.totalorder %v7089_v32, 4  ;;  %vm16648_vm12 = vmmov %vm16629_vm3 }
 0x5e0   : > { %v11390_v16 = vunpack.i.h.bf16 %v11388_v18  ;;  %v11389_v45 = vunpack.i.l.bf16 %v11388_v18  ;;  %v6918_v35 = vsel %vm16632_vm6, %v6914_v34, %v11374_v41  ;;  %v6919_v21 = vsel %vm16633_vm7, %v6915_v47, %v11375_v27  ;;  %v11572_v41 = vld [vmem:[%s16000_s1 + $0x110] sm:$0xff]  }
 0x5e1   : > { %v11383_v5 = vpop.permute.xlu0 %11382  ;;  %v7091_v27 = vand.u32 7, %v7087_v14 }
 0x5e2   : > { %v11385_v42 = vunpack.i.h.bf16 %v11383_v5  ;;  %v11384_v29 = vunpack.i.l.bf16 %v11383_v5  ;;  %v6894_v24 = vsel %vm6108_vm10, %v6890_v20, %v11389_v45  ;;  %v6895_v28 = vsel %vm6108_vm10, %v6891_v2, %v11390_v16  ;;  %v11569_v5 = vld [vmem:[%s16000_s1 + $0x158] sm:$0xff]   ;;  %v11580_v45 = vld [vmem:[%s16000_s1 + $0x1d0] sm:$0xff]   ;;  %v11574_v2 = vld [vmem:[%s16000_s1 + $0x108] sm:$0xff]  }
 0x5e3   : > { %v11398_v57 = vpop.permute.xlu1 %11397  ;;  %9532 = vmatprep.subr.bf16.mxu0 %v11569_v5  ;;  %v11578_v16 = vld [vmem:[%s16000_s1 + $0x198] sm:$0xff]   ;;  %vm15526_vm2 = vcmp.lt.s32.totalorder %v7091_v27, 4 }
 0x5e4   : > { %v11400_v25 = vunpack.i.h.bf16 %v11398_v57  ;;  %v11399_v58 = vunpack.i.l.bf16 %v11398_v57  ;;  %v6922_v31 = vsel %vm6108_vm10, %v6918_v35, %v11384_v29  ;;  %v6923_v52 = vsel %vm6108_vm10, %v6919_v21, %v11385_v42  ;;  %9533 = vmatpush3.bf16.msra.mxu0 %v11570_v63  ;;  %9561 = vmatpush3.bf16.msra.mxu1 %v11578_v16  ;;  %v11575_v35 = vld [vmem:[%s16000_s1 + $0x140] sm:$0xff]  }
 0x5e5   : > { %v11393_v60 = vpop.permute.xlu0 %11392  ;;  %vm15489_vm10 = vcmp.lt.s32.totalorder %v7088_v0, 4  ;;  %9534 = vmatprep.subr.bf16.mxu0 %v11571_v1  ;;  %9562 = vmatprep.subr.bf16.mxu1 %v11580_v45  ;;  %v9367_v45 = vld [vmem:[%s16001_s2 + $0x3] ss:$0 sm:$0xff] }
 0x5e6   : > { %v11395_v59 = vunpack.i.h.bf16 %v11393_v60  ;;  %v11394_v49 = vunpack.i.l.bf16 %v11393_v60  ;;  %v6898_v4 = vsel %vm6126_vm1, %v6894_v24, %v11399_v58  ;;  %v6899_v15 = vsel %vm6126_vm1, %v6895_v28, %v11400_v25  ;;  %v11582_v60 = vld [vmem:[%s16000_s1 + $0x190] sm:$0xff]  }
 0x5e7   : > { %v11408_v50 = vpop.permute.xlu1 %11407 }
 0x5e8   : > { %v11410_v53 = vunpack.i.h.bf16 %v11408_v50  ;;  %v11409_v17 = vunpack.i.l.bf16 %v11408_v50  ;;  %v6926_v12 = vsel %vm6126_vm1, %v6922_v31, %v11394_v49  ;;  %v6927_v33 = vsel %vm6126_vm1, %v6923_v52, %v11395_v59  ;;  %9535 = vmatpush3.bf16.msra.mxu0 %v11572_v41  ;;  %9563 = vmatpush3.bf16.msra.mxu1 %v11582_v60  ;;  %v11576_v50 = vld [vmem:[%s16000_s1 + $0x100] sm:$0xff]   ;;  %v11579_v52 = vld [vmem:[%s16000_s1 + $0x138] sm:$0xff]  }
 0x5e9   : > { %v11403_v3 = vpop.permute.xlu0 %11402  ;;  %9536 = vmatprep.subr.bf16.mxu0 %v11573_v26 }
 0x5ea   : > { %v11405_v9 = vunpack.i.h.bf16 %v11403_v3  ;;  %v11404_v6 = vunpack.i.l.bf16 %v11403_v3  ;;  %v6902_v55 = vsel %vm6144_vm9, %v6898_v4, %v11409_v17  ;;  %v6903_v56 = vsel %vm6144_vm9, %v6899_v15, %v11410_v53  ;;  %v11581_v53 = vld [vmem:[%s16000_s1 + $0xf8] sm:$0xff]  }
 0x5eb   : > { %v6934_v39 = vpack.c.bf16 %v6903_v56, %v6902_v55 }
 0x5ec   : > { %v6930_v61 = vsel %vm6144_vm9, %v6926_v12, %v11404_v6  ;;  %v6931_v10 = vsel %vm6144_vm9, %v6927_v33, %v11405_v9  ;;  %vm15500_vm9 = vcmp.lt.s32.totalorder %v7090_v23, 4  ;;  %9537 = vmatpush3.bf16.msra.mxu0 %v11574_v2 }
 0x5ed   : > { %v6935_v48 = vpack.c.bf16 %v6931_v10, %v6930_v61  ;;  %9538 = vmatprep.subr.bf16.mxu0 %v11575_v35 }
 0x5ef   : > { %7072 = vmatprep.mubr.bf16.mxu1 %v6935_v48 }
 0x5f0   : > { %7073 = vmatmul.mubr.bf16.gmra.mxu1 %v6934_v39  ;;  %9539 = vmatpush3.bf16.msra.mxu0 %v11576_v50 }
 0x5f1   : > { %9540 = vmatprep.subr.bf16.mxu0 %v11579_v52 }
 0x5f4   : > { %9541 = vmatpush3.bf16.msra.mxu0 %v11581_v53 }
 0x694   : > { %v9520_v46 = vpop.f32.mrf.mxu1 }
 0x696   : > { %v9521_v30 = vpop.f32.mrf.mxu1 }
 0x697   : > { %v9522_v40 = vadd.f32 %v9521_v30, %v9520_v46 }
 0x698   : > { %v9523_v51 = vpop.f32.mrf.mxu1 }
 0x699   : > { %v7104_v57 = vsel %vm15489_vm10, %v9522_v40, 0.0 }
 0x69a   : > { %v9524_v7 = vpop.f32.mrf.mxu1  ;;  %v7108_v47 = vsel %vm16641_vm4, %v7104_v57, 0.0  ;;  %vm16649_vm4 = vmmov %vm16629_vm3 }
 0x69b   : > { %v9525_v18 = vadd.f32 %v9524_v7, %v9523_v51 }
 0x69d   : > { %v7105_v43 = vsel %vm15472_vm13, %v9525_v18, 0.0 }
 0x69e   : > { %v7109_v42 = vsel %vm16640_vm8, %v7105_v43, 0.0  ;;  %vm7220_vm8 = vcmask 259072  }
 0x69f   : > { %v7110_v59 = vadd.f32 %v7109_v42, %v7108_v47 }
 0x6b0   : > { %v9526_v19 = vpop.f32.mrf.mxu1 }
 0x6b2   : > { %v9527_v13 = vpop.f32.mrf.mxu1 }
 0x6b3   : > { %v9528_v44 = vadd.f32 %v9527_v13, %v9526_v19 }
 0x6b4   : > { %v9529_v29 = vpop.f32.mrf.mxu1 }
 0x6b5   : > { %v7106_v34 = vsel %vm15500_vm9, %v9528_v44, 0.0 }
 0x6b6   : > { %v7111_v25 = vsel %vm16642_vm11, %v7106_v34, 0.0  ;;  %v9530_v58 = vpop.f32.mrf.mxu1  ;;  %vm16650_vm11 = vmmov %vm16629_vm3 }
 0x6b7   : > { %v9531_v49 = vadd.f32 %v9530_v58, %v9529_v29  ;;  %v7112_v21 = vadd.f32 %v7111_v25, %v7110_v59  ;;  %v9368_v29 = vld [vmem:[%s16001_s2 + $0x4] ss:$0 sm:$0xff] }
 0x6b9   : > { %v7107_v24 = vsel %vm15526_vm2, %v9531_v49, 0.0 }
 0x6ba   : > { %v7113_v28 = vsel %vm16645_vm14, %v7107_v24, 0.0  ;;  %vm16652_vm14 = vcmask 523264  }
 0x6bb   : > { %v7114_v31 = vadd.f32 %v7113_v28, %v7112_v21 }
 0x6bd   : > { %v7115_v3 = vrot.slane %v7114_v31, 4 }
 0x6bf   : > { %v7116_v17 = vadd.f32 %v7115_v3, %v7114_v31 }
 0x6c1   : > { %v7117_v4 = vrot.slane %v7116_v17, 2 }
 0x6c3   : > { %v7118_v15 = vadd.f32 %v7117_v4, %v7116_v17 }
 0x6c5   : > { %v7119_v9 = vrot.slane %v7118_v15, 1 }
 0x6c7   : > { %v7120_v6 = vadd.f32 %v7119_v9, %v7118_v15 }
 0x6c9   : > { %v7122_v12 = vmul.f32 0.0625, %v7120_v6 }
 0x6cb   : > { %v7123_v33 = vsub.f32 %v9522_v40, %v7122_v12  ;;  %v7124_v55 = vsub.f32 %v9525_v18, %v7122_v12  ;;  %v7125_v56 = vsub.f32 %v9528_v44, %v7122_v12  ;;  %v7126_v61 = vsub.f32 %v9531_v49, %v7122_v12 }
 0x6cd   : > { %v7127_v10 = vsel %vm15489_vm10, %v7123_v33, 0.0  ;;  %v7128_v39 = vsel %vm15472_vm13, %v7124_v55, 0.0  ;;  %v7129_v48 = vsel %vm15500_vm9, %v7125_v56, 0.0  ;;  %v7130_v46 = vsel %vm15526_vm2, %v7126_v61, 0.0  ;;  %vm16651_vm2 = vmmov %vm16629_vm3 }
 0x6ce   : > { %v7131_v38 = vmul.f32 %v7127_v10, %v7127_v10  ;;  %v7132_v30 = vmul.f32 %v7128_v39, %v7128_v39  ;;  %v7133_v51 = vmul.f32 %v7129_v48, %v7129_v48  ;;  %v7134_v7 = vmul.f32 %v7130_v46, %v7130_v46 }
 0x6cf   : > { %vm7215_vm9 = vcmask 1044480  }
 0x6d0   : > { %v7135_v18 = vsel %vm16646_vm15, %v7131_v38, 0.0  ;;  %v7136_v14 = vsel %vm16629_vm3, %v7132_v30, 0.0  ;;  %v7138_v5 = vsel %vm16647_vm5, %v7133_v51, 0.0  ;;  %v7140_v22 = vsel %vm16648_vm12, %v7134_v7, 0.0  ;;  %vm16653_vm15 = vmmov %vm16652_vm14 }
 0x6d1   : > { %v7137_v40 = vadd.f32 %v7136_v14, %v7135_v18  ;;  %v11583_v18 = vld [vmem:[%s16000_s1 + $0x1c8] sm:$0xff]   ;;  %vm16654_vm3 = vmmov %vm16651_vm2 }
 0x6d2   : > { %v11584_v14 = vld [vmem:[%s16000_s1 + $0x188] sm:$0xff]   ;;  %9564 = vmatprep.subr.bf16.mxu1 %v11583_v18  ;;  %vm16655_vm5 = vmmov %vm16651_vm2 }
 0x6d3   : > { %v7139_v63 = vadd.f32 %v7138_v5, %v7137_v40  ;;  %9565 = vmatpush3.bf16.msra.mxu1 %v11584_v14  ;;  %v11585_v40 = vld [vmem:[%s16000_s1 + $0x130] sm:$0xff]   ;;  %v11586_v5 = vld [vmem:[%s16000_s1 + $0x1c0] sm:$0xff]   ;;  %vm16656_vm12 = vmmov %vm16652_vm14 }
 0x6d4   : > { %9542 = vmatprep.subr.bf16.mxu0 %v11585_v40  ;;  %9566 = vmatprep.subr.bf16.mxu1 %v11586_v5 }
 0x6d5   : > { %v7141_v1 = vadd.f32 %v7140_v22, %v7139_v63  ;;  %v11587_v63 = vld [vmem:[%s16000_s1 + $0xf0] sm:$0xff]   ;;  %v11588_v22 = vld [vmem:[%s16000_s1 + $0x180] sm:$0xff]  }
 0x6d6   : > { %9543 = vmatpush3.bf16.msra.mxu0 %v11587_v63 }
 0x6d7   : > { %v7142_v36 = vrot.slane %v7141_v1, 4  ;;  %9567 = vmatpush3.bf16.msra.mxu1 %v11588_v22 }
 0x6d9   : > { %v7143_v19 = vadd.f32 %v7142_v36, %v7141_v1 }
 0x6db   : > { %v7144_v43 = vrot.slane %v7143_v19, 2 }
 0x6dd   : > { %v7145_v37 = vadd.f32 %v7144_v43, %v7143_v19 }
 0x6df   : > { %v7146_v13 = vrot.slane %v7145_v37, 1 }
 0x6e1   : > { %v7147_v54 = vadd.f32 %v7146_v13, %v7145_v37 }
 0x6e3   : > { %v7148_v27 = vmul.f32 0.0625, %v7147_v54 }
 0x6e5   : > { %v7149_v41 = vadd.f32 1e-05, %v7148_v27 }
 0x6e7   : > { %11667 = vrsqrt.f32 %v7149_v41 }
 0x6f4   : > { %v11668_v16 = vpop.eup %11667 }
 0x6f5   : > { %v7151_v57 = vmul.f32 %v11668_v16, %v7123_v33  ;;  %v7152_v44 = vmul.f32 %v11668_v16, %v7124_v55  ;;  %v7153_v26 = vmul.f32 %v11668_v16, %v7125_v56  ;;  %v7154_v42 = vmul.f32 %v11668_v16, %v7126_v61 }
 0x6f7   : > { %v7159_v60 = vmul.f32 %v9367_v45, %v7151_v57  ;;  %v7160_v34 = vmul.f32 %v9367_v45, %v7152_v44  ;;  %v7161_v47 = vmul.f32 %v9367_v45, %v7153_v26  ;;  %v7162_v25 = vmul.f32 %v9367_v45, %v7154_v42  ;;  %v11589_v26 = vld [vmem:[%s16000_s1 + $0x1b8] sm:$0xff]  }
 0x6f8   : > { %v11590_v42 = vld [vmem:[%s16000_s1 + $0x178] sm:$0xff]   ;;  %9568 = vmatprep.subr.bf16.mxu1 %v11589_v26 }
 0x6f9   : > { %v7167_v58 = vadd.f32 %v9368_v29, %v7159_v60  ;;  %v7168_v20 = vadd.f32 %v9368_v29, %v7160_v34  ;;  %v7169_v2 = vadd.f32 %v9368_v29, %v7161_v47  ;;  %v7170_v59 = vadd.f32 %v9368_v29, %v7162_v25  ;;  %v11591_v29 = vld [vmem:[%s16000_s1 + $0x128] sm:$0xff]   ;;  %v11592_v60 = vld [vmem:[%s16000_s1 + $0x1b0] sm:$0xff]   ;;  %9569 = vmatpush3.bf16.msra.mxu1 %v11590_v42 }
 0x6fa   : > { %v11593_v47 = vld [vmem:[%s16000_s1 + $0xe8] sm:$0xff]   ;;  %9544 = vmatprep.subr.bf16.mxu0 %v11591_v29  ;;  %9570 = vmatprep.subr.bf16.mxu1 %v11592_v60 }
 0x6fb   : > { %vm7171_vm6 = vcmp.gt.f32.partialorder %v7167_v58, 0.0  ;;  %vm7172_vm7 = vcmp.gt.f32.partialorder %v7168_v20, 0.0  ;;  %vm7173_vm13 = vcmp.gt.f32.partialorder %v7169_v2, 0.0  ;;  %vm7174_vm10 = vcmp.gt.f32.partialorder %v7170_v59, 0.0  ;;  %9545 = vmatpush3.bf16.msra.mxu0 %v11593_v47 }
 0x6fc   : > { %v7175_v49 = vmul.f32 0.2, %v7167_v58  ;;  %v7176_v35 = vmul.f32 0.2, %v7168_v20  ;;  %v7177_v21 = vmul.f32 0.2, %v7169_v2 }
 0x6fd   : > { %v7178_v24 = vmul.f32 0.2, %v7170_v59 }
 0x6fe   : > { %v7179_v28 = vsel %vm7171_vm6, %v7167_v58, %v7175_v49  ;;  %v7180_v50 = vsel %vm7172_vm7, %v7168_v20, %v7176_v35  ;;  %v7181_v31 = vsel %vm7173_vm13, %v7169_v2, %v7177_v21  ;;  %v11594_v20 = vld [vmem:[%s16000_s1 + $0x170] sm:$0xff]   ;;  %v11595_v49 = vld [vmem:[%s16000_s1 + $0x1a8] sm:$0xff]   ;;  %vm16657_vm6 = vmmov %vm16656_vm12 }
 0x6ff   : > { %v7182_v52 = vsel %vm7174_vm10, %v7170_v59, %v7178_v24  ;;  %v7187_v3 = vrot.slane %v7180_v50, 1  ;;  %v7188_v53 = vrot.slane %v7179_v28, 1  ;;  %v7189_v17 = vrot.slane %v7181_v31, 1  ;;  %9571 = vmatpush3.bf16.msra.mxu1 %v11594_v20  ;;  %v11596_v24 = vld [vmem:[%s16000_s1 + $0x168] sm:$0xff]   ;;  %vm16658_vm7 = vmmov %vm16651_vm2 }
 0x700   : > { %v7190_v4 = vrot.slane %v7182_v52, 1  ;;  %v7195_v15 = vrot.slane %v7180_v50, 7  ;;  %v7196_v9 = vrot.slane %v7179_v28, 7  ;;  %v7197_v6 = vrot.slane %v7181_v31, 7  ;;  %9572 = vmatprep.subr.bf16.mxu1 %v11595_v49  ;;  %vm16659_vm13 = vmmov %vm16651_vm2 }
 0x701   : > { %v7198_v12 = vrot.slane %v7182_v52, 7  ;;  %v7203_v33 = vrot.slane %v7180_v50, 5  ;;  %v7204_v55 = vrot.slane %v7179_v28, 5  ;;  %v7205_v56 = vrot.slane %v7181_v31, 5  ;;  %v11597_v28 = vld [vmem:[%s16000_s1 + $0x120] sm:$0xff]   ;;  %vm16660_vm10 = vmmov %vm16651_vm2 }
 0x702   : > { %v7206_v61 = vrot.slane %v7182_v52, 5  ;;  %v7211_v10 = vsel %vm492_vm0, %v7187_v3, %v7195_v15  ;;  %v7212_v39 = vsel %vm492_vm0, %v7188_v53, %v7196_v9  ;;  %v7213_v48 = vsel %vm492_vm0, %v7189_v17, %v7197_v6  ;;  %v11599_v50 = vld [vmem:[%s16000_s1 + $0xe0] sm:$0xff]   ;;  %9546 = vmatprep.subr.bf16.mxu0 %v11597_v28 }
 0x703   : > { %v7214_v46 = vsel %vm492_vm0, %v7190_v4, %v7198_v12  ;;  %v7216_v38 = vsel %vm7215_vm9, %v7211_v10, %v7203_v33  ;;  %v7217_v30 = vsel %vm7215_vm9, %v7212_v39, %v7204_v55  ;;  %v7218_v51 = vsel %vm7215_vm9, %v7213_v48, %v7205_v56  ;;  %v11598_v3 = vld [vmem:[%s16000_s1 + $0x1a0] sm:$0xff]   ;;  %9547 = vmatpush3.bf16.msra.mxu0 %v11599_v50 }
 0x704   : > { %v7219_v7 = vsel %vm7215_vm9, %v7214_v46, %v7206_v61  ;;  %7221 = vst.msk [vmem:[#allocation5] sm:$0x3f] %vm7220_vm8, %v7216_v38  ;;  %7222 = vst.msk [vmem:[#allocation5 + $0x10] sm:$0x3f] %vm7220_vm8, %v7217_v30  ;;  %9573 = vmatpush3.bf16.msra.mxu1 %v11596_v24  ;;  %v11600_v15 = vld [vmem:[%s16000_s1 + $0x160] sm:$0xff]  }
 0x705   : > { %7223 = vst.msk [vmem:[#allocation5 + $0x20] sm:$0x3f] %vm7220_vm8, %v7216_v38  ;;  %7224 = vst.msk [vmem:[#allocation5 + $0x30] sm:$0x3f] %vm7220_vm8, %v7218_v51  ;;  %9574 = vmatprep.subr.bf16.mxu1 %v11598_v3 }
 0x706   : > { %7226 = vst.msk [vmem:[#allocation5 + $0x50] sm:$0x3f] %vm7220_vm8, %v7218_v51  ;;  %7225 = vst.msk [vmem:[#allocation5 + $0x40] sm:$0x3f] %vm7220_vm8, %v7219_v7 }
 0x707   : > { %vm16661_vm9 = vmmov %vm16657_vm6 }
 0x708   : > { %9575 = vmatpush3.bf16.msra.mxu1 %v11600_v15  ;;  %vm16662_vm8 = vmmov %vm16657_vm6 }
 0x70b   : > { %v7307_v36 = vld [vmem:[#allocation5 + $0x11] sm:$0xff]  ;;  %v7294_v54 = vld [vmem:[#allocation5 + $0x1] sm:$0xff] }
 0x70c   : > { %v15598_v1 = vld [vmem:[#allocation5 + $0x31] sm:$0xff]  ;;  %v15600_v19 = vld [vmem:[#allocation5 + $0x21] sm:$0xff]  ;;  %v11421_v16 = vpack.i.bf16 %v7307_v36, %v7294_v54 }
 0x70d   : > { %v15602_v43 = vld [vmem:[#allocation5 + $0x41] sm:$0xff]  ;;  %v11411_v37 = vpack.i.bf16 %v15600_v19, %v7307_v36  ;;  %v7310_v27 = vld [vmem:[#allocation5 + $0x12] sm:$0xff]  ;;  %v11431_v34 = vpack.i.bf16 %v15598_v1, %v15600_v19 }
 0x70e   : > { %v11416_v13 = vpack.i.bf16 %v15602_v43, %v15598_v1  ;;  %v15608_v41 = vld [vmem:[#allocation5 + $0x22] sm:$0xff]  ;;  %v7336_v57 = vld [vmem:[#allocation5 + $0x32] sm:$0xff]  ;;  %v11476_v55 = vpack.i.bf16 %v15602_v43, %v15600_v19 }
 0x70f   : > { %11412 = vrot.lane.b32.xlu0 %v11411_v37, %s11688_s25  ;;  %v11426_v45 = vpack.i.bf16 %v15608_v41, %v7310_v27  ;;  %v7337_v44 = vld [vmem:[#allocation5 + $0x42] sm:$0xff]  ;;  %v7313_v2 = vld [vmem:[#allocation5 + $0x13] sm:$0xff]  ;;  %v11451_v53 = vpack.i.bf16 %v7336_v57, %v15608_v41 }
 0x710   : > { %11417 = vrot.lane.b32.xlu1 %v11416_v13, %s11688_s25  ;;  %v11436_v25 = vpack.i.bf16 %v7337_v44, %v7336_v57  ;;  %v7297_v58 = vld [vmem:[#allocation5 + $0x2] sm:$0xff]  ;;  %v7339_v31 = vld [vmem:[#allocation5 + $0x33] sm:$0xff]  ;;  %v11486_v10 = vpack.i.bf16 %v7337_v44, %v15608_v41 }
 0x711   : > { %v7314_v59 = vld [vmem:[#allocation5 + $0x23] sm:$0xff]  ;;  %v11441_v35 = vpack.i.bf16 %v7310_v27, %v7297_v58  ;;  %v7335_v12 = vld [vmem:[#allocation5 + $0x51] sm:$0xff] }
 0x712   : > { %v11446_v21 = vpack.i.bf16 %v7314_v59, %v7313_v2  ;;  %v7340_v52 = vld [vmem:[#allocation5 + $0x43] sm:$0xff]  ;;  %v11466_v6 = vpack.i.bf16 %v7339_v31, %v7314_v59  ;;  %v11471_v33 = vpack.i.bf16 %v7335_v12, %v15598_v1  ;;  %v7338_v56 = vld [vmem:[#allocation5 + $0x52] sm:$0xff] }
 0x713   : > { %11422 = vrot.lane.b32.xlu0 %v11421_v16, %s11688_s25  ;;  %v11456_v17 = vpack.i.bf16 %v7340_v52, %v7339_v31  ;;  %v7300_v4 = vld [vmem:[#allocation5 + $0x3] sm:$0xff]  ;;  %v11481_v61 = vpack.i.bf16 %v7338_v56, %v7336_v57  ;;  %v7341_v39 = vld [vmem:[#allocation5 + $0x53] sm:$0xff]  ;;  %v11496_v46 = vpack.i.bf16 %v7340_v52, %v7314_v59 }
 0x714   : > { %11427 = vrot.lane.b32.xlu1 %v11426_v45, %s11696_s19  ;;  %v11461_v9 = vpack.i.bf16 %v7313_v2, %v7300_v4  ;;  %v11491_v48 = vpack.i.bf16 %v7341_v39, %v7339_v31  ;;  %v15671_v36 = vld [vmem:[#allocation5 + $0x20] sm:$0xff]  ;;  %v7304_v54 = vld [vmem:[#allocation5 + $0x10] sm:$0xff] }
 0x715   : > { %v15673_v43 = vld [vmem:[#allocation5 + $0x40] sm:$0xff] }
 0x716   : > { %v7291_v47 = vld [vmem:[#allocation5] sm:$0xff] }
 0x717   : > { %11432 = vrot.lane.b32.xlu0 %v11431_v34, %s11688_s25  ;;  %v7330_v34 = vld [vmem:[#allocation5 + $0x30] sm:$0xff] }
 0x718   : > { %11437 = vrot.lane.b32.xlu1 %v11436_v25, %s11696_s19 }
 0x71b   : > { %11442 = vrot.lane.b32.xlu0 %v11441_v35, %s11696_s19 }
 0x71c   : > { %11447 = vrot.lane.b32.xlu1 %v11446_v21, %s11700_s30 }
 0x71f   : > { %11452 = vrot.lane.b32.xlu0 %v11451_v53, %s11696_s19 }
 0x720   : > { %11457 = vrot.lane.b32.xlu1 %v11456_v17, %s11700_s30 }
 0x723   : > { %11462 = vrot.lane.b32.xlu0 %v11461_v9, %s11700_s30 }
 0x724   : > { %11467 = vrot.lane.b32.xlu1 %v11466_v6, %s11700_s30 }
 0x727   : > { %11472 = vrot.lane.b32.xlu0 %v11471_v33, %s11688_s25 }
 0x728   : > { %11477 = vrot.lane.b32.xlu1 %v11476_v55, %s11688_s25 }
 0x72b   : > { %11482 = vrot.lane.b32.xlu0 %v11481_v61, %s11696_s19 }
 0x72c   : > { %11487 = vrot.lane.b32.xlu1 %v11486_v10, %s11696_s19 }
 0x72f   : > { %11492 = vrot.lane.b32.xlu0 %v11491_v48, %s11700_s30 }
 0x730   : > { %11497 = vrot.lane.b32.xlu1 %v11496_v46, %s11700_s30 }
 0x781   : > { %v11413_v38 = vpop.permute.xlu0 %11412 }
 0x782   : > { %v11418_v30 = vpop.permute.xlu1 %11417  ;;  %v11415_v14 = vunpack.i.h.bf16 %v11413_v38  ;;  %v11414_v63 = vunpack.i.l.bf16 %v11413_v38 }
 0x783   : > { %v11420_v5 = vunpack.i.h.bf16 %v11418_v30  ;;  %v11419_v37 = vunpack.i.l.bf16 %v11418_v30 }
 0x784   : > { %v7496_v13 = vsel %vm16649_vm4, %v15671_v36, %v11415_v14  ;;  %v7495_v45 = vsel %vm16651_vm2, %v7304_v54, %v11414_v63  ;;  %vm16663_vm4 = vmmov %vm16657_vm6 }
 0x785   : > { %v11423_v51 = vpop.permute.xlu0 %11422  ;;  %v7514_v16 = vsel %vm16650_vm11, %v15673_v43, %v11420_v5  ;;  %v7513_v49 = vsel %vm16654_vm3, %v7330_v34, %v11419_v37  ;;  %vm16664_vm11 = vmmov %vm16663_vm4 }
 0x786   : > { %v11428_v7 = vpop.permute.xlu1 %11427  ;;  %v11424_v27 = vunpack.i.l.bf16 %v11423_v51  ;;  %v11425_v25 = vunpack.i.h.bf16 %v11423_v51  ;;  %vm16667_vm3 = vmmov %vm16651_vm2 }
 0x787   : > { %v11430_v22 = vunpack.i.h.bf16 %v11428_v7  ;;  %v11429_v1 = vunpack.i.l.bf16 %v11428_v7 }
 0x788   : > { %v7486_v35 = vsel %vm16655_vm5, %v7291_v47, %v11424_v27  ;;  %v7487_v9 = vsel %vm16658_vm7, %v7304_v54, %v11425_v25  ;;  %vm16668_vm5 = vmmov %vm16663_vm4 }
 0x789   : > { %v11433_v18 = vpop.permute.xlu0 %11432  ;;  %v7498_v26 = vsel %vm16652_vm14, %v7495_v45, %v11429_v1  ;;  %v7499_v42 = vsel %vm16653_vm15, %v7496_v13, %v11430_v22  ;;  %vm16665_vm14 = vmmov %vm16651_vm2 }
 0x78a   : > { %v11438_v40 = vpop.permute.xlu1 %11437  ;;  %v11435_v58 = vunpack.i.h.bf16 %v11433_v18  ;;  %v11434_v21 = vunpack.i.l.bf16 %v11433_v18  ;;  %vm16666_vm15 = vmmov %vm16651_vm2 }
 0x78b   : > { %v11440_v29 = vunpack.i.h.bf16 %v11438_v40  ;;  %v11439_v60 = vunpack.i.l.bf16 %v11438_v40  ;;  %vm16671_vm7 = vmmov %vm16663_vm4 }
 0x78c   : > { %v7505_v6 = vsel %vm16659_vm13, %v7330_v34, %v11435_v58  ;;  %v7504_v56 = vsel %vm16660_vm10, %v15671_v36, %v11434_v21  ;;  %vm15802_vm13 = vcmp.lt.s32.totalorder %v7088_v0, 3  ;;  %vm16676_vm10 = vmmov %vm16663_vm4 }
 0x78d   : > { %v11443_v19 = vpop.permute.xlu0 %11442  ;;  %v7517_v53 = vsel %vm16656_vm12, %v7514_v16, %v11440_v29  ;;  %v7516_v17 = vsel %vm16657_vm6, %v7513_v49, %v11439_v60  ;;  %vm16669_vm12 = vmmov %vm16663_vm4 }
 0x78e   : > { %v11448_v41 = vpop.permute.xlu1 %11447  ;;  %v11445_v50 = vunpack.i.h.bf16 %v11443_v19  ;;  %v11444_v31 = vunpack.i.l.bf16 %v11443_v19  ;;  %vm16670_vm6 = vmmov %vm16663_vm4 }
 0x78f   : > { %v11450_v57 = vunpack.i.h.bf16 %v11448_v41  ;;  %v11449_v44 = vunpack.i.l.bf16 %v11448_v41 }
 0x790   : > { %v7489_v46 = vsel %vm16661_vm9, %v7486_v35, %v11444_v31  ;;  %v7490_v38 = vsel %vm16662_vm8, %v7487_v9, %v11445_v50  ;;  %v11602_v9 = vld [vmem:[%s16000_s1 + $0x218] sm:$0xff]   ;;  %vm15813_vm9 = vcmp.lt.s32.totalorder %v7090_v23, 3  ;;  %vm16679_vm8 = vmmov %vm16663_vm4 }
 0x791   : > { %v11453_v20 = vpop.permute.xlu0 %11452  ;;  %v7501_v2 = vsel %vm6126_vm1, %v7498_v26, %v11449_v44  ;;  %v7502_v59 = vsel %vm6126_vm1, %v7499_v42, %v11450_v57  ;;  %v7332_v26 = vld [vmem:[#allocation5 + $0x50] sm:$0xff] }
 0x792   : > { %v11458_v24 = vpop.permute.xlu1 %11457  ;;  %v7523_v28 = vpack.c.bf16 %v7502_v59, %v7501_v2  ;;  %v11455_v4 = vunpack.i.h.bf16 %v11453_v20  ;;  %v11454_v15 = vunpack.i.l.bf16 %v11453_v20 }
 0x793   : > { %v11460_v52 = vunpack.i.h.bf16 %v11458_v24  ;;  %v11459_v3 = vunpack.i.l.bf16 %v11458_v24 }
 0x794   : > { %7754 = vmatprep.mubr.bf16.mxu0 %v7523_v28  ;;  %v7507_v7 = vsel %vm16663_vm4, %v7504_v56, %v11454_v15  ;;  %v7508_v18 = vsel %vm16664_vm11, %v7505_v6, %v11455_v4  ;;  %v11601_v15 = vld [vmem:[%s16000_s1 + $0x258] sm:$0xff]   ;;  %v11603_v6 = vld [vmem:[%s16000_s1 + $0x250] sm:$0xff]   ;;  %vm16680_vm11 = vmmov %vm16663_vm4 }
 0x795   : > { %v11463_v12 = vpop.permute.xlu0 %11462  ;;  %v7519_v33 = vsel %vm6126_vm1, %v7516_v17, %v11459_v3  ;;  %v7520_v55 = vsel %vm6126_vm1, %v7517_v53, %v11460_v52  ;;  %9588 = vmatprep.subr.bf16.mxu0 %v11601_v15  ;;  %v11605_v56 = vld [vmem:[%s16000_s1 + $0x210] sm:$0xff]  }
 0x796   : > { %v11468_v61 = vpop.permute.xlu1 %11467  ;;  %v11465_v10 = vunpack.i.h.bf16 %v11463_v12  ;;  %v11464_v39 = vunpack.i.l.bf16 %v11463_v12  ;;  %v7525_v48 = vpack.c.bf16 %v7520_v55, %v7519_v33  ;;  %v11604_v12 = vld [vmem:[%s16000_s1 + $0x2d8] sm:$0xff]   ;;  %v11608_v55 = vld [vmem:[%s16000_s1 + $0x2d0] sm:$0xff]  }
 0x797   : > { %v11470_v30 = vunpack.i.h.bf16 %v11468_v61  ;;  %v11469_v51 = vunpack.i.l.bf16 %v11468_v61  ;;  %v11606_v33 = vld [vmem:[%s16000_s1 + $0x298] sm:$0xff]   ;;  %9610 = vmatprep.subr.bf16.mxu1 %v11604_v12  ;;  %v11607_v61 = vld [vmem:[%s16000_s1 + $0x248] sm:$0xff]  }
 0x798   : > { %v7492_v14 = vsel %vm6126_vm1, %v7489_v46, %v11464_v39  ;;  %v7493_v40 = vsel %vm6126_vm1, %v7490_v38, %v11465_v10  ;;  %7802 = vmatprep.mubr.bf16.mxu1 %v7525_v48  ;;  %v11610_v10 = vld [vmem:[%s16000_s1 + $0x290] sm:$0xff]   ;;  %v11612_v39 = vld [vmem:[%s16000_s1 + $0x2c8] sm:$0xff]   ;;  %v11611_v46 = vld [vmem:[%s16000_s1 + $0x240] sm:$0xff]  }
 0x799   : > { %v7510_v5 = vsel %vm6126_vm1, %v7507_v7, %v11469_v51  ;;  %v7511_v63 = vsel %vm6126_vm1, %v7508_v18, %v11470_v30  ;;  %v7522_v22 = vpack.c.bf16 %v7493_v40, %v7492_v14  ;;  %v11473_v1 = vpop.permute.xlu0 %11472  ;;  %v11609_v48 = vld [vmem:[%s16000_s1 + $0x208] sm:$0xff]   ;;  %v11616_v30 = vld [vmem:[%s16000_s1 + $0x2c0] sm:$0xff]   ;;  %v11615_v7 = vld [vmem:[%s16000_s1 + $0x238] sm:$0xff]  }
 0x79a   : > { %v7524_v19 = vpack.c.bf16 %v7511_v63, %v7510_v5  ;;  %v11478_v37 = vpop.permute.xlu1 %11477  ;;  %v11475_v13 = vunpack.i.h.bf16 %v11473_v1  ;;  %v11474_v54 = vunpack.i.l.bf16 %v11473_v1  ;;  %v11614_v38 = vld [vmem:[%s16000_s1 + $0x288] sm:$0xff]   ;;  %v11613_v51 = vld [vmem:[%s16000_s1 + $0x200] sm:$0xff]   ;;  %v11620_v40 = vld [vmem:[%s16000_s1 + $0x2b8] sm:$0xff]  }
 0x79b   : > { %7755 = vmatmul.mubr.bf16.vlgmr.msra.gmra.mxu0 %v7522_v22  ;;  %v11480_v41 = vunpack.i.h.bf16 %v11478_v37  ;;  %v11479_v16 = vunpack.i.l.bf16 %v11478_v37  ;;  %v11618_v18 = vld [vmem:[%s16000_s1 + $0x280] sm:$0xff]   ;;  %v11617_v22 = vld [vmem:[%s16000_s1 + $0x1f8] sm:$0xff]  }
 0x79c   : > { %7803 = vmatmul.mubr.bf16.vlgmr.msra.gmra.mxu1 %v7524_v19  ;;  %v7515_v60 = vsel %vm16651_vm2, %v7332_v26, %v11475_v13  ;;  %v7497_v47 = vsel %vm16665_vm14, %v7330_v34, %v11474_v54  ;;  %9589 = vmatpush3.bf16.msra.mxu0 %v11602_v9  ;;  %v11619_v19 = vld [vmem:[%s16000_s1 + $0x230] sm:$0xff]   ;;  %v11622_v37 = vld [vmem:[%s16000_s1 + $0x278] sm:$0xff]   ;;  %vm16681_vm2 = vmmov %vm16663_vm4 }
 0x79d   : > { %v11483_v27 = vpop.permute.xlu0 %11482  ;;  %v7506_v58 = vsel %vm16666_vm15, %v15673_v43, %v11480_v41  ;;  %v7488_v20 = vsel %vm16667_vm3, %v15671_v36, %v11479_v16  ;;  %9590 = vmatprep.subr.bf16.mxu0 %v11603_v6  ;;  %9611 = vmatpush3.bf16.msra.mxu1 %v11606_v33  ;;  %v11624_v54 = vld [vmem:[%s16000_s1 + $0x2b0] sm:$0xff]   ;;  %vm16682_vm14 = vmmov %vm16681_vm2 }
 0x79e   : > { %v11488_v45 = vpop.permute.xlu1 %11487  ;;  %v11485_v57 = vunpack.i.h.bf16 %v11483_v27  ;;  %v11484_v44 = vunpack.i.l.bf16 %v11483_v27  ;;  %9612 = vmatprep.subr.bf16.mxu1 %v11608_v55  ;;  %v11621_v16 = vld [vmem:[%s16000_s1 + $0x1f0] sm:$0xff]  }
 0x79f   : > { %v11490_v42 = vunpack.i.h.bf16 %v11488_v45  ;;  %v11489_v29 = vunpack.i.l.bf16 %v11488_v45  ;;  %v11626_v26 = vld [vmem:[%s16000_s1 + $0x270] sm:$0xff]  }
 0x7a0   : > { %v7500_v35 = vsel %vm16668_vm5, %v7497_v47, %v11484_v44  ;;  %v7518_v21 = vsel %vm16669_vm12, %v7515_v60, %v11485_v57  ;;  %9591 = vmatpush3.bf16.msra.mxu0 %v11605_v56  ;;  %v11623_v44 = vld [vmem:[%s16000_s1 + $0x228] sm:$0xff]   ;;  %vm7918_vm12 = vcmask 1043456  }
 0x7a1   : > { %v11493_v25 = vpop.permute.xlu0 %11492  ;;  %v7491_v50 = vsel %vm16670_vm6, %v7488_v20, %v11489_v29  ;;  %v7509_v34 = vsel %vm16671_vm7, %v7506_v58, %v11490_v42  ;;  %9592 = vmatprep.subr.bf16.mxu0 %v11607_v61  ;;  %9613 = vmatpush3.bf16.msra.mxu1 %v11610_v10  ;;  %vm7922_vm6 = vcmask 520192  }
 0x7a2   : > { %v11498_v2 = vpop.permute.xlu1 %11497  ;;  %v11495_v59 = vunpack.i.h.bf16 %v11493_v25  ;;  %v11494_v49 = vunpack.i.l.bf16 %v11493_v25  ;;  %9614 = vmatprep.subr.bf16.mxu1 %v11612_v39  ;;  %v11625_v25 = vld [vmem:[%s16000_s1 + $0x1e8] sm:$0xff]  }
 0x7a3   : > { %v11500_v24 = vunpack.i.h.bf16 %v11498_v2  ;;  %v11499_v28 = vunpack.i.l.bf16 %v11498_v2 }
 0x7a4   : > { %v7503_v31 = vsel %vm6126_vm1, %v7500_v35, %v11494_v49  ;;  %v7521_v43 = vsel %vm6126_vm1, %v7518_v21, %v11495_v59  ;;  %9593 = vmatpush3.bf16.msra.mxu0 %v11609_v48 }
 0x7a5   : > { %v7527_v52 = vpack.c.bf16 %v7503_v31, %v7503_v31  ;;  %v7529_v3 = vpack.c.bf16 %v7521_v43, %v7521_v43  ;;  %v7494_v36 = vsel %vm6126_vm1, %v7491_v50, %v11499_v28  ;;  %v7512_v53 = vsel %vm6126_vm1, %v7509_v34, %v11500_v24  ;;  %9594 = vmatprep.subr.bf16.mxu0 %v11611_v46 }
 0x7a6   : > { %v7526_v17 = vpack.c.bf16 %v7494_v36, %v7494_v36  ;;  %v7528_v4 = vpack.c.bf16 %v7512_v53, %v7512_v53  ;;  %9615 = vmatpush3.bf16.msra.mxu1 %v11614_v38  ;;  %vm15796_vm1 = vcmp.lt.s32.totalorder %v7089_v32, 3 }
 0x7a7   : > { %7762 = vmatprep.mubr.bf16.mxu0 %v7527_v52  ;;  %7810 = vmatprep.mubr.bf16.mxu1 %v7529_v3 }
 0x7a8   : > { %7763 = vmatmul.mubr.bf16.gmra.mxu0 %v7526_v17  ;;  %7811 = vmatmul.mubr.bf16.gmra.mxu1 %v7528_v4 }
 0x7a9   : > { %9616 = vmatprep.subr.bf16.mxu1 %v11616_v30  ;;  %9595 = vmatpush3.bf16.msra.mxu0 %v11613_v51 }
 0x7aa   : > { %9596 = vmatprep.subr.bf16.mxu0 %v11615_v7  ;;  %9617 = vmatpush3.bf16.msra.mxu1 %v11618_v18 }
 0x7ab   : > { %9618 = vmatprep.subr.bf16.mxu1 %v11620_v40 }
 0x7ad   : > { %9597 = vmatpush3.bf16.msra.mxu0 %v11617_v22 }
 0x7ae   : > { %9598 = vmatprep.subr.bf16.mxu0 %v11619_v19  ;;  %9619 = vmatpush3.bf16.msra.mxu1 %v11622_v37 }
 0x7af   : > { %9620 = vmatprep.subr.bf16.mxu1 %v11624_v54 }
 0x7b1   : > { %9599 = vmatpush3.bf16.msra.mxu0 %v11621_v16 }
 0x7b2   : > { %9600 = vmatprep.subr.bf16.mxu0 %v11623_v44  ;;  %9621 = vmatpush3.bf16.msra.mxu1 %v11626_v26  ;;  %v9402_v44 = vld [vmem:[%s16001_s2 + $0x6] ss:$0 sm:$0xff] }
 0x7b5   : > { %9601 = vmatpush3.bf16.msra.mxu0 %v11625_v25 }
 0x85b   : > { %v9548_v14 = vpop.f32.mrf.mxu0 }
 0x85c   : > { %v9576_v5 = vpop.f32.mrf.mxu1 }
 0x85d   : > { %v9549_v63 = vpop.f32.mrf.mxu0 }
 0x85e   : > { %v9577_v1 = vpop.f32.mrf.mxu1  ;;  %v9550_v42 = vadd.f32 %v9549_v63, %v9548_v14 }
 0x85f   : > { %v9551_v13 = vpop.f32.mrf.mxu0  ;;  %v9578_v29 = vadd.f32 %v9577_v1, %v9576_v5 }
 0x860   : > { %v9579_v27 = vpop.f32.mrf.mxu1 }
 0x861   : > { %v9552_v41 = vpop.f32.mrf.mxu0  ;;  %v7805_v20 = vadd.f32 %v9578_v29, %v9550_v42 }
 0x862   : > { %v9553_v45 = vadd.f32 %v9552_v41, %v9551_v13  ;;  %v9580_v57 = vpop.f32.mrf.mxu1  ;;  %v9401_v41 = vld [vmem:[%s16001_s2 + $0x5] ss:$0 sm:$0xff] }
 0x863   : > { %v9581_v60 = vadd.f32 %v9580_v57, %v9579_v27  ;;  %v7829_v21 = vsel %vm15802_vm13, %v7805_v20, 0.0 }
 0x864   : > { %v7832_v43 = vsel %vm16679_vm8, %v7829_v21, 0.0 }
 0x865   : > { %v7808_v47 = vadd.f32 %v9581_v60, %v9553_v45 }
 0x867   : > { %v7830_v35 = vsel %vm15796_vm1, %v7808_v47, 0.0 }
 0x868   : > { %v9554_v59 = vpop.f32.mrf.mxu0  ;;  %v9582_v49 = vpop.f32.mrf.mxu1  ;;  %v7833_v50 = vsel %vm16676_vm10, %v7830_v35, 0.0 }
 0x869   : > { %v7834_v36 = vadd.f32 %v7833_v50, %v7832_v43 }
 0x86a   : > { %v9555_v62 = vpop.f32.mrf.mxu0  ;;  %v9583_v32 = vpop.f32.mrf.mxu1 }
 0x86b   : > { %v9556_v24 = vadd.f32 %v9555_v62, %v9554_v59  ;;  %v9584_v28 = vadd.f32 %v9583_v32, %v9582_v49 }
 0x86c   : > { %v9557_v0 = vpop.f32.mrf.mxu0  ;;  %v9585_v34 = vpop.f32.mrf.mxu1 }
 0x86d   : > { %v7813_v31 = vadd.f32 %v9584_v28, %v9556_v24 }
 0x86e   : > { %v9558_v52 = vpop.f32.mrf.mxu0  ;;  %v9586_v3 = vpop.f32.mrf.mxu1 }
 0x86f   : > { %v7831_v53 = vsel %vm15813_vm9, %v7813_v31, 0.0 }
 0x870   : > { %v7835_v17 = vsel %vm16663_vm4, %v7831_v53, 0.0 }
 0x871   : > { %v7836_v4 = vadd.f32 %v7835_v17, %v7834_v36  ;;  %v11627_v17 = vld [vmem:[%s16000_s1 + $0x220] sm:$0xff]  }
 0x872   : > { %9602 = vmatprep.subr.bf16.mxu0 %v11627_v17  ;;  %v11640_v17 = vld [vmem:[%s16000_s1 + $0x3d0] sm:$0xff]  }
 0x873   : > { %v7837_v15 = vrot.slane %v7836_v4, 4 }
 0x875   : > { %v7838_v8 = vadd.f32 %v7837_v15, %v7836_v4  ;;  %v11628_v4 = vld [vmem:[%s16000_s1 + $0x2a8] sm:$0xff]   ;;  %v11629_v15 = vld [vmem:[%s16000_s1 + $0x1e0] sm:$0xff]  }
 0x876   : > { %9622 = vmatprep.subr.bf16.mxu1 %v11628_v4  ;;  %9603 = vmatpush3.bf16.msra.mxu0 %v11629_v15 }
 0x877   : > { %v7839_v23 = vrot.slane %v7838_v8, 2 }
 0x879   : > { %v7840_v9 = vadd.f32 %v7839_v23, %v7838_v8  ;;  %v11630_v8 = vld [vmem:[%s16000_s1 + $0x268] sm:$0xff]   ;;  %v11631_v23 = vld [vmem:[%s16000_s1 + $0x2a0] sm:$0xff]  }
 0x87a   : > { %9623 = vmatpush3.bf16.msra.mxu1 %v11630_v8 }
 0x87b   : > { %v7841_v6 = vrot.slane %v7840_v9, 1  ;;  %9624 = vmatprep.subr.bf16.mxu1 %v11631_v23 }
 0x87d   : > { %v7842_v12 = vadd.f32 %v7841_v6, %v7840_v9  ;;  %v11632_v9 = vld [vmem:[%s16000_s1 + $0x358] sm:$0xff]   ;;  %v11633_v6 = vld [vmem:[%s16000_s1 + $0x260] sm:$0xff]  }
 0x87e   : > { %9632 = vmatprep.subr.bf16.mxu0 %v11632_v9  ;;  %9625 = vmatpush3.bf16.msra.mxu1 %v11633_v6  ;;  %v11641_v6 = vld [vmem:[%s16000_s1 + $0x308] sm:$0xff]  }
 0x87f   : > { %v7844_v33 = vmul.f32 0.11111111, %v7842_v12 }
 0x881   : > { %v7845_v55 = vsub.f32 %v7805_v20, %v7844_v33  ;;  %v7846_v56 = vsub.f32 %v7808_v47, %v7844_v33  ;;  %v7847_v61 = vsub.f32 %v7813_v31, %v7844_v33 }
 0x883   : > { %v7848_v10 = vsel %vm15802_vm13, %v7845_v55, 0.0  ;;  %v7849_v39 = vsel %vm15796_vm1, %v7846_v56, 0.0  ;;  %v7850_v48 = vsel %vm15813_vm9, %v7847_v61, 0.0 }
 0x884   : > { %v7851_v46 = vmul.f32 %v7848_v10, %v7848_v10  ;;  %v7852_v38 = vmul.f32 %v7849_v39, %v7849_v39  ;;  %v7853_v30 = vmul.f32 %v7850_v48, %v7850_v48 }
 0x886   : > { %v7854_v51 = vsel %vm16680_vm11, %v7851_v46, 0.0  ;;  %v7855_v7 = vsel %vm16681_vm2, %v7852_v38, 0.0  ;;  %v7857_v14 = vsel %vm16682_vm14, %v7853_v30, 0.0 }
 0x887   : > { %v7856_v18 = vadd.f32 %v7855_v7, %v7854_v51  ;;  %v11636_v51 = vld [vmem:[%s16000_s1 + $0x3d8] sm:$0xff]  }
 0x888   : > { %9654 = vmatprep.subr.bf16.mxu1 %v11636_v51  ;;  %v11647_v51 = vld [vmem:[%s16000_s1 + $0x338] sm:$0xff]  }
 0x889   : > { %v7858_v40 = vadd.f32 %v7857_v14, %v7856_v18 }
 0x88b   : > { %v7859_v5 = vrot.slane %v7858_v40, 4 }
 0x88d   : > { %v7860_v63 = vadd.f32 %v7859_v5, %v7858_v40 }
 0x88f   : > { %v7861_v22 = vrot.slane %v7860_v63, 2 }
 0x891   : > { %v7862_v1 = vadd.f32 %v7861_v22, %v7860_v63 }
 0x893   : > { %v7863_v19 = vrot.slane %v7862_v1, 1 }
 0x895   : > { %v7864_v37 = vadd.f32 %v7863_v19, %v7862_v1 }
 0x897   : > { %v7865_v13 = vmul.f32 0.11111111, %v7864_v37 }
 0x899   : > { %v7866_v54 = vadd.f32 1e-05, %v7865_v13 }
 0x89b   : > { %11669 = vrsqrt.f32 %v7866_v54 }
 0x8a8   : > { %v11670_v27 = vpop.eup %11669 }
 0x8a9   : > { %v7868_v16 = vmul.f32 %v11670_v27, %v7845_v55  ;;  %v7869_v45 = vmul.f32 %v11670_v27, %v7846_v56  ;;  %v7870_v57 = vmul.f32 %v11670_v27, %v7847_v61 }
 0x8ab   : > { %v7875_v26 = vmul.f32 %v9401_v41, %v7868_v16  ;;  %v7876_v42 = vmul.f32 %v9401_v41, %v7869_v45  ;;  %v7877_v29 = vmul.f32 %v9401_v41, %v7870_v57 }
 0x8ad   : > { %v7882_v60 = vadd.f32 %v9402_v44, %v7875_v26  ;;  %v7883_v47 = vadd.f32 %v9402_v44, %v7876_v42  ;;  %v7884_v25 = vadd.f32 %v9402_v44, %v7877_v29 }
 0x8af   : > { %vm7885_vm15 = vcmp.gt.f32.partialorder %v7882_v60, 0.0  ;;  %vm7886_vm3 = vcmp.gt.f32.partialorder %v7883_v47, 0.0  ;;  %vm7887_vm5 = vcmp.gt.f32.partialorder %v7884_v25, 0.0  ;;  %v7888_v58 = vmul.f32 0.2, %v7882_v60 }
 0x8b0   : > { %v7889_v20 = vmul.f32 0.2, %v7883_v47  ;;  %v7890_v2 = vmul.f32 0.2, %v7884_v25 }
 0x8b1   : > { %v7891_v59 = vsel %vm7885_vm15, %v7882_v60, %v7888_v58 }
 0x8b2   : > { %v7892_v49 = vsel %vm7886_vm3, %v7883_v47, %v7889_v20  ;;  %v7893_v35 = vsel %vm7887_vm5, %v7884_v25, %v7890_v2  ;;  %v7898_v62 = vrot.slane %v7891_v59, 1  ;;  %v7904_v32 = vrot.slane %v7891_v59, 7  ;;  %v11634_v25 = vld [vmem:[%s16000_s1 + $0x318] sm:$0xff]  }
 0x8b3   : > { %v7897_v21 = vrot.slane %v7892_v49, 1  ;;  %v7899_v24 = vrot.slane %v7893_v35, 1  ;;  %v7903_v28 = vrot.slane %v7892_v49, 7  ;;  %v7905_v50 = vrot.slane %v7893_v35, 7 }
 0x8b4   : > { %v7909_v11 = vrot.slane %v7892_v49, 5  ;;  %v7910_v0 = vrot.slane %v7891_v59, 5  ;;  %v7911_v34 = vrot.slane %v7893_v35, 5  ;;  %v7916_v31 = vsel %vm492_vm0, %v7898_v62, %v7904_v32  ;;  %v11635_v49 = vld [vmem:[%s16000_s1 + $0x350] sm:$0xff]  }
 0x8b5   : > { %v7915_v43 = vsel %vm492_vm0, %v7897_v21, %v7903_v28  ;;  %v7917_v52 = vsel %vm492_vm0, %v7899_v24, %v7905_v50  ;;  %vm16683_vm0 = vmmov %vm16681_vm2 }
 0x8b6   : > { %v7919_v3 = vsel %vm7918_vm12, %v7915_v43, %v7909_v11  ;;  %v7920_v36 = vsel %vm7918_vm12, %v7916_v31, %v7910_v0  ;;  %v7921_v53 = vsel %vm7918_vm12, %v7917_v52, %v7911_v34  ;;  %vm16684_vm7 = vmmov %vm16683_vm0  ;;  %v11637_v31 = vld [vmem:[%s16000_s1 + $0x310] sm:$0xff]   ;;  %v11638_v43 = vld [vmem:[%s16000_s1 + $0x398] sm:$0xff]  }
 0x8b7   : > { %7923 = vst.msk [vmem:[#allocation6] sm:$0x1f] %vm7922_vm6, %v7919_v3  ;;  %7924 = vst.msk [vmem:[#allocation6 + $0x10] sm:$0x1f] %vm7922_vm6, %v7920_v36 }
 0x8b8   : > { %7925 = vst.msk [vmem:[#allocation6 + $0x20] sm:$0x1f] %vm7922_vm6, %v7919_v3  ;;  %7926 = vst.msk [vmem:[#allocation6 + $0x30] sm:$0x1f] %vm7922_vm6, %v7921_v53  ;;  %v11639_v53 = vld [vmem:[%s16000_s1 + $0x348] sm:$0xff]  }
 0x8b9   : > { %7927 = vst.msk [vmem:[#allocation6 + $0x40] sm:$0x1f] %vm7922_vm6, %v7919_v3  ;;  %vm16685_vm1 = vmmov %vm16683_vm0 }
 0x8ba   : > { %vm16686_vm13 = vmmov %vm16683_vm0 }
 0x8bb   : > { %vm16687_vm10 = vmmov %vm16683_vm0 }
 0x8bc   : > { %vm16688_vm9 = vmmov %vm16683_vm0 }
 0x8bd   : > { %vm16689_vm8 = vmmov %vm16683_vm0 }
 0x8be   : > { %v8062_v12 = vld [vmem:[#allocation6 + $0x3] sm:$0xff]  ;;  %v8063_v33 = vld [vmem:[#allocation6 + $0x13] sm:$0xff]  ;;  %vm16690_vm4 = vmmov %vm16683_vm0 }
 0x8bf   : > { %v8058_v55 = vld [vmem:[#allocation6 + $0x1] sm:$0xff]  ;;  %v11501_v56 = vpack.i.bf16 %v8063_v33, %v8062_v12  ;;  %v8059_v61 = vld [vmem:[#allocation6 + $0x11] sm:$0xff]  ;;  %vm16691_vm11 = vmmov %vm16683_vm0 }
 0x8c0   : > { %v11506_v10 = vpack.i.bf16 %v8059_v61, %v8058_v55  ;;  %v8072_v39 = vld [vmem:[#allocation6 + $0x23] sm:$0xff]  ;;  %v8081_v30 = vld [vmem:[#allocation6 + $0x33] sm:$0xff]  ;;  %vm16692_vm2 = vmmov %vm16683_vm0 }
 0x8c1   : > { %11502 = vrot.lane.b32.xlu0 %v11501_v56, %s11696_s19  ;;  %v8068_v48 = vld [vmem:[#allocation6 + $0x21] sm:$0xff]  ;;  %v11511_v46 = vpack.i.bf16 %v8072_v39, %v8063_v33  ;;  %v8077_v7 = vld [vmem:[#allocation6 + $0x31] sm:$0xff]  ;;  %v11521_v18 = vpack.i.bf16 %v8081_v30, %v8072_v39  ;;  %vm16693_vm14 = vmmov %vm16683_vm0 }
 0x8c2   : > { %11507 = vrot.lane.b32.xlu1 %v11506_v10, %s11696_s19  ;;  %v11516_v38 = vpack.i.bf16 %v8068_v48, %v8059_v61  ;;  %v11526_v14 = vpack.i.bf16 %v8077_v7, %v8068_v48  ;;  %v8090_v40 = vld [vmem:[#allocation6 + $0x43] sm:$0xff]  ;;  %v8061_v16 = vld [vmem:[#allocation6 + $0x12] sm:$0xff]  ;;  %vm16694_vm15 = vmmov %vm16683_vm0 }
 0x8c3   : > { %v8086_v5 = vld [vmem:[#allocation6 + $0x41] sm:$0xff]  ;;  %v11531_v63 = vpack.i.bf16 %v8090_v40, %v8081_v30  ;;  %v8057_v57 = vld [vmem:[#allocation6 + $0x10] sm:$0xff]  ;;  %v11644_v61 = vld [vmem:[%s16000_s1 + $0x3c8] sm:$0xff]  }
 0x8c4   : > { %v11536_v22 = vpack.i.bf16 %v8086_v5, %v8077_v7  ;;  %v8060_v41 = vld [vmem:[#allocation6 + $0x2] sm:$0xff]  ;;  %v8079_v4 = vld [vmem:[#allocation6 + $0x32] sm:$0xff]  ;;  %vm16695_vm3 = vmmov %vm16683_vm0 }
 0x8c5   : > { %11512 = vrot.lane.b32.xlu0 %v11511_v46, %s11696_s19  ;;  %v8056_v45 = vld [vmem:[#allocation6] sm:$0xff]  ;;  %v11643_v56 = vld [vmem:[%s16000_s1 + $0x340] sm:$0xff]   ;;  %v11646_v30 = vld [vmem:[%s16000_s1 + $0x388] sm:$0xff]  }
 0x8c6   : > { %11517 = vrot.lane.b32.xlu1 %v11516_v38, %s11696_s19  ;;  %v8070_v32 = vld [vmem:[#allocation6 + $0x22] sm:$0xff]  ;;  %v11645_v38 = vld [vmem:[%s16000_s1 + $0x300] sm:$0xff]   ;;  %vm16696_vm5 = vmmov %vm16683_vm0 }
 0x8c7   : > { %v15889_v21 = vld [vmem:[#allocation6 + $0x20] sm:$0xff]  ;;  %v11648_v7 = vld [vmem:[%s16000_s1 + $0x3c0] sm:$0xff]   ;;  %v11652_v5 = vld [vmem:[%s16000_s1 + $0x3b8] sm:$0xff]  }
 0x8c8   : > { %v11642_v12 = vld [vmem:[%s16000_s1 + $0x390] sm:$0xff]   ;;  %vm16697_vm12 = vmmov %vm16683_vm0 }
 0x8c9   : > { %11522 = vrot.lane.b32.xlu0 %v11521_v18, %s11696_s19  ;;  %v8088_v10 = vld [vmem:[#allocation6 + $0x42] sm:$0xff]  ;;  %vm16698_vm6 = vmmov %vm16683_vm0 }
 0x8ca   : > { %11527 = vrot.lane.b32.xlu1 %v11526_v14, %s11696_s19  ;;  %v11649_v18 = vld [vmem:[%s16000_s1 + $0x2f8] sm:$0xff]   ;;  %v11650_v14 = vld [vmem:[%s16000_s1 + $0x380] sm:$0xff]   ;;  %v11651_v40 = vld [vmem:[%s16000_s1 + $0x330] sm:$0xff]  }
 0x8cd   : > { %11532 = vrot.lane.b32.xlu0 %v11531_v63, %s11696_s19  ;;  %v11653_v63 = vld [vmem:[%s16000_s1 + $0x2f0] sm:$0xff]  }
 0x8ce   : > { %11537 = vrot.lane.b32.xlu1 %v11536_v22, %s11696_s19  ;;  %v11654_v22 = vld [vmem:[%s16000_s1 + $0x378] sm:$0xff]  }
 0x933   : > { %v11503_v1 = vpop.permute.xlu0 %11502 }
 0x934   : > { %v11505_v19 = vunpack.i.h.bf16 %v11503_v1  ;;  %v11504_v37 = vunpack.i.l.bf16 %v11503_v1  ;;  %v11508_v13 = vpop.permute.xlu1 %11507 }
 0x935   : > { %v11510_v54 = vunpack.i.h.bf16 %v11508_v13  ;;  %v11509_v27 = vunpack.i.l.bf16 %v11508_v13  ;;  %v11657_v13 = vld [vmem:[%s16000_s1 + $0x2e8] sm:$0xff]  }
 0x936   : > { %v8157_v44 = vsel %vm16683_vm0, %v8060_v41, %v11504_v37  ;;  %v8158_v26 = vsel %vm16684_vm7, %v8061_v16, %v11505_v19  ;;  %v11655_v19 = vld [vmem:[%s16000_s1 + $0x328] sm:$0xff]   ;;  %v11656_v37 = vld [vmem:[%s16000_s1 + $0x3b0] sm:$0xff]   ;;  %vm8734_vm0 = vcmask 1024  }
 0x937   : > { %v8155_v42 = vsel %vm16685_vm1, %v8056_v45, %v11509_v27  ;;  %v8156_v29 = vsel %vm16686_vm13, %v8057_v57, %v11510_v54  ;;  %v11513_v60 = vpop.permute.xlu0 %11512  ;;  %v8172_v47 = vpack.c.bf16 %v8158_v26, %v8157_v44  ;;  %v11658_v54 = vld [vmem:[%s16000_s1 + $0x370] sm:$0xff]   ;;  %v11659_v27 = vld [vmem:[%s16000_s1 + $0x320] sm:$0xff]   ;;  %v11660_v41 = vld [vmem:[%s16000_s1 + $0x3a8] sm:$0xff]  }
 0x938   : > { %v8171_v58 = vpack.c.bf16 %v8156_v29, %v8155_v42  ;;  %v11515_v20 = vunpack.i.h.bf16 %v11513_v60  ;;  %v11514_v2 = vunpack.i.l.bf16 %v11513_v60  ;;  %v11518_v59 = vpop.permute.xlu1 %11517  ;;  %v11661_v44 = vld [vmem:[%s16000_s1 + $0x2e0] sm:$0xff]   ;;  %v11662_v26 = vld [vmem:[%s16000_s1 + $0x368] sm:$0xff]  }
 0x939   : > { %v11520_v35 = vunpack.i.h.bf16 %v11518_v59  ;;  %v11519_v62 = vunpack.i.l.bf16 %v11518_v59  ;;  %8595 = vmatprep.mubr.bf16.mxu0 %v8172_v47  ;;  %v8075_v42 = vld [vmem:[#allocation6 + $0x30] sm:$0xff]  ;;  %v8084_v59 = vld [vmem:[#allocation6 + $0x40] sm:$0xff] }
 0x93a   : > { %8596 = vmatmul.mubr.bf16.vlgmr.msra.gmra.mxu0 %v8171_v58  ;;  %v8161_v24 = vsel %vm16687_vm10, %v8061_v16, %v11514_v2  ;;  %v8162_v28 = vsel %vm16688_vm9, %v8070_v32, %v11515_v20  ;;  %v11663_v29 = vld [vmem:[%s16000_s1 + $0x3a0] sm:$0xff]  }
 0x93b   : > { %v8160_v50 = vsel %vm16689_vm8, %v15889_v21, %v11520_v35  ;;  %v8159_v11 = vsel %vm16690_vm4, %v8057_v57, %v11519_v62  ;;  %9633 = vmatpush3.bf16.msra.mxu0 %v11634_v25  ;;  %v11523_v0 = vpop.permute.xlu0 %11522  ;;  %v8174_v34 = vpack.c.bf16 %v8162_v28, %v8161_v24  ;;  %v11664_v20 = vld [vmem:[%s16000_s1 + $0x360] sm:$0xff]  }
 0x93c   : > { %v8173_v52 = vpack.c.bf16 %v8160_v50, %v8159_v11  ;;  %v11525_v3 = vunpack.i.h.bf16 %v11523_v0  ;;  %v11524_v36 = vunpack.i.l.bf16 %v11523_v0  ;;  %9634 = vmatprep.subr.bf16.mxu0 %v11635_v49  ;;  %v11528_v1 = vpop.permute.xlu1 %11527 }
 0x93d   : > { %8636 = vmatprep.mubr.bf16.mxu1 %v8174_v34  ;;  %v11530_v16 = vunpack.i.h.bf16 %v11528_v1  ;;  %v11529_v45 = vunpack.i.l.bf16 %v11528_v1 }
 0x93e   : > { %8637 = vmatmul.mubr.bf16.vlgmr.msra.gmra.mxu1 %v8173_v52  ;;  %v8165_v15 = vsel %vm16691_vm11, %v8070_v32, %v11524_v36  ;;  %v8166_v8 = vsel %vm16692_vm2, %v8079_v4, %v11525_v3 }
 0x93f   : > { %9635 = vmatpush3.bf16.msra.mxu0 %v11637_v31  ;;  %9655 = vmatpush3.bf16.msra.mxu1 %v11638_v43  ;;  %v11533_v23 = vpop.permute.xlu0 %11532  ;;  %v8176_v9 = vpack.c.bf16 %v8166_v8, %v8165_v15  ;;  %v8164_v60 = vsel %vm16695_vm3, %v8075_v42, %v11530_v16  ;;  %v8163_v47 = vsel %vm16696_vm5, %v15889_v21, %v11529_v45 }
 0x940   : > { %v11535_v33 = vunpack.i.h.bf16 %v11533_v23  ;;  %v11534_v55 = vunpack.i.l.bf16 %v11533_v23  ;;  %9636 = vmatprep.subr.bf16.mxu0 %v11639_v53  ;;  %9656 = vmatprep.subr.bf16.mxu1 %v11640_v17  ;;  %v11538_v57 = vpop.permute.xlu1 %11537  ;;  %v8175_v2 = vpack.c.bf16 %v8164_v60, %v8163_v47 }
 0x941   : > { %8677 = vmatprep.mubr.bf16.mxu0 %v8176_v9  ;;  %v11540_v25 = vunpack.i.h.bf16 %v11538_v57  ;;  %v11539_v58 = vunpack.i.l.bf16 %v11538_v57 }
 0x942   : > { %v8169_v39 = vsel %vm16693_vm14, %v8079_v4, %v11534_v55  ;;  %v8170_v48 = vsel %vm16694_vm15, %v8088_v10, %v11535_v33  ;;  %v9467_v55 = vld [vmem:[%s16001_s2 + $0x7] ss:$0 sm:$0xff] }
 0x943   : > { %9637 = vmatpush3.bf16.msra.mxu0 %v11641_v6  ;;  %9657 = vmatpush3.bf16.msra.mxu1 %v11642_v12  ;;  %v8178_v46 = vpack.c.bf16 %v8170_v48, %v8169_v39  ;;  %v8168_v49 = vsel %vm16697_vm12, %v8084_v59, %v11540_v25  ;;  %v8167_v35 = vsel %vm16698_vm6, %v8075_v42, %v11539_v58 }
 0x944   : > { %9638 = vmatprep.subr.bf16.mxu0 %v11643_v56  ;;  %9658 = vmatprep.subr.bf16.mxu1 %v11644_v61  ;;  %v8177_v62 = vpack.c.bf16 %v8168_v49, %v8167_v35 }
 0x945   : > { %8718 = vmatprep.mubr.bf16.mxu1 %v8178_v46 }
 0x947   : > { %9639 = vmatpush3.bf16.msra.mxu0 %v11645_v38  ;;  %9659 = vmatpush3.bf16.msra.mxu1 %v11646_v30 }
 0x948   : > { %9640 = vmatprep.subr.bf16.mxu0 %v11647_v51  ;;  %9660 = vmatprep.subr.bf16.mxu1 %v11648_v7 }
 0x94b   : > { %9641 = vmatpush3.bf16.msra.mxu0 %v11649_v18  ;;  %9661 = vmatpush3.bf16.msra.mxu1 %v11650_v14 }
 0x94c   : > { %9642 = vmatprep.subr.bf16.mxu0 %v11651_v40  ;;  %9662 = vmatprep.subr.bf16.mxu1 %v11652_v5 }
 0x94f   : > { %9643 = vmatpush3.bf16.msra.mxu0 %v11653_v63  ;;  %9663 = vmatpush3.bf16.msra.mxu1 %v11654_v22 }
 0x950   : > { %9644 = vmatprep.subr.bf16.mxu0 %v11655_v19  ;;  %9664 = vmatprep.subr.bf16.mxu1 %v11656_v37 }
 0x953   : > { %9645 = vmatpush3.bf16.msra.mxu0 %v11657_v13  ;;  %9665 = vmatpush3.bf16.msra.mxu1 %v11658_v54 }
 0x954   : > { %9646 = vmatprep.subr.bf16.mxu0 %v11659_v27  ;;  %9666 = vmatprep.subr.bf16.mxu1 %v11660_v41 }
 0x957   : > { %9647 = vmatpush3.bf16.msra.mxu0 %v11661_v44  ;;  %9667 = vmatpush3.bf16.msra.mxu1 %v11662_v26 }
 0x958   : > { %9668 = vmatprep.subr.bf16.mxu1 %v11663_v29 }
 0x95a   : > { %8678 = vmatmul.mubr.bf16.vlgmr.msra.gmra.mxu0 %v8175_v2 }
 0x95b   : > { %9669 = vmatpush3.bf16.msra.mxu1 %v11664_v20 }
 0x95e   : > { %8719 = vmatmul.mubr.bf16.vlgmr.msra.gmra.mxu1 %v8177_v62 }
 0x9fa   : > { %v9604_v32 = vpop.f32.mrf.mxu0 }
 0x9fc   : > { %v9605_v21 = vpop.f32.mrf.mxu0 }
 0x9fd   : > { %v9606_v3 = vadd.f32 %v9605_v21, %v9604_v32 }
 0x9fe   : > { %v9626_v24 = vpop.f32.mrf.mxu1  ;;  %v9607_v28 = vpop.f32.mrf.mxu0 }
 0xa00   : > { %v9627_v50 = vpop.f32.mrf.mxu1  ;;  %v9608_v11 = vpop.f32.mrf.mxu0 }
 0xa01   : > { %v9628_v31 = vadd.f32 %v9627_v50, %v9626_v24  ;;  %v9609_v9 = vadd.f32 %v9608_v11, %v9607_v28 }
 0xa02   : > { %v9629_v0 = vpop.f32.mrf.mxu1 }
 0xa03   : > { %v8639_v4 = vadd.f32 %v9628_v31, %v9606_v3 }
 0xa04   : > { %v9630_v43 = vpop.f32.mrf.mxu1 }
 0xa05   : > { %v9631_v15 = vadd.f32 %v9630_v43, %v9629_v0 }
 0xa07   : > { %v8642_v61 = vadd.f32 %v9631_v15, %v9609_v9 }
 0xa1a   : > { %v9648_v34 = vpop.f32.mrf.mxu0 }
 0xa1c   : > { %v9649_v52 = vpop.f32.mrf.mxu0 }
 0xa1d   : > { %v9650_v36 = vadd.f32 %v9649_v52, %v9648_v34 }
 0xa1e   : > { %v9651_v53 = vpop.f32.mrf.mxu0  ;;  %v9670_v17 = vpop.f32.mrf.mxu1 }
 0xa1f   : > { %v8680_v6 = vadd.f32 %v9650_v36, %v8639_v4 }
 0xa20   : > { %v9652_v8 = vpop.f32.mrf.mxu0  ;;  %v9671_v23 = vpop.f32.mrf.mxu1 }
 0xa21   : > { %v9653_v12 = vadd.f32 %v9652_v8, %v9651_v53  ;;  %v9672_v33 = vadd.f32 %v9671_v23, %v9670_v17 }
 0xa22   : > { %v9673_v56 = vpop.f32.mrf.mxu1 }
 0xa23   : > { %v8721_v10 = vadd.f32 %v9672_v33, %v8680_v6  ;;  %v8683_v48 = vadd.f32 %v9653_v12, %v8642_v61 }
 0xa24   : > { %v9674_v39 = vpop.f32.mrf.mxu1 }
 0xa25   : > { %v8732_v46 = vadd.f32 %v9467_v55, %v8721_v10  ;;  %v9675_v38 = vadd.f32 %v9674_v39, %v9673_v56 }
 0xa27   : > { %8735 = vst.msk [vmem:[%s170_s20] sm:$0x3] %vm8734_vm0, %v8732_v46  ;;  %v8724_v30 = vadd.f32 %v9675_v38, %v8683_v48 }
 0xa29   : > { %v8733_v51 = vadd.f32 %v9467_v55, %v8724_v30 }
 0xa2b   : > { %8736 = vst.msk [vmem:[%s170_s20 + $0x2] sm:$0x3] %vm8734_vm0, %v8733_v51 }
 0xa2c PF: > { %s13_s12 = sadd.s32 1, %s11679_s12  }
 0xa2d   : > { %p10_p4 = scmp.ge.s32.totalorder %s13_s12, 4  }
 0xa2f   :  { %12 = sbr.rel (!%p10_p4) target bundleno = 1 (0x1), region = 769 }

</bundles_post_ra>
